<compile_context>
chip_gen: v7x
topology: tpu7x:2x2x1
jax: 0.10.0
libtpu: 0.0.40
codegen_flags: <defaults>
</compile_context>

<pallas_src>
import math
import numpy as np
import jax
import jax.numpy as jnp
from jax.experimental import pallas as pl
from jax.experimental.pallas import tpu as pltpu

DIM_MODEL = 32
DIM_FF = 64
NUM_HEADS = 8
D_K = DIM_MODEL                                # per-head dim (reference sets d_k = dim_model)
HDK = NUM_HEADS * D_K                          # 256
EPS = 1e-5
SCALE = 1.0 / math.sqrt(D_K * NUM_HEADS)       # reference norm_factor
NEG_INF = -1e30                                # f32-only score path (bf16 would overflow)
MAX_TB = 8                                     # cap batch elements/program (bounds unroll+vregs)


def decoder_block_kernel(
    src_ref, tgt_ref,
    bias_ref,          # (H*L, H*L) f32 constant block-diagonal softmax bias (hoisted)
    w_self_qkv_ref,    # (32, 768) bf16  per-head column groups [Qh|Kh|Vh]
    b_self_qkv_ref,    # (1, 768)  f32
    w_cross_q_ref,     # (32, 256) bf16  per-head contiguous columns
    b_cross_q_ref,     # (1, 256)  f32
    w_cross_kv_ref,    # (32, 512) bf16  per-head column groups [Kh|Vh]
    b_cross_kv_ref,    # (1, 512)  f32
    wo_w_ref,          # (2, H, 32, 32) bf16   [0]=self, [1]=cross, per-head Wo blocks
    wo_b_ref,          # (2, 1, 32) f32
    w1_ref,            # (32, 64) bf16
    b1_ref,            # (1, 64)  f32
    w2_ref,            # (64, 32) bf16
    b2_ref,            # (1, 32)  f32
    ln_ref,            # (4, 32)  f32  rows: [g_attn, b_attn, g_ffn, b_ffn]
    out_ref,           # (TB, L, 32)
):
    TB, L, D = src_ref.shape
    R = TB * L
    G3 = 3 * D_K
    G2 = 2 * D_K

    # Row-stacked activations: all projections / FFN / LayerNorms run on (TB*L, D).
    src = src_ref[...].reshape(R, D)
    tgt = tgt_ref[...].reshape(R, D)
    attn_bias = bias_ref[...]                           # constant, reused by both attentions

    g_attn = ln_ref[0:1, :]
    b_attn = ln_ref[1:2, :]
    g_ffn = ln_ref[2:3, :]
    b_ffn = ln_ref[3:4, :]

    def layernorm(x, g, b):
        # reference LayerNorm: unbiased variance, gamma*(x-mean)/(sqrt(var)+eps)+beta.
        # Exact divide here (approx reciprocal is reserved for the softmax denominator).
        mean = jnp.mean(x, axis=-1, keepdims=True)
        d = x - mean
        var = jnp.sum(d * d, axis=-1, keepdims=True) * (1.0 / (D - 1))
        return g * d / (jnp.sqrt(var) + EPS) + b

    def attn_core(q_s, k_s, v_s, wo_heads):
        # q_s/k_s/v_s: (H*L, D_K) bf16, heads stacked head-major along sublanes.
        s = jax.lax.dot_general(q_s, k_s, (((1,), (1,)), ((), ())),
                                preferred_element_type=jnp.float32)     # (HL, HL)
        s = s * SCALE + attn_bias                                       # mask cross-head blocks
        s = s - jnp.max(s, axis=-1, keepdims=True)
        p = jnp.exp(s)
        p = p * pl.reciprocal(jnp.sum(p, axis=-1, keepdims=True), approx=True)
        ctx = jnp.dot(p.astype(jnp.bfloat16), v_s,
                      preferred_element_type=jnp.float32).astype(jnp.bfloat16)   # (HL, D_K)
        # Per-head output projection accumulated in f32 (replaces the (L, H*D) lane-merge
        # relayout; the ctx row slices below are sublane-aligned and free).
        out = jnp.dot(ctx[0:L, :], wo_heads[0], preferred_element_type=jnp.float32)
        for h in range(1, NUM_HEADS):
            out = out + jnp.dot(ctx[h * L:(h + 1) * L, :], wo_heads[h],
                                preferred_element_type=jnp.float32)
        return out                                                      # (L, DIM_MODEL) f32

    # ---------------- self-attention: one fused (R,32)x(32,768) QKV matmul ----------------
    qkv = jnp.dot(src.astype(jnp.bfloat16), w_self_qkv_ref[...],
                  preferred_element_type=jnp.float32) + b_self_qkv_ref[...]
    qkv = qkv.astype(jnp.bfloat16)                      # (R, 768), per-head groups [Qh|Kh|Vh]

    wo_self = [wo_w_ref[0, h] for h in range(NUM_HEADS)]
    sa_rows = []
    for tb in range(TB):
        rows = qkv[tb * L:(tb + 1) * L, :]              # sublane-aligned batch slice
        blk = jnp.concatenate(                          # (H*L, 3*D_K): one stack covers Q,K,V
            [rows[:, h * G3:(h + 1) * G3] for h in range(NUM_HEADS)], axis=0)
        sa_rows.append(attn_core(blk[:, 0:D_K], blk[:, D_K:2 * D_K],
                                 blk[:, 2 * D_K:3 * D_K], wo_self))
    sa = jnp.concatenate(sa_rows, axis=0) + wo_b_ref[0]                  # (R, 32)
    mha_block = layernorm(src + sa, g_attn, b_attn)                      # dropout = identity

    # ------------- cross-attention: Q from target, K/V from mha_block (fused) -------------
    q_full = (jnp.dot(tgt.astype(jnp.bfloat16), w_cross_q_ref[...],
                      preferred_element_type=jnp.float32)
              + b_cross_q_ref[...]).astype(jnp.bfloat16)                 # (R, 256)
    kv_full = (jnp.dot(mha_block.astype(jnp.bfloat16), w_cross_kv_ref[...],
                       preferred_element_type=jnp.float32)
               + b_cross_kv_ref[...]).astype(jnp.bfloat16)               # (R, 512), [Kh|Vh]

    wo_cross = [wo_w_ref[1, h] for h in range(NUM_HEADS)]
    ca_rows = []
    for tb in range(TB):
        qrows = q_full[tb * L:(tb + 1) * L, :]
        kvrows = kv_full[tb * L:(tb + 1) * L, :]
        q_s = jnp.concatenate(
            [qrows[:, h * D_K:(h + 1) * D_K] for h in range(NUM_HEADS)], axis=0)
        kv_blk = jnp.concatenate(
            [kvrows[:, h * G2:(h + 1) * G2] for h in range(NUM_HEADS)], axis=0)
        ca_rows.append(attn_core(q_s, kv_blk[:, 0:D_K], kv_blk[:, D_K:G2], wo_cross))
    ca = jnp.concatenate(ca_rows, axis=0) + wo_b_ref[1]                  # (R, 32)
    cmha = layernorm(mha_block + ca, g_attn, b_attn)    # reference reuses self_attn_norm

    # ---------------- pointwise FFN + residual + LayerNorm (row-stacked) ----------------
    cmha_bf = cmha.astype(jnp.bfloat16)
    h1 = jnp.dot(cmha_bf, w1_ref[...], preferred_element_type=jnp.float32) + b1_ref[...]
    h1 = jnp.maximum(h1, 0.0)
    ffn = jnp.dot(h1.astype(jnp.bfloat16), w2_ref[...],
                  preferred_element_type=jnp.float32) + b2_ref[...]
    out = layernorm(cmha + ffn, g_ffn, b_ffn)                            # (R, 32)

    out_ref[...] = out.reshape(TB, L, D).astype(out_ref.dtype)


def init_params(key):
    """Deterministic nn.Linear-style init, packed into the kernel's parameter slabs."""
    def linear(k, in_dim, out_dim):
        kw, kb = jax.random.split(k)
        bound = 1.0 / math.sqrt(in_dim)
        w = jax.random.uniform(kw, (in_dim, out_dim), jnp.float32, -bound, bound)
        b = jax.random.uniform(kb, (out_dim,), jnp.float32, -bound, bound)
        return w, b

    keys = jax.random.split(key, 10)
    # Permutation converting the reference's '(d h)' interleaved feature layout (head index
    # fastest) into contiguous per-head blocks used inside the kernel.
    perm = np.arange(HDK).reshape(D_K, NUM_HEADS).T.reshape(-1)
    hs = [slice(h * D_K, (h + 1) * D_K) for h in range(NUM_HEADS)]

    # self-attention: fused QKV weight, columns grouped per head as [Qh | Kh | Vh]
    wq, bq = linear(keys[0], DIM_MODEL, HDK)
    wk, bk = linear(keys[1], DIM_MODEL, HDK)
    wv, bv = linear(keys[2], DIM_MODEL, HDK)
    wo_s, bo_s = linear(keys[3], HDK, DIM_MODEL)        # see Wo shape note in header
    wq, wk, wv = wq[:, perm], wk[:, perm], wv[:, perm]
    bq, bk, bv = bq[perm], bk[perm], bv[perm]
    w_self = jnp.concatenate([m for h in hs for m in (wq[:, h], wk[:, h], wv[:, h])], axis=1)
    b_self = jnp.concatenate([v for h in hs for v in (bq[h], bk[h], bv[h])]).reshape(1, 3 * HDK)

    # cross-attention: Q (from target) kept separate; K/V fused, column groups [Kh | Vh]
    cwq, cbq = linear(keys[4], DIM_MODEL, HDK)
    cwk, cbk = linear(keys[5], DIM_MODEL, HDK)
    cwv, cbv = linear(keys[6], DIM_MODEL, HDK)
    wo_c, bo_c = linear(keys[7], HDK, DIM_MODEL)
    w_cross_q = cwq[:, perm]
    b_cross_q = cbq[perm].reshape(1, HDK)
    cwk, cwv = cwk[:, perm], cwv[:, perm]
    cbk, cbv = cbk[perm], cbv[perm]
    w_cross_kv = jnp.concatenate([m for h in hs for m in (cwk[:, h], cwv[:, h])], axis=1)
    b_cross_kv = jnp.concatenate([v for h in hs for v in (cbk[h], cbv[h])]).reshape(1, 2 * HDK)

    w1, b1 = linear(keys[8], DIM_MODEL, DIM_FF)
    w2, b2 = linear(keys[9], DIM_FF, DIM_MODEL)

    ones = jnp.ones((DIM_MODEL,), jnp.float32)
    zeros = jnp.zeros((DIM_MODEL,), jnp.float32)

    return {
        "w_self_qkv": w_self,                                      # (32, 768)
        "b_self_qkv": b_self,                                      # (1, 768)
        "w_cross_q": w_cross_q,                                    # (32, 256)
        "b_cross_q": b_cross_q,                                    # (1, 256)
        "w_cross_kv": w_cross_kv,                                  # (32, 512)
        "b_cross_kv": b_cross_kv,                                  # (1, 512)
        "wo_w": jnp.stack([wo_s.reshape(NUM_HEADS, D_K, DIM_MODEL),
                           wo_c.reshape(NUM_HEADS, D_K, DIM_MODEL)]),   # (2, 8, 32, 32)
        "wo_b": jnp.stack([bo_s.reshape(1, DIM_MODEL),
                           bo_c.reshape(1, DIM_MODEL)]),           # (2, 1, 32)
        "ffn_w1": w1,                                              # (32, 64)
        "ffn_b1": b1.reshape(1, DIM_FF),                           # (1, 64)
        "ffn_w2": w2,                                              # (64, 32)
        "ffn_b2": b2.reshape(1, DIM_MODEL),                        # (1, 32)
        # self_attn_norm gamma/beta, ffn_norm gamma/beta (cross_attn_norm is unused by the
        # reference forward, which reuses self_attn_norm for both attention residuals).
        "ln": jnp.stack([ones, zeros, ones, zeros]),               # (4, 32)
    }


def _pick_tb(batch, seq):
    """Batch elements per grid step: fill rows (<=256) but keep >= 2 programs for v7x."""
    best = 1
    for tb in range(1, min(batch, MAX_TB) + 1):
        if batch % tb != 0 or tb * seq > 256:
            continue
        if batch >= 2 and batch // tb < 2:
            continue
        best = tb
    return best


def decoder_block(src, target, params):
    B, L, D = src.shape
    assert D == DIM_MODEL and target.shape == src.shape
    TB = _pick_tb(B, L)
    HL = NUM_HEADS * L

    # Constant block-diagonal softmax bias (heads stacked head-major on sublanes), hoisted out
    # of the kernel body and shared by both attentions and every grid step.
    r = np.arange(HL)
    bias = np.where((r[:, None] // L) == (r[None, :] // L), 0.0, NEG_INF).astype(np.float32)
    bias = jnp.asarray(bias)

    # bf16 weights for the MXU; biases / LayerNorm params / bias mask stay f32.
    operands = [
        src, target, bias,
        params["w_self_qkv"].astype(jnp.bfloat16), params["b_self_qkv"],
        params["w_cross_q"].astype(jnp.bfloat16), params["b_cross_q"],
        params["w_cross_kv"].astype(jnp.bfloat16), params["b_cross_kv"],
        params["wo_w"].astype(jnp.bfloat16), params["wo_b"],
        params["ffn_w1"].astype(jnp.bfloat16), params["ffn_b1"],
        params["ffn_w2"].astype(jnp.bfloat16), params["ffn_b2"],
        params["ln"],
    ]

    act_spec = pl.BlockSpec((TB, L, D), lambda b: (b, 0, 0))

    def const_spec(p):
        nd = p.ndim
        idx = lambda b, _nd=nd: (0,) * _nd
        buffered = getattr(pl, "Buffered", None)
        if buffered is not None:
            try:
                # constant index_map -> single buffering (no useless double-buffer VMEM/DMAs)
                return pl.BlockSpec(p.shape, idx, pipeline_mode=buffered(1))
            except TypeError:
                pass
        return pl.BlockSpec(p.shape, idx)

    in_specs = [act_spec, act_spec] + [const_spec(p) for p in operands[2:]]

    out = pl.pallas_call(
        decoder_block_kernel,
        out_shape=jax.ShapeDtypeStruct((B, L, D), src.dtype),
        grid_spec=pltpu.PrefetchScalarGridSpec(
            num_scalar_prefetch=0,
            grid=(B // TB,),                 # TB batch elements per program
            in_specs=in_specs,
            out_specs=pl.BlockSpec((TB, L, D), lambda b: (b, 0, 0)),
        ),
        compiler_params=pltpu.CompilerParams(dimension_semantics=("parallel",)),
    )(*operands)
    return out


if __name__ == "__main__":
    key = jax.random.PRNGKey(0)
    k_src, k_tgt, k_par = jax.random.split(key, 3)

    B, L = 8, 8                               # small demo; TB=4 -> grid=(2,) (both v7x cores)
    src = jax.random.normal(k_src, (B, L, DIM_MODEL), jnp.float32)
    target = jax.random.normal(k_tgt, (B, L, DIM_MODEL), jnp.float32)
    params = init_params(k_par)

    out = decoder_block(src, target, params)
    out = jax.block_until_ready(out)
    assert out.shape == (B, L, DIM_MODEL)
    assert bool(jnp.all(jnp.isfinite(out)))
    print("KERNEL_OK")
</pallas_src>

<mosaic_0001>
module attributes {stable_mosaic.version = 11 : i64} {
  func.func @decoder_block_kernel(%arg0: i32, %arg1: memref<4x8x32xf32, #tpu.memory_space<vmem>>, %arg2: memref<4x8x32xf32, #tpu.memory_space<vmem>>, %arg3: memref<64x64xf32, #tpu.memory_space<vmem>>, %arg4: memref<32x768xbf16, #tpu.memory_space<vmem>>, %arg5: memref<1x768xf32, #tpu.memory_space<vmem>>, %arg6: memref<32x256xbf16, #tpu.memory_space<vmem>>, %arg7: memref<1x256xf32, #tpu.memory_space<vmem>>, %arg8: memref<32x512xbf16, #tpu.memory_space<vmem>>, %arg9: memref<1x512xf32, #tpu.memory_space<vmem>>, %arg10: memref<2x8x32x32xbf16, #tpu.memory_space<vmem>>, %arg11: memref<2x1x32xf32, #tpu.memory_space<vmem>>, %arg12: memref<32x64xbf16, #tpu.memory_space<vmem>>, %arg13: memref<1x64xf32, #tpu.memory_space<vmem>>, %arg14: memref<64x32xbf16, #tpu.memory_space<vmem>>, %arg15: memref<1x32xf32, #tpu.memory_space<vmem>>, %arg16: memref<4x32xf32, #tpu.memory_space<vmem>>, %arg17: memref<4x8x32xf32, #tpu.memory_space<vmem>>) attributes {dimension_semantics = [#tpu.dimension_semantics<parallel>], iteration_bounds = array<i64: 2>, scalar_prefetch = 0 : i64, scratch_operands = 0 : i64, tpu.core_type = #tpu.core_type<tc>, window_params = [{transform_indices = @transform_0, window_bounds = array<i64: 4, 8, 32>}, {transform_indices = @transform_1, window_bounds = array<i64: 4, 8, 32>}, {pipeline_mode = #tpu.pipeline_mode<synchronous>, transform_indices = @transform_2, window_bounds = array<i64: 64, 64>}, {pipeline_mode = #tpu.pipeline_mode<synchronous>, transform_indices = @transform_3, window_bounds = array<i64: 32, 768>}, {pipeline_mode = #tpu.pipeline_mode<synchronous>, transform_indices = @transform_4, window_bounds = array<i64: 1, 768>}, {pipeline_mode = #tpu.pipeline_mode<synchronous>, transform_indices = @transform_5, window_bounds = array<i64: 32, 256>}, {pipeline_mode = #tpu.pipeline_mode<synchronous>, transform_indices = @transform_6, window_bounds = array<i64: 1, 256>}, {pipeline_mode = #tpu.pipeline_mode<synchronous>, transform_indices = @transform_7, window_bounds = array<i64: 32, 512>}, {pipeline_mode = #tpu.pipeline_mode<synchronous>, transform_indices = @transform_8, window_bounds = array<i64: 1, 512>}, {pipeline_mode = #tpu.pipeline_mode<synchronous>, transform_indices = @transform_9, window_bounds = array<i64: 2, 8, 32, 32>}, {pipeline_mode = #tpu.pipeline_mode<synchronous>, transform_indices = @transform_10, window_bounds = array<i64: 2, 1, 32>}, {pipeline_mode = #tpu.pipeline_mode<synchronous>, transform_indices = @transform_11, window_bounds = array<i64: 32, 64>}, {pipeline_mode = #tpu.pipeline_mode<synchronous>, transform_indices = @transform_12, window_bounds = array<i64: 1, 64>}, {pipeline_mode = #tpu.pipeline_mode<synchronous>, transform_indices = @transform_13, window_bounds = array<i64: 64, 32>}, {pipeline_mode = #tpu.pipeline_mode<synchronous>, transform_indices = @transform_14, window_bounds = array<i64: 1, 32>}, {pipeline_mode = #tpu.pipeline_mode<synchronous>, transform_indices = @transform_15, window_bounds = array<i64: 4, 32>}, {transform_indices = @transform_16, window_bounds = array<i64: 4, 8, 32>}]} {
    %c0 = arith.constant 0 : index
    %c0_0 = arith.constant 0 : index
    %c0_1 = arith.constant 0 : index
    %0 = vector.load %arg1[%c0, %c0_0, %c0_1] : memref<4x8x32xf32, #tpu.memory_space<vmem>>, vector<4x8x32xf32>
    %1 = vector.shape_cast %0 : vector<4x8x32xf32> to vector<32x32xf32>
    %c0_2 = arith.constant 0 : index
    %c0_3 = arith.constant 0 : index
    %c0_4 = arith.constant 0 : index
    %2 = vector.load %arg2[%c0_2, %c0_3, %c0_4] : memref<4x8x32xf32, #tpu.memory_space<vmem>>, vector<4x8x32xf32>
    %3 = vector.shape_cast %2 : vector<4x8x32xf32> to vector<32x32xf32>
    %c0_5 = arith.constant 0 : index
    %c0_6 = arith.constant 0 : index
    %4 = vector.load %arg3[%c0_5, %c0_6] : memref<64x64xf32, #tpu.memory_space<vmem>>, vector<64x64xf32>
    %c0_7 = arith.constant 0 : index
    %c0_8 = arith.constant 0 : index
    %5 = vector.load %arg16[%c0_7, %c0_8] : memref<4x32xf32, #tpu.memory_space<vmem>>, vector<1x32xf32>
    %c1 = arith.constant 1 : index
    %c0_9 = arith.constant 0 : index
    %6 = vector.load %arg16[%c1, %c0_9] : memref<4x32xf32, #tpu.memory_space<vmem>>, vector<1x32xf32>
    %c2 = arith.constant 2 : index
    %c0_10 = arith.constant 0 : index
    %7 = vector.load %arg16[%c2, %c0_10] : memref<4x32xf32, #tpu.memory_space<vmem>>, vector<1x32xf32>
    %c3 = arith.constant 3 : index
    %c0_11 = arith.constant 0 : index
    %8 = vector.load %arg16[%c3, %c0_11] : memref<4x32xf32, #tpu.memory_space<vmem>>, vector<1x32xf32>
    %9 = arith.truncf %1 : vector<32x32xf32> to vector<32x32xbf16>
    %c0_12 = arith.constant 0 : index
    %c0_13 = arith.constant 0 : index
    %10 = vector.load %arg4[%c0_12, %c0_13] : memref<32x768xbf16, #tpu.memory_space<vmem>>, vector<32x768xbf16>
    %cst = arith.constant dense<0.000000e+00> : vector<32x768xf32>
    %11 = tpu.matmul %9, %10, %cst {dimension_numbers = #tpu.dot_dimension_numbers<[1], [0], [0], [1], [0, 0, 1, 1], [], []>} : vector<32x32xbf16>, vector<32x768xbf16>, vector<32x768xf32> -> vector<32x768xf32>
    %c0_14 = arith.constant 0 : index
    %c0_15 = arith.constant 0 : index
    %12 = vector.load %arg5[%c0_14, %c0_15] : memref<1x768xf32, #tpu.memory_space<vmem>>, vector<1x768xf32>
    %13 = vector.broadcast %12 : vector<1x768xf32> to vector<32x768xf32>
    %14 = arith.addf %11, %13 : vector<32x768xf32>
    %15 = arith.truncf %14 : vector<32x768xf32> to vector<32x768xbf16>
    %c0_16 = arith.constant 0 : index
    %c0_17 = arith.constant 0 : index
    %c0_18 = arith.constant 0 : index
    %c0_19 = arith.constant 0 : index
    %16 = vector.load %arg10[%c0_16, %c0_17, %c0_18, %c0_19] : memref<2x8x32x32xbf16, #tpu.memory_space<vmem>>, vector<1x1x32x32xbf16>
    %17 = vector.shape_cast %16 : vector<1x1x32x32xbf16> to vector<32x32xbf16>
    %c0_20 = arith.constant 0 : index
    %c1_21 = arith.constant 1 : index
    %c0_22 = arith.constant 0 : index
    %c0_23 = arith.constant 0 : index
    %18 = vector.load %arg10[%c0_20, %c1_21, %c0_22, %c0_23] : memref<2x8x32x32xbf16, #tpu.memory_space<vmem>>, vector<1x1x32x32xbf16>
    %19 = vector.shape_cast %18 : vector<1x1x32x32xbf16> to vector<32x32xbf16>
    %c0_24 = arith.constant 0 : index
    %c2_25 = arith.constant 2 : index
    %c0_26 = arith.constant 0 : index
    %c0_27 = arith.constant 0 : index
    %20 = vector.load %arg10[%c0_24, %c2_25, %c0_26, %c0_27] : memref<2x8x32x32xbf16, #tpu.memory_space<vmem>>, vector<1x1x32x32xbf16>
    %21 = vector.shape_cast %20 : vector<1x1x32x32xbf16> to vector<32x32xbf16>
    %c0_28 = arith.constant 0 : index
    %c3_29 = arith.constant 3 : index
    %c0_30 = arith.constant 0 : index
    %c0_31 = arith.constant 0 : index
    %22 = vector.load %arg10[%c0_28, %c3_29, %c0_30, %c0_31] : memref<2x8x32x32xbf16, #tpu.memory_space<vmem>>, vector<1x1x32x32xbf16>
    %23 = vector.shape_cast %22 : vector<1x1x32x32xbf16> to vector<32x32xbf16>
    %c0_32 = arith.constant 0 : index
    %c4 = arith.constant 4 : index
    %c0_33 = arith.constant 0 : index
    %c0_34 = arith.constant 0 : index
    %24 = vector.load %arg10[%c0_32, %c4, %c0_33, %c0_34] : memref<2x8x32x32xbf16, #tpu.memory_space<vmem>>, vector<1x1x32x32xbf16>
    %25 = vector.shape_cast %24 : vector<1x1x32x32xbf16> to vector<32x32xbf16>
    %c0_35 = arith.constant 0 : index
    %c5 = arith.constant 5 : index
    %c0_36 = arith.constant 0 : index
    %c0_37 = arith.constant 0 : index
    %26 = vector.load %arg10[%c0_35, %c5, %c0_36, %c0_37] : memref<2x8x32x32xbf16, #tpu.memory_space<vmem>>, vector<1x1x32x32xbf16>
    %27 = vector.shape_cast %26 : vector<1x1x32x32xbf16> to vector<32x32xbf16>
    %c0_38 = arith.constant 0 : index
    %c6 = arith.constant 6 : index
    %c0_39 = arith.constant 0 : index
    %c0_40 = arith.constant 0 : index
    %28 = vector.load %arg10[%c0_38, %c6, %c0_39, %c0_40] : memref<2x8x32x32xbf16, #tpu.memory_space<vmem>>, vector<1x1x32x32xbf16>
    %29 = vector.shape_cast %28 : vector<1x1x32x32xbf16> to vector<32x32xbf16>
    %c0_41 = arith.constant 0 : index
    %c7 = arith.constant 7 : index
    %c0_42 = arith.constant 0 : index
    %c0_43 = arith.constant 0 : index
    %30 = vector.load %arg10[%c0_41, %c7, %c0_42, %c0_43] : memref<2x8x32x32xbf16, #tpu.memory_space<vmem>>, vector<1x1x32x32xbf16>
    %31 = vector.shape_cast %30 : vector<1x1x32x32xbf16> to vector<32x32xbf16>
    %32 = vector.extract_strided_slice %15 {offsets = [0, 0], sizes = [8, 768], strides = [1, 1]} : vector<32x768xbf16> to vector<8x768xbf16>
    %33 = vector.extract_strided_slice %32 {offsets = [0, 0], sizes = [8, 96], strides = [1, 1]} : vector<8x768xbf16> to vector<8x96xbf16>
    %34 = vector.extract_strided_slice %32 {offsets = [0, 96], sizes = [8, 96], strides = [1, 1]} : vector<8x768xbf16> to vector<8x96xbf16>
    %35 = vector.extract_strided_slice %32 {offsets = [0, 192], sizes = [8, 96], strides = [1, 1]} : vector<8x768xbf16> to vector<8x96xbf16>
    %36 = vector.extract_strided_slice %32 {offsets = [0, 288], sizes = [8, 96], strides = [1, 1]} : vector<8x768xbf16> to vector<8x96xbf16>
    %37 = vector.extract_strided_slice %32 {offsets = [0, 384], sizes = [8, 96], strides = [1, 1]} : vector<8x768xbf16> to vector<8x96xbf16>
    %38 = vector.extract_strided_slice %32 {offsets = [0, 480], sizes = [8, 96], strides = [1, 1]} : vector<8x768xbf16> to vector<8x96xbf16>
    %39 = vector.extract_strided_slice %32 {offsets = [0, 576], sizes = [8, 96], strides = [1, 1]} : vector<8x768xbf16> to vector<8x96xbf16>
    %40 = vector.extract_strided_slice %32 {offsets = [0, 672], sizes = [8, 96], strides = [1, 1]} : vector<8x768xbf16> to vector<8x96xbf16>
    %41 = tpu.concatenate %33, %34, %35, %36, %37, %38, %39, %40 in 0 : vector<8x96xbf16>, vector<8x96xbf16>, vector<8x96xbf16>, vector<8x96xbf16>, vector<8x96xbf16>, vector<8x96xbf16>, vector<8x96xbf16>, vector<8x96xbf16> -> vector<64x96xbf16>
    %42 = vector.extract_strided_slice %41 {offsets = [0, 0], sizes = [64, 32], strides = [1, 1]} : vector<64x96xbf16> to vector<64x32xbf16>
    %43 = vector.extract_strided_slice %41 {offsets = [0, 32], sizes = [64, 32], strides = [1, 1]} : vector<64x96xbf16> to vector<64x32xbf16>
    %44 = vector.extract_strided_slice %41 {offsets = [0, 64], sizes = [64, 32], strides = [1, 1]} : vector<64x96xbf16> to vector<64x32xbf16>
    %cst_44 = arith.constant dense<0.000000e+00> : vector<64x64xf32>
    %45 = tpu.matmul %42, %43, %cst_44 {dimension_numbers = #tpu.dot_dimension_numbers<[1], [1], [0], [0], [0, 0, 1, 0], [], []>} : vector<64x32xbf16>, vector<64x32xbf16>, vector<64x64xf32> -> vector<64x64xf32>
    %cst_45 = arith.constant 6.250000e-02 : f32
    %46 = vector.broadcast %cst_45 : f32 to vector<64x64xf32>
    %47 = arith.mulf %45, %46 : vector<64x64xf32>
    %48 = arith.addf %47, %4 : vector<64x64xf32>
    %cst_46 = arith.constant dense<0xFF800000> : vector<64xf32>
    %49 = vector.multi_reduction <maximumf>, %48, %cst_46 [1] : vector<64x64xf32> to vector<64xf32>
    %50 = vector.shape_cast %49 : vector<64xf32> to vector<64x1xf32>
    %51 = vector.broadcast %50 : vector<64x1xf32> to vector<64x64xf32>
    %52 = arith.subf %48, %51 : vector<64x64xf32>
    %53 = math.exp %52 : vector<64x64xf32>
    %cst_47 = arith.constant dense<0.000000e+00> : vector<64xf32>
    %54 = vector.multi_reduction <add>, %53, %cst_47 [1] : vector<64x64xf32> to vector<64xf32>
    %55 = vector.shape_cast %54 : vector<64xf32> to vector<64x1xf32>
    %56 = tpu.reciprocal %55 {approx = true} : vector<64x1xf32> -> vector<64x1xf32>
    %57 = vector.broadcast %56 : vector<64x1xf32> to vector<64x64xf32>
    %58 = arith.mulf %53, %57 : vector<64x64xf32>
    %59 = arith.truncf %58 : vector<64x64xf32> to vector<64x64xbf16>
    %cst_48 = arith.constant dense<0.000000e+00> : vector<64x32xf32>
    %60 = tpu.matmul %59, %44, %cst_48 {dimension_numbers = #tpu.dot_dimension_numbers<[1], [0], [0], [1], [0, 0, 1, 1], [], []>} : vector<64x64xbf16>, vector<64x32xbf16>, vector<64x32xf32> -> vector<64x32xf32>
    %61 = arith.truncf %60 : vector<64x32xf32> to vector<64x32xbf16>
    %62 = vector.extract_strided_slice %61 {offsets = [0, 0], sizes = [8, 32], strides = [1, 1]} : vector<64x32xbf16> to vector<8x32xbf16>
    %cst_49 = arith.constant dense<0.000000e+00> : vector<8x32xf32>
    %63 = tpu.matmul %62, %17, %cst_49 {dimension_numbers = #tpu.dot_dimension_numbers<[1], [0], [0], [1], [0, 0, 1, 1], [], []>} : vector<8x32xbf16>, vector<32x32xbf16>, vector<8x32xf32> -> vector<8x32xf32>
    %64 = vector.extract_strided_slice %61 {offsets = [8, 0], sizes = [8, 32], strides = [1, 1]} : vector<64x32xbf16> to vector<8x32xbf16>
    %cst_50 = arith.constant dense<0.000000e+00> : vector<8x32xf32>
    %65 = tpu.matmul %64, %19, %cst_50 {dimension_numbers = #tpu.dot_dimension_numbers<[1], [0], [0], [1], [0, 0, 1, 1], [], []>} : vector<8x32xbf16>, vector<32x32xbf16>, vector<8x32xf32> -> vector<8x32xf32>
    %66 = arith.addf %63, %65 : vector<8x32xf32>
    %67 = vector.extract_strided_slice %61 {offsets = [16, 0], sizes = [8, 32], strides = [1, 1]} : vector<64x32xbf16> to vector<8x32xbf16>
    %cst_51 = arith.constant dense<0.000000e+00> : vector<8x32xf32>
    %68 = tpu.matmul %67, %21, %cst_51 {dimension_numbers = #tpu.dot_dimension_numbers<[1], [0], [0], [1], [0, 0, 1, 1], [], []>} : vector<8x32xbf16>, vector<32x32xbf16>, vector<8x32xf32> -> vector<8x32xf32>
    %69 = arith.addf %66, %68 : vector<8x32xf32>
    %70 = vector.extract_strided_slice %61 {offsets = [24, 0], sizes = [8, 32], strides = [1, 1]} : vector<64x32xbf16> to vector<8x32xbf16>
    %cst_52 = arith.constant dense<0.000000e+00> : vector<8x32xf32>
    %71 = tpu.matmul %70, %23, %cst_52 {dimension_numbers = #tpu.dot_dimension_numbers<[1], [0], [0], [1], [0, 0, 1, 1], [], []>} : vector<8x32xbf16>, vector<32x32xbf16>, vector<8x32xf32> -> vector<8x32xf32>
    %72 = arith.addf %69, %71 : vector<8x32xf32>
    %73 = vector.extract_strided_slice %61 {offsets = [32, 0], sizes = [8, 32], strides = [1, 1]} : vector<64x32xbf16> to vector<8x32xbf16>
    %cst_53 = arith.constant dense<0.000000e+00> : vector<8x32xf32>
    %74 = tpu.matmul %73, %25, %cst_53 {dimension_numbers = #tpu.dot_dimension_numbers<[1], [0], [0], [1], [0, 0, 1, 1], [], []>} : vector<8x32xbf16>, vector<32x32xbf16>, vector<8x32xf32> -> vector<8x32xf32>
    %75 = arith.addf %72, %74 : vector<8x32xf32>
    %76 = vector.extract_strided_slice %61 {offsets = [40, 0], sizes = [8, 32], strides = [1, 1]} : vector<64x32xbf16> to vector<8x32xbf16>
    %cst_54 = arith.constant dense<0.000000e+00> : vector<8x32xf32>
    %77 = tpu.matmul %76, %27, %cst_54 {dimension_numbers = #tpu.dot_dimension_numbers<[1], [0], [0], [1], [0, 0, 1, 1], [], []>} : vector<8x32xbf16>, vector<32x32xbf16>, vector<8x32xf32> -> vector<8x32xf32>
    %78 = arith.addf %75, %77 : vector<8x32xf32>
    %79 = vector.extract_strided_slice %61 {offsets = [48, 0], sizes = [8, 32], strides = [1, 1]} : vector<64x32xbf16> to vector<8x32xbf16>
    %cst_55 = arith.constant dense<0.000000e+00> : vector<8x32xf32>
    %80 = tpu.matmul %79, %29, %cst_55 {dimension_numbers = #tpu.dot_dimension_numbers<[1], [0], [0], [1], [0, 0, 1, 1], [], []>} : vector<8x32xbf16>, vector<32x32xbf16>, vector<8x32xf32> -> vector<8x32xf32>
    %81 = arith.addf %78, %80 : vector<8x32xf32>
    %82 = vector.extract_strided_slice %61 {offsets = [56, 0], sizes = [8, 32], strides = [1, 1]} : vector<64x32xbf16> to vector<8x32xbf16>
    %cst_56 = arith.constant dense<0.000000e+00> : vector<8x32xf32>
    %83 = tpu.matmul %82, %31, %cst_56 {dimension_numbers = #tpu.dot_dimension_numbers<[1], [0], [0], [1], [0, 0, 1, 1], [], []>} : vector<8x32xbf16>, vector<32x32xbf16>, vector<8x32xf32> -> vector<8x32xf32>
    %84 = arith.addf %81, %83 : vector<8x32xf32>
    %85 = vector.extract_strided_slice %15 {offsets = [8, 0], sizes = [8, 768], strides = [1, 1]} : vector<32x768xbf16> to vector<8x768xbf16>
    %86 = vector.extract_strided_slice %85 {offsets = [0, 0], sizes = [8, 96], strides = [1, 1]} : vector<8x768xbf16> to vector<8x96xbf16>
    %87 = vector.extract_strided_slice %85 {offsets = [0, 96], sizes = [8, 96], strides = [1, 1]} : vector<8x768xbf16> to vector<8x96xbf16>
    %88 = vector.extract_strided_slice %85 {offsets = [0, 192], sizes = [8, 96], strides = [1, 1]} : vector<8x768xbf16> to vector<8x96xbf16>
    %89 = vector.extract_strided_slice %85 {offsets = [0, 288], sizes = [8, 96], strides = [1, 1]} : vector<8x768xbf16> to vector<8x96xbf16>
    %90 = vector.extract_strided_slice %85 {offsets = [0, 384], sizes = [8, 96], strides = [1, 1]} : vector<8x768xbf16> to vector<8x96xbf16>
    %91 = vector.extract_strided_slice %85 {offsets = [0, 480], sizes = [8, 96], strides = [1, 1]} : vector<8x768xbf16> to vector<8x96xbf16>
    %92 = vector.extract_strided_slice %85 {offsets = [0, 576], sizes = [8, 96], strides = [1, 1]} : vector<8x768xbf16> to vector<8x96xbf16>
    %93 = vector.extract_strided_slice %85 {offsets = [0, 672], sizes = [8, 96], strides = [1, 1]} : vector<8x768xbf16> to vector<8x96xbf16>
    %94 = tpu.concatenate %86, %87, %88, %89, %90, %91, %92, %93 in 0 : vector<8x96xbf16>, vector<8x96xbf16>, vector<8x96xbf16>, vector<8x96xbf16>, vector<8x96xbf16>, vector<8x96xbf16>, vector<8x96xbf16>, vector<8x96xbf16> -> vector<64x96xbf16>
    %95 = vector.extract_strided_slice %94 {offsets = [0, 0], sizes = [64, 32], strides = [1, 1]} : vector<64x96xbf16> to vector<64x32xbf16>
    %96 = vector.extract_strided_slice %94 {offsets = [0, 32], sizes = [64, 32], strides = [1, 1]} : vector<64x96xbf16> to vector<64x32xbf16>
    %97 = vector.extract_strided_slice %94 {offsets = [0, 64], sizes = [64, 32], strides = [1, 1]} : vector<64x96xbf16> to vector<64x32xbf16>
    %cst_57 = arith.constant dense<0.000000e+00> : vector<64x64xf32>
    %98 = tpu.matmul %95, %96, %cst_57 {dimension_numbers = #tpu.dot_dimension_numbers<[1], [1], [0], [0], [0, 0, 1, 0], [], []>} : vector<64x32xbf16>, vector<64x32xbf16>, vector<64x64xf32> -> vector<64x64xf32>
    %cst_58 = arith.constant 6.250000e-02 : f32
    %99 = vector.broadcast %cst_58 : f32 to vector<64x64xf32>
    %100 = arith.mulf %98, %99 : vector<64x64xf32>
    %101 = arith.addf %100, %4 : vector<64x64xf32>
    %cst_59 = arith.constant dense<0xFF800000> : vector<64xf32>
    %102 = vector.multi_reduction <maximumf>, %101, %cst_59 [1] : vector<64x64xf32> to vector<64xf32>
    %103 = vector.shape_cast %102 : vector<64xf32> to vector<64x1xf32>
    %104 = vector.broadcast %103 : vector<64x1xf32> to vector<64x64xf32>
    %105 = arith.subf %101, %104 : vector<64x64xf32>
    %106 = math.exp %105 : vector<64x64xf32>
    %cst_60 = arith.constant dense<0.000000e+00> : vector<64xf32>
    %107 = vector.multi_reduction <add>, %106, %cst_60 [1] : vector<64x64xf32> to vector<64xf32>
    %108 = vector.shape_cast %107 : vector<64xf32> to vector<64x1xf32>
    %109 = tpu.reciprocal %108 {approx = true} : vector<64x1xf32> -> vector<64x1xf32>
    %110 = vector.broadcast %109 : vector<64x1xf32> to vector<64x64xf32>
    %111 = arith.mulf %106, %110 : vector<64x64xf32>
    %112 = arith.truncf %111 : vector<64x64xf32> to vector<64x64xbf16>
    %cst_61 = arith.constant dense<0.000000e+00> : vector<64x32xf32>
    %113 = tpu.matmul %112, %97, %cst_61 {dimension_numbers = #tpu.dot_dimension_numbers<[1], [0], [0], [1], [0, 0, 1, 1], [], []>} : vector<64x64xbf16>, vector<64x32xbf16>, vector<64x32xf32> -> vector<64x32xf32>
    %114 = arith.truncf %113 : vector<64x32xf32> to vector<64x32xbf16>
    %115 = vector.extract_strided_slice %114 {offsets = [0, 0], sizes = [8, 32], strides = [1, 1]} : vector<64x32xbf16> to vector<8x32xbf16>
    %cst_62 = arith.constant dense<0.000000e+00> : vector<8x32xf32>
    %116 = tpu.matmul %115, %17, %cst_62 {dimension_numbers = #tpu.dot_dimension_numbers<[1], [0], [0], [1], [0, 0, 1, 1], [], []>} : vector<8x32xbf16>, vector<32x32xbf16>, vector<8x32xf32> -> vector<8x32xf32>
    %117 = vector.extract_strided_slice %114 {offsets = [8, 0], sizes = [8, 32], strides = [1, 1]} : vector<64x32xbf16> to vector<8x32xbf16>
    %cst_63 = arith.constant dense<0.000000e+00> : vector<8x32xf32>
    %118 = tpu.matmul %117, %19, %cst_63 {dimension_numbers = #tpu.dot_dimension_numbers<[1], [0], [0], [1], [0, 0, 1, 1], [], []>} : vector<8x32xbf16>, vector<32x32xbf16>, vector<8x32xf32> -> vector<8x32xf32>
    %119 = arith.addf %116, %118 : vector<8x32xf32>
    %120 = vector.extract_strided_slice %114 {offsets = [16, 0], sizes = [8, 32], strides = [1, 1]} : vector<64x32xbf16> to vector<8x32xbf16>
    %cst_64 = arith.constant dense<0.000000e+00> : vector<8x32xf32>
    %121 = tpu.matmul %120, %21, %cst_64 {dimension_numbers = #tpu.dot_dimension_numbers<[1], [0], [0], [1], [0, 0, 1, 1], [], []>} : vector<8x32xbf16>, vector<32x32xbf16>, vector<8x32xf32> -> vector<8x32xf32>
    %122 = arith.addf %119, %121 : vector<8x32xf32>
    %123 = vector.extract_strided_slice %114 {offsets = [24, 0], sizes = [8, 32], strides = [1, 1]} : vector<64x32xbf16> to vector<8x32xbf16>
    %cst_65 = arith.constant dense<0.000000e+00> : vector<8x32xf32>
    %124 = tpu.matmul %123, %23, %cst_65 {dimension_numbers = #tpu.dot_dimension_numbers<[1], [0], [0], [1], [0, 0, 1, 1], [], []>} : vector<8x32xbf16>, vector<32x32xbf16>, vector<8x32xf32> -> vector<8x32xf32>
    %125 = arith.addf %122, %124 : vector<8x32xf32>
    %126 = vector.extract_strided_slice %114 {offsets = [32, 0], sizes = [8, 32], strides = [1, 1]} : vector<64x32xbf16> to vector<8x32xbf16>
    %cst_66 = arith.constant dense<0.000000e+00> : vector<8x32xf32>
    %127 = tpu.matmul %126, %25, %cst_66 {dimension_numbers = #tpu.dot_dimension_numbers<[1], [0], [0], [1], [0, 0, 1, 1], [], []>} : vector<8x32xbf16>, vector<32x32xbf16>, vector<8x32xf32> -> vector<8x32xf32>
    %128 = arith.addf %125, %127 : vector<8x32xf32>
    %129 = vector.extract_strided_slice %114 {offsets = [40, 0], sizes = [8, 32], strides = [1, 1]} : vector<64x32xbf16> to vector<8x32xbf16>
    %cst_67 = arith.constant dense<0.000000e+00> : vector<8x32xf32>
    %130 = tpu.matmul %129, %27, %cst_67 {dimension_numbers = #tpu.dot_dimension_numbers<[1], [0], [0], [1], [0, 0, 1, 1], [], []>} : vector<8x32xbf16>, vector<32x32xbf16>, vector<8x32xf32> -> vector<8x32xf32>
    %131 = arith.addf %128, %130 : vector<8x32xf32>
    %132 = vector.extract_strided_slice %114 {offsets = [48, 0], sizes = [8, 32], strides = [1, 1]} : vector<64x32xbf16> to vector<8x32xbf16>
    %cst_68 = arith.constant dense<0.000000e+00> : vector<8x32xf32>
    %133 = tpu.matmul %132, %29, %cst_68 {dimension_numbers = #tpu.dot_dimension_numbers<[1], [0], [0], [1], [0, 0, 1, 1], [], []>} : vector<8x32xbf16>, vector<32x32xbf16>, vector<8x32xf32> -> vector<8x32xf32>
    %134 = arith.addf %131, %133 : vector<8x32xf32>
    %135 = vector.extract_strided_slice %114 {offsets = [56, 0], sizes = [8, 32], strides = [1, 1]} : vector<64x32xbf16> to vector<8x32xbf16>
    %cst_69 = arith.constant dense<0.000000e+00> : vector<8x32xf32>
    %136 = tpu.matmul %135, %31, %cst_69 {dimension_numbers = #tpu.dot_dimension_numbers<[1], [0], [0], [1], [0, 0, 1, 1], [], []>} : vector<8x32xbf16>, vector<32x32xbf16>, vector<8x32xf32> -> vector<8x32xf32>
    %137 = arith.addf %134, %136 : vector<8x32xf32>
    %138 = vector.extract_strided_slice %15 {offsets = [16, 0], sizes = [8, 768], strides = [1, 1]} : vector<32x768xbf16> to vector<8x768xbf16>
    %139 = vector.extract_strided_slice %138 {offsets = [0, 0], sizes = [8, 96], strides = [1, 1]} : vector<8x768xbf16> to vector<8x96xbf16>
    %140 = vector.extract_strided_slice %138 {offsets = [0, 96], sizes = [8, 96], strides = [1, 1]} : vector<8x768xbf16> to vector<8x96xbf16>
    %141 = vector.extract_strided_slice %138 {offsets = [0, 192], sizes = [8, 96], strides = [1, 1]} : vector<8x768xbf16> to vector<8x96xbf16>
    %142 = vector.extract_strided_slice %138 {offsets = [0, 288], sizes = [8, 96], strides = [1, 1]} : vector<8x768xbf16> to vector<8x96xbf16>
    %143 = vector.extract_strided_slice %138 {offsets = [0, 384], sizes = [8, 96], strides = [1, 1]} : vector<8x768xbf16> to vector<8x96xbf16>
    %144 = vector.extract_strided_slice %138 {offsets = [0, 480], sizes = [8, 96], strides = [1, 1]} : vector<8x768xbf16> to vector<8x96xbf16>
    %145 = vector.extract_strided_slice %138 {offsets = [0, 576], sizes = [8, 96], strides = [1, 1]} : vector<8x768xbf16> to vector<8x96xbf16>
    %146 = vector.extract_strided_slice %138 {offsets = [0, 672], sizes = [8, 96], strides = [1, 1]} : vector<8x768xbf16> to vector<8x96xbf16>
    %147 = tpu.concatenate %139, %140, %141, %142, %143, %144, %145, %146 in 0 : vector<8x96xbf16>, vector<8x96xbf16>, vector<8x96xbf16>, vector<8x96xbf16>, vector<8x96xbf16>, vector<8x96xbf16>, vector<8x96xbf16>, vector<8x96xbf16> -> vector<64x96xbf16>
    %148 = vector.extract_strided_slice %147 {offsets = [0, 0], sizes = [64, 32], strides = [1, 1]} : vector<64x96xbf16> to vector<64x32xbf16>
    %149 = vector.extract_strided_slice %147 {offsets = [0, 32], sizes = [64, 32], strides = [1, 1]} : vector<64x96xbf16> to vector<64x32xbf16>
    %150 = vector.extract_strided_slice %147 {offsets = [0, 64], sizes = [64, 32], strides = [1, 1]} : vector<64x96xbf16> to vector<64x32xbf16>
    %cst_70 = arith.constant dense<0.000000e+00> : vector<64x64xf32>
    %151 = tpu.matmul %148, %149, %cst_70 {dimension_numbers = #tpu.dot_dimension_numbers<[1], [1], [0], [0], [0, 0, 1, 0], [], []>} : vector<64x32xbf16>, vector<64x32xbf16>, vector<64x64xf32> -> vector<64x64xf32>
    %cst_71 = arith.constant 6.250000e-02 : f32
    %152 = vector.broadcast %cst_71 : f32 to vector<64x64xf32>
    %153 = arith.mulf %151, %152 : vector<64x64xf32>
    %154 = arith.addf %153, %4 : vector<64x64xf32>
    %cst_72 = arith.constant dense<0xFF800000> : vector<64xf32>
    %155 = vector.multi_reduction <maximumf>, %154, %cst_72 [1] : vector<64x64xf32> to vector<64xf32>
    %156 = vector.shape_cast %155 : vector<64xf32> to vector<64x1xf32>
    %157 = vector.broadcast %156 : vector<64x1xf32> to vector<64x64xf32>
    %158 = arith.subf %154, %157 : vector<64x64xf32>
    %159 = math.exp %158 : vector<64x64xf32>
    %cst_73 = arith.constant dense<0.000000e+00> : vector<64xf32>
    %160 = vector.multi_reduction <add>, %159, %cst_73 [1] : vector<64x64xf32> to vector<64xf32>
    %161 = vector.shape_cast %160 : vector<64xf32> to vector<64x1xf32>
    %162 = tpu.reciprocal %161 {approx = true} : vector<64x1xf32> -> vector<64x1xf32>
    %163 = vector.broadcast %162 : vector<64x1xf32> to vector<64x64xf32>
    %164 = arith.mulf %159, %163 : vector<64x64xf32>
    %165 = arith.truncf %164 : vector<64x64xf32> to vector<64x64xbf16>
    %cst_74 = arith.constant dense<0.000000e+00> : vector<64x32xf32>
    %166 = tpu.matmul %165, %150, %cst_74 {dimension_numbers = #tpu.dot_dimension_numbers<[1], [0], [0], [1], [0, 0, 1, 1], [], []>} : vector<64x64xbf16>, vector<64x32xbf16>, vector<64x32xf32> -> vector<64x32xf32>
    %167 = arith.truncf %166 : vector<64x32xf32> to vector<64x32xbf16>
    %168 = vector.extract_strided_slice %167 {offsets = [0, 0], sizes = [8, 32], strides = [1, 1]} : vector<64x32xbf16> to vector<8x32xbf16>
    %cst_75 = arith.constant dense<0.000000e+00> : vector<8x32xf32>
    %169 = tpu.matmul %168, %17, %cst_75 {dimension_numbers = #tpu.dot_dimension_numbers<[1], [0], [0], [1], [0, 0, 1, 1], [], []>} : vector<8x32xbf16>, vector<32x32xbf16>, vector<8x32xf32> -> vector<8x32xf32>
    %170 = vector.extract_strided_slice %167 {offsets = [8, 0], sizes = [8, 32], strides = [1, 1]} : vector<64x32xbf16> to vector<8x32xbf16>
    %cst_76 = arith.constant dense<0.000000e+00> : vector<8x32xf32>
    %171 = tpu.matmul %170, %19, %cst_76 {dimension_numbers = #tpu.dot_dimension_numbers<[1], [0], [0], [1], [0, 0, 1, 1], [], []>} : vector<8x32xbf16>, vector<32x32xbf16>, vector<8x32xf32> -> vector<8x32xf32>
    %172 = arith.addf %169, %171 : vector<8x32xf32>
    %173 = vector.extract_strided_slice %167 {offsets = [16, 0], sizes = [8, 32], strides = [1, 1]} : vector<64x32xbf16> to vector<8x32xbf16>
    %cst_77 = arith.constant dense<0.000000e+00> : vector<8x32xf32>
    %174 = tpu.matmul %173, %21, %cst_77 {dimension_numbers = #tpu.dot_dimension_numbers<[1], [0], [0], [1], [0, 0, 1, 1], [], []>} : vector<8x32xbf16>, vector<32x32xbf16>, vector<8x32xf32> -> vector<8x32xf32>
    %175 = arith.addf %172, %174 : vector<8x32xf32>
    %176 = vector.extract_strided_slice %167 {offsets = [24, 0], sizes = [8, 32], strides = [1, 1]} : vector<64x32xbf16> to vector<8x32xbf16>
    %cst_78 = arith.constant dense<0.000000e+00> : vector<8x32xf32>
    %177 = tpu.matmul %176, %23, %cst_78 {dimension_numbers = #tpu.dot_dimension_numbers<[1], [0], [0], [1], [0, 0, 1, 1], [], []>} : vector<8x32xbf16>, vector<32x32xbf16>, vector<8x32xf32> -> vector<8x32xf32>
    %178 = arith.addf %175, %177 : vector<8x32xf32>
    %179 = vector.extract_strided_slice %167 {offsets = [32, 0], sizes = [8, 32], strides = [1, 1]} : vector<64x32xbf16> to vector<8x32xbf16>
    %cst_79 = arith.constant dense<0.000000e+00> : vector<8x32xf32>
    %180 = tpu.matmul %179, %25, %cst_79 {dimension_numbers = #tpu.dot_dimension_numbers<[1], [0], [0], [1], [0, 0, 1, 1], [], []>} : vector<8x32xbf16>, vector<32x32xbf16>, vector<8x32xf32> -> vector<8x32xf32>
    %181 = arith.addf %178, %180 : vector<8x32xf32>
    %182 = vector.extract_strided_slice %167 {offsets = [40, 0], sizes = [8, 32], strides = [1, 1]} : vector<64x32xbf16> to vector<8x32xbf16>
    %cst_80 = arith.constant dense<0.000000e+00> : vector<8x32xf32>
    %183 = tpu.matmul %182, %27, %cst_80 {dimension_numbers = #tpu.dot_dimension_numbers<[1], [0], [0], [1], [0, 0, 1, 1], [], []>} : vector<8x32xbf16>, vector<32x32xbf16>, vector<8x32xf32> -> vector<8x32xf32>
    %184 = arith.addf %181, %183 : vector<8x32xf32>
    %185 = vector.extract_strided_slice %167 {offsets = [48, 0], sizes = [8, 32], strides = [1, 1]} : vector<64x32xbf16> to vector<8x32xbf16>
    %cst_81 = arith.constant dense<0.000000e+00> : vector<8x32xf32>
    %186 = tpu.matmul %185, %29, %cst_81 {dimension_numbers = #tpu.dot_dimension_numbers<[1], [0], [0], [1], [0, 0, 1, 1], [], []>} : vector<8x32xbf16>, vector<32x32xbf16>, vector<8x32xf32> -> vector<8x32xf32>
    %187 = arith.addf %184, %186 : vector<8x32xf32>
    %188 = vector.extract_strided_slice %167 {offsets = [56, 0], sizes = [8, 32], strides = [1, 1]} : vector<64x32xbf16> to vector<8x32xbf16>
    %cst_82 = arith.constant dense<0.000000e+00> : vector<8x32xf32>
    %189 = tpu.matmul %188, %31, %cst_82 {dimension_numbers = #tpu.dot_dimension_numbers<[1], [0], [0], [1], [0, 0, 1, 1], [], []>} : vector<8x32xbf16>, vector<32x32xbf16>, vector<8x32xf32> -> vector<8x32xf32>
    %190 = arith.addf %187, %189 : vector<8x32xf32>
    %191 = vector.extract_strided_slice %15 {offsets = [24, 0], sizes = [8, 768], strides = [1, 1]} : vector<32x768xbf16> to vector<8x768xbf16>
    %192 = vector.extract_strided_slice %191 {offsets = [0, 0], sizes = [8, 96], strides = [1, 1]} : vector<8x768xbf16> to vector<8x96xbf16>
    %193 = vector.extract_strided_slice %191 {offsets = [0, 96], sizes = [8, 96], strides = [1, 1]} : vector<8x768xbf16> to vector<8x96xbf16>
    %194 = vector.extract_strided_slice %191 {offsets = [0, 192], sizes = [8, 96], strides = [1, 1]} : vector<8x768xbf16> to vector<8x96xbf16>
    %195 = vector.extract_strided_slice %191 {offsets = [0, 288], sizes = [8, 96], strides = [1, 1]} : vector<8x768xbf16> to vector<8x96xbf16>
    %196 = vector.extract_strided_slice %191 {offsets = [0, 384], sizes = [8, 96], strides = [1, 1]} : vector<8x768xbf16> to vector<8x96xbf16>
    %197 = vector.extract_strided_slice %191 {offsets = [0, 480], sizes = [8, 96], strides = [1, 1]} : vector<8x768xbf16> to vector<8x96xbf16>
    %198 = vector.extract_strided_slice %191 {offsets = [0, 576], sizes = [8, 96], strides = [1, 1]} : vector<8x768xbf16> to vector<8x96xbf16>
    %199 = vector.extract_strided_slice %191 {offsets = [0, 672], sizes = [8, 96], strides = [1, 1]} : vector<8x768xbf16> to vector<8x96xbf16>
    %200 = tpu.concatenate %192, %193, %194, %195, %196, %197, %198, %199 in 0 : vector<8x96xbf16>, vector<8x96xbf16>, vector<8x96xbf16>, vector<8x96xbf16>, vector<8x96xbf16>, vector<8x96xbf16>, vector<8x96xbf16>, vector<8x96xbf16> -> vector<64x96xbf16>
    %201 = vector.extract_strided_slice %200 {offsets = [0, 0], sizes = [64, 32], strides = [1, 1]} : vector<64x96xbf16> to vector<64x32xbf16>
    %202 = vector.extract_strided_slice %200 {offsets = [0, 32], sizes = [64, 32], strides = [1, 1]} : vector<64x96xbf16> to vector<64x32xbf16>
    %203 = vector.extract_strided_slice %200 {offsets = [0, 64], sizes = [64, 32], strides = [1, 1]} : vector<64x96xbf16> to vector<64x32xbf16>
    %cst_83 = arith.constant dense<0.000000e+00> : vector<64x64xf32>
    %204 = tpu.matmul %201, %202, %cst_83 {dimension_numbers = #tpu.dot_dimension_numbers<[1], [1], [0], [0], [0, 0, 1, 0], [], []>} : vector<64x32xbf16>, vector<64x32xbf16>, vector<64x64xf32> -> vector<64x64xf32>
    %cst_84 = arith.constant 6.250000e-02 : f32
    %205 = vector.broadcast %cst_84 : f32 to vector<64x64xf32>
    %206 = arith.mulf %204, %205 : vector<64x64xf32>
    %207 = arith.addf %206, %4 : vector<64x64xf32>
    %cst_85 = arith.constant dense<0xFF800000> : vector<64xf32>
    %208 = vector.multi_reduction <maximumf>, %207, %cst_85 [1] : vector<64x64xf32> to vector<64xf32>
    %209 = vector.shape_cast %208 : vector<64xf32> to vector<64x1xf32>
    %210 = vector.broadcast %209 : vector<64x1xf32> to vector<64x64xf32>
    %211 = arith.subf %207, %210 : vector<64x64xf32>
    %212 = math.exp %211 : vector<64x64xf32>
    %cst_86 = arith.constant dense<0.000000e+00> : vector<64xf32>
    %213 = vector.multi_reduction <add>, %212, %cst_86 [1] : vector<64x64xf32> to vector<64xf32>
    %214 = vector.shape_cast %213 : vector<64xf32> to vector<64x1xf32>
    %215 = tpu.reciprocal %214 {approx = true} : vector<64x1xf32> -> vector<64x1xf32>
    %216 = vector.broadcast %215 : vector<64x1xf32> to vector<64x64xf32>
    %217 = arith.mulf %212, %216 : vector<64x64xf32>
    %218 = arith.truncf %217 : vector<64x64xf32> to vector<64x64xbf16>
    %cst_87 = arith.constant dense<0.000000e+00> : vector<64x32xf32>
    %219 = tpu.matmul %218, %203, %cst_87 {dimension_numbers = #tpu.dot_dimension_numbers<[1], [0], [0], [1], [0, 0, 1, 1], [], []>} : vector<64x64xbf16>, vector<64x32xbf16>, vector<64x32xf32> -> vector<64x32xf32>
    %220 = arith.truncf %219 : vector<64x32xf32> to vector<64x32xbf16>
    %221 = vector.extract_strided_slice %220 {offsets = [0, 0], sizes = [8, 32], strides = [1, 1]} : vector<64x32xbf16> to vector<8x32xbf16>
    %cst_88 = arith.constant dense<0.000000e+00> : vector<8x32xf32>
    %222 = tpu.matmul %221, %17, %cst_88 {dimension_numbers = #tpu.dot_dimension_numbers<[1], [0], [0], [1], [0, 0, 1, 1], [], []>} : vector<8x32xbf16>, vector<32x32xbf16>, vector<8x32xf32> -> vector<8x32xf32>
    %223 = vector.extract_strided_slice %220 {offsets = [8, 0], sizes = [8, 32], strides = [1, 1]} : vector<64x32xbf16> to vector<8x32xbf16>
    %cst_89 = arith.constant dense<0.000000e+00> : vector<8x32xf32>
    %224 = tpu.matmul %223, %19, %cst_89 {dimension_numbers = #tpu.dot_dimension_numbers<[1], [0], [0], [1], [0, 0, 1, 1], [], []>} : vector<8x32xbf16>, vector<32x32xbf16>, vector<8x32xf32> -> vector<8x32xf32>
    %225 = arith.addf %222, %224 : vector<8x32xf32>
    %226 = vector.extract_strided_slice %220 {offsets = [16, 0], sizes = [8, 32], strides = [1, 1]} : vector<64x32xbf16> to vector<8x32xbf16>
    %cst_90 = arith.constant dense<0.000000e+00> : vector<8x32xf32>
    %227 = tpu.matmul %226, %21, %cst_90 {dimension_numbers = #tpu.dot_dimension_numbers<[1], [0], [0], [1], [0, 0, 1, 1], [], []>} : vector<8x32xbf16>, vector<32x32xbf16>, vector<8x32xf32> -> vector<8x32xf32>
    %228 = arith.addf %225, %227 : vector<8x32xf32>
    %229 = vector.extract_strided_slice %220 {offsets = [24, 0], sizes = [8, 32], strides = [1, 1]} : vector<64x32xbf16> to vector<8x32xbf16>
    %cst_91 = arith.constant dense<0.000000e+00> : vector<8x32xf32>
    %230 = tpu.matmul %229, %23, %cst_91 {dimension_numbers = #tpu.dot_dimension_numbers<[1], [0], [0], [1], [0, 0, 1, 1], [], []>} : vector<8x32xbf16>, vector<32x32xbf16>, vector<8x32xf32> -> vector<8x32xf32>
    %231 = arith.addf %228, %230 : vector<8x32xf32>
    %232 = vector.extract_strided_slice %220 {offsets = [32, 0], sizes = [8, 32], strides = [1, 1]} : vector<64x32xbf16> to vector<8x32xbf16>
    %cst_92 = arith.constant dense<0.000000e+00> : vector<8x32xf32>
    %233 = tpu.matmul %232, %25, %cst_92 {dimension_numbers = #tpu.dot_dimension_numbers<[1], [0], [0], [1], [0, 0, 1, 1], [], []>} : vector<8x32xbf16>, vector<32x32xbf16>, vector<8x32xf32> -> vector<8x32xf32>
    %234 = arith.addf %231, %233 : vector<8x32xf32>
    %235 = vector.extract_strided_slice %220 {offsets = [40, 0], sizes = [8, 32], strides = [1, 1]} : vector<64x32xbf16> to vector<8x32xbf16>
    %cst_93 = arith.constant dense<0.000000e+00> : vector<8x32xf32>
    %236 = tpu.matmul %235, %27, %cst_93 {dimension_numbers = #tpu.dot_dimension_numbers<[1], [0], [0], [1], [0, 0, 1, 1], [], []>} : vector<8x32xbf16>, vector<32x32xbf16>, vector<8x32xf32> -> vector<8x32xf32>
    %237 = arith.addf %234, %236 : vector<8x32xf32>
    %238 = vector.extract_strided_slice %220 {offsets = [48, 0], sizes = [8, 32], strides = [1, 1]} : vector<64x32xbf16> to vector<8x32xbf16>
    %cst_94 = arith.constant dense<0.000000e+00> : vector<8x32xf32>
    %239 = tpu.matmul %238, %29, %cst_94 {dimension_numbers = #tpu.dot_dimension_numbers<[1], [0], [0], [1], [0, 0, 1, 1], [], []>} : vector<8x32xbf16>, vector<32x32xbf16>, vector<8x32xf32> -> vector<8x32xf32>
    %240 = arith.addf %237, %239 : vector<8x32xf32>
    %241 = vector.extract_strided_slice %220 {offsets = [56, 0], sizes = [8, 32], strides = [1, 1]} : vector<64x32xbf16> to vector<8x32xbf16>
    %cst_95 = arith.constant dense<0.000000e+00> : vector<8x32xf32>
    %242 = tpu.matmul %241, %31, %cst_95 {dimension_numbers = #tpu.dot_dimension_numbers<[1], [0], [0], [1], [0, 0, 1, 1], [], []>} : vector<8x32xbf16>, vector<32x32xbf16>, vector<8x32xf32> -> vector<8x32xf32>
    %243 = arith.addf %240, %242 : vector<8x32xf32>
    %244 = tpu.concatenate %84, %137, %190, %243 in 0 : vector<8x32xf32>, vector<8x32xf32>, vector<8x32xf32>, vector<8x32xf32> -> vector<32x32xf32>
    %c0_96 = arith.constant 0 : index
    %c0_97 = arith.constant 0 : index
    %c0_98 = arith.constant 0 : index
    %245 = vector.load %arg11[%c0_96, %c0_97, %c0_98] : memref<2x1x32xf32, #tpu.memory_space<vmem>>, vector<1x1x32xf32>
    %246 = vector.shape_cast %245 : vector<1x1x32xf32> to vector<1x32xf32>
    %247 = vector.broadcast %246 : vector<1x32xf32> to vector<32x32xf32>
    %248 = arith.addf %244, %247 : vector<32x32xf32>
    %249 = arith.addf %1, %248 : vector<32x32xf32>
    %cst_99 = arith.constant dense<0.000000e+00> : vector<32xf32>
    %250 = vector.multi_reduction <add>, %249, %cst_99 [1] : vector<32x32xf32> to vector<32xf32>
    %251 = vector.shape_cast %250 : vector<32xf32> to vector<32x1xf32>
    %cst_100 = arith.constant 3.200000e+01 : f32
    %252 = vector.broadcast %cst_100 : f32 to vector<32x1xf32>
    %253 = arith.divf %251, %252 : vector<32x1xf32>
    %254 = vector.broadcast %253 : vector<32x1xf32> to vector<32x32xf32>
    %255 = arith.subf %249, %254 : vector<32x32xf32>
    %256 = arith.mulf %255, %255 : vector<32x32xf32>
    %cst_101 = arith.constant dense<0.000000e+00> : vector<32xf32>
    %257 = vector.multi_reduction <add>, %256, %cst_101 [1] : vector<32x32xf32> to vector<32xf32>
    %258 = vector.shape_cast %257 : vector<32xf32> to vector<32x1xf32>
    %cst_102 = arith.constant 0.0322580636 : f32
    %259 = vector.broadcast %cst_102 : f32 to vector<32x1xf32>
    %260 = arith.mulf %258, %259 : vector<32x1xf32>
    %261 = vector.broadcast %5 : vector<1x32xf32> to vector<32x32xf32>
    %262 = arith.mulf %261, %255 : vector<32x32xf32>
    %263 = math.sqrt %260 : vector<32x1xf32>
    %cst_103 = arith.constant 9.99999974E-6 : f32
    %264 = vector.broadcast %cst_103 : f32 to vector<32x1xf32>
    %265 = arith.addf %263, %264 : vector<32x1xf32>
    %266 = vector.broadcast %265 : vector<32x1xf32> to vector<32x32xf32>
    %267 = arith.divf %262, %266 : vector<32x32xf32>
    %268 = vector.broadcast %6 : vector<1x32xf32> to vector<32x32xf32>
    %269 = arith.addf %267, %268 : vector<32x32xf32>
    %270 = arith.truncf %3 : vector<32x32xf32> to vector<32x32xbf16>
    %c0_104 = arith.constant 0 : index
    %c0_105 = arith.constant 0 : index
    %271 = vector.load %arg6[%c0_104, %c0_105] : memref<32x256xbf16, #tpu.memory_space<vmem>>, vector<32x256xbf16>
    %cst_106 = arith.constant dense<0.000000e+00> : vector<32x256xf32>
    %272 = tpu.matmul %270, %271, %cst_106 {dimension_numbers = #tpu.dot_dimension_numbers<[1], [0], [0], [1], [0, 0, 1, 1], [], []>} : vector<32x32xbf16>, vector<32x256xbf16>, vector<32x256xf32> -> vector<32x256xf32>
    %c0_107 = arith.constant 0 : index
    %c0_108 = arith.constant 0 : index
    %273 = vector.load %arg7[%c0_107, %c0_108] : memref<1x256xf32, #tpu.memory_space<vmem>>, vector<1x256xf32>
    %274 = vector.broadcast %273 : vector<1x256xf32> to vector<32x256xf32>
    %275 = arith.addf %272, %274 : vector<32x256xf32>
    %276 = arith.truncf %275 : vector<32x256xf32> to vector<32x256xbf16>
    %277 = arith.truncf %269 : vector<32x32xf32> to vector<32x32xbf16>
    %c0_109 = arith.constant 0 : index
    %c0_110 = arith.constant 0 : index
    %278 = vector.load %arg8[%c0_109, %c0_110] : memref<32x512xbf16, #tpu.memory_space<vmem>>, vector<32x512xbf16>
    %cst_111 = arith.constant dense<0.000000e+00> : vector<32x512xf32>
    %279 = tpu.matmul %277, %278, %cst_111 {dimension_numbers = #tpu.dot_dimension_numbers<[1], [0], [0], [1], [0, 0, 1, 1], [], []>} : vector<32x32xbf16>, vector<32x512xbf16>, vector<32x512xf32> -> vector<32x512xf32>
    %c0_112 = arith.constant 0 : index
    %c0_113 = arith.constant 0 : index
    %280 = vector.load %arg9[%c0_112, %c0_113] : memref<1x512xf32, #tpu.memory_space<vmem>>, vector<1x512xf32>
    %281 = vector.broadcast %280 : vector<1x512xf32> to vector<32x512xf32>
    %282 = arith.addf %279, %281 : vector<32x512xf32>
    %283 = arith.truncf %282 : vector<32x512xf32> to vector<32x512xbf16>
    %c1_114 = arith.constant 1 : index
    %c0_115 = arith.constant 0 : index
    %c0_116 = arith.constant 0 : index
    %c0_117 = arith.constant 0 : index
    %284 = vector.load %arg10[%c1_114, %c0_115, %c0_116, %c0_117] : memref<2x8x32x32xbf16, #tpu.memory_space<vmem>>, vector<1x1x32x32xbf16>
    %285 = vector.shape_cast %284 : vector<1x1x32x32xbf16> to vector<32x32xbf16>
    %c1_118 = arith.constant 1 : index
    %c1_119 = arith.constant 1 : index
    %c0_120 = arith.constant 0 : index
    %c0_121 = arith.constant 0 : index
    %286 = vector.load %arg10[%c1_118, %c1_119, %c0_120, %c0_121] : memref<2x8x32x32xbf16, #tpu.memory_space<vmem>>, vector<1x1x32x32xbf16>
    %287 = vector.shape_cast %286 : vector<1x1x32x32xbf16> to vector<32x32xbf16>
    %c1_122 = arith.constant 1 : index
    %c2_123 = arith.constant 2 : index
    %c0_124 = arith.constant 0 : index
    %c0_125 = arith.constant 0 : index
    %288 = vector.load %arg10[%c1_122, %c2_123, %c0_124, %c0_125] : memref<2x8x32x32xbf16, #tpu.memory_space<vmem>>, vector<1x1x32x32xbf16>
    %289 = vector.shape_cast %288 : vector<1x1x32x32xbf16> to vector<32x32xbf16>
    %c1_126 = arith.constant 1 : index
    %c3_127 = arith.constant 3 : index
    %c0_128 = arith.constant 0 : index
    %c0_129 = arith.constant 0 : index
    %290 = vector.load %arg10[%c1_126, %c3_127, %c0_128, %c0_129] : memref<2x8x32x32xbf16, #tpu.memory_space<vmem>>, vector<1x1x32x32xbf16>
    %291 = vector.shape_cast %290 : vector<1x1x32x32xbf16> to vector<32x32xbf16>
    %c1_130 = arith.constant 1 : index
    %c4_131 = arith.constant 4 : index
    %c0_132 = arith.constant 0 : index
    %c0_133 = arith.constant 0 : index
    %292 = vector.load %arg10[%c1_130, %c4_131, %c0_132, %c0_133] : memref<2x8x32x32xbf16, #tpu.memory_space<vmem>>, vector<1x1x32x32xbf16>
    %293 = vector.shape_cast %292 : vector<1x1x32x32xbf16> to vector<32x32xbf16>
    %c1_134 = arith.constant 1 : index
    %c5_135 = arith.constant 5 : index
    %c0_136 = arith.constant 0 : index
    %c0_137 = arith.constant 0 : index
    %294 = vector.load %arg10[%c1_134, %c5_135, %c0_136, %c0_137] : memref<2x8x32x32xbf16, #tpu.memory_space<vmem>>, vector<1x1x32x32xbf16>
    %295 = vector.shape_cast %294 : vector<1x1x32x32xbf16> to vector<32x32xbf16>
    %c1_138 = arith.constant 1 : index
    %c6_139 = arith.constant 6 : index
    %c0_140 = arith.constant 0 : index
    %c0_141 = arith.constant 0 : index
    %296 = vector.load %arg10[%c1_138, %c6_139, %c0_140, %c0_141] : memref<2x8x32x32xbf16, #tpu.memory_space<vmem>>, vector<1x1x32x32xbf16>
    %297 = vector.shape_cast %296 : vector<1x1x32x32xbf16> to vector<32x32xbf16>
    %c1_142 = arith.constant 1 : index
    %c7_143 = arith.constant 7 : index
    %c0_144 = arith.constant 0 : index
    %c0_145 = arith.constant 0 : index
    %298 = vector.load %arg10[%c1_142, %c7_143, %c0_144, %c0_145] : memref<2x8x32x32xbf16, #tpu.memory_space<vmem>>, vector<1x1x32x32xbf16>
    %299 = vector.shape_cast %298 : vector<1x1x32x32xbf16> to vector<32x32xbf16>
    %300 = vector.extract_strided_slice %276 {offsets = [0, 0], sizes = [8, 256], strides = [1, 1]} : vector<32x256xbf16> to vector<8x256xbf16>
    %301 = vector.extract_strided_slice %283 {offsets = [0, 0], sizes = [8, 512], strides = [1, 1]} : vector<32x512xbf16> to vector<8x512xbf16>
    %302 = vector.extract_strided_slice %300 {offsets = [0, 0], sizes = [8, 32], strides = [1, 1]} : vector<8x256xbf16> to vector<8x32xbf16>
    %303 = vector.extract_strided_slice %300 {offsets = [0, 32], sizes = [8, 32], strides = [1, 1]} : vector<8x256xbf16> to vector<8x32xbf16>
    %304 = vector.extract_strided_slice %300 {offsets = [0, 64], sizes = [8, 32], strides = [1, 1]} : vector<8x256xbf16> to vector<8x32xbf16>
    %305 = vector.extract_strided_slice %300 {offsets = [0, 96], sizes = [8, 32], strides = [1, 1]} : vector<8x256xbf16> to vector<8x32xbf16>
    %306 = vector.extract_strided_slice %300 {offsets = [0, 128], sizes = [8, 32], strides = [1, 1]} : vector<8x256xbf16> to vector<8x32xbf16>
    %307 = vector.extract_strided_slice %300 {offsets = [0, 160], sizes = [8, 32], strides = [1, 1]} : vector<8x256xbf16> to vector<8x32xbf16>
    %308 = vector.extract_strided_slice %300 {offsets = [0, 192], sizes = [8, 32], strides = [1, 1]} : vector<8x256xbf16> to vector<8x32xbf16>
    %309 = vector.extract_strided_slice %300 {offsets = [0, 224], sizes = [8, 32], strides = [1, 1]} : vector<8x256xbf16> to vector<8x32xbf16>
    %310 = tpu.concatenate %302, %303, %304, %305, %306, %307, %308, %309 in 0 : vector<8x32xbf16>, vector<8x32xbf16>, vector<8x32xbf16>, vector<8x32xbf16>, vector<8x32xbf16>, vector<8x32xbf16>, vector<8x32xbf16>, vector<8x32xbf16> -> vector<64x32xbf16>
    %311 = vector.extract_strided_slice %301 {offsets = [0, 0], sizes = [8, 64], strides = [1, 1]} : vector<8x512xbf16> to vector<8x64xbf16>
    %312 = vector.extract_strided_slice %301 {offsets = [0, 64], sizes = [8, 64], strides = [1, 1]} : vector<8x512xbf16> to vector<8x64xbf16>
    %313 = vector.extract_strided_slice %301 {offsets = [0, 128], sizes = [8, 64], strides = [1, 1]} : vector<8x512xbf16> to vector<8x64xbf16>
    %314 = vector.extract_strided_slice %301 {offsets = [0, 192], sizes = [8, 64], strides = [1, 1]} : vector<8x512xbf16> to vector<8x64xbf16>
    %315 = vector.extract_strided_slice %301 {offsets = [0, 256], sizes = [8, 64], strides = [1, 1]} : vector<8x512xbf16> to vector<8x64xbf16>
    %316 = vector.extract_strided_slice %301 {offsets = [0, 320], sizes = [8, 64], strides = [1, 1]} : vector<8x512xbf16> to vector<8x64xbf16>
    %317 = vector.extract_strided_slice %301 {offsets = [0, 384], sizes = [8, 64], strides = [1, 1]} : vector<8x512xbf16> to vector<8x64xbf16>
    %318 = vector.extract_strided_slice %301 {offsets = [0, 448], sizes = [8, 64], strides = [1, 1]} : vector<8x512xbf16> to vector<8x64xbf16>
    %319 = tpu.concatenate %311, %312, %313, %314, %315, %316, %317, %318 in 0 : vector<8x64xbf16>, vector<8x64xbf16>, vector<8x64xbf16>, vector<8x64xbf16>, vector<8x64xbf16>, vector<8x64xbf16>, vector<8x64xbf16>, vector<8x64xbf16> -> vector<64x64xbf16>
    %320 = vector.extract_strided_slice %319 {offsets = [0, 0], sizes = [64, 32], strides = [1, 1]} : vector<64x64xbf16> to vector<64x32xbf16>
    %321 = vector.extract_strided_slice %319 {offsets = [0, 32], sizes = [64, 32], strides = [1, 1]} : vector<64x64xbf16> to vector<64x32xbf16>
    %cst_146 = arith.constant dense<0.000000e+00> : vector<64x64xf32>
    %322 = tpu.matmul %310, %320, %cst_146 {dimension_numbers = #tpu.dot_dimension_numbers<[1], [1], [0], [0], [0, 0, 1, 0], [], []>} : vector<64x32xbf16>, vector<64x32xbf16>, vector<64x64xf32> -> vector<64x64xf32>
    %cst_147 = arith.constant 6.250000e-02 : f32
    %323 = vector.broadcast %cst_147 : f32 to vector<64x64xf32>
    %324 = arith.mulf %322, %323 : vector<64x64xf32>
    %325 = arith.addf %324, %4 : vector<64x64xf32>
    %cst_148 = arith.constant dense<0xFF800000> : vector<64xf32>
    %326 = vector.multi_reduction <maximumf>, %325, %cst_148 [1] : vector<64x64xf32> to vector<64xf32>
    %327 = vector.shape_cast %326 : vector<64xf32> to vector<64x1xf32>
    %328 = vector.broadcast %327 : vector<64x1xf32> to vector<64x64xf32>
    %329 = arith.subf %325, %328 : vector<64x64xf32>
    %330 = math.exp %329 : vector<64x64xf32>
    %cst_149 = arith.constant dense<0.000000e+00> : vector<64xf32>
    %331 = vector.multi_reduction <add>, %330, %cst_149 [1] : vector<64x64xf32> to vector<64xf32>
    %332 = vector.shape_cast %331 : vector<64xf32> to vector<64x1xf32>
    %333 = tpu.reciprocal %332 {approx = true} : vector<64x1xf32> -> vector<64x1xf32>
    %334 = vector.broadcast %333 : vector<64x1xf32> to vector<64x64xf32>
    %335 = arith.mulf %330, %334 : vector<64x64xf32>
    %336 = arith.truncf %335 : vector<64x64xf32> to vector<64x64xbf16>
    %cst_150 = arith.constant dense<0.000000e+00> : vector<64x32xf32>
    %337 = tpu.matmul %336, %321, %cst_150 {dimension_numbers = #tpu.dot_dimension_numbers<[1], [0], [0], [1], [0, 0, 1, 1], [], []>} : vector<64x64xbf16>, vector<64x32xbf16>, vector<64x32xf32> -> vector<64x32xf32>
    %338 = arith.truncf %337 : vector<64x32xf32> to vector<64x32xbf16>
    %339 = vector.extract_strided_slice %338 {offsets = [0, 0], sizes = [8, 32], strides = [1, 1]} : vector<64x32xbf16> to vector<8x32xbf16>
    %cst_151 = arith.constant dense<0.000000e+00> : vector<8x32xf32>
    %340 = tpu.matmul %339, %285, %cst_151 {dimension_numbers = #tpu.dot_dimension_numbers<[1], [0], [0], [1], [0, 0, 1, 1], [], []>} : vector<8x32xbf16>, vector<32x32xbf16>, vector<8x32xf32> -> vector<8x32xf32>
    %341 = vector.extract_strided_slice %338 {offsets = [8, 0], sizes = [8, 32], strides = [1, 1]} : vector<64x32xbf16> to vector<8x32xbf16>
    %cst_152 = arith.constant dense<0.000000e+00> : vector<8x32xf32>
    %342 = tpu.matmul %341, %287, %cst_152 {dimension_numbers = #tpu.dot_dimension_numbers<[1], [0], [0], [1], [0, 0, 1, 1], [], []>} : vector<8x32xbf16>, vector<32x32xbf16>, vector<8x32xf32> -> vector<8x32xf32>
    %343 = arith.addf %340, %342 : vector<8x32xf32>
    %344 = vector.extract_strided_slice %338 {offsets = [16, 0], sizes = [8, 32], strides = [1, 1]} : vector<64x32xbf16> to vector<8x32xbf16>
    %cst_153 = arith.constant dense<0.000000e+00> : vector<8x32xf32>
    %345 = tpu.matmul %344, %289, %cst_153 {dimension_numbers = #tpu.dot_dimension_numbers<[1], [0], [0], [1], [0, 0, 1, 1], [], []>} : vector<8x32xbf16>, vector<32x32xbf16>, vector<8x32xf32> -> vector<8x32xf32>
    %346 = arith.addf %343, %345 : vector<8x32xf32>
    %347 = vector.extract_strided_slice %338 {offsets = [24, 0], sizes = [8, 32], strides = [1, 1]} : vector<64x32xbf16> to vector<8x32xbf16>
    %cst_154 = arith.constant dense<0.000000e+00> : vector<8x32xf32>
    %348 = tpu.matmul %347, %291, %cst_154 {dimension_numbers = #tpu.dot_dimension_numbers<[1], [0], [0], [1], [0, 0, 1, 1], [], []>} : vector<8x32xbf16>, vector<32x32xbf16>, vector<8x32xf32> -> vector<8x32xf32>
    %349 = arith.addf %346, %348 : vector<8x32xf32>
    %350 = vector.extract_strided_slice %338 {offsets = [32, 0], sizes = [8, 32], strides = [1, 1]} : vector<64x32xbf16> to vector<8x32xbf16>
    %cst_155 = arith.constant dense<0.000000e+00> : vector<8x32xf32>
    %351 = tpu.matmul %350, %293, %cst_155 {dimension_numbers = #tpu.dot_dimension_numbers<[1], [0], [0], [1], [0, 0, 1, 1], [], []>} : vector<8x32xbf16>, vector<32x32xbf16>, vector<8x32xf32> -> vector<8x32xf32>
    %352 = arith.addf %349, %351 : vector<8x32xf32>
    %353 = vector.extract_strided_slice %338 {offsets = [40, 0], sizes = [8, 32], strides = [1, 1]} : vector<64x32xbf16> to vector<8x32xbf16>
    %cst_156 = arith.constant dense<0.000000e+00> : vector<8x32xf32>
    %354 = tpu.matmul %353, %295, %cst_156 {dimension_numbers = #tpu.dot_dimension_numbers<[1], [0], [0], [1], [0, 0, 1, 1], [], []>} : vector<8x32xbf16>, vector<32x32xbf16>, vector<8x32xf32> -> vector<8x32xf32>
    %355 = arith.addf %352, %354 : vector<8x32xf32>
    %356 = vector.extract_strided_slice %338 {offsets = [48, 0], sizes = [8, 32], strides = [1, 1]} : vector<64x32xbf16> to vector<8x32xbf16>
    %cst_157 = arith.constant dense<0.000000e+00> : vector<8x32xf32>
    %357 = tpu.matmul %356, %297, %cst_157 {dimension_numbers = #tpu.dot_dimension_numbers<[1], [0], [0], [1], [0, 0, 1, 1], [], []>} : vector<8x32xbf16>, vector<32x32xbf16>, vector<8x32xf32> -> vector<8x32xf32>
    %358 = arith.addf %355, %357 : vector<8x32xf32>
    %359 = vector.extract_strided_slice %338 {offsets = [56, 0], sizes = [8, 32], strides = [1, 1]} : vector<64x32xbf16> to vector<8x32xbf16>
    %cst_158 = arith.constant dense<0.000000e+00> : vector<8x32xf32>
    %360 = tpu.matmul %359, %299, %cst_158 {dimension_numbers = #tpu.dot_dimension_numbers<[1], [0], [0], [1], [0, 0, 1, 1], [], []>} : vector<8x32xbf16>, vector<32x32xbf16>, vector<8x32xf32> -> vector<8x32xf32>
    %361 = arith.addf %358, %360 : vector<8x32xf32>
    %362 = vector.extract_strided_slice %276 {offsets = [8, 0], sizes = [8, 256], strides = [1, 1]} : vector<32x256xbf16> to vector<8x256xbf16>
    %363 = vector.extract_strided_slice %283 {offsets = [8, 0], sizes = [8, 512], strides = [1, 1]} : vector<32x512xbf16> to vector<8x512xbf16>
    %364 = vector.extract_strided_slice %362 {offsets = [0, 0], sizes = [8, 32], strides = [1, 1]} : vector<8x256xbf16> to vector<8x32xbf16>
    %365 = vector.extract_strided_slice %362 {offsets = [0, 32], sizes = [8, 32], strides = [1, 1]} : vector<8x256xbf16> to vector<8x32xbf16>
    %366 = vector.extract_strided_slice %362 {offsets = [0, 64], sizes = [8, 32], strides = [1, 1]} : vector<8x256xbf16> to vector<8x32xbf16>
    %367 = vector.extract_strided_slice %362 {offsets = [0, 96], sizes = [8, 32], strides = [1, 1]} : vector<8x256xbf16> to vector<8x32xbf16>
    %368 = vector.extract_strided_slice %362 {offsets = [0, 128], sizes = [8, 32], strides = [1, 1]} : vector<8x256xbf16> to vector<8x32xbf16>
    %369 = vector.extract_strided_slice %362 {offsets = [0, 160], sizes = [8, 32], strides = [1, 1]} : vector<8x256xbf16> to vector<8x32xbf16>
    %370 = vector.extract_strided_slice %362 {offsets = [0, 192], sizes = [8, 32], strides = [1, 1]} : vector<8x256xbf16> to vector<8x32xbf16>
    %371 = vector.extract_strided_slice %362 {offsets = [0, 224], sizes = [8, 32], strides = [1, 1]} : vector<8x256xbf16> to vector<8x32xbf16>
    %372 = tpu.concatenate %364, %365, %366, %367, %368, %369, %370, %371 in 0 : vector<8x32xbf16>, vector<8x32xbf16>, vector<8x32xbf16>, vector<8x32xbf16>, vector<8x32xbf16>, vector<8x32xbf16>, vector<8x32xbf16>, vector<8x32xbf16> -> vector<64x32xbf16>
    %373 = vector.extract_strided_slice %363 {offsets = [0, 0], sizes = [8, 64], strides = [1, 1]} : vector<8x512xbf16> to vector<8x64xbf16>
    %374 = vector.extract_strided_slice %363 {offsets = [0, 64], sizes = [8, 64], strides = [1, 1]} : vector<8x512xbf16> to vector<8x64xbf16>
    %375 = vector.extract_strided_slice %363 {offsets = [0, 128], sizes = [8, 64], strides = [1, 1]} : vector<8x512xbf16> to vector<8x64xbf16>
    %376 = vector.extract_strided_slice %363 {offsets = [0, 192], sizes = [8, 64], strides = [1, 1]} : vector<8x512xbf16> to vector<8x64xbf16>
    %377 = vector.extract_strided_slice %363 {offsets = [0, 256], sizes = [8, 64], strides = [1, 1]} : vector<8x512xbf16> to vector<8x64xbf16>
    %378 = vector.extract_strided_slice %363 {offsets = [0, 320], sizes = [8, 64], strides = [1, 1]} : vector<8x512xbf16> to vector<8x64xbf16>
    %379 = vector.extract_strided_slice %363 {offsets = [0, 384], sizes = [8, 64], strides = [1, 1]} : vector<8x512xbf16> to vector<8x64xbf16>
    %380 = vector.extract_strided_slice %363 {offsets = [0, 448], sizes = [8, 64], strides = [1, 1]} : vector<8x512xbf16> to vector<8x64xbf16>
    %381 = tpu.concatenate %373, %374, %375, %376, %377, %378, %379, %380 in 0 : vector<8x64xbf16>, vector<8x64xbf16>, vector<8x64xbf16>, vector<8x64xbf16>, vector<8x64xbf16>, vector<8x64xbf16>, vector<8x64xbf16>, vector<8x64xbf16> -> vector<64x64xbf16>
    %382 = vector.extract_strided_slice %381 {offsets = [0, 0], sizes = [64, 32], strides = [1, 1]} : vector<64x64xbf16> to vector<64x32xbf16>
    %383 = vector.extract_strided_slice %381 {offsets = [0, 32], sizes = [64, 32], strides = [1, 1]} : vector<64x64xbf16> to vector<64x32xbf16>
    %cst_159 = arith.constant dense<0.000000e+00> : vector<64x64xf32>
    %384 = tpu.matmul %372, %382, %cst_159 {dimension_numbers = #tpu.dot_dimension_numbers<[1], [1], [0], [0], [0, 0, 1, 0], [], []>} : vector<64x32xbf16>, vector<64x32xbf16>, vector<64x64xf32> -> vector<64x64xf32>
    %cst_160 = arith.constant 6.250000e-02 : f32
    %385 = vector.broadcast %cst_160 : f32 to vector<64x64xf32>
    %386 = arith.mulf %384, %385 : vector<64x64xf32>
    %387 = arith.addf %386, %4 : vector<64x64xf32>
    %cst_161 = arith.constant dense<0xFF800000> : vector<64xf32>
    %388 = vector.multi_reduction <maximumf>, %387, %cst_161 [1] : vector<64x64xf32> to vector<64xf32>
    %389 = vector.shape_cast %388 : vector<64xf32> to vector<64x1xf32>
    %390 = vector.broadcast %389 : vector<64x1xf32> to vector<64x64xf32>
    %391 = arith.subf %387, %390 : vector<64x64xf32>
    %392 = math.exp %391 : vector<64x64xf32>
    %cst_162 = arith.constant dense<0.000000e+00> : vector<64xf32>
    %393 = vector.multi_reduction <add>, %392, %cst_162 [1] : vector<64x64xf32> to vector<64xf32>
    %394 = vector.shape_cast %393 : vector<64xf32> to vector<64x1xf32>
    %395 = tpu.reciprocal %394 {approx = true} : vector<64x1xf32> -> vector<64x1xf32>
    %396 = vector.broadcast %395 : vector<64x1xf32> to vector<64x64xf32>
    %397 = arith.mulf %392, %396 : vector<64x64xf32>
    %398 = arith.truncf %397 : vector<64x64xf32> to vector<64x64xbf16>
    %cst_163 = arith.constant dense<0.000000e+00> : vector<64x32xf32>
    %399 = tpu.matmul %398, %383, %cst_163 {dimension_numbers = #tpu.dot_dimension_numbers<[1], [0], [0], [1], [0, 0, 1, 1], [], []>} : vector<64x64xbf16>, vector<64x32xbf16>, vector<64x32xf32> -> vector<64x32xf32>
    %400 = arith.truncf %399 : vector<64x32xf32> to vector<64x32xbf16>
    %401 = vector.extract_strided_slice %400 {offsets = [0, 0], sizes = [8, 32], strides = [1, 1]} : vector<64x32xbf16> to vector<8x32xbf16>
    %cst_164 = arith.constant dense<0.000000e+00> : vector<8x32xf32>
    %402 = tpu.matmul %401, %285, %cst_164 {dimension_numbers = #tpu.dot_dimension_numbers<[1], [0], [0], [1], [0, 0, 1, 1], [], []>} : vector<8x32xbf16>, vector<32x32xbf16>, vector<8x32xf32> -> vector<8x32xf32>
    %403 = vector.extract_strided_slice %400 {offsets = [8, 0], sizes = [8, 32], strides = [1, 1]} : vector<64x32xbf16> to vector<8x32xbf16>
    %cst_165 = arith.constant dense<0.000000e+00> : vector<8x32xf32>
    %404 = tpu.matmul %403, %287, %cst_165 {dimension_numbers = #tpu.dot_dimension_numbers<[1], [0], [0], [1], [0, 0, 1, 1], [], []>} : vector<8x32xbf16>, vector<32x32xbf16>, vector<8x32xf32> -> vector<8x32xf32>
    %405 = arith.addf %402, %404 : vector<8x32xf32>
    %406 = vector.extract_strided_slice %400 {offsets = [16, 0], sizes = [8, 32], strides = [1, 1]} : vector<64x32xbf16> to vector<8x32xbf16>
    %cst_166 = arith.constant dense<0.000000e+00> : vector<8x32xf32>
    %407 = tpu.matmul %406, %289, %cst_166 {dimension_numbers = #tpu.dot_dimension_numbers<[1], [0], [0], [1], [0, 0, 1, 1], [], []>} : vector<8x32xbf16>, vector<32x32xbf16>, vector<8x32xf32> -> vector<8x32xf32>
    %408 = arith.addf %405, %407 : vector<8x32xf32>
    %409 = vector.extract_strided_slice %400 {offsets = [24, 0], sizes = [8, 32], strides = [1, 1]} : vector<64x32xbf16> to vector<8x32xbf16>
    %cst_167 = arith.constant dense<0.000000e+00> : vector<8x32xf32>
    %410 = tpu.matmul %409, %291, %cst_167 {dimension_numbers = #tpu.dot_dimension_numbers<[1], [0], [0], [1], [0, 0, 1, 1], [], []>} : vector<8x32xbf16>, vector<32x32xbf16>, vector<8x32xf32> -> vector<8x32xf32>
    %411 = arith.addf %408, %410 : vector<8x32xf32>
    %412 = vector.extract_strided_slice %400 {offsets = [32, 0], sizes = [8, 32], strides = [1, 1]} : vector<64x32xbf16> to vector<8x32xbf16>
    %cst_168 = arith.constant dense<0.000000e+00> : vector<8x32xf32>
    %413 = tpu.matmul %412, %293, %cst_168 {dimension_numbers = #tpu.dot_dimension_numbers<[1], [0], [0], [1], [0, 0, 1, 1], [], []>} : vector<8x32xbf16>, vector<32x32xbf16>, vector<8x32xf32> -> vector<8x32xf32>
    %414 = arith.addf %411, %413 : vector<8x32xf32>
    %415 = vector.extract_strided_slice %400 {offsets = [40, 0], sizes = [8, 32], strides = [1, 1]} : vector<64x32xbf16> to vector<8x32xbf16>
    %cst_169 = arith.constant dense<0.000000e+00> : vector<8x32xf32>
    %416 = tpu.matmul %415, %295, %cst_169 {dimension_numbers = #tpu.dot_dimension_numbers<[1], [0], [0], [1], [0, 0, 1, 1], [], []>} : vector<8x32xbf16>, vector<32x32xbf16>, vector<8x32xf32> -> vector<8x32xf32>
    %417 = arith.addf %414, %416 : vector<8x32xf32>
    %418 = vector.extract_strided_slice %400 {offsets = [48, 0], sizes = [8, 32], strides = [1, 1]} : vector<64x32xbf16> to vector<8x32xbf16>
    %cst_170 = arith.constant dense<0.000000e+00> : vector<8x32xf32>
    %419 = tpu.matmul %418, %297, %cst_170 {dimension_numbers = #tpu.dot_dimension_numbers<[1], [0], [0], [1], [0, 0, 1, 1], [], []>} : vector<8x32xbf16>, vector<32x32xbf16>, vector<8x32xf32> -> vector<8x32xf32>
    %420 = arith.addf %417, %419 : vector<8x32xf32>
    %421 = vector.extract_strided_slice %400 {offsets = [56, 0], sizes = [8, 32], strides = [1, 1]} : vector<64x32xbf16> to vector<8x32xbf16>
    %cst_171 = arith.constant dense<0.000000e+00> : vector<8x32xf32>
    %422 = tpu.matmul %421, %299, %cst_171 {dimension_numbers = #tpu.dot_dimension_numbers<[1], [0], [0], [1], [0, 0, 1, 1], [], []>} : vector<8x32xbf16>, vector<32x32xbf16>, vector<8x32xf32> -> vector<8x32xf32>
    %423 = arith.addf %420, %422 : vector<8x32xf32>
    %424 = vector.extract_strided_slice %276 {offsets = [16, 0], sizes = [8, 256], strides = [1, 1]} : vector<32x256xbf16> to vector<8x256xbf16>
    %425 = vector.extract_strided_slice %283 {offsets = [16, 0], sizes = [8, 512], strides = [1, 1]} : vector<32x512xbf16> to vector<8x512xbf16>
    %426 = vector.extract_strided_slice %424 {offsets = [0, 0], sizes = [8, 32], strides = [1, 1]} : vector<8x256xbf16> to vector<8x32xbf16>
    %427 = vector.extract_strided_slice %424 {offsets = [0, 32], sizes = [8, 32], strides = [1, 1]} : vector<8x256xbf16> to vector<8x32xbf16>
    %428 = vector.extract_strided_slice %424 {offsets = [0, 64], sizes = [8, 32], strides = [1, 1]} : vector<8x256xbf16> to vector<8x32xbf16>
    %429 = vector.extract_strided_slice %424 {offsets = [0, 96], sizes = [8, 32], strides = [1, 1]} : vector<8x256xbf16> to vector<8x32xbf16>
    %430 = vector.extract_strided_slice %424 {offsets = [0, 128], sizes = [8, 32], strides = [1, 1]} : vector<8x256xbf16> to vector<8x32xbf16>
    %431 = vector.extract_strided_slice %424 {offsets = [0, 160], sizes = [8, 32], strides = [1, 1]} : vector<8x256xbf16> to vector<8x32xbf16>
    %432 = vector.extract_strided_slice %424 {offsets = [0, 192], sizes = [8, 32], strides = [1, 1]} : vector<8x256xbf16> to vector<8x32xbf16>
    %433 = vector.extract_strided_slice %424 {offsets = [0, 224], sizes = [8, 32], strides = [1, 1]} : vector<8x256xbf16> to vector<8x32xbf16>
    %434 = tpu.concatenate %426, %427, %428, %429, %430, %431, %432, %433 in 0 : vector<8x32xbf16>, vector<8x32xbf16>, vector<8x32xbf16>, vector<8x32xbf16>, vector<8x32xbf16>, vector<8x32xbf16>, vector<8x32xbf16>, vector<8x32xbf16> -> vector<64x32xbf16>
    %435 = vector.extract_strided_slice %425 {offsets = [0, 0], sizes = [8, 64], strides = [1, 1]} : vector<8x512xbf16> to vector<8x64xbf16>
    %436 = vector.extract_strided_slice %425 {offsets = [0, 64], sizes = [8, 64], strides = [1, 1]} : vector<8x512xbf16> to vector<8x64xbf16>
    %437 = vector.extract_strided_slice %425 {offsets = [0, 128], sizes = [8, 64], strides = [1, 1]} : vector<8x512xbf16> to vector<8x64xbf16>
    %438 = vector.extract_strided_slice %425 {offsets = [0, 192], sizes = [8, 64], strides = [1, 1]} : vector<8x512xbf16> to vector<8x64xbf16>
    %439 = vector.extract_strided_slice %425 {offsets = [0, 256], sizes = [8, 64], strides = [1, 1]} : vector<8x512xbf16> to vector<8x64xbf16>
    %440 = vector.extract_strided_slice %425 {offsets = [0, 320], sizes = [8, 64], strides = [1, 1]} : vector<8x512xbf16> to vector<8x64xbf16>
    %441 = vector.extract_strided_slice %425 {offsets = [0, 384], sizes = [8, 64], strides = [1, 1]} : vector<8x512xbf16> to vector<8x64xbf16>
    %442 = vector.extract_strided_slice %425 {offsets = [0, 448], sizes = [8, 64], strides = [1, 1]} : vector<8x512xbf16> to vector<8x64xbf16>
    %443 = tpu.concatenate %435, %436, %437, %438, %439, %440, %441, %442 in 0 : vector<8x64xbf16>, vector<8x64xbf16>, vector<8x64xbf16>, vector<8x64xbf16>, vector<8x64xbf16>, vector<8x64xbf16>, vector<8x64xbf16>, vector<8x64xbf16> -> vector<64x64xbf16>
    %444 = vector.extract_strided_slice %443 {offsets = [0, 0], sizes = [64, 32], strides = [1, 1]} : vector<64x64xbf16> to vector<64x32xbf16>
    %445 = vector.extract_strided_slice %443 {offsets = [0, 32], sizes = [64, 32], strides = [1, 1]} : vector<64x64xbf16> to vector<64x32xbf16>
    %cst_172 = arith.constant dense<0.000000e+00> : vector<64x64xf32>
    %446 = tpu.matmul %434, %444, %cst_172 {dimension_numbers = #tpu.dot_dimension_numbers<[1], [1], [0], [0], [0, 0, 1, 0], [], []>} : vector<64x32xbf16>, vector<64x32xbf16>, vector<64x64xf32> -> vector<64x64xf32>
    %cst_173 = arith.constant 6.250000e-02 : f32
    %447 = vector.broadcast %cst_173 : f32 to vector<64x64xf32>
    %448 = arith.mulf %446, %447 : vector<64x64xf32>
    %449 = arith.addf %448, %4 : vector<64x64xf32>
    %cst_174 = arith.constant dense<0xFF800000> : vector<64xf32>
    %450 = vector.multi_reduction <maximumf>, %449, %cst_174 [1] : vector<64x64xf32> to vector<64xf32>
    %451 = vector.shape_cast %450 : vector<64xf32> to vector<64x1xf32>
    %452 = vector.broadcast %451 : vector<64x1xf32> to vector<64x64xf32>
    %453 = arith.subf %449, %452 : vector<64x64xf32>
    %454 = math.exp %453 : vector<64x64xf32>
    %cst_175 = arith.constant dense<0.000000e+00> : vector<64xf32>
    %455 = vector.multi_reduction <add>, %454, %cst_175 [1] : vector<64x64xf32> to vector<64xf32>
    %456 = vector.shape_cast %455 : vector<64xf32> to vector<64x1xf32>
    %457 = tpu.reciprocal %456 {approx = true} : vector<64x1xf32> -> vector<64x1xf32>
    %458 = vector.broadcast %457 : vector<64x1xf32> to vector<64x64xf32>
    %459 = arith.mulf %454, %458 : vector<64x64xf32>
    %460 = arith.truncf %459 : vector<64x64xf32> to vector<64x64xbf16>
    %cst_176 = arith.constant dense<0.000000e+00> : vector<64x32xf32>
    %461 = tpu.matmul %460, %445, %cst_176 {dimension_numbers = #tpu.dot_dimension_numbers<[1], [0], [0], [1], [0, 0, 1, 1], [], []>} : vector<64x64xbf16>, vector<64x32xbf16>, vector<64x32xf32> -> vector<64x32xf32>
    %462 = arith.truncf %461 : vector<64x32xf32> to vector<64x32xbf16>
    %463 = vector.extract_strided_slice %462 {offsets = [0, 0], sizes = [8, 32], strides = [1, 1]} : vector<64x32xbf16> to vector<8x32xbf16>
    %cst_177 = arith.constant dense<0.000000e+00> : vector<8x32xf32>
    %464 = tpu.matmul %463, %285, %cst_177 {dimension_numbers = #tpu.dot_dimension_numbers<[1], [0], [0], [1], [0, 0, 1, 1], [], []>} : vector<8x32xbf16>, vector<32x32xbf16>, vector<8x32xf32> -> vector<8x32xf32>
    %465 = vector.extract_strided_slice %462 {offsets = [8, 0], sizes = [8, 32], strides = [1, 1]} : vector<64x32xbf16> to vector<8x32xbf16>
    %cst_178 = arith.constant dense<0.000000e+00> : vector<8x32xf32>
    %466 = tpu.matmul %465, %287, %cst_178 {dimension_numbers = #tpu.dot_dimension_numbers<[1], [0], [0], [1], [0, 0, 1, 1], [], []>} : vector<8x32xbf16>, vector<32x32xbf16>, vector<8x32xf32> -> vector<8x32xf32>
    %467 = arith.addf %464, %466 : vector<8x32xf32>
    %468 = vector.extract_strided_slice %462 {offsets = [16, 0], sizes = [8, 32], strides = [1, 1]} : vector<64x32xbf16> to vector<8x32xbf16>
    %cst_179 = arith.constant dense<0.000000e+00> : vector<8x32xf32>
    %469 = tpu.matmul %468, %289, %cst_179 {dimension_numbers = #tpu.dot_dimension_numbers<[1], [0], [0], [1], [0, 0, 1, 1], [], []>} : vector<8x32xbf16>, vector<32x32xbf16>, vector<8x32xf32> -> vector<8x32xf32>
    %470 = arith.addf %467, %469 : vector<8x32xf32>
    %471 = vector.extract_strided_slice %462 {offsets = [24, 0], sizes = [8, 32], strides = [1, 1]} : vector<64x32xbf16> to vector<8x32xbf16>
    %cst_180 = arith.constant dense<0.000000e+00> : vector<8x32xf32>
    %472 = tpu.matmul %471, %291, %cst_180 {dimension_numbers = #tpu.dot_dimension_numbers<[1], [0], [0], [1], [0, 0, 1, 1], [], []>} : vector<8x32xbf16>, vector<32x32xbf16>, vector<8x32xf32> -> vector<8x32xf32>
    %473 = arith.addf %470, %472 : vector<8x32xf32>
    %474 = vector.extract_strided_slice %462 {offsets = [32, 0], sizes = [8, 32], strides = [1, 1]} : vector<64x32xbf16> to vector<8x32xbf16>
    %cst_181 = arith.constant dense<0.000000e+00> : vector<8x32xf32>
    %475 = tpu.matmul %474, %293, %cst_181 {dimension_numbers = #tpu.dot_dimension_numbers<[1], [0], [0], [1], [0, 0, 1, 1], [], []>} : vector<8x32xbf16>, vector<32x32xbf16>, vector<8x32xf32> -> vector<8x32xf32>
    %476 = arith.addf %473, %475 : vector<8x32xf32>
    %477 = vector.extract_strided_slice %462 {offsets = [40, 0], sizes = [8, 32], strides = [1, 1]} : vector<64x32xbf16> to vector<8x32xbf16>
    %cst_182 = arith.constant dense<0.000000e+00> : vector<8x32xf32>
    %478 = tpu.matmul %477, %295, %cst_182 {dimension_numbers = #tpu.dot_dimension_numbers<[1], [0], [0], [1], [0, 0, 1, 1], [], []>} : vector<8x32xbf16>, vector<32x32xbf16>, vector<8x32xf32> -> vector<8x32xf32>
    %479 = arith.addf %476, %478 : vector<8x32xf32>
    %480 = vector.extract_strided_slice %462 {offsets = [48, 0], sizes = [8, 32], strides = [1, 1]} : vector<64x32xbf16> to vector<8x32xbf16>
    %cst_183 = arith.constant dense<0.000000e+00> : vector<8x32xf32>
    %481 = tpu.matmul %480, %297, %cst_183 {dimension_numbers = #tpu.dot_dimension_numbers<[1], [0], [0], [1], [0, 0, 1, 1], [], []>} : vector<8x32xbf16>, vector<32x32xbf16>, vector<8x32xf32> -> vector<8x32xf32>
    %482 = arith.addf %479, %481 : vector<8x32xf32>
    %483 = vector.extract_strided_slice %462 {offsets = [56, 0], sizes = [8, 32], strides = [1, 1]} : vector<64x32xbf16> to vector<8x32xbf16>
    %cst_184 = arith.constant dense<0.000000e+00> : vector<8x32xf32>
    %484 = tpu.matmul %483, %299, %cst_184 {dimension_numbers = #tpu.dot_dimension_numbers<[1], [0], [0], [1], [0, 0, 1, 1], [], []>} : vector<8x32xbf16>, vector<32x32xbf16>, vector<8x32xf32> -> vector<8x32xf32>
    %485 = arith.addf %482, %484 : vector<8x32xf32>
    %486 = vector.extract_strided_slice %276 {offsets = [24, 0], sizes = [8, 256], strides = [1, 1]} : vector<32x256xbf16> to vector<8x256xbf16>
    %487 = vector.extract_strided_slice %283 {offsets = [24, 0], sizes = [8, 512], strides = [1, 1]} : vector<32x512xbf16> to vector<8x512xbf16>
    %488 = vector.extract_strided_slice %486 {offsets = [0, 0], sizes = [8, 32], strides = [1, 1]} : vector<8x256xbf16> to vector<8x32xbf16>
    %489 = vector.extract_strided_slice %486 {offsets = [0, 32], sizes = [8, 32], strides = [1, 1]} : vector<8x256xbf16> to vector<8x32xbf16>
    %490 = vector.extract_strided_slice %486 {offsets = [0, 64], sizes = [8, 32], strides = [1, 1]} : vector<8x256xbf16> to vector<8x32xbf16>
    %491 = vector.extract_strided_slice %486 {offsets = [0, 96], sizes = [8, 32], strides = [1, 1]} : vector<8x256xbf16> to vector<8x32xbf16>
    %492 = vector.extract_strided_slice %486 {offsets = [0, 128], sizes = [8, 32], strides = [1, 1]} : vector<8x256xbf16> to vector<8x32xbf16>
    %493 = vector.extract_strided_slice %486 {offsets = [0, 160], sizes = [8, 32], strides = [1, 1]} : vector<8x256xbf16> to vector<8x32xbf16>
    %494 = vector.extract_strided_slice %486 {offsets = [0, 192], sizes = [8, 32], strides = [1, 1]} : vector<8x256xbf16> to vector<8x32xbf16>
    %495 = vector.extract_strided_slice %486 {offsets = [0, 224], sizes = [8, 32], strides = [1, 1]} : vector<8x256xbf16> to vector<8x32xbf16>
    %496 = tpu.concatenate %488, %489, %490, %491, %492, %493, %494, %495 in 0 : vector<8x32xbf16>, vector<8x32xbf16>, vector<8x32xbf16>, vector<8x32xbf16>, vector<8x32xbf16>, vector<8x32xbf16>, vector<8x32xbf16>, vector<8x32xbf16> -> vector<64x32xbf16>
    %497 = vector.extract_strided_slice %487 {offsets = [0, 0], sizes = [8, 64], strides = [1, 1]} : vector<8x512xbf16> to vector<8x64xbf16>
    %498 = vector.extract_strided_slice %487 {offsets = [0, 64], sizes = [8, 64], strides = [1, 1]} : vector<8x512xbf16> to vector<8x64xbf16>
    %499 = vector.extract_strided_slice %487 {offsets = [0, 128], sizes = [8, 64], strides = [1, 1]} : vector<8x512xbf16> to vector<8x64xbf16>
    %500 = vector.extract_strided_slice %487 {offsets = [0, 192], sizes = [8, 64], strides = [1, 1]} : vector<8x512xbf16> to vector<8x64xbf16>
    %501 = vector.extract_strided_slice %487 {offsets = [0, 256], sizes = [8, 64], strides = [1, 1]} : vector<8x512xbf16> to vector<8x64xbf16>
    %502 = vector.extract_strided_slice %487 {offsets = [0, 320], sizes = [8, 64], strides = [1, 1]} : vector<8x512xbf16> to vector<8x64xbf16>
    %503 = vector.extract_strided_slice %487 {offsets = [0, 384], sizes = [8, 64], strides = [1, 1]} : vector<8x512xbf16> to vector<8x64xbf16>
    %504 = vector.extract_strided_slice %487 {offsets = [0, 448], sizes = [8, 64], strides = [1, 1]} : vector<8x512xbf16> to vector<8x64xbf16>
    %505 = tpu.concatenate %497, %498, %499, %500, %501, %502, %503, %504 in 0 : vector<8x64xbf16>, vector<8x64xbf16>, vector<8x64xbf16>, vector<8x64xbf16>, vector<8x64xbf16>, vector<8x64xbf16>, vector<8x64xbf16>, vector<8x64xbf16> -> vector<64x64xbf16>
    %506 = vector.extract_strided_slice %505 {offsets = [0, 0], sizes = [64, 32], strides = [1, 1]} : vector<64x64xbf16> to vector<64x32xbf16>
    %507 = vector.extract_strided_slice %505 {offsets = [0, 32], sizes = [64, 32], strides = [1, 1]} : vector<64x64xbf16> to vector<64x32xbf16>
    %cst_185 = arith.constant dense<0.000000e+00> : vector<64x64xf32>
    %508 = tpu.matmul %496, %506, %cst_185 {dimension_numbers = #tpu.dot_dimension_numbers<[1], [1], [0], [0], [0, 0, 1, 0], [], []>} : vector<64x32xbf16>, vector<64x32xbf16>, vector<64x64xf32> -> vector<64x64xf32>
    %cst_186 = arith.constant 6.250000e-02 : f32
    %509 = vector.broadcast %cst_186 : f32 to vector<64x64xf32>
    %510 = arith.mulf %508, %509 : vector<64x64xf32>
    %511 = arith.addf %510, %4 : vector<64x64xf32>
    %cst_187 = arith.constant dense<0xFF800000> : vector<64xf32>
    %512 = vector.multi_reduction <maximumf>, %511, %cst_187 [1] : vector<64x64xf32> to vector<64xf32>
    %513 = vector.shape_cast %512 : vector<64xf32> to vector<64x1xf32>
    %514 = vector.broadcast %513 : vector<64x1xf32> to vector<64x64xf32>
    %515 = arith.subf %511, %514 : vector<64x64xf32>
    %516 = math.exp %515 : vector<64x64xf32>
    %cst_188 = arith.constant dense<0.000000e+00> : vector<64xf32>
    %517 = vector.multi_reduction <add>, %516, %cst_188 [1] : vector<64x64xf32> to vector<64xf32>
    %518 = vector.shape_cast %517 : vector<64xf32> to vector<64x1xf32>
    %519 = tpu.reciprocal %518 {approx = true} : vector<64x1xf32> -> vector<64x1xf32>
    %520 = vector.broadcast %519 : vector<64x1xf32> to vector<64x64xf32>
    %521 = arith.mulf %516, %520 : vector<64x64xf32>
    %522 = arith.truncf %521 : vector<64x64xf32> to vector<64x64xbf16>
    %cst_189 = arith.constant dense<0.000000e+00> : vector<64x32xf32>
    %523 = tpu.matmul %522, %507, %cst_189 {dimension_numbers = #tpu.dot_dimension_numbers<[1], [0], [0], [1], [0, 0, 1, 1], [], []>} : vector<64x64xbf16>, vector<64x32xbf16>, vector<64x32xf32> -> vector<64x32xf32>
    %524 = arith.truncf %523 : vector<64x32xf32> to vector<64x32xbf16>
    %525 = vector.extract_strided_slice %524 {offsets = [0, 0], sizes = [8, 32], strides = [1, 1]} : vector<64x32xbf16> to vector<8x32xbf16>
    %cst_190 = arith.constant dense<0.000000e+00> : vector<8x32xf32>
    %526 = tpu.matmul %525, %285, %cst_190 {dimension_numbers = #tpu.dot_dimension_numbers<[1], [0], [0], [1], [0, 0, 1, 1], [], []>} : vector<8x32xbf16>, vector<32x32xbf16>, vector<8x32xf32> -> vector<8x32xf32>
    %527 = vector.extract_strided_slice %524 {offsets = [8, 0], sizes = [8, 32], strides = [1, 1]} : vector<64x32xbf16> to vector<8x32xbf16>
    %cst_191 = arith.constant dense<0.000000e+00> : vector<8x32xf32>
    %528 = tpu.matmul %527, %287, %cst_191 {dimension_numbers = #tpu.dot_dimension_numbers<[1], [0], [0], [1], [0, 0, 1, 1], [], []>} : vector<8x32xbf16>, vector<32x32xbf16>, vector<8x32xf32> -> vector<8x32xf32>
    %529 = arith.addf %526, %528 : vector<8x32xf32>
    %530 = vector.extract_strided_slice %524 {offsets = [16, 0], sizes = [8, 32], strides = [1, 1]} : vector<64x32xbf16> to vector<8x32xbf16>
    %cst_192 = arith.constant dense<0.000000e+00> : vector<8x32xf32>
    %531 = tpu.matmul %530, %289, %cst_192 {dimension_numbers = #tpu.dot_dimension_numbers<[1], [0], [0], [1], [0, 0, 1, 1], [], []>} : vector<8x32xbf16>, vector<32x32xbf16>, vector<8x32xf32> -> vector<8x32xf32>
    %532 = arith.addf %529, %531 : vector<8x32xf32>
    %533 = vector.extract_strided_slice %524 {offsets = [24, 0], sizes = [8, 32], strides = [1, 1]} : vector<64x32xbf16> to vector<8x32xbf16>
    %cst_193 = arith.constant dense<0.000000e+00> : vector<8x32xf32>
    %534 = tpu.matmul %533, %291, %cst_193 {dimension_numbers = #tpu.dot_dimension_numbers<[1], [0], [0], [1], [0, 0, 1, 1], [], []>} : vector<8x32xbf16>, vector<32x32xbf16>, vector<8x32xf32> -> vector<8x32xf32>
    %535 = arith.addf %532, %534 : vector<8x32xf32>
    %536 = vector.extract_strided_slice %524 {offsets = [32, 0], sizes = [8, 32], strides = [1, 1]} : vector<64x32xbf16> to vector<8x32xbf16>
    %cst_194 = arith.constant dense<0.000000e+00> : vector<8x32xf32>
    %537 = tpu.matmul %536, %293, %cst_194 {dimension_numbers = #tpu.dot_dimension_numbers<[1], [0], [0], [1], [0, 0, 1, 1], [], []>} : vector<8x32xbf16>, vector<32x32xbf16>, vector<8x32xf32> -> vector<8x32xf32>
    %538 = arith.addf %535, %537 : vector<8x32xf32>
    %539 = vector.extract_strided_slice %524 {offsets = [40, 0], sizes = [8, 32], strides = [1, 1]} : vector<64x32xbf16> to vector<8x32xbf16>
    %cst_195 = arith.constant dense<0.000000e+00> : vector<8x32xf32>
    %540 = tpu.matmul %539, %295, %cst_195 {dimension_numbers = #tpu.dot_dimension_numbers<[1], [0], [0], [1], [0, 0, 1, 1], [], []>} : vector<8x32xbf16>, vector<32x32xbf16>, vector<8x32xf32> -> vector<8x32xf32>
    %541 = arith.addf %538, %540 : vector<8x32xf32>
    %542 = vector.extract_strided_slice %524 {offsets = [48, 0], sizes = [8, 32], strides = [1, 1]} : vector<64x32xbf16> to vector<8x32xbf16>
    %cst_196 = arith.constant dense<0.000000e+00> : vector<8x32xf32>
    %543 = tpu.matmul %542, %297, %cst_196 {dimension_numbers = #tpu.dot_dimension_numbers<[1], [0], [0], [1], [0, 0, 1, 1], [], []>} : vector<8x32xbf16>, vector<32x32xbf16>, vector<8x32xf32> -> vector<8x32xf32>
    %544 = arith.addf %541, %543 : vector<8x32xf32>
    %545 = vector.extract_strided_slice %524 {offsets = [56, 0], sizes = [8, 32], strides = [1, 1]} : vector<64x32xbf16> to vector<8x32xbf16>
    %cst_197 = arith.constant dense<0.000000e+00> : vector<8x32xf32>
    %546 = tpu.matmul %545, %299, %cst_197 {dimension_numbers = #tpu.dot_dimension_numbers<[1], [0], [0], [1], [0, 0, 1, 1], [], []>} : vector<8x32xbf16>, vector<32x32xbf16>, vector<8x32xf32> -> vector<8x32xf32>
    %547 = arith.addf %544, %546 : vector<8x32xf32>
    %548 = tpu.concatenate %361, %423, %485, %547 in 0 : vector<8x32xf32>, vector<8x32xf32>, vector<8x32xf32>, vector<8x32xf32> -> vector<32x32xf32>
    %c1_198 = arith.constant 1 : index
    %c0_199 = arith.constant 0 : index
    %c0_200 = arith.constant 0 : index
    %549 = vector.load %arg11[%c1_198, %c0_199, %c0_200] : memref<2x1x32xf32, #tpu.memory_space<vmem>>, vector<1x1x32xf32>
    %550 = vector.shape_cast %549 : vector<1x1x32xf32> to vector<1x32xf32>
    %551 = vector.broadcast %550 : vector<1x32xf32> to vector<32x32xf32>
    %552 = arith.addf %548, %551 : vector<32x32xf32>
    %553 = arith.addf %269, %552 : vector<32x32xf32>
    %cst_201 = arith.constant dense<0.000000e+00> : vector<32xf32>
    %554 = vector.multi_reduction <add>, %553, %cst_201 [1] : vector<32x32xf32> to vector<32xf32>
    %555 = vector.shape_cast %554 : vector<32xf32> to vector<32x1xf32>
    %cst_202 = arith.constant 3.200000e+01 : f32
    %556 = vector.broadcast %cst_202 : f32 to vector<32x1xf32>
    %557 = arith.divf %555, %556 : vector<32x1xf32>
    %558 = vector.broadcast %557 : vector<32x1xf32> to vector<32x32xf32>
    %559 = arith.subf %553, %558 : vector<32x32xf32>
    %560 = arith.mulf %559, %559 : vector<32x32xf32>
    %cst_203 = arith.constant dense<0.000000e+00> : vector<32xf32>
    %561 = vector.multi_reduction <add>, %560, %cst_203 [1] : vector<32x32xf32> to vector<32xf32>
    %562 = vector.shape_cast %561 : vector<32xf32> to vector<32x1xf32>
    %cst_204 = arith.constant 0.0322580636 : f32
    %563 = vector.broadcast %cst_204 : f32 to vector<32x1xf32>
    %564 = arith.mulf %562, %563 : vector<32x1xf32>
    %565 = vector.broadcast %5 : vector<1x32xf32> to vector<32x32xf32>
    %566 = arith.mulf %565, %559 : vector<32x32xf32>
    %567 = math.sqrt %564 : vector<32x1xf32>
    %cst_205 = arith.constant 9.99999974E-6 : f32
    %568 = vector.broadcast %cst_205 : f32 to vector<32x1xf32>
    %569 = arith.addf %567, %568 : vector<32x1xf32>
    %570 = vector.broadcast %569 : vector<32x1xf32> to vector<32x32xf32>
    %571 = arith.divf %566, %570 : vector<32x32xf32>
    %572 = vector.broadcast %6 : vector<1x32xf32> to vector<32x32xf32>
    %573 = arith.addf %571, %572 : vector<32x32xf32>
    %574 = arith.truncf %573 : vector<32x32xf32> to vector<32x32xbf16>
    %c0_206 = arith.constant 0 : index
    %c0_207 = arith.constant 0 : index
    %575 = vector.load %arg12[%c0_206, %c0_207] : memref<32x64xbf16, #tpu.memory_space<vmem>>, vector<32x64xbf16>
    %cst_208 = arith.constant dense<0.000000e+00> : vector<32x64xf32>
    %576 = tpu.matmul %574, %575, %cst_208 {dimension_numbers = #tpu.dot_dimension_numbers<[1], [0], [0], [1], [0, 0, 1, 1], [], []>} : vector<32x32xbf16>, vector<32x64xbf16>, vector<32x64xf32> -> vector<32x64xf32>
    %c0_209 = arith.constant 0 : index
    %c0_210 = arith.constant 0 : index
    %577 = vector.load %arg13[%c0_209, %c0_210] : memref<1x64xf32, #tpu.memory_space<vmem>>, vector<1x64xf32>
    %578 = vector.broadcast %577 : vector<1x64xf32> to vector<32x64xf32>
    %579 = arith.addf %576, %578 : vector<32x64xf32>
    %cst_211 = arith.constant 0.000000e+00 : f32
    %580 = vector.broadcast %cst_211 : f32 to vector<32x64xf32>
    %581 = arith.maximumf %579, %580 : vector<32x64xf32>
    %582 = arith.truncf %581 : vector<32x64xf32> to vector<32x64xbf16>
    %c0_212 = arith.constant 0 : index
    %c0_213 = arith.constant 0 : index
    %583 = vector.load %arg14[%c0_212, %c0_213] : memref<64x32xbf16, #tpu.memory_space<vmem>>, vector<64x32xbf16>
    %cst_214 = arith.constant dense<0.000000e+00> : vector<32x32xf32>
    %584 = tpu.matmul %582, %583, %cst_214 {dimension_numbers = #tpu.dot_dimension_numbers<[1], [0], [0], [1], [0, 0, 1, 1], [], []>} : vector<32x64xbf16>, vector<64x32xbf16>, vector<32x32xf32> -> vector<32x32xf32>
    %c0_215 = arith.constant 0 : index
    %c0_216 = arith.constant 0 : index
    %585 = vector.load %arg15[%c0_215, %c0_216] : memref<1x32xf32, #tpu.memory_space<vmem>>, vector<1x32xf32>
    %586 = vector.broadcast %585 : vector<1x32xf32> to vector<32x32xf32>
    %587 = arith.addf %584, %586 : vector<32x32xf32>
    %588 = arith.addf %573, %587 : vector<32x32xf32>
    %cst_217 = arith.constant dense<0.000000e+00> : vector<32xf32>
    %589 = vector.multi_reduction <add>, %588, %cst_217 [1] : vector<32x32xf32> to vector<32xf32>
    %590 = vector.shape_cast %589 : vector<32xf32> to vector<32x1xf32>
    %cst_218 = arith.constant 3.200000e+01 : f32
    %591 = vector.broadcast %cst_218 : f32 to vector<32x1xf32>
    %592 = arith.divf %590, %591 : vector<32x1xf32>
    %593 = vector.broadcast %592 : vector<32x1xf32> to vector<32x32xf32>
    %594 = arith.subf %588, %593 : vector<32x32xf32>
    %595 = arith.mulf %594, %594 : vector<32x32xf32>
    %cst_219 = arith.constant dense<0.000000e+00> : vector<32xf32>
    %596 = vector.multi_reduction <add>, %595, %cst_219 [1] : vector<32x32xf32> to vector<32xf32>
    %597 = vector.shape_cast %596 : vector<32xf32> to vector<32x1xf32>
    %cst_220 = arith.constant 0.0322580636 : f32
    %598 = vector.broadcast %cst_220 : f32 to vector<32x1xf32>
    %599 = arith.mulf %597, %598 : vector<32x1xf32>
    %600 = vector.broadcast %7 : vector<1x32xf32> to vector<32x32xf32>
    %601 = arith.mulf %600, %594 : vector<32x32xf32>
    %602 = math.sqrt %599 : vector<32x1xf32>
    %cst_221 = arith.constant 9.99999974E-6 : f32
    %603 = vector.broadcast %cst_221 : f32 to vector<32x1xf32>
    %604 = arith.addf %602, %603 : vector<32x1xf32>
    %605 = vector.broadcast %604 : vector<32x1xf32> to vector<32x32xf32>
    %606 = arith.divf %601, %605 : vector<32x32xf32>
    %607 = vector.broadcast %8 : vector<1x32xf32> to vector<32x32xf32>
    %608 = arith.addf %606, %607 : vector<32x32xf32>
    %609 = vector.shape_cast %608 : vector<32x32xf32> to vector<4x8x32xf32>
    %c0_222 = arith.constant 0 : index
    %c0_223 = arith.constant 0 : index
    %c0_224 = arith.constant 0 : index
    %610 = vector.load %arg17[%c0_222, %c0_223, %c0_224] : memref<4x8x32xf32, #tpu.memory_space<vmem>>, vector<4x8x32xf32>
    tpu.vector_store %arg17[%c0_222, %c0_223, %c0_224], %609 {strides = array<i32>} : memref<4x8x32xf32, #tpu.memory_space<vmem>>, vector<4x8x32xf32>,
    return
  }
  func.func @transform_0(%arg0: i32) -> (i32, i32, i32) {
    %c0_i32 = arith.constant 0 : i32
    %c0_i32_0 = arith.constant 0 : i32
    %c0_i32_1 = arith.constant 0 : i32
    return %arg0, %c0_i32, %c0_i32_0 : i32, i32, i32
  }
  func.func @transform_1(%arg0: i32) -> (i32, i32, i32) {
    %c0_i32 = arith.constant 0 : i32
    %c0_i32_0 = arith.constant 0 : i32
    %c0_i32_1 = arith.constant 0 : i32
    return %arg0, %c0_i32, %c0_i32_0 : i32, i32, i32
  }
  func.func @transform_2(%arg0: i32) -> (i32, i32) {
    %c0_i32 = arith.constant 0 : i32
    %c0_i32_0 = arith.constant 0 : i32
    %c0_i32_1 = arith.constant 0 : i32
    return %c0_i32, %c0_i32_0 : i32, i32
  }
  func.func @transform_3(%arg0: i32) -> (i32, i32) {
    %c0_i32 = arith.constant 0 : i32
    %c0_i32_0 = arith.constant 0 : i32
    %c0_i32_1 = arith.constant 0 : i32
    return %c0_i32, %c0_i32_0 : i32, i32
  }
  func.func @transform_4(%arg0: i32) -> (i32, i32) {
    %c0_i32 = arith.constant 0 : i32
    %c0_i32_0 = arith.constant 0 : i32
    %c0_i32_1 = arith.constant 0 : i32
    return %c0_i32, %c0_i32_0 : i32, i32
  }
  func.func @transform_5(%arg0: i32) -> (i32, i32) {
    %c0_i32 = arith.constant 0 : i32
    %c0_i32_0 = arith.constant 0 : i32
    %c0_i32_1 = arith.constant 0 : i32
    return %c0_i32, %c0_i32_0 : i32, i32
  }
  func.func @transform_6(%arg0: i32) -> (i32, i32) {
    %c0_i32 = arith.constant 0 : i32
    %c0_i32_0 = arith.constant 0 : i32
    %c0_i32_1 = arith.constant 0 : i32
    return %c0_i32, %c0_i32_0 : i32, i32
  }
  func.func @transform_7(%arg0: i32) -> (i32, i32) {
    %c0_i32 = arith.constant 0 : i32
    %c0_i32_0 = arith.constant 0 : i32
    %c0_i32_1 = arith.constant 0 : i32
    return %c0_i32, %c0_i32_0 : i32, i32
  }
  func.func @transform_8(%arg0: i32) -> (i32, i32) {
    %c0_i32 = arith.constant 0 : i32
    %c0_i32_0 = arith.constant 0 : i32
    %c0_i32_1 = arith.constant 0 : i32
    return %c0_i32, %c0_i32_0 : i32, i32
  }
  func.func @transform_9(%arg0: i32) -> (i32, i32, i32, i32) {
    %c0_i32 = arith.constant 0 : i32
    %c0_i32_0 = arith.constant 0 : i32
    %c0_i32_1 = arith.constant 0 : i32
    %c0_i32_2 = arith.constant 0 : i32
    %c0_i32_3 = arith.constant 0 : i32
    return %c0_i32, %c0_i32_0, %c0_i32_1, %c0_i32_2 : i32, i32, i32, i32
  }
  func.func @transform_10(%arg0: i32) -> (i32, i32, i32) {
    %c0_i32 = arith.constant 0 : i32
    %c0_i32_0 = arith.constant 0 : i32
    %c0_i32_1 = arith.constant 0 : i32
    %c0_i32_2 = arith.constant 0 : i32
    return %c0_i32, %c0_i32_0, %c0_i32_1 : i32, i32, i32
  }
  func.func @transform_11(%arg0: i32) -> (i32, i32) {
    %c0_i32 = arith.constant 0 : i32
    %c0_i32_0 = arith.constant 0 : i32
    %c0_i32_1 = arith.constant 0 : i32
    return %c0_i32, %c0_i32_0 : i32, i32
  }
  func.func @transform_12(%arg0: i32) -> (i32, i32) {
    %c0_i32 = arith.constant 0 : i32
    %c0_i32_0 = arith.constant 0 : i32
    %c0_i32_1 = arith.constant 0 : i32
    return %c0_i32, %c0_i32_0 : i32, i32
  }
  func.func @transform_13(%arg0: i32) -> (i32, i32) {
    %c0_i32 = arith.constant 0 : i32
    %c0_i32_0 = arith.constant 0 : i32
    %c0_i32_1 = arith.constant 0 : i32
    return %c0_i32, %c0_i32_0 : i32, i32
  }
  func.func @transform_14(%arg0: i32) -> (i32, i32) {
    %c0_i32 = arith.constant 0 : i32
    %c0_i32_0 = arith.constant 0 : i32
    %c0_i32_1 = arith.constant 0 : i32
    return %c0_i32, %c0_i32_0 : i32, i32
  }
  func.func @transform_15(%arg0: i32) -> (i32, i32) {
    %c0_i32 = arith.constant 0 : i32
    %c0_i32_0 = arith.constant 0 : i32
    %c0_i32_1 = arith.constant 0 : i32
    return %c0_i32, %c0_i32_0 : i32, i32
  }
  func.func @transform_16(%arg0: i32) -> (i32, i32, i32) {
    %c0_i32 = arith.constant 0 : i32
    %c0_i32_0 = arith.constant 0 : i32
    %c0_i32_1 = arith.constant 0 : i32
    return %arg0, %c0_i32, %c0_i32_0 : i32, i32, i32
  }
}

</mosaic_0001>

<bundles_post_ra>
// kernel: tpu_custom_call.1
= control target key start
LH: loop header
LB: loop body
LE: loop exit
PB: predicated region body
PF: predicated region fallthrough
CT: control target
= control target key end

     0   :  { %s12881_s0 = inlined_call_operand.hbm [shape: f32[8,8,32], index: 0, kind: input, shape index: {}]   ;;  %s12882_s1 = inlined_call_operand.hbm [shape: f32[8,8,32], index: 1, kind: input, shape index: {}]   ;;  %s12883_s2 = inlined_call_operand.hbm [shape: f32[64,64], index: 2, kind: input, shape index: {}]   ;;  %s12884_s3 = inlined_call_operand.hbm [shape: bf16[32,768], index: 3, kind: input, shape index: {}]   ;;  %s12885_s4 = inlined_call_operand.hbm [shape: f32[1,768], index: 4, kind: input, shape index: {}]   ;;  %s12886_s5 = inlined_call_operand.hbm [shape: bf16[32,256], index: 5, kind: input, shape index: {}]   ;;  %s12887_s6 = inlined_call_operand.hbm [shape: f32[1,256], index: 6, kind: input, shape index: {}]   ;;  %s12888_s7 = inlined_call_operand.vmem [shape: bf16[32,512], index: 7, kind: input, shape index: {}]   ;;  %s12889_s8 = inlined_call_operand.hbm [shape: f32[1,512], index: 8, kind: input, shape index: {}]   ;;  %s12890_s9 = inlined_call_operand.hbm [shape: bf16[2,8,32,32], index: 9, kind: input, shape index: {}]   ;;  %s12891_s10 = inlined_call_operand.hbm [shape: f32[2,1,32], index: 10, kind: input, shape index: {}]   ;;  %s12892_s11 = inlined_call_operand.hbm [shape: bf16[32,64], index: 11, kind: input, shape index: {}]   ;;  %s12893_s12 = inlined_call_operand.vmem [shape: f32[1,64], index: 12, kind: input, shape index: {}]   ;;  %s12894_s13 = inlined_call_operand.vmem [shape: bf16[64,32], index: 13, kind: input, shape index: {}]   ;;  %s12895_s14 = inlined_call_operand.vmem [shape: f32[1,32], index: 14, kind: input, shape index: {}]   ;;  %s12896_s15 = inlined_call_operand.vmem [shape: f32[4,32], index: 15, kind: input, shape index: {}]   ;;  %s12897_s16 = inlined_call_operand.hbm [shape: f32[8,8,32], index: 16, kind: output, shape index: {}]  }
   0x1   :  { %12912 = sst [smem:[#allocation30_spill]] %s12881_s0 }
   0x2   :  { %12913 = sst [smem:[#allocation31_spill]] %s12883_s2 }
   0x3   :  { %12914 = sst [smem:[#allocation32_spill]] %s12884_s3 }
   0x4   :  { %12915 = sst [smem:[#allocation33_spill]] %s12885_s4 }
   0x5   :  { %12916 = sst [smem:[#allocation34_spill]] %s12886_s5 }
   0x6   :  { %12917 = sst [smem:[#allocation35_spill]] %s12887_s6 }
   0x7   :  { %12918 = sst [smem:[#allocation36_spill]] %s12888_s7 }
   0x8   :  { %12919 = sst [smem:[#allocation37_spill]] %s12889_s8 }
   0x9   :  { %12920 = sst [smem:[#allocation38_spill]] %s12890_s9 }
   0xa   :  { %12921 = sst [smem:[#allocation39_spill]] %s12893_s12 }
   0xb   :  { %12922 = sst [smem:[#allocation40_spill]] %s12894_s13 }
   0xc   :  { %12923 = sst [smem:[#allocation41_spill]] %s12895_s14 }
   0xd   :  { %12924 = sst [smem:[#allocation42_spill]] %s12896_s15 }
   0xe   :  { %12925 = sst [smem:[#allocation43_spill]] %s12897_s16 }
   0xf   :  { %21 = vsyncpa [#allocation3], 0 }
  0x10   :  { %23 = vsyncpa [#allocation3 + $0x1], 0 }
  0x11   :  { %24 = vsyncpa [#allocation6], 0 }
  0x12   :  { %26 = vsyncpa [#allocation6 + $0x1], 0 }
  0x13   :  { %27 = vsyncpa [#allocation9], 0 }
  0x14   :  { %28 = vsyncpa [#allocation12], 0 }
  0x15   :  { %29 = vsyncpa [#allocation15], 0 }
  0x16   :  { %30 = vsyncpa [#allocation18], 0 }
  0x17   :  { %31 = vsyncpa [#allocation4], 0 }
  0x18   :  { %33 = vsyncpa [#allocation4 + $0x1], 0  ;;  %s10361_s21 = smov 0   ;;  %s10363_s22 = smov 0  }
  0x19   :  { %s10365_s23 = smov 0   ;;  %s10367_s24 = smov 0  }
  0x1a LB: > { %s10248_s25 = smov [#allocation7]   ;;  %s10382_s27 = sadd.s32 4294967295, %s10246_s24   ;;  %s10246_s24 = sphi %s10367_s24, %s12969_s24   ;;  %s10242_s23 = sphi %s10365_s23, %s12968_s23   ;;  %s10238_s22 = sphi %s10363_s22, %s12967_s22   ;;  %s10234_s21 = sphi %s10361_s21, %s12966_s21  }
  0x1b   : > { %s428_s26 = sshll.u32 %s10248_s25, 4  ;;  %p7844_p0 = scmp.ge.s32.totalorder %s10246_s24, 1  ;;  %s10387_s26 = int_to_ptr.vmem [resolvable:$true] %s428_s26 }
  0x1c   : > { %p12906_p1 = scmp.eq.s32.totalorder %s10382_s27, 0  ;;  %p416_p2 = scmp.lt.s32.totalorder %s10246_s24, 3 }
  0x1d   : > { %s10249_s29 = smov [#allocation8]   ;;  %s10250_s17 = smov [#allocation11]  }
  0x1e   : > { %p10389_p3 = pnand %p7844_p0, %p416_p2  ;;  %s441_s30 = sshll.u32 %s10249_s29, 4  ;;  %s10402_s30 = int_to_ptr.vmem [resolvable:$true] %s441_s30 }
  0x1f   : > { %s10404_s18 = sshll.u32 %s10250_s17, 4  ;;  %s12929_s2 = sld [smem:[#allocation31_spill]]  ;;  %s466_s18 = int_to_ptr.vmem [resolvable:$true] %s10404_s18 }
  0x20   : > { %s12926_s28 = scalar_select %p10389_p3, 1, 0 }
  0x21   : > { %p9288_p5 = pneg %p10389_p3 }
  0x22   : > { %12927 = sst [smem:[#allocation29_spill]] %s12926_s28 }
  0x23   : > { %p10398_p6 = pnand %p9288_p5, %p12906_p1 }
  0x25   : > { %s9844_s25 = scalar_lea.hbm %s12929_s2, 1024  ;;  %p10414_p8 = pneg %p10398_p6 }
  0x26   : > { %p9845_p7 = scmp.ne.s32.totalorder %s12929_s2, %s9844_s25  ;;  %p9851_p11 = scmp.lt.u32.totalorder %s9844_s25, %s12929_s2 }
  0x28   : > { %p9847_p9 = pnand %p10414_p8, %p9845_p7 }
  0x2a   : > { %p9848_p10 = pneg %p9847_p9 }
  0x2c   : > { %p9853_p12 = pnand %p9851_p11, %p9848_p10 }
  0x2e   : > { %9856 = shalt.err (!%p9853_p12)
}
  0x2f   : > { %s9857_s14 = scalar_lea.vmem %s10387_s26, 1024  ;;  %p9865_p5 = scmp.lt.s32.totalorder %s10387_s26, %s10387_s26 }
  0x30   : > { %p9858_p13 = scmp.ne.s32.totalorder %s10387_s26, %s9857_s14  ;;  %p9866_p4 = scmp.lt.s32.totalorder %s9857_s14, %s9857_s14 }
  0x32   : > { %p9860_p0 = pnand %p9858_p13, %p10414_p8  ;;  %p9867_p7 = por %p9866_p4, %p9865_p5 }
  0x34   : > { %p9861_p2 = pneg %p9860_p0 }
  0x36   : > { %p9868_p9 = pnand %p9867_p7, %p9861_p2 }
  0x38   : > { %9871 = shalt.err (!%p9868_p9)
}
  0x39   : > { %s12904_s16 = smov 128   ;;  %s12908_s12 = smov 8  }
  0x3a   : > { %9291 = dma.hbm_to_vmem [thread:$0]  (!%p10398_p6), %s12929_s2, 1024, %s10387_s26, [#allocation6], %s12904_s16, %s12904_s16, %s12908_s12  }
  0x3b   : > { %s12931_s3 = sld [smem:[#allocation32_spill]] }
  0x41   : > { %s9872_s14 = scalar_lea.hbm %s12931_s3, 1536 }
  0x42   : > { %p9873_p4 = scmp.ne.s32.totalorder %s12931_s3, %s9872_s14  ;;  %p9879_p12 = scmp.lt.u32.totalorder %s9872_s14, %s12931_s3 }
  0x44   : > { %p9875_p10 = pnand %p9873_p4, %p10414_p8 }
  0x46   : > { %p9876_p11 = pneg %p9875_p10 }
  0x48   : > { %p9881_p13 = pnand %p9879_p12, %p9876_p11 }
  0x4a   : > { %9884 = shalt.err (!%p9881_p13)
}
  0x4b   : > { %s9885_s26 = scalar_lea.vmem %s10402_s30, 1536  ;;  %p9893_p7 = scmp.lt.s32.totalorder %s10402_s30, %s10402_s30 }
  0x4c   : > { %p9886_p0 = scmp.ne.s32.totalorder %s10402_s30, %s9885_s26  ;;  %p9894_p9 = scmp.lt.s32.totalorder %s9885_s26, %s9885_s26 }
  0x4e   : > { %p9888_p2 = pnand %p9886_p0, %p10414_p8  ;;  %p9895_p4 = por %p9894_p9, %p9893_p7 }
  0x50   : > { %p9889_p5 = pneg %p9888_p2 }
  0x52   : > { %p9896_p10 = pnand %p9895_p4, %p9889_p5 }
  0x54   : > { %9899 = shalt.err (!%p9896_p10)
}
  0x55   : > { %s10253_s13 = smov 384   ;;  %s10254_s7 = smov 24  }
  0x56   : > { %9294 = dma.hbm_to_vmem [thread:$0]  (!%p10398_p6), %s12931_s3, 1536, %s10402_s30, [#allocation9], %s10253_s13, %s10253_s13, %s10254_s7  }
  0x57   : > { %s12932_s5 = sld [smem:[#allocation34_spill]] }
  0x5d   : > { %s9900_s25 = scalar_lea.hbm %s12932_s5, 512 }
  0x5e   : > { %p9901_p11 = scmp.ne.s32.totalorder %s12932_s5, %s9900_s25  ;;  %p9907_p0 = scmp.lt.u32.totalorder %s9900_s25, %s12932_s5 }
  0x60   : > { %p9903_p12 = pnand %p9901_p11, %p10414_p8 }
  0x62   : > { %p9904_p13 = pneg %p9903_p12 }
  0x64   : > { %p9909_p2 = pnand %p9907_p0, %p9904_p13 }
  0x66   : > { %9912 = shalt.err (!%p9909_p2)
}
  0x67   : > { %s9913_s15 = scalar_lea.vmem %s466_s18, 512  ;;  %p9921_p4 = scmp.lt.s32.totalorder %s466_s18, %s466_s18 }
  0x68   : > { %p9914_p5 = scmp.ne.s32.totalorder %s466_s18, %s9913_s15  ;;  %p9922_p10 = scmp.lt.s32.totalorder %s9913_s15, %s9913_s15 }
  0x6a   : > { %p9916_p7 = pnand %p9914_p5, %p10414_p8  ;;  %p9923_p1 = por %p9922_p10, %p9921_p4 }
  0x6c   : > { %p9917_p9 = pneg %p9916_p7 }
  0x6e   : > { %p9924_p3 = pnand %p9923_p1, %p9917_p9 }
  0x70   : > { %9927 = shalt.err (!%p9924_p3)
}
  0x71   : > { %s12933_s30 = smov 128   ;;  %s10255_s7 = smov [#allocation14]  }
  0x72   : > { %9300 = dma.hbm_to_vmem [thread:$0]  (!%p10398_p6), %s12932_s5, 512, %s466_s18, [#allocation12], %s12933_s30, %s12933_s30, %s12908_s12  }
  0x73   : > { %s493_s28 = sshll.u32 %s10255_s7, 4  ;;  %s10256_s19 = smov [#allocation17]   ;;  %s494_s28 = int_to_ptr.vmem [resolvable:$true] %s493_s28 }
  0x74   : > { %s516_s20 = sshll.u32 %s10256_s19, 4  ;;  %s12934_s8 = sld [smem:[#allocation37_spill]]  ;;  %s517_s20 = int_to_ptr.vmem [resolvable:$true] %s516_s20 }
  0x7a   : > { %s9928_s14 = scalar_lea.hbm %s12934_s8, 64 }
  0x7b   : > { %p9929_p1 = scmp.ne.s32.totalorder %s12934_s8, %s9928_s14  ;;  %p9935_p12 = scmp.lt.u32.totalorder %s9928_s14, %s12934_s8 }
  0x7d   : > { %p9931_p3 = pnand %p9929_p1, %p10414_p8 }
  0x7f   : > { %p9932_p11 = pneg %p9931_p3 }
  0x81   : > { %p9937_p13 = pnand %p9935_p12, %p9932_p11 }
  0x83   : > { %9940 = shalt.err (!%p9937_p13)
}
  0x84   : > { %s9941_s18 = scalar_lea.vmem %s494_s28, 64  ;;  %p9949_p7 = scmp.lt.s32.totalorder %s494_s28, %s494_s28 }
  0x85   : > { %p9942_p0 = scmp.ne.s32.totalorder %s494_s28, %s9941_s18  ;;  %p9950_p9 = scmp.lt.s32.totalorder %s9941_s18, %s9941_s18 }
  0x87   : > { %p9944_p2 = pnand %p9942_p0, %p10414_p8  ;;  %p9951_p4 = por %p9950_p9, %p9949_p7 }
  0x89   : > { %p9945_p5 = pneg %p9944_p2 }
  0x8b   : > { %p9952_p10 = pnand %p9951_p4, %p9945_p5 }
  0x8d   : > { %9955 = shalt.err (!%p9952_p10)
}
  0x8e   : > { %9306 = dma.hbm_to_vmem [thread:$0]  (!%p10398_p6), %s12934_s8, 64, %s494_s28, [#allocation15]  }
  0x8f   : > { %s9956_s25 = scalar_lea.hbm %s12891_s10, 32 }
  0x90   : > { %p9957_p1 = scmp.ne.s32.totalorder %s12891_s10, %s9956_s25  ;;  %p9963_p12 = scmp.lt.u32.totalorder %s9956_s25, %s12891_s10 }
  0x92   : > { %p9959_p3 = pnand %p9957_p1, %p10414_p8 }
  0x94   : > { %p9960_p11 = pneg %p9959_p3 }
  0x96   : > { %p9965_p13 = pnand %p9963_p12, %p9960_p11 }
  0x98   : > { %9968 = shalt.err (!%p9965_p13)
}
  0x99   : > { %s9969_s16 = scalar_lea.vmem %s517_s20, 32  ;;  %p9977_p7 = scmp.lt.s32.totalorder %s517_s20, %s517_s20 }
  0x9a   : > { %p9970_p0 = scmp.ne.s32.totalorder %s517_s20, %s9969_s16  ;;  %p9978_p9 = scmp.lt.s32.totalorder %s9969_s16, %s9969_s16 }
  0x9c   : > { %p9972_p2 = pnand %p9970_p0, %p10414_p8  ;;  %p9979_p4 = por %p9978_p9, %p9977_p7 }
  0x9e   : > { %p9973_p5 = pneg %p9972_p2 }
  0xa0   : > { %p9980_p10 = pnand %p9979_p4, %p9973_p5 }
  0xa2   : > { %9983 = shalt.err (!%p9980_p10)
}
  0xa3   : > { %s10257_s28 = smov 16   ;;  %s10258_s18 = smov 1  }
  0xa4   : > { %9312 = dma.hbm_to_vmem [thread:$0]  (!%p10398_p6), %s12891_s10, 32, %s517_s20, [#allocation18], %s10257_s28, %s10257_s28, %s10258_s18  }
  0xa5   : > { %s10259_s2 = smov [#allocation10]   ;;  %s10260_s25 = smov [#allocation13]  }
  0xa6   : > { %s455_s19 = sshll.u32 %s10259_s2, 4  ;;  %s479_s17 = sshll.u32 %s10260_s25, 4  ;;  %s456_s19 = int_to_ptr.vmem [resolvable:$true] %s455_s19  ;;  %s480_s17 = int_to_ptr.vmem [resolvable:$true] %s479_s17 }
  0xa7   : > { %s12935_s4 = sld [smem:[#allocation33_spill]] }
  0xad   : > { %s9984_s15 = scalar_lea.hbm %s12935_s4, 96 }
  0xae   : > { %p9985_p1 = scmp.ne.s32.totalorder %s12935_s4, %s9984_s15  ;;  %p9991_p12 = scmp.lt.u32.totalorder %s9984_s15, %s12935_s4 }
  0xb0   : > { %p9987_p3 = pnand %p9985_p1, %p10414_p8 }
  0xb2   : > { %p9988_p11 = pneg %p9987_p3 }
  0xb4   : > { %p9993_p13 = pnand %p9991_p12, %p9988_p11 }
  0xb6   : > { %9996 = shalt.err (!%p9993_p13)
}
  0xb7   : > { %s9997_s20 = scalar_lea.vmem %s456_s19, 96  ;;  %p10005_p7 = scmp.lt.s32.totalorder %s456_s19, %s456_s19 }
  0xb8   : > { %p9998_p0 = scmp.ne.s32.totalorder %s456_s19, %s9997_s20  ;;  %p10006_p9 = scmp.lt.s32.totalorder %s9997_s20, %s9997_s20 }
  0xba   : > { %p10000_p2 = pnand %p9998_p0, %p10414_p8  ;;  %p10007_p4 = por %p10006_p9, %p10005_p7 }
  0xbc   : > { %p10001_p5 = pneg %p10000_p2 }
  0xbe   : > { %p10008_p10 = pnand %p10007_p4, %p10001_p5 }
  0xc0   : > { %10011 = shalt.err (!%p10008_p10)
}
  0xc1   : > { %9297 = dma.hbm_to_vmem [thread:$0]  (!%p10398_p6), %s12935_s4, 96, %s456_s19, [#allocation9]  }
  0xc2   : > { %s12936_s6 = sld [smem:[#allocation35_spill]] }
  0xc8   : > { %s10012_s18 = scalar_lea.hbm %s12936_s6, 32 }
  0xc9   : > { %p10013_p1 = scmp.ne.s32.totalorder %s12936_s6, %s10012_s18  ;;  %p10019_p12 = scmp.lt.u32.totalorder %s10012_s18, %s12936_s6 }
  0xcb   : > { %p10015_p3 = pnand %p10013_p1, %p10414_p8 }
  0xcd   : > { %p10016_p11 = pneg %p10015_p3 }
  0xcf   : > { %p10021_p13 = pnand %p10019_p12, %p10016_p11 }
  0xd1   : > { %10024 = shalt.err (!%p10021_p13)
}
  0xd2   : > { %s10025_s14 = scalar_lea.vmem %s480_s17, 32  ;;  %p10033_p7 = scmp.lt.s32.totalorder %s480_s17, %s480_s17 }
  0xd3   : > { %p10026_p0 = scmp.ne.s32.totalorder %s480_s17, %s10025_s14  ;;  %p10034_p9 = scmp.lt.s32.totalorder %s10025_s14, %s10025_s14 }
  0xd5   : > { %p10028_p2 = pnand %p10026_p0, %p10414_p8  ;;  %p10035_p4 = por %p10034_p9, %p10033_p7 }
  0xd7   : > { %p10029_p5 = pneg %p10028_p2 }
  0xd9   : > { %p10036_p10 = pnand %p10035_p4, %p10029_p5 }
  0xdb   : > { %10039 = shalt.err (!%p10036_p10)
}
  0xdc   : > { %9303 = dma.hbm_to_vmem [thread:$0]  (!%p10398_p6), %s12936_s6, 32, %s480_s17, [#allocation12]  }
  0xdd   : > { %s10261_s15 = smov [#allocation16]   ;;  %s12937_s9 = sld [smem:[#allocation38_spill]] }
  0xde   : > { %s503_s16 = sshll.u32 %s10261_s15, 4  ;;  %s504_s16 = int_to_ptr.vmem [resolvable:$true] %s503_s16 }
  0xe3   : > { %s10040_s28 = scalar_lea.hbm %s12937_s9, 4096 }
  0xe4   : > { %p10041_p1 = scmp.ne.s32.totalorder %s12937_s9, %s10040_s28  ;;  %p10047_p12 = scmp.lt.u32.totalorder %s10040_s28, %s12937_s9 }
  0xe6   : > { %p10043_p3 = pnand %p10041_p1, %p10414_p8 }
  0xe8   : > { %p10044_p11 = pneg %p10043_p3 }
  0xea   : > { %p10049_p13 = pnand %p10047_p12, %p10044_p11 }
  0xec   : > { %10052 = shalt.err (!%p10049_p13)
}
  0xed   : > { %s10053_s17 = scalar_lea.vmem %s504_s16, 4096  ;;  %p10061_p7 = scmp.lt.s32.totalorder %s504_s16, %s504_s16 }
  0xee   : > { %p10054_p0 = scmp.ne.s32.totalorder %s504_s16, %s10053_s17  ;;  %p10062_p9 = scmp.lt.s32.totalorder %s10053_s17, %s10053_s17 }
  0xf0   : > { %p10056_p2 = pnand %p10054_p0, %p10414_p8  ;;  %p10063_p4 = por %p10062_p9, %p10061_p7 }
  0xf2   : > { %p10057_p5 = pneg %p10056_p2 }
  0xf4   : > { %p10064_p10 = pnand %p10063_p4, %p10057_p5 }
  0xf6   : > { %10067 = shalt.err (!%p10064_p10)
}
  0xf7   : > { %s10262_s7 = smov 64   ;;  %s10263_s2 = smov 4  }
  0xf8   : > { %9309 = dma.hbm_to_vmem [thread:$0]  (!%p10398_p6), %s12937_s9, 4096, %s504_s16, [#allocation15], %s10262_s7, %s10262_s7, %s10263_s2  }
  0xf9   : > { %s10264_s19 = smov [#allocation19]   ;;  %s10068_s12 = scalar_lea.hbm %s12892_s11, 256 }
  0xfa   : > { %s529_s26 = sshll.u32 %s10264_s19, 4  ;;  %p10069_p1 = scmp.ne.s32.totalorder %s12892_s11, %s10068_s12  ;;  %s530_s26 = int_to_ptr.vmem [resolvable:$true] %s529_s26 }
  0xfb   : > { %p10075_p12 = scmp.lt.u32.totalorder %s10068_s12, %s12892_s11 }
  0xfc   : > { %p10071_p3 = pnand %p10069_p1, %p10414_p8 }
  0xfe   : > { %p10072_p11 = pneg %p10071_p3 }
 0x100   : > { %p10077_p13 = pnand %p10075_p12, %p10072_p11 }
 0x102   : > { %10080 = shalt.err (!%p10077_p13)
}
 0x103   : > { %s10081_s16 = scalar_lea.vmem %s530_s26, 256  ;;  %p10089_p7 = scmp.lt.s32.totalorder %s530_s26, %s530_s26 }
 0x104   : > { %p10082_p0 = scmp.ne.s32.totalorder %s530_s26, %s10081_s16  ;;  %p10090_p9 = scmp.lt.s32.totalorder %s10081_s16, %s10081_s16 }
 0x106   : > { %p10084_p2 = pnand %p10082_p0, %p10414_p8  ;;  %p10091_p4 = por %p10090_p9, %p10089_p7 }
 0x108   : > { %p10085_p5 = pneg %p10084_p2 }
 0x10a   : > { %p10092_p10 = pnand %p10091_p4, %p10085_p5 }
 0x10c   : > { %10095 = shalt.err (!%p10092_p10)
}
 0x10d   : > { %9315 = dma.hbm_to_vmem [thread:$0]  (!%p10398_p6), %s12892_s11, 256, %s530_s26, [#allocation18], %s10262_s7, %s10262_s7, %s10263_s2  }
 0x10e   : > { %s7843_s29 = sadd.s32 4294967294, %s10246_s24   ;;  %s10593_s0 = sadd.s32 1, %s10246_s24  }
 0x10f   : > { %s46_s25 = sadd.s32 1, %s10242_s23  ;;  %s43_s14 = ssub.s32 %s10246_s24, %s10593_s0 }
 0x110   : > { %p53_p8 = scmp.ne.s32.totalorder %s10242_s23, %s10238_s22  ;;  %p44_p1 = scmp.eq.s32.totalorder %s43_s14, 0 }
 0x111   : > { %p54_p3 = scmp.eq.s32.totalorder %s10246_s24, 0  ;;  %p59_p11 = scmp.ne.s32.totalorder %s10238_s22, %s10234_s21 }
 0x112   : > { %p403_p12 = scmp.eq.s32.totalorder %s10382_s27, 1  ;;  %p12938_p0 = scmp.eq.s32.totalorder %s10382_s27, 0 }
 0x113   : > { %s10605_s19 = scalar_select %p44_p1, %s10242_s23, %s46_s25  }
 0x114   : > { %p55_p13 = por %p54_p3, %p53_p8  ;;  %p10609_p2 = por %p12938_p0, %p59_p11 }
 0x115   : > { %p10613_p6 = por %p403_p12, %p53_p8  ;;  %p409_p5 = scmp.eq.s32.totalorder %s7843_s29, 1 }
 0x116   : > { %p9336_p7 = scmp.lt.s32.totalorder %s10246_s24, 2  ;;  %s555_s2 = sand.u32 1, %s10242_s23  }
 0x117   : > { %s12940_s7 = scalar_select %p10613_p6, 1, 0 }
 0x118   : > { %p10619_p9 = por %p409_p5, %p59_p11  ;;  %s10623_s20 = sshll.u32 %s555_s2, 5 }
 0x119   : > { %s8093_s12 = sshll.u32 %s10246_s24, 9  ;;  %s12942_s5 = sld [smem:[#allocation30_spill]] }
 0x11a   : > { %s12941_s26 = scalar_select %p10619_p9, 1, 0 }
 0x11b   : > { %s559_s16 = scalar_lea.vmem [#allocation2], %s10623_s20  ;;  %p10632_p4 = pnand %p9336_p7, %p55_p13 }
 0x11c   : > { %s566_s13 = sshll.u32 %s559_s16, 4  ;;  %s10641_s14 = scalar_lea.hbm %s12882_s1, %s8093_s12  ;;  %s10636_s13 = int_to_ptr.vmem [resolvable:$true] %s566_s13 }
 0x11d   : > { %s10643_s28 = scalar_lea.sflag [#allocation3], %s555_s2  ;;  %p10098_p8 = pneg %p10632_p4 }
 0x11f   : > { %s10629_s18 = scalar_lea.hbm %s12942_s5, %s8093_s12  ;;  %s10101_s6 = scalar_lea.hbm %s12942_s5, 1024 }
 0x120   : > { %s10096_s3 = scalar_lea.hbm %s10629_s18, 512  ;;  %p10102_p11 = scmp.lt.u32.totalorder %s10629_s18, %s12942_s5 }
 0x121   : > { %p10097_p10 = scmp.ne.s32.totalorder %s10629_s18, %s10096_s3  ;;  %p10103_p12 = scmp.lt.u32.totalorder %s10101_s6, %s10096_s3 }
 0x122   : > { %p10105_p0 = scmp.lt.u32.totalorder %s10096_s3, %s10629_s18 }
 0x123   : > { %p10099_p1 = pnand %p10098_p8, %p10097_p10  ;;  %p10104_p13 = por %p10103_p12, %p10102_p11 }
 0x125   : > { %p10100_p3 = pneg %p10099_p1  ;;  %p10106_p5 = por %p10105_p0, %p10104_p13 }
 0x127   : > { %p10107_p7 = pnand %p10106_p5, %p10100_p3 }
 0x129   : > { %10110 = shalt.err (!%p10107_p7)
}
 0x12a   : > { %s10111_s2 = scalar_lea.vmem %s10636_s13, 512  ;;  %s10265_s4 = smov [#allocation2]  }
 0x12b   : > { %p10112_p10 = scmp.ne.s32.totalorder %s10636_s13, %s10111_s2  ;;  %s10116_s12 = sshll.u32 %s10265_s4, 4  ;;  %s10117_s12 = int_to_ptr.vmem [resolvable:$false] %s10116_s12 }
 0x12c   : > { %s10118_s8 = scalar_lea.vmem %s10117_s12, 1024  ;;  %p10119_p6 = scmp.lt.s32.totalorder %s10636_s13, %s10117_s12 }
 0x12d   : > { %p10114_p1 = pnand %p10112_p10, %p10098_p8  ;;  %p10120_p11 = scmp.lt.s32.totalorder %s10118_s8, %s10111_s2 }
 0x12f   : > { %p10115_p9 = pneg %p10114_p1  ;;  %p10121_p12 = por %p10120_p11, %p10119_p6 }
 0x131   : > { %p10122_p13 = pnand %p10121_p12, %p10115_p9 }
 0x133   : > { %10125 = shalt.err (!%p10122_p13)
}
 0x134   : > { %s12944_s6 = smov 8   ;;  %s580_s9 = scalar_lea.vmem [#allocation5], %s10623_s20 }
 0x135   : > { %9319 = dma.hbm_to_vmem [thread:$0]  (!%p10632_p4), %s10629_s18, 512, %s10636_s13, %s10643_s28, %s12933_s30, %s12933_s30, %s12944_s6  }
 0x136   : > { %s587_s29 = sshll.u32 %s580_s9, 4  ;;  %s576_s25 = sand.u32 1, %s10246_s24   ;;  %s10676_s29 = int_to_ptr.vmem [resolvable:$true] %s587_s29 }
 0x137   : > { %s10678_s3 = scalar_lea.sflag [#allocation6], %s576_s25  ;;  %s10126_s16 = scalar_lea.hbm %s10641_s14, 512 }
 0x138   : > { %p10127_p6 = scmp.ne.s32.totalorder %s10641_s14, %s10126_s16  ;;  %s10131_s12 = scalar_lea.hbm %s12882_s1, 1024 }
 0x139   : > { %p10132_p0 = scmp.lt.u32.totalorder %s10641_s14, %s12882_s1  ;;  %p10133_p5 = scmp.lt.u32.totalorder %s10131_s12, %s10126_s16 }
 0x13a   : > { %p10129_p9 = pnand %p10127_p6, %p10098_p8  ;;  %p10135_p10 = scmp.lt.u32.totalorder %s10126_s16, %s10641_s14 }
 0x13b   : > { %p10134_p7 = por %p10133_p5, %p10132_p0 }
 0x13c   : > { %p10130_p3 = pneg %p10129_p9 }
 0x13d   : > { %p10136_p1 = por %p10135_p10, %p10134_p7 }
 0x13f   : > { %p10137_p11 = pnand %p10136_p1, %p10130_p3 }
 0x141   : > { %10140 = shalt.err (!%p10137_p11)
}
 0x142   : > { %s10141_s20 = scalar_lea.vmem %s10676_s29, 512  ;;  %s10266_s18 = smov [#allocation5]  }
 0x143   : > { %p10142_p12 = scmp.ne.s32.totalorder %s10676_s29, %s10141_s20  ;;  %s10146_s13 = sshll.u32 %s10266_s18, 4  ;;  %s10147_s13 = int_to_ptr.vmem [resolvable:$false] %s10146_s13 }
 0x144   : > { %s10148_s5 = scalar_lea.vmem %s10147_s13, 1024  ;;  %p10149_p9 = scmp.lt.s32.totalorder %s10676_s29, %s10147_s13 }
 0x145   : > { %p10144_p13 = pnand %p10142_p12, %p10098_p8  ;;  %p10150_p0 = scmp.lt.s32.totalorder %s10148_s5, %s10141_s20 }
 0x147   : > { %p10145_p6 = pneg %p10144_p13  ;;  %p10151_p5 = por %p10150_p0, %p10149_p9 }
 0x149   : > { %p10152_p7 = pnand %p10151_p5, %p10145_p6 }
 0x14b   : > { %10155 = shalt.err (!%p10152_p7)
}
 0x14c   : > { %9322 = dma.hbm_to_vmem [thread:$0]  (!%p10632_p4), %s10641_s14, 512, %s10676_s29, %s10678_s3, %s12933_s30, %s12933_s30, %s12944_s6  }
 0x14d   : > { %s12945_s28 = sld [smem:[#allocation29_spill]] }
 0x153   : > { %p12946_p8 = scmp.ne.s32.totalorder %s12945_s28, 0 }
 0x154   : > { %s10710_s9 = sand.u32 (!%p12946_p8), 1, %s10238_s22  }
 0x155   : > { %599 = sbr.rel (%p12946_p8) target bundleno = 9452 (0x24ec), region = 84  ;;  %s10713_s25 = sshll.u32 (!%p12946_p8), %s10710_s9, 5 }
 0x156   : > { %s602_s17 = scalar_lea.sflag (!%p12946_p8), [#allocation3], %s10710_s9  ;;  %s10717_s16 = scalar_lea.vmem (!%p12946_p8), [#allocation2], %s10713_s25 }
 0x15c   : > { %10201 = dma.done.wait (%p10609_p2), %s602_s17, 512  }
 0x15d   : > { %10203 = vsyncadd (%p10609_p2), %s602_s17, 4294966784  ;;  %s610_s30 = sand.u32 1, %s10382_s27   ;;  %s10725_s6 = scalar_lea.vmem [#allocation5], %s10713_s25 }
 0x15e   : > { %s611_s14 = scalar_lea.sflag [#allocation6], %s610_s30 }
 0x15f   : > { %10205 = dma.done.wait (%p10609_p2), %s611_s14, 512  }
 0x160   : > { %10207 = vsyncadd (%p10609_p2), %s611_s14, 4294966784  ;;  %p12947_p4 = scmp.eq.s32.totalorder %s10382_s27, 0 }
 0x162   : > { %10209 = dma.done.wait (%p12947_p4), [#allocation6], 1024   ;;  %p12948_p3 = pmov %p12947_p4 }
 0x164   : > { %10211 = vsyncadd (%p12948_p3), [#allocation6], 4294966272  ;;  %p12949_p10 = pmov %p12948_p3 }
 0x165   : > { %p12950_p1 = pmov %p12948_p3 }
 0x166   : > { %10213 = dma.done.wait (%p12949_p10), [#allocation9], 1632  }
 0x167   : > { %10215 = vsyncadd (%p12950_p1), [#allocation9], 4294965664  ;;  %p12951_p11 = pmov %p12950_p1 }
 0x168   : > { %p12952_p12 = pmov %p12950_p1 }
 0x169   : > { %10217 = dma.done.wait (%p12951_p11), [#allocation12], 544  }
 0x16a   : > { %10219 = vsyncadd (%p12952_p12), [#allocation12], 4294966752  ;;  %p12953_p2 = pmov %p12950_p1 }
 0x16b   : > { %p12954_p13 = pmov %p12950_p1 }
 0x16c   : > { %10221 = dma.done.wait (%p12953_p2), [#allocation15], 4160  }
 0x16d   : > { %10223 = vsyncadd (%p12954_p13), [#allocation15], 4294963136  ;;  %p12955_p6 = pmov %p12950_p1 }
 0x16e   : > { %p12956_p9 = pmov %p12950_p1 }
 0x16f   : > { %10225 = dma.done.wait (%p12955_p6), [#allocation18], 288  }
 0x170   : > { %10227 = vsyncadd (%p12956_p9), [#allocation18], 4294967008  ;;  %v10267_v0 = vmov 0   ;;  %v9404_v1 = vld [vmem:[#allocation8 + $0x4] ss:$24 sps:$4 sm:$0xff]   ;;  %v709_v8 = vld [vmem:[%s10717_s16 + $0x8] sm:$0xff]  ;;  %v744_v19 = vlaneseq }
 0x171   : > { %873 = vmatprep.mubr.bf16.mxu0 %v10267_v0  ;;  %926 = vmatprep.mubr.bf16.mxu1 %v10267_v0  ;;  %v9406_v2 = vld [vmem:[#allocation8] ss:$24 sps:$4 sm:$0xff]   ;;  %v9407_v3 = vld [vmem:[#allocation8 + $0x34] ss:$24 sps:$4 sm:$0xff]   ;;  %v9409_v4 = vld [vmem:[#allocation8 + $0x30] ss:$24 sps:$4 sm:$0xff]  }
 0x172   : > { %841 = vmatprep.subr.bf16.mxu0 %v9404_v1  ;;  %v9410_v5 = vld [vmem:[#allocation8 + $0xc] ss:$24 sps:$4 sm:$0xff]   ;;  %v9412_v6 = vld [vmem:[#allocation8 + $0x8] ss:$24 sps:$4 sm:$0xff]   ;;  %v9413_v9 = vld [vmem:[#allocation8 + $0x3c] ss:$24 sps:$4 sm:$0xff]  }
 0x173   : > { %842 = vmatpush1.bf16.msra.mxu0 %v9406_v2  ;;  %v708_v7 = vld [vmem:[%s10717_s16] sm:$0xff]  ;;  %894 = vmatprep.subr.bf16.mxu1 %v9410_v5  ;;  %v9415_v11 = vld [vmem:[#allocation8 + $0x38] ss:$24 sps:$4 sm:$0xff]   ;;  %vm834_vm0 = vcmask 261120   ;;  %v9418_v13 = vld [vmem:[#allocation8 + $0x14] ss:$24 sps:$4 sm:$0xff]  }
 0x174   : > { %843 = vmatprep.subr.bf16.mxu0 %v9407_v3  ;;  %895 = vmatpush1.bf16.msra.mxu1 %v9412_v6  ;;  %v728_v10 = vpack.c.bf16 %v709_v8, %v708_v7  ;;  %v9416_v12 = vld [vmem:[#allocation8 + $0x10] ss:$24 sps:$4 sm:$0xff]   ;;  %v711_v15 = vld [vmem:[%s10717_s16 + $0x18] sm:$0xff]  ;;  %v10767_v20 = vshrl.u32 %v744_v19, 7  ;;  %v742_v22 = vld [vmem:[#allocation10] sm:$0x3f] }
 0x175   : > { %896 = vmatprep.subr.bf16.mxu1 %v9413_v9  ;;  %v710_v14 = vld [vmem:[%s10717_s16 + $0x10] sm:$0xff]  ;;  %v9419_v16 = vld [vmem:[#allocation8 + $0x40] ss:$24 sps:$4 sm:$0xff]   ;;  %v9421_v17 = vld [vmem:[#allocation8 + $0x44] ss:$24 sps:$4 sm:$0xff]   ;;  %s10268_s15 = smov 64  }
 0x176   : > { %v729_v18 = vpack.c.bf16 %v711_v15, %v710_v14  ;;  %v10770_v21 = vsub.s32 0, %v10767_v20  ;;  %v10773_v23 = vsub.s32 1, %v10767_v20  ;;  %v754_v24 = vsub.s32 2, %v10767_v20  ;;  %s10269_s29 = smov 32   ;;  %s10270_s3 = smov 96  }
 0x177   : > { %844 = vmatpush1.bf16.msra.mxu0 %v9409_v4  ;;  %v758_v25 = vsub.s32 3, %v10767_v20  ;;  %v762_v54 = vsub.s32 4, %v10767_v20  ;;  %v766_v57 = vsub.s32 5, %v10767_v20  ;;  %vm1089_vm1 = vcmask 1043456   ;;  %s12957_s12 = sld [smem:[#allocation36_spill]]  ;;  %s12958_s18 = sld [smem:[#allocation42_spill]] }
 0x178   : > { %947 = vmatprep.subr.bf16.mxu0 %v9418_v13  ;;  %897 = vmatpush1.bf16.msra.mxu1 %v9415_v11  ;;  %v747_v26 = vrot.slane %v742_v22, %v10770_v21  ;;  %v751_v28 = vrot.slane %v742_v22, %v10773_v23  ;;  %v10781_v29 = vrot.slane %v742_v22, %v754_v24  ;;  %vm1066_vm2 = vcmask 523264   ;;  %s12959_s4 = sld [smem:[#allocation40_spill]]  ;;  %s703_s13 = scalar_lea.vmem [#allocation20], %s10713_s25 }
 0x179   : > { %v10785_v31 = vrot.slane %v742_v22, %v758_v25  ;;  %v10816_v1 = vrot.slane %v742_v22, %v762_v54  ;;  %v10821_v4 = vrot.slane %v742_v22, %v766_v57  ;;  %vm10272_vm3 = vmmov 0   ;;  %s8095_s5 = sshll.u32 %s10382_s27, 9  ;;  %s7662_s28 = sshll.u32 %s703_s13, 4  ;;  %s12836_s28 = int_to_ptr.vmem [resolvable:$true] %s7662_s28 }
 0x17a   : > { %7886 = vmatmul.mubr.msk.bf16.vlgmr.msra.gmra.mrb[0].mxu0 %vm834_vm0, %v728_v10  ;;  %s12962_s30 = sld [smem:[#allocation43_spill]]  ;;  %s10156_s27 = scalar_lea.vmem %s12836_s28, 512 }
 0x17b   : > { %948 = vmatpush1.bf16.msra.mxu0 %v9416_v12  ;;  %883 = vmatprep.mubr.bf16.mxu0 %v10267_v0  ;;  %p10157_p0 = scmp.ne.s32.totalorder %s12836_s28, %s10156_s27  ;;  %p12963_p5 = scmp.ne.s32.totalorder %s12940_s7, 0 }
 0x17c   : > { %949 = vmatprep.subr.bf16.mxu0 %v9421_v17  ;;  %7888 = vmatmul.mubr.msk.bf16.vlgmr.msra.gmra.mrb[0].mxu1 %vm834_vm0, %v728_v10 }
 0x17d   : > { %936 = vmatprep.mubr.bf16.mxu1 %v10267_v0  ;;  %p10158_p7 = pnand %p10157_p0, %p12963_p5 }
 0x17f   : > { %950 = vmatpush1.bf16.msra.mxu0 %v9419_v16  ;;  %p10159_p8 = pneg %p10158_p7 }
 0x180   : > { %s12834_s14 = scalar_lea.hbm %s12962_s30, %s8095_s5 }
 0x182   : > { %7887 = vmatmul.mubr.msk.bf16.gmra.mrb[4].mxu0 %vm834_vm0, %v729_v18 }
 0x183   : > { %979 = vmatprep.mubr.bf16.mxu0 %v10267_v0 }
 0x184   : > { %7889 = vmatmul.mubr.msk.bf16.gmra.mrb[4].mxu1 %vm834_vm0, %v729_v18 }
 0x18a   : > { %7890 = vmatmul.mubr.msk.bf16.vlgmr.msra.gmra.mrb[8].mxu0 %vm834_vm0, %v728_v10 }
 0x18b   : > { %989 = vmatprep.mubr.bf16.mxu0 %v10267_v0 }
 0x192   : > { %7891 = vmatmul.mubr.msk.bf16.gmra.mrb[12].mxu0 %vm834_vm0, %v729_v18 }
 0x24d   : > { %v875_v27 = vpop.f32.mrb[0].mxu0 }
 0x24e   : > { %v877_v30 = vpop.f32.mrb[1].mxu0  ;;  %v876_v33 = vadd.f32 %v875_v27, %v747_v26 }
 0x24f   : > { %v879_v32 = vpop.f32.mrb[2].mxu0  ;;  %v928_v36 = vpop.f32.mrb[0].mxu1  ;;  %v878_v37 = vadd.f32 %v877_v30, %v751_v28 }
 0x250   : > { %v880_v34 = vadd.f32 %v879_v32, %v747_v26  ;;  %v881_v35 = vpop.f32.mrb[3].mxu0  ;;  %v929_v39 = vadd.f32 %v928_v36, %v10781_v29  ;;  %v930_v40 = vpop.f32.mrb[1].mxu1 }
 0x251   : > { %v882_v38 = vadd.f32 %v881_v35, %v751_v28  ;;  %v931_v42 = vadd.f32 %v930_v40, %v10785_v31  ;;  %v932_v43 = vpop.f32.mrb[2].mxu1 }
 0x252   : > { %v10788_v41 = vpack.c.bf16 %v880_v34, %v876_v33  ;;  %v933_v45 = vadd.f32 %v932_v43, %v10781_v29  ;;  %v934_v46 = vpop.f32.mrb[3].mxu1 }
 0x253   : > { %v10791_v44 = vpack.c.bf16 %v882_v38, %v878_v37  ;;  %v935_v48 = vadd.f32 %v934_v46, %v10785_v31 }
 0x254   : > { %v1053_v47 = vrot.slane %v10788_v41, 4  ;;  %v10796_v49 = vpack.c.bf16 %v933_v45, %v929_v39 }
 0x255   : > { %1062 = vrot.lane.b32.xlu1 %v10791_v44, %s10268_s15  ;;  %v885_v50 = vpop.f32.mrb[4].mxu0  ;;  %v10803_v53 = vpack.c.bf16 %v935_v48, %v931_v42  ;;  %v1054_v60 = vrot.slane %v10791_v44, 4 }
 0x256   : > { %v886_v51 = vadd.f32 %v885_v50, %v747_v26  ;;  %1055 = vrot.lane.b32.xlu0 %v1053_v47, %s10269_s29  ;;  %v887_v52 = vpop.f32.mrb[5].mxu0  ;;  %v1068_v2 = vrot.slane %v10796_v49, 4 }
 0x257   : > { %v888_v55 = vadd.f32 %v887_v52, %v751_v28  ;;  %v889_v56 = vpop.f32.mrb[6].mxu0  ;;  %v1073_v62 = vrot.slane %v10803_v53, 4  ;;  %v938_v43 = vpop.f32.mrb[4].mxu1 }
 0x258   : > { %v890_v58 = vadd.f32 %v889_v56, %v747_v26  ;;  %v891_v59 = vpop.f32.mrb[7].mxu0  ;;  %v939_v45 = vadd.f32 %v938_v43, %v10781_v29  ;;  %v940_v46 = vpop.f32.mrb[5].mxu1 }
 0x259   : > { %v892_v61 = vadd.f32 %v891_v59, %v751_v28  ;;  %1064 = vrot.lane.b32.xlu1 %v10796_v49, %s10268_s15  ;;  %v941_v48 = vadd.f32 %v940_v46, %v10785_v31  ;;  %v942_v50 = vpop.f32.mrb[6].mxu1 }
 0x25a   : > { %v10811_v63 = vpack.c.bf16 %v890_v58, %v886_v51  ;;  %1057 = vrot.lane.b32.xlu0 %v1054_v60, %s10269_s29  ;;  %v943_v51 = vadd.f32 %v942_v50, %v10781_v29  ;;  %v944_v52 = vpop.f32.mrb[7].mxu1 }
 0x25b   : > { %v10819_v3 = vpack.c.bf16 %v892_v61, %v888_v55  ;;  %v945_v54 = vadd.f32 %v944_v52, %v10785_v31 }
 0x25c   : > { %v10881_v55 = vpack.c.bf16 %v943_v51, %v939_v45  ;;  %v10916_v51 = vld [vmem:[#allocation7 + $0x20] sm:$0xff] }
 0x25d   : > { %v981_v5 = vpop.f32.mrb[8].mxu0  ;;  %1075 = vrot.lane.b32.xlu1 %v1073_v62, %s10269_s29  ;;  %v10883_v56 = vpack.c.bf16 %v945_v54, %v941_v48 }
 0x25e   : > { %v982_v6 = vadd.f32 %v981_v5, %v10816_v1  ;;  %v983_v7 = vpop.f32.mrb[9].mxu0  ;;  %1069 = vrot.lane.b32.xlu0 %v1068_v2, %s10270_s3 }
 0x25f   : > { %v984_v8 = vadd.f32 %v983_v7, %v10821_v4  ;;  %v985_v9 = vpop.f32.mrb[10].mxu0 }
 0x260   : > { %v986_v10 = vadd.f32 %v985_v9, %v10816_v1  ;;  %v987_v11 = vpop.f32.mrb[11].mxu0  ;;  %v10899_v9 = vld [vmem:[#allocation7] sm:$0xff] }
 0x261   : > { %v988_v12 = vadd.f32 %v987_v11, %v10821_v4 }
 0x262   : > { %v10833_v13 = vpack.c.bf16 %v986_v10, %v982_v6 }
 0x263   : > { %v10835_v14 = vpack.c.bf16 %v988_v12, %v984_v8 }
 0x264   : > { %1081 = vrot.lane.b32.xlu1 %v10833_v13, %s10268_s15  ;;  %v1074_v15 = vrot.slane %v10833_v13, 4 }
 0x265   : > { %v1086_v16 = vrot.slane %v10835_v14, 4 }
 0x266   : > { %1077 = vrot.lane.b32.xlu0 %v1074_v15, %s10269_s29 }
 0x268   : > { %1087 = vrot.lane.b32.xlu1 %v1086_v16, %s10270_s3 }
 0x26a   : > { %1083 = vrot.lane.b32.xlu0 %v10835_v14, %s10268_s15 }
 0x2c7   : > { %v1063_v17 = vpop.permute.xlu1 %1062 }
 0x2c8   : > { %v1056_v18 = vpop.permute.xlu0 %1055 }
 0x2cb   : > { %v1065_v22 = vpop.permute.xlu1 %1064 }
 0x2cc   : > { %v1058_v19 = vpop.permute.xlu0 %1057  ;;  %v1067_v28 = vsel %vm1066_vm2, %v1063_v17, %v1065_v22 }
 0x2cd   : > { %v1060_v26 = vsel %vm834_vm0, %v1056_v18, %v1058_v19  ;;  %v10901_v18 = vld [vmem:[#allocation7 + $0x8] sm:$0xff]  ;;  %v10903_v19 = vld [vmem:[#allocation7 + $0x10] sm:$0xff] }
 0x2ce   : > { %v10852_v27 = vsel %vm1089_vm1, %v10788_v41, %v1060_v26 }
 0x2cf   : > { %1106 = vrot.lane.b32.xlu0 %v10852_v27, %s10270_s3  ;;  %8434 = vmatprep.mubr.msk.bf16.mxu1 %vm834_vm0, %v10852_v27  ;;  %v1076_v32 = vpop.permute.xlu1 %1075 }
 0x2d0   : > { %v1070_v30 = vpop.permute.xlu0 %1069 }
 0x2d1   : > { %v10860_v33 = vsel %vm1089_vm1, %v1067_v28, %v1070_v30 }
 0x2d2   : > { %1108 = vrot.lane.b32.xlu1 %v10860_v33, %s10270_s3 }
 0x2d6   : > { %v1082_v34 = vpop.permute.xlu1 %1081 }
 0x2d8   : > { %v1078_v35 = vpop.permute.xlu0 %1077 }
 0x2d9   : > { %v1079_v36 = vsel %vm834_vm0, %v1076_v32, %v1078_v35  ;;  %v10909_v35 = vld [vmem:[#allocation7 + $0x18] sm:$0xff] }
 0x2da   : > { %v10867_v37 = vsel %vm1089_vm1, %v10803_v53, %v1079_v36  ;;  %v1088_v39 = vpop.permute.xlu1 %1087 }
 0x2db   : > { %1110 = vrot.lane.b32.xlu0 %v10867_v37, %s10270_s3 }
 0x2dc   : > { %v1084_v38 = vpop.permute.xlu0 %1083 }
 0x2dd   : > { %v1085_v40 = vsel %vm1066_vm2, %v1082_v34, %v1084_v38 }
 0x2de   : > { %v10873_v42 = vsel %vm1089_vm1, %v1085_v40, %v1088_v39  ;;  %v10912_v39 = vld [vmem:[#allocation7 + $0x30] sm:$0xff] }
 0x2df   : > { %1112 = vrot.lane.b32.xlu1 %v10873_v42, %s10270_s3 }
 0x341   : > { %v1107_v57 = vpop.permute.xlu0 %1106 }
 0x342   : > { %9214 = vmatprep.subr.msk.bf16.mxu1 %vm834_vm0, %v1107_v57  ;;  %v1123_v58 = vsel %vm834_vm0, %v1107_v57, 0 }
 0x343   : > { %8427 = vmatpush3.bf16.xpose.msra.mxu1 %v1123_v58  ;;  %v10919_v58 = vld [vmem:[#allocation7 + $0x38] sm:$0xff] }
 0x344   : > { %v1109_v59 = vpop.permute.xlu1 %1108 }
 0x345   : > { %9215 = vmatprep.subr.msk.bf16.mxu1 %vm834_vm0, %v1109_v59  ;;  %v1126_v61 = vsel %vm834_vm0, %v1109_v59, 0 }
 0x34b   : > { %8429 = vmatpush3.bf16.xpose.msra.mxu1 %v1126_v61 }
 0x34d   : > { %v1111_v29 = vpop.permute.xlu0 %1110 }
 0x34e   : > { %9216 = vmatprep.subr.msk.bf16.mxu1 %vm834_vm0, %v1111_v29  ;;  %v1129_v31 = vsel %vm834_vm0, %v1111_v29, 0 }
 0x351   : > { %v1113_v5 = vpop.permute.xlu1 %1112 }
 0x352   : > { %v1132_v6 = vsel %vm834_vm0, %v1113_v5, 0 }
 0x353   : > { %8431 = vmatpush3.bf16.xpose.msra.mxu1 %v1129_v31 }
 0x354   : > { %9217 = vmatprep.subr.msk.bf16.mxu1 %vm834_vm0, %v1113_v5 }
 0x35b   : > { %8433 = vmatpush3.bf16.xpose.msra.mxu1 %v1132_v6  ;;  %v10925_v6 = vld [vmem:[#allocation7 + $0x28] sm:$0xff] }
 0x362   : > { %8435 = vmatmul.mubr.msk.bf16.vlgmr.msra.gmra.mrb[8].mxu1 %vm834_vm0, %v10860_v33 }
 0x363   : > { %8438 = vmatprep.mubr.msk.bf16.mxu1 %vm834_vm0, %v10867_v37 }
 0x36a   : > { %8439 = vmatmul.mubr.msk.bf16.gmra.mrb[12].mxu1 %vm834_vm0, %v10873_v42 }
 0x435   : > { %v8436_v7 = vpop.f32.mrb[8].mxu1 }
 0x436   : > { %v1168_v8 = vpop.f32.mrb[9].mxu1  ;;  %v1201_v10 = vmul.f32 0.0625, %v8436_v7 }
 0x437   : > { %v1199_v11 = vmul.f32 0.0625, %v1168_v8  ;;  %v8437_v12 = vpop.f32.mrb[10].mxu1 }
 0x438   : > { %v1171_v17 = vpop.f32.mrb[11].mxu1  ;;  %v1202_v28 = vmul.f32 0.0625, %v8437_v12  ;;  %v1209_v34 = vadd.f32 %v1201_v10, %v10903_v19 }
 0x439   : > { %v1200_v22 = vmul.f32 0.0625, %v1171_v17  ;;  %v1207_v26 = vadd.f32 %v1199_v11, %v10899_v9 }
 0x43a   : > { %v1222_v48 = vsel %vm1066_vm2, %v1209_v34, -inf  ;;  %v1210_v50 = vadd.f32 %v1202_v28, %v10909_v35 }
 0x43b   : > { %v1216_v30 = vsel %vm1066_vm2, %v1207_v26, -inf  ;;  %v1208_v32 = vadd.f32 %v1200_v22, %v10901_v18 }
 0x43c   : > { %1217 = vmax.xlane.f32.xlu0 %v1216_v30  ;;  %v1225_v31 = vsel %vm1066_vm2, %v1210_v50, -inf }
 0x43d   : > { %v8440_v36 = vpop.f32.mrb[12].mxu1  ;;  %v1219_v38 = vsel %vm1066_vm2, %v1208_v32, -inf }
 0x43e   : > { %v1205_v40 = vmul.f32 0.0625, %v8440_v36  ;;  %1220 = vmax.xlane.f32.xlu1 %v1219_v38  ;;  %v1184_v43 = vpop.f32.mrb[13].mxu1 }
 0x43f   : > { %v1203_v45 = vmul.f32 0.0625, %v1184_v43  ;;  %v8441_v46 = vpop.f32.mrb[14].mxu1 }
 0x440   : > { %v1206_v52 = vmul.f32 0.0625, %v8441_v46  ;;  %1223 = vmax.xlane.f32.xlu0 %v1222_v48  ;;  %v1187_v54 = vpop.f32.mrb[15].mxu1  ;;  %v1213_v57 = vadd.f32 %v1205_v40, %v10912_v39 }
 0x441   : > { %v1211_v61 = vadd.f32 %v1203_v45, %v10916_v51  ;;  %v1204_v29 = vmul.f32 0.0625, %v1187_v54 }
 0x442   : > { %v1234_v59 = vsel %vm1066_vm2, %v1213_v57, -inf  ;;  %v1214_v5 = vadd.f32 %v1206_v52, %v10919_v58 }
 0x443   : > { %1235 = vmax.xlane.f32.xlu1 %v1234_v59  ;;  %v1228_v7 = vsel %vm1066_vm2, %v1211_v61, -inf  ;;  %v1212_v10 = vadd.f32 %v1204_v29, %v10925_v6 }
 0x444   : > { %1226 = vmax.xlane.f32.xlu0 %v1225_v31  ;;  %v1237_v8 = vsel %vm1066_vm2, %v1214_v5, -inf }
 0x445   : > { %v1231_v11 = vsel %vm1066_vm2, %v1212_v10, -inf }
 0x447   : > { %1229 = vmax.xlane.f32.xlu1 %v1228_v7 }
 0x448   : > { %1238 = vmax.xlane.f32.xlu0 %v1237_v8 }
 0x44c   : > { %1232 = vmax.xlane.f32.xlu0 %v1231_v11 }
 0x458   : > { %1308 = vrot.lane.b32.xlu1 %v10852_v27, %s10268_s15 }
 0x462   : > { %1310 = vrot.lane.b32.xlu0 %v10860_v33, %s10268_s15 }
 0x4c9   : > { %v1218_v12 = vpop.xlane.xlu0 %1217 }
 0x4ca   : > { %v1240_v22 = vsub.f32 %v1207_v26, %v1218_v12 }
 0x4cb   : > { %v1221_v17 = vpop.xlane.xlu1 %1220 }
 0x4cc   : > { %v1241_v36 = vsub.f32 %v1208_v32, %v1221_v17  ;;  %v1248_v38 = vmul.f32 1.442695, %v1240_v22 }
 0x4cd   : > { %v1224_v28 = vpop.xlane.xlu0 %1223 }
 0x4ce   : > { %v1242_v30 = vsub.f32 %v1209_v34, %v1224_v28  ;;  %v1250_v52 = vmul.f32 1.442695, %v1241_v36 }
 0x4d0   : > { %v1252_v40 = vmul.f32 1.442695, %v1242_v30  ;;  %v1236_v43 = vpop.xlane.xlu1 %1235 }
 0x4d1   : > { %v1246_v45 = vsub.f32 %v1213_v57, %v1236_v43  ;;  %v1227_v46 = vpop.xlane.xlu0 %1226 }
 0x4d2   : > { %9478 = vpow2.f32 %v1252_v40  ;;  %v1243_v48 = vsub.f32 %v1210_v50, %v1227_v46 }
 0x4d3   : > { %9480 = vpow2.f32 %v1248_v38  ;;  %v1260_v54 = vmul.f32 1.442695, %v1246_v45 }
 0x4d4   : > { %v1254_v27 = vmul.f32 1.442695, %v1243_v48  ;;  %v1230_v59 = vpop.xlane.xlu1 %1229 }
 0x4d5   : > { %v1244_v29 = vsub.f32 %v1211_v61, %v1230_v59  ;;  %v1239_v33 = vpop.xlane.xlu0 %1238 }
 0x4d6   : > { %9482 = vpow2.f32 %v1254_v27  ;;  %v1247_v34 = vsub.f32 %v1214_v5, %v1239_v33 }
 0x4d7   : > { %9484 = vpow2.f32 %v1250_v52  ;;  %v1256_v26 = vmul.f32 1.442695, %v1244_v29 }
 0x4d8   : > { %9486 = vpow2.f32 %v1260_v54  ;;  %v1309_v32 = vpop.permute.xlu1 %1308  ;;  %v1262_v50 = vmul.f32 1.442695, %v1247_v34 }
 0x4d9   : > { %8442 = vmatprep.subr.bf16.mxu0 %v1309_v32  ;;  %v1233_v31 = vpop.xlane.xlu0 %1232  ;;  %9488 = vpow2.f32 %v1256_v26 }
 0x4da   : > { %8443 = vmatpush3.bf16.msra.mxu0 %v1309_v32  ;;  %v1245_v7 = vsub.f32 %v1212_v10, %v1233_v31  ;;  %9490 = vpow2.f32 %v1262_v50 }
 0x4dc   : > { %v10935_v57 = vpop.eup %9478  ;;  %v1258_v5 = vmul.f32 1.442695, %v1245_v7 }
 0x4dd   : > { %v1311_v8 = vpop.permute.xlu0 %1310  ;;  %v1270_v11 = vsel %vm1066_vm2, %v10935_v57, 0.0  ;;  %v10939_v61 = vpop.eup %9480 }
 0x4de   : > { %1271 = vadd.xlane.f32.xlu1 %v1270_v11  ;;  %8444 = vmatprep.subr.bf16.mxu0 %v1311_v8  ;;  %v1264_v22 = vsel %vm1066_vm2, %v10939_v61, 0.0  ;;  %9492 = vpow2.f32 %v1258_v5 }
 0x4df   : > { %8445 = vmatpush3.bf16.msra.mxu0 %v1311_v8 }
 0x4e0   : > { %v10941_v12 = vpop.eup %9482 }
 0x4e1   : > { %v9485_v17 = vpop.eup %9484  ;;  %v1273_v10 = vsel %vm1066_vm2, %v10941_v12, 0.0 }
 0x4e2   : > { %v10947_v28 = vpop.eup %9486  ;;  %1265 = vadd.xlane.f32.xlu1 %v1264_v22  ;;  %1274 = vadd.xlane.f32.xlu0 %v1273_v10  ;;  %v1267_v36 = vsel %vm1066_vm2, %v9485_v17, 0.0  ;;  %v11004_v22 = vld [vmem:[#allocation16 + $0x10] sm:$0xff]  }
 0x4e3   : > { %v1282_v30 = vsel %vm1066_vm2, %v10947_v28, 0.0  ;;  %v10952_v38 = vpop.eup %9488 }
 0x4e4   : > { %v1276_v40 = vsel %vm1066_vm2, %v10952_v38, 0.0  ;;  %v10956_v43 = vpop.eup %9490 }
 0x4e5   : > { %v1285_v45 = vsel %vm1066_vm2, %v10956_v43, 0.0 }
 0x4e6   : > { %1283 = vadd.xlane.f32.xlu1 %v1282_v30  ;;  %1268 = vadd.xlane.f32.xlu0 %v1267_v36  ;;  %v991_v30 = vpop.f32.mrb[12].mxu0  ;;  %v10271_v36 = vmov 0.0  }
 0x4e7   : > { %8466 = vmatprep.subr.bf16.mxu1 %v10271_v36  ;;  %8470 = vmatprep.mubr.msk.bf16.mxu1 %vm10272_vm3, %v10271_v36 }
 0x4e8   : > { %v10960_v46 = vpop.eup %9492 }
 0x4e9   : > { %v1279_v48 = vsel %vm1066_vm2, %v10960_v46, 0.0 }
 0x4ea   : > { %1277 = vadd.xlane.f32.xlu0 %v1276_v40 }
 0x4ee   : > { %1286 = vadd.xlane.f32.xlu0 %v1285_v45  ;;  %v992_v45 = vadd.f32 %v991_v30, %v10816_v1  ;;  %v11074_v30 = vld [vmem:[#allocation16 + $0x28] sm:$0xff]  }
 0x4f2   : > { %1280 = vadd.xlane.f32.xlu0 %v1279_v48  ;;  %v993_v48 = vpop.f32.mrb[13].mxu0 }
 0x4f7   : > { %1312 = vrot.lane.b32.xlu1 %v10867_v37, %s10268_s15 }
 0x4fb   : > { %1855 = vrot.lane.b32.xlu1 %v10788_v41, %s10269_s29 }
 0x4ff   : > { %1857 = vrot.lane.b32.xlu1 %v10791_v44, %s10269_s29 }
 0x503   : > { %1860 = vrot.lane.b32.xlu1 %v1054_v60, %s10268_s15 }
 0x507   : > { %1862 = vrot.lane.b32.xlu1 %v1068_v2, %s10268_s15 }
 0x508   : > { %1314 = vrot.lane.b32.xlu0 %v10873_v42, %s10268_s15 }
 0x50b   : > { %1867 = vrot.lane.b32.xlu1 %v10803_v53, %s10269_s29 }
 0x50c   : > { %1865 = vrot.lane.b32.xlu0 %v10796_v49, %s10270_s3 }
 0x50f   : > { %1872 = vrot.lane.b32.xlu1 %v1074_v15, %s10268_s15 }
 0x510   : > { %1869 = vrot.lane.b32.xlu0 %v10833_v13, %s10269_s29 }
 0x513   : > { %1877 = vrot.lane.b32.xlu1 %v10835_v14, %s10270_s3 }
 0x514   : > { %1874 = vrot.lane.b32.xlu0 %v1086_v16, %s10268_s15 }
 0x56b   : > { %v1272_v44 = vpop.xlane.xlu1 %1271 }
 0x56f   : > { %v1266_v60 = vpop.xlane.xlu1 %1265  ;;  %v1275_v2 = vpop.xlane.xlu0 %1274 }
 0x570   : > { %9494 = vrcp.f32 %v1266_v60 }
 0x571   : > { %9496 = vrcp.f32 %v1275_v2 }
 0x573   : > { %v1284_v37 = vpop.xlane.xlu1 %1283  ;;  %v1269_v49 = vpop.xlane.xlu0 %1268 }
 0x574   : > { %9498 = vrcp.f32 %v1269_v49 }
 0x575   : > { %9500 = vrcp.f32 %v1272_v44 }
 0x577   : > { %v1313_v15 = vpop.permute.xlu1 %1312  ;;  %v1278_v42 = vpop.xlane.xlu0 %1277 }
 0x578   : > { %8446 = vmatprep.subr.bf16.mxu0 %v1313_v15  ;;  %9502 = vrcp.f32 %v1278_v42 }
 0x579   : > { %8447 = vmatpush3.bf16.msra.mxu0 %v1313_v15 }
 0x57a   : > { %v9495_v54 = vpop.eup %9494 }
 0x57b   : > { %v1856_v13 = vpop.permute.xlu1 %1855  ;;  %v1287_v52 = vpop.xlane.xlu0 %1286  ;;  %v1296_v33 = vmul.f32 %v9495_v54, %v10939_v61 }
 0x57c   : > { %9504 = vrcp.f32 %v1287_v52  ;;  %v9497_v14 = vpop.eup %9496 }
 0x57d   : > { %9506 = vrcp.f32 %v1284_v37  ;;  %v1299_v31 = vmul.f32 %v9497_v14, %v10941_v12  ;;  %v11006_v12 = vld [vmem:[#allocation16] sm:$0xff]   ;;  %v995_v37 = vpop.f32.mrb[14].mxu0 }
 0x57e   : > { %v9499_v16 = vpop.eup %9498  ;;  %8467 = vmatpush3.bf16.msra.mxu1 %v11006_v12  ;;  %v996_v52 = vadd.f32 %v995_v37, %v10816_v1  ;;  %v11084_v37 = vld [vmem:[#allocation16 + $0x40] sm:$0xff]  }
 0x57f   : > { %v1858_v27 = vpop.permute.xlu1 %1857  ;;  %v1281_v59 = vpop.xlane.xlu0 %1280  ;;  %v1297_v26 = vmul.f32 %v9499_v16, %v9485_v17  ;;  %8468 = vmatprep.subr.bf16.mxu1 %v10271_v36 }
 0x580   : > { %v1859_v29 = vsel %vm834_vm0, %v1856_v13, %v1858_v27  ;;  %9508 = vrcp.f32 %v1281_v59  ;;  %v9501_v34 = vpop.eup %9500  ;;  %v994_v13 = vadd.f32 %v993_v48, %v10821_v4 }
 0x581   : > { %v10997_v32 = vsel %vm1089_vm1, %v1053_v47, %v1859_v29  ;;  %v1304_v50 = vpack.c.bf16 %v1297_v26, %v1296_v33  ;;  %v1298_v11 = vmul.f32 %v9501_v34, %v10935_v57  ;;  %v11051_v26 = vld [vmem:[#allocation16 + $0x8] sm:$0xff]  }
 0x582   : > { %1895 = vrot.lane.b32.xlu0 %v10997_v32, %s10270_s3  ;;  %v9503_v61 = vpop.eup %9502  ;;  %8469 = vmatpush3.bf16.msra.mxu1 %v11051_v26 }
 0x583   : > { %v1861_v7 = vpop.permute.xlu1 %1860  ;;  %v1315_v8 = vpop.permute.xlu0 %1314  ;;  %8450 = vmatprep.mubr.msk.bf16.mxu0 %vm1066_vm2, %v1304_v50  ;;  %v1305_v5 = vpack.c.bf16 %v1299_v31, %v1298_v11  ;;  %v1300_v60 = vmul.f32 %v9503_v61, %v10952_v38  ;;  %8482 = vmatprep.subr.bf16.mxu1 %v10271_v36  ;;  %v11061_v11 = vld [vmem:[#allocation16 + $0x30] sm:$0xff]  }
 0x584   : > { %8448 = vmatprep.subr.bf16.mxu0 %v1315_v8 }
 0x585   : > { %8449 = vmatpush3.bf16.msra.mxu0 %v1315_v8 }
 0x586   : > { %v9505_v41 = vpop.eup %9504  ;;  %8458 = vmatprep.subr.bf16.mxu0 %v10271_v36 }
 0x587   : > { %v1863_v17 = vpop.permute.xlu1 %1862  ;;  %v1866_v47 = vpop.permute.xlu0 %1865  ;;  %v1303_v2 = vmul.f32 %v9505_v41, %v10956_v43 }
 0x588   : > { %v1864_v10 = vsel %vm1066_vm2, %v1861_v7, %v1863_v17  ;;  %8451 = vmatmul.mubr.msk.bf16.vlgmr.msra.gmra.mrb[16].mxu0 %vm1066_vm2, %v1305_v5  ;;  %v9507_v57 = vpop.eup %9506  ;;  %v997_v43 = vpop.f32.mrb[15].mxu0  ;;  %v11063_v5 = vld [vmem:[#allocation16 + $0x20] sm:$0xff]   ;;  %v11067_v17 = vld [vmem:[#allocation16 + $0x38] sm:$0xff]  }
 0x589   : > { %v11012_v40 = vsel %vm1089_vm1, %v1864_v10, %v1866_v47  ;;  %8459 = vmatpush3.bf16.msra.mxu0 %v11004_v22  ;;  %v1302_v38 = vmul.f32 %v9507_v57, %v10947_v28  ;;  %v998_v27 = vadd.f32 %v997_v43, %v10821_v4  ;;  %v11049_v4 = vld [vmem:[#allocation16 + $0x18] sm:$0xff]  }
 0x58a   : > { %v9509_v44 = vpop.eup %9508  ;;  %1897 = vrot.lane.b32.xlu1 %v11012_v40, %s10270_s3  ;;  %8460 = vmatprep.subr.bf16.mxu0 %v10271_v36 }
 0x58b   : > { %v1868_v49 = vpop.permute.xlu1 %1867  ;;  %v1870_v15 = vpop.permute.xlu0 %1869  ;;  %v1301_v42 = vmul.f32 %v9509_v44, %v10960_v46  ;;  %v11034_v46 = vpack.c.bf16 %v996_v52, %v992_v45  ;;  %v1307_v1 = vpack.c.bf16 %v1303_v2, %v1302_v38  ;;  %v11040_v29 = vpack.c.bf16 %v998_v27, %v994_v13  ;;  %v11080_v44 = vld [vmem:[#allocation16 + $0x50] sm:$0xff]   ;;  %v11106_v52 = vld [vmem:[#allocation16 + $0x60] sm:$0xff]   ;;  %v11118_v38 = vld [vmem:[#allocation16 + $0x68] sm:$0xff]  }
 0x58c   : > { %v1871_v54 = vsel %vm834_vm0, %v1868_v49, %v1870_v15  ;;  %v11089_v49 = vld [vmem:[#allocation16 + $0x58] sm:$0xff]   ;;  %v11096_v15 = vld [vmem:[#allocation16 + $0x48] sm:$0xff]  }
 0x58d   : > { %v11032_v14 = vsel %vm1089_vm1, %v1073_v62, %v1871_v54  ;;  %v1306_v16 = vpack.c.bf16 %v1301_v42, %v1300_v60  ;;  %8461 = vmatpush3.bf16.msra.mxu0 %v11049_v4  ;;  %v11102_v42 = vld [vmem:[#allocation16 + $0x70] sm:$0xff]   ;;  %v11111_v54 = vld [vmem:[#allocation16 + $0x78] sm:$0xff]  }
 0x58e   : > { %1899 = vrot.lane.b32.xlu0 %v11032_v14, %s10270_s3  ;;  %8474 = vmatprep.subr.bf16.mxu0 %v10271_v36 }
 0x58f   : > { %v1873_v59 = vpop.permute.xlu1 %1872  ;;  %8454 = vmatprep.mubr.msk.bf16.mxu0 %vm1066_vm2, %v1306_v16  ;;  %v1875_v28 = vpop.permute.xlu0 %1874 }
 0x590   : > { %8455 = vmatmul.mubr.msk.bf16.gmra.mrb[20].mxu0 %vm1066_vm2, %v1307_v1  ;;  %v1876_v53 = vsel %vm1066_vm2, %v1873_v59, %v1875_v28 }
 0x591   : > { %8462 = vmatprep.mubr.msk.bf16.mxu0 %vm10272_vm3, %v10271_v36 }
 0x593   : > { %v1878_v62 = vpop.permute.xlu1 %1877 }
 0x594   : > { %v11045_v33 = vsel %vm1089_vm1, %v1876_v53, %v1878_v62 }
 0x595   : > { %1901 = vrot.lane.b32.xlu1 %v11045_v33, %s10270_s3 }
 0x5f4   : > { %v1896_v16 = vpop.permute.xlu0 %1895 }
 0x5f5   : > { %v1912_v27 = vsel %vm834_vm0, %v1896_v16, 0 }
 0x5fc   : > { %v1898_v1 = vpop.permute.xlu1 %1897 }
 0x5fd   : > { %v1915_v59 = vsel %vm834_vm0, %v1898_v1, 0 }
 0x600   : > { %v1900_v28 = vpop.permute.xlu0 %1899 }
 0x601   : > { %v1918_v53 = vsel %vm834_vm0, %v1900_v28, 0 }
 0x607   : > { %v1902_v62 = vpop.permute.xlu1 %1901 }
 0x65b   : > { %v8452_v34 = vpop.f32.mrb[16].mxu0 }
 0x65c   : > { %v1366_v31 = vpop.f32.mrb[17].mxu0 }
 0x65d   : > { %v8453_v50 = vpop.f32.mrb[18].mxu0 }
 0x65e   : > { %v1398_v7 = vpack.c.bf16 %v8453_v50, %v8452_v34  ;;  %v1369_v8 = vpop.f32.mrb[19].mxu0  ;;  %v1921_v34 = vsel %vm834_vm0, %v1902_v62, 0 }
 0x65f   : > { %v1397_v61 = vpack.c.bf16 %v1369_v8, %v1366_v31 }
 0x660   : > { %v1570_v60 = vrot.slane %v1398_v7, 4 }
 0x661   : > { %v1402_v41 = vrot.slane %v1397_v61, 4  ;;  %8471 = vmatmul.mubr.msk.bf16.vlgmr.msra.gmra.mrb[16].mxu1 %vm834_vm0, %v1397_v61 }
 0x662   : > { %8483 = vmatpush3.bf16.msra.mxu1 %v11061_v11  ;;  %8486 = vmatprep.mubr.msk.bf16.mxu1 %vm10272_vm3, %v10271_v36 }
 0x663   : > { %v8456_v47 = vpop.f32.mrb[20].mxu0  ;;  %8463 = vmatmul.mubr.msk.bf16.vlgmr.msra.gmra.mrb[24].mxu0 %vm834_vm0, %v1402_v41  ;;  %8484 = vmatprep.subr.bf16.mxu1 %v10271_v36 }
 0x664   : > { %8475 = vmatpush3.bf16.msra.mxu0 %v11063_v5  ;;  %v1382_v10 = vpop.f32.mrb[21].mxu0  ;;  %8478 = vmatprep.mubr.msk.bf16.mxu0 %vm10272_vm3, %v10271_v36 }
 0x665   : > { %v8457_v57 = vpop.f32.mrb[22].mxu0  ;;  %8476 = vmatprep.subr.bf16.mxu0 %v10271_v36 }
 0x666   : > { %v1400_v45 = vpack.c.bf16 %v8457_v57, %v8456_v47  ;;  %v1385_v48 = vpop.f32.mrb[23].mxu0  ;;  %8485 = vmatpush3.bf16.msra.mxu1 %v11067_v17 }
 0x667   : > { %v1399_v2 = vpack.c.bf16 %v1385_v48, %v1382_v10  ;;  %8498 = vmatprep.subr.bf16.mxu1 %v10271_v36 }
 0x668   : > { %8477 = vmatpush3.bf16.msra.mxu0 %v11074_v30  ;;  %v1798_v43 = vrot.slane %v1400_v45, 4 }
 0x669   : > { %8487 = vmatmul.mubr.msk.bf16.vlgmr.msra.gmra.mrb[20].mxu1 %vm834_vm0, %v1570_v60  ;;  %8490 = vmatprep.subr.bf16.mxu0 %v10271_v36  ;;  %v1684_v13 = vrot.slane %v1399_v2, 4 }
 0x66a   : > { %8499 = vmatpush3.bf16.msra.mxu1 %v11080_v44  ;;  %8502 = vmatprep.mubr.msk.bf16.mxu1 %vm10272_vm3, %v10271_v36 }
 0x66b   : > { %8479 = vmatmul.mubr.msk.bf16.vlgmr.msra.gmra.mrb[28].mxu0 %vm834_vm0, %v1398_v7  ;;  %8500 = vmatprep.subr.bf16.mxu1 %v10271_v36 }
 0x66c   : > { %8491 = vmatpush3.bf16.msra.mxu0 %v11084_v37  ;;  %8494 = vmatprep.mubr.msk.bf16.mxu0 %vm10272_vm3, %v10271_v36 }
 0x66d   : > { %8492 = vmatprep.subr.bf16.mxu0 %v10271_v36 }
 0x66e   : > { %8501 = vmatpush3.bf16.msra.mxu1 %v11089_v49 }
 0x66f   : > { %8514 = vmatprep.subr.bf16.mxu1 %v10271_v36 }
 0x670   : > { %8493 = vmatpush3.bf16.msra.mxu0 %v11096_v15 }
 0x671   : > { %8503 = vmatmul.mubr.msk.bf16.vlgmr.msra.gmra.mrb[24].mxu1 %vm834_vm0, %v1684_v13  ;;  %8506 = vmatprep.subr.bf16.mxu0 %v10271_v36 }
 0x672   : > { %8515 = vmatpush3.bf16.msra.mxu1 %v11102_v42  ;;  %8518 = vmatprep.mubr.msk.bf16.mxu1 %vm10272_vm3, %v10271_v36 }
 0x673   : > { %8495 = vmatmul.mubr.msk.bf16.vlgmr.msra.gmra.mrb[32].mxu0 %vm834_vm0, %v1399_v2  ;;  %8516 = vmatprep.subr.bf16.mxu1 %v10271_v36 }
 0x674   : > { %8507 = vmatpush3.bf16.msra.mxu0 %v11106_v52  ;;  %8510 = vmatprep.mubr.msk.bf16.mxu0 %vm10272_vm3, %v10271_v36 }
 0x675   : > { %8508 = vmatprep.subr.bf16.mxu0 %v10271_v36 }
 0x676   : > { %8517 = vmatpush3.bf16.msra.mxu1 %v11111_v54 }
 0x678   : > { %8509 = vmatpush3.bf16.msra.mxu0 %v11118_v38 }
 0x679   : > { %9218 = vmatprep.subr.msk.bf16.mxu0 %vm834_vm0, %v1896_v16  ;;  %8519 = vmatmul.mubr.msk.bf16.vlgmr.msra.gmra.mrb[28].mxu1 %vm834_vm0, %v1798_v43 }
 0x67b   : > { %8511 = vmatmul.mubr.msk.bf16.vlgmr.msra.gmra.mrb[36].mxu0 %vm834_vm0, %v1400_v45 }
 0x67c   : > { %8530 = vmatprep.mubr.msk.bf16.mxu0 %vm834_vm0, %v10997_v32 }
 0x681   : > { %8523 = vmatpush3.bf16.xpose.msra.mxu0 %v1912_v27 }
 0x682   : > { %9219 = vmatprep.subr.msk.bf16.mxu0 %vm834_vm0, %v1898_v1 }
 0x689   : > { %8525 = vmatpush3.bf16.xpose.msra.mxu0 %v1915_v59 }
 0x68a   : > { %9220 = vmatprep.subr.msk.bf16.mxu0 %vm834_vm0, %v1900_v28 }
 0x691   : > { %8527 = vmatpush3.bf16.xpose.msra.mxu0 %v1918_v53 }
 0x692   : > { %9221 = vmatprep.subr.msk.bf16.mxu0 %vm834_vm0, %v1902_v62 }
 0x699   : > { %8529 = vmatpush3.bf16.xpose.msra.mxu0 %v1921_v34 }
 0x69a   : > { %8570 = vmatprep.subr.bf16.mxu0 %v10271_v36 }
 0x6a0   : > { %8531 = vmatmul.mubr.msk.bf16.vlgmr.msra.gmra.mrb[40].mxu0 %vm834_vm0, %v11012_v40 }
 0x6a1   : > { %8534 = vmatprep.mubr.msk.bf16.mxu0 %vm834_vm0, %v11032_v14  ;;  %8571 = vmatpush3.bf16.msra.mxu0 %v11063_v5 }
 0x6a2   : > { %8572 = vmatprep.subr.bf16.mxu0 %v10271_v36 }
 0x6a5   : > { %8573 = vmatpush3.bf16.msra.mxu0 %v11074_v30 }
 0x6a6   : > { %8586 = vmatprep.subr.bf16.mxu0 %v10271_v36 }
 0x6a8   : > { %8535 = vmatmul.mubr.msk.bf16.gmra.mrb[44].mxu0 %vm834_vm0, %v11045_v33 }
 0x6a9   : > { %8574 = vmatprep.mubr.msk.bf16.mxu0 %vm10272_vm3, %v10271_v36 }
 0x734   : > { %v1507_v31 = vpop.f32.mrb[16].mxu1 }
 0x735   : > { %v8472_v50 = vpop.f32.mrb[17].mxu1 }
 0x736   : > { %v1452_v7 = vpop.f32.mrb[24].mxu0  ;;  %v1510_v8 = vpop.f32.mrb[18].mxu1 }
 0x737   : > { %v1508_v61 = vadd.f32 %v1507_v31, %v1452_v7  ;;  %v8464_v41 = vpop.f32.mrb[25].mxu0  ;;  %v8473_v47 = vpop.f32.mrb[19].mxu1 }
 0x738   : > { %v1455_v10 = vpop.f32.mrb[26].mxu0 }
 0x739   : > { %v8465_v57 = vpop.f32.mrb[27].mxu0 }
 0x73c   : > { %v1620_v45 = vpop.f32.mrb[20].mxu1 }
 0x73d   : > { %v8488_v48 = vpop.f32.mrb[21].mxu1 }
 0x73e   : > { %v1562_v60 = vpop.f32.mrb[28].mxu0  ;;  %v1623_v2 = vpop.f32.mrb[22].mxu1 }
 0x73f   : > { %v1568_v13 = vadd.f32 %v1562_v60, %v1508_v61  ;;  %v8480_v43 = vpop.f32.mrb[29].mxu0  ;;  %v8489_v16 = vpop.f32.mrb[23].mxu1 }
 0x740   : > { %v1565_v27 = vpop.f32.mrb[30].mxu0 }
 0x741   : > { %v8481_v1 = vpop.f32.mrb[31].mxu0  ;;  %v1626_v59 = vadd.f32 %v1620_v45, %v1568_v13 }
 0x744   : > { %v1734_v28 = vpop.f32.mrb[24].mxu1 }
 0x745   : > { %v8504_v53 = vpop.f32.mrb[25].mxu1 }
 0x746   : > { %v1676_v62 = vpop.f32.mrb[32].mxu0  ;;  %v1737_v34 = vpop.f32.mrb[26].mxu1 }
 0x747   : > { %v1682_v50 = vadd.f32 %v1676_v62, %v1626_v59  ;;  %v8496_v31 = vpop.f32.mrb[33].mxu0  ;;  %v8505_v7 = vpop.f32.mrb[27].mxu1 }
 0x748   : > { %v1679_v8 = vpop.f32.mrb[34].mxu0 }
 0x749   : > { %v8497_v41 = vpop.f32.mrb[35].mxu0  ;;  %v1740_v47 = vadd.f32 %v1734_v28, %v1682_v50 }
 0x74c   : > { %v1848_v10 = vpop.f32.mrb[28].mxu1 }
 0x74d   : > { %v8520_v57 = vpop.f32.mrb[29].mxu1 }
 0x74e   : > { %v1790_v48 = vpop.f32.mrb[36].mxu0  ;;  %v1851_v2 = vpop.f32.mrb[30].mxu1 }
 0x74f   : > { %v1796_v61 = vadd.f32 %v1790_v48, %v1740_v47  ;;  %v8512_v60 = vpop.f32.mrb[37].mxu0  ;;  %v8521_v43 = vpop.f32.mrb[31].mxu1 }
 0x750   : > { %v1793_v16 = vpop.f32.mrb[38].mxu0 }
 0x751   : > { %v11150_v27 = vadd.f32 %v1848_v10, %v1796_v61  ;;  %v8513_v45 = vpop.f32.mrb[39].mxu0 }
 0x773   : > { %v8532_v13 = vpop.f32.mrb[40].mxu0 }
 0x774   : > { %v1957_v1 = vpop.f32.mrb[41].mxu0  ;;  %v1990_v53 = vmul.f32 0.0625, %v8532_v13 }
 0x775   : > { %v1988_v59 = vmul.f32 0.0625, %v1957_v1  ;;  %v8533_v62 = vpop.f32.mrb[42].mxu0 }
 0x776   : > { %v1960_v34 = vpop.f32.mrb[43].mxu0  ;;  %v1991_v50 = vmul.f32 0.0625, %v8533_v62  ;;  %v1998_v41 = vadd.f32 %v1990_v53, %v10903_v19 }
 0x777   : > { %v1989_v31 = vmul.f32 0.0625, %v1960_v34  ;;  %v1996_v28 = vadd.f32 %v1988_v59, %v10899_v9 }
 0x778   : > { %v1999_v48 = vadd.f32 %v1991_v50, %v10909_v35  ;;  %v2010_v9 = vsel %vm1066_vm2, %v1998_v41, -inf }
 0x779   : > { %v2004_v7 = vsel %vm1066_vm2, %v1996_v28, -inf  ;;  %v1997_v8 = vadd.f32 %v1989_v31, %v10901_v18 }
 0x77a   : > { %2005 = vmax.xlane.f32.xlu0 %v2004_v7  ;;  %v2013_v19 = vsel %vm1066_vm2, %v1999_v48, -inf }
 0x77b   : > { %v8536_v47 = vpop.f32.mrb[44].mxu0  ;;  %v2007_v10 = vsel %vm1066_vm2, %v1997_v8, -inf }
 0x77c   : > { %2008 = vmax.xlane.f32.xlu1 %v2007_v10  ;;  %v1973_v57 = vpop.f32.mrb[45].mxu0  ;;  %v1994_v2 = vmul.f32 0.0625, %v8536_v47 }
 0x77d   : > { %v1992_v61 = vmul.f32 0.0625, %v1973_v57  ;;  %v8537_v60 = vpop.f32.mrb[46].mxu0 }
 0x77e   : > { %2011 = vmax.xlane.f32.xlu0 %v2010_v9  ;;  %v1976_v43 = vpop.f32.mrb[47].mxu0  ;;  %v1995_v45 = vmul.f32 0.0625, %v8537_v60  ;;  %v2002_v1 = vadd.f32 %v1994_v2, %v10912_v39 }
 0x77f   : > { %v1993_v16 = vmul.f32 0.0625, %v1976_v43  ;;  %v2000_v18 = vadd.f32 %v1992_v61, %v10916_v51 }
 0x780   : > { %v2022_v35 = vsel %vm1066_vm2, %v2002_v1, -inf  ;;  %v2003_v62 = vadd.f32 %v1995_v45, %v10919_v58 }
 0x781   : > { %v2016_v13 = vsel %vm1066_vm2, %v2000_v18, -inf  ;;  %v2001_v53 = vadd.f32 %v1993_v16, %v10925_v6 }
 0x782   : > { %2014 = vmax.xlane.f32.xlu0 %v2013_v19  ;;  %2017 = vmax.xlane.f32.xlu1 %v2016_v13  ;;  %v2025_v51 = vsel %vm1066_vm2, %v2003_v62, -inf }
 0x783   : > { %v2019_v59 = vsel %vm1066_vm2, %v2001_v53, -inf }
 0x786   : > { %2023 = vmax.xlane.f32.xlu1 %v2022_v35  ;;  %2020 = vmax.xlane.f32.xlu0 %v2019_v59 }
 0x78a   : > { %2026 = vmax.xlane.f32.xlu0 %v2025_v51 }
 0x797   : > { %2096 = vrot.lane.b32.xlu1 %v10997_v32, %s10268_s15 }
 0x807   : > { %v2006_v34 = vpop.xlane.xlu0 %2005 }
 0x808   : > { %v2028_v39 = vsub.f32 %v1996_v28, %v2006_v34 }
 0x809   : > { %v2009_v31 = vpop.xlane.xlu1 %2008 }
 0x80a   : > { %v2036_v7 = vmul.f32 1.442695, %v2028_v39  ;;  %v2029_v47 = vsub.f32 %v1997_v8, %v2009_v31 }
 0x80b   : > { %v2012_v6 = vpop.xlane.xlu0 %2011 }
 0x80c   : > { %v2030_v50 = vsub.f32 %v1998_v41, %v2012_v6  ;;  %v2038_v61 = vmul.f32 1.442695, %v2029_v47 }
 0x80e   : > { %v2040_v10 = vmul.f32 1.442695, %v2030_v50 }
 0x80f   : > { %v2015_v57 = vpop.xlane.xlu0 %2014  ;;  %v2018_v2 = vpop.xlane.xlu1 %2017 }
 0x810   : > { %9510 = vpow2.f32 %v2040_v10  ;;  %v2031_v58 = vsub.f32 %v1999_v48, %v2015_v57  ;;  %v2032_v9 = vsub.f32 %v2000_v18, %v2018_v2 }
 0x811   : > { %9512 = vpow2.f32 %v2036_v7 }
 0x812   : > { %v2042_v60 = vmul.f32 1.442695, %v2031_v58  ;;  %v2044_v28 = vmul.f32 1.442695, %v2032_v9  ;;  %v2550_v58 = vrot.slane %v10819_v3, 4 }
 0x813   : > { %v2024_v43 = vpop.xlane.xlu1 %2023  ;;  %v2021_v16 = vpop.xlane.xlu0 %2020 }
 0x814   : > { %9514 = vpow2.f32 %v2042_v60  ;;  %v2034_v32 = vsub.f32 %v2002_v1, %v2024_v43  ;;  %v2033_v45 = vsub.f32 %v2001_v53, %v2021_v16  ;;  %v2568_v60 = vrot.slane %v11034_v46, 4 }
 0x815   : > { %9516 = vpow2.f32 %v2038_v61  ;;  %v2549_v61 = vrot.slane %v10811_v63, 4 }
 0x816   : > { %v2048_v19 = vmul.f32 1.442695, %v2034_v32  ;;  %v2046_v48 = vmul.f32 1.442695, %v2033_v45 }
 0x817   : > { %v2097_v41 = vpop.permute.xlu1 %2096  ;;  %v2027_v13 = vpop.xlane.xlu0 %2026 }
 0x818   : > { %9518 = vpow2.f32 %v2048_v19  ;;  %v2035_v8 = vsub.f32 %v2003_v62, %v2027_v13  ;;  %8538 = vmatprep.subr.bf16.mxu1 %v2097_v41 }
 0x819   : > { %8539 = vmatpush3.bf16.msra.mxu1 %v2097_v41  ;;  %9520 = vpow2.f32 %v2044_v28 }
 0x81a   : > { %v11170_v35 = vpop.eup %9510  ;;  %v2050_v59 = vmul.f32 1.442695, %v2035_v8 }
 0x81b   : > { %v2058_v18 = vsel %vm1066_vm2, %v11170_v35, 0.0  ;;  %v11174_v51 = vpop.eup %9512 }
 0x81c   : > { %9522 = vpow2.f32 %v2050_v59  ;;  %2059 = vadd.xlane.f32.xlu1 %v2058_v18  ;;  %v2052_v53 = vsel %vm1066_vm2, %v11174_v51, 0.0 }
 0x81d   : > { %9524 = vpow2.f32 %v2046_v48 }
 0x81e   : > { %v11176_v1 = vpop.eup %9514 }
 0x81f   : > { %v2061_v62 = vsel %vm1066_vm2, %v11176_v1, 0.0  ;;  %v9517_v34 = vpop.eup %9516 }
 0x820   : > { %2053 = vadd.xlane.f32.xlu1 %v2052_v53  ;;  %2062 = vadd.xlane.f32.xlu0 %v2061_v62  ;;  %v2055_v6 = vsel %vm1066_vm2, %v9517_v34, 0.0 }
 0x822   : > { %v11182_v39 = vpop.eup %9518 }
 0x823   : > { %v2070_v31 = vsel %vm1066_vm2, %v11182_v39, 0.0  ;;  %v11187_v50 = vpop.eup %9520 }
 0x824   : > { %2071 = vadd.xlane.f32.xlu1 %v2070_v31  ;;  %2056 = vadd.xlane.f32.xlu0 %v2055_v6  ;;  %v2064_v47 = vsel %vm1066_vm2, %v11187_v50, 0.0 }
 0x826   : > { %v11189_v7 = vpop.eup %9522 }
 0x827   : > { %v2073_v10 = vsel %vm1066_vm2, %v11189_v7, 0.0  ;;  %v11195_v57 = vpop.eup %9524 }
 0x828   : > { %2065 = vadd.xlane.f32.xlu1 %v2064_v47  ;;  %2074 = vadd.xlane.f32.xlu0 %v2073_v10  ;;  %v2067_v2 = vsel %vm1066_vm2, %v11195_v57, 0.0 }
 0x82c   : > { %2068 = vadd.xlane.f32.xlu0 %v2067_v2 }
 0x839   : > { %2100 = vrot.lane.b32.xlu1 %v11032_v14, %s10268_s15  ;;  %v2567_v14 = vrot.slane %v10883_v56, 4 }
 0x83d   : > { %2102 = vrot.lane.b32.xlu1 %v11045_v33, %s10268_s15  ;;  %v2580_v33 = vrot.slane %v11040_v29, 4 }
 0x841   : > { %2553 = vrot.lane.b32.xlu1 %v2550_v58, %s10269_s29 }
 0x842   : > { %2098 = vrot.lane.b32.xlu0 %v11012_v40, %s10268_s15  ;;  %v2562_v40 = vrot.slane %v10881_v55, 4 }
 0x845   : > { %2559 = vrot.lane.b32.xlu1 %v10881_v55, %s10268_s15 }
 0x846   : > { %2551 = vrot.lane.b32.xlu0 %v2549_v61, %s10269_s29 }
 0x849   : > { %2569 = vrot.lane.b32.xlu1 %v2567_v14, %s10269_s29 }
 0x84a   : > { %2557 = vrot.lane.b32.xlu0 %v10819_v3, %s10268_s15 }
 0x84d   : > { %2575 = vrot.lane.b32.xlu1 %v11034_v46, %s10268_s15 }
 0x84e   : > { %2563 = vrot.lane.b32.xlu0 %v2562_v40, %s10270_s3 }
 0x851   : > { %2581 = vrot.lane.b32.xlu1 %v2580_v33, %s10270_s3 }
 0x852   : > { %2571 = vrot.lane.b32.xlu0 %v2568_v60, %s10269_s29 }
 0x856   : > { %2577 = vrot.lane.b32.xlu0 %v11040_v29, %s10268_s15 }
 0x8a9   : > { %v2060_v9 = vpop.xlane.xlu1 %2059 }
 0x8ad   : > { %v2054_v43 = vpop.xlane.xlu1 %2053  ;;  %v2063_v16 = vpop.xlane.xlu0 %2062 }
 0x8ae   : > { %9526 = vrcp.f32 %v2054_v43 }
 0x8b1   : > { %v2072_v32 = vpop.xlane.xlu1 %2071  ;;  %v2057_v28 = vpop.xlane.xlu0 %2056 }
 0x8b2   : > { %9528 = vrcp.f32 %v2057_v28 }
 0x8b3   : > { %9530 = vrcp.f32 %v2063_v16 }
 0x8b4   : > { %9532 = vrcp.f32 %v2060_v9 }
 0x8b5   : > { %v2066_v19 = vpop.xlane.xlu1 %2065  ;;  %v2075_v45 = vpop.xlane.xlu0 %2074 }
 0x8b6   : > { %9534 = vrcp.f32 %v2066_v19 }
 0x8b8   : > { %v9527_v8 = vpop.eup %9526 }
 0x8b9   : > { %v2101_v41 = vpop.permute.xlu1 %2100  ;;  %v2069_v13 = vpop.xlane.xlu0 %2068  ;;  %v2084_v53 = vmul.f32 %v9527_v8, %v11174_v51 }
 0x8ba   : > { %9536 = vrcp.f32 %v2069_v13 }
 0x8bb   : > { %9538 = vrcp.f32 %v2075_v45 }
 0x8bc   : > { %v9529_v48 = vpop.eup %9528  ;;  %9540 = vrcp.f32 %v2072_v32 }
 0x8bd   : > { %v2103_v59 = vpop.permute.xlu1 %2102  ;;  %v2099_v18 = vpop.permute.xlu0 %2098  ;;  %v2085_v62 = vmul.f32 %v9529_v48, %v9517_v34 }
 0x8be   : > { %8540 = vmatprep.subr.bf16.mxu1 %v2099_v18  ;;  %v9531_v6 = vpop.eup %9530 }
 0x8bf   : > { %8541 = vmatpush3.bf16.msra.mxu1 %v2099_v18  ;;  %v2092_v31 = vpack.c.bf16 %v2085_v62, %v2084_v53  ;;  %v9533_v2 = vpop.eup %9532  ;;  %v2087_v34 = vmul.f32 %v9531_v6, %v11176_v1 }
 0x8c0   : > { %8542 = vmatprep.subr.bf16.mxu1 %v2101_v41  ;;  %v9535_v43 = vpop.eup %9534  ;;  %v2086_v45 = vmul.f32 %v9533_v2, %v11170_v35 }
 0x8c1   : > { %v2554_v47 = vpop.permute.xlu1 %2553  ;;  %v2552_v10 = vpop.permute.xlu0 %2551  ;;  %8546 = vmatprep.mubr.msk.bf16.mxu1 %vm1066_vm2, %v2092_v31 }
 0x8c2   : > { %v2555_v9 = vsel %vm834_vm0, %v2552_v10, %v2554_v47  ;;  %v2093_v13 = vpack.c.bf16 %v2087_v34, %v2086_v45 }
 0x8c3   : > { %8543 = vmatpush3.bf16.msra.mxu1 %v2101_v41  ;;  %v11242_v16 = vsel %vm1089_vm1, %v10811_v63, %v2555_v9  ;;  %v2088_v41 = vmul.f32 %v9535_v43, %v11187_v50 }
 0x8c4   : > { %v9537_v51 = vpop.eup %9536  ;;  %8544 = vmatprep.subr.bf16.mxu1 %v2103_v59  ;;  %2599 = vrot.lane.b32.xlu0 %v11242_v16, %s10270_s3 }
 0x8c5   : > { %v2560_v32 = vpop.permute.xlu1 %2559  ;;  %v2558_v28 = vpop.permute.xlu0 %2557  ;;  %v2089_v19 = vmul.f32 %v9537_v51, %v11195_v57 }
 0x8c6   : > { %v9539_v8 = vpop.eup %9538  ;;  %v2561_v48 = vsel %vm1066_vm2, %v2558_v28, %v2560_v32 }
 0x8c7   : > { %8545 = vmatpush3.bf16.msra.mxu1 %v2103_v59  ;;  %v2094_v53 = vpack.c.bf16 %v2089_v19, %v2088_v41  ;;  %v9541_v57 = vpop.eup %9540  ;;  %v2091_v35 = vmul.f32 %v9539_v8, %v11189_v7 }
 0x8c8   : > { %8554 = vmatprep.subr.bf16.mxu1 %v10271_v36  ;;  %v2090_v6 = vmul.f32 %v9541_v57, %v11182_v39 }
 0x8c9   : > { %v2570_v1 = vpop.permute.xlu1 %2569  ;;  %v2564_v18 = vpop.permute.xlu0 %2563 }
 0x8ca   : > { %8547 = vmatmul.mubr.msk.bf16.vlgmr.msra.gmra.mrb[32].mxu1 %vm1066_vm2, %v2093_v13  ;;  %v11254_v62 = vsel %vm1089_vm1, %v2561_v48, %v2564_v18  ;;  %v2095_v10 = vpack.c.bf16 %v2091_v35, %v2090_v6 }
 0x8cb   : > { %8550 = vmatprep.mubr.msk.bf16.mxu1 %vm1066_vm2, %v2094_v53  ;;  %2601 = vrot.lane.b32.xlu1 %v11254_v62, %s10270_s3 }
 0x8cc   : > { %8555 = vmatpush3.bf16.msra.mxu1 %v11004_v22 }
 0x8cd   : > { %v2576_v50 = vpop.permute.xlu1 %2575  ;;  %v2572_v59 = vpop.permute.xlu0 %2571  ;;  %8556 = vmatprep.subr.bf16.mxu1 %v10271_v36 }
 0x8ce   : > { %v2573_v31 = vsel %vm834_vm0, %v2570_v1, %v2572_v59 }
 0x8cf   : > { %v11266_v47 = vsel %vm1089_vm1, %v10883_v56, %v2573_v31 }
 0x8d0   : > { %2603 = vrot.lane.b32.xlu0 %v11266_v47, %s10270_s3  ;;  %8557 = vmatpush3.bf16.msra.mxu1 %v11049_v4 }
 0x8d1   : > { %v2582_v7 = vpop.permute.xlu1 %2581  ;;  %v2578_v22 = vpop.permute.xlu0 %2577  ;;  %8562 = vmatprep.subr.bf16.mxu1 %v10271_v36 }
 0x8d2   : > { %v2579_v2 = vsel %vm1066_vm2, %v2576_v50, %v2578_v22  ;;  %8551 = vmatmul.mubr.msk.bf16.gmra.mrb[36].mxu1 %vm1066_vm2, %v2095_v10 }
 0x8d3   : > { %v11275_v39 = vsel %vm1089_vm1, %v2579_v2, %v2582_v7  ;;  %8558 = vmatprep.mubr.msk.bf16.mxu1 %vm10272_vm3, %v10271_v36 }
 0x8d4   : > { %2605 = vrot.lane.b32.xlu1 %v11275_v39, %s10270_s3 }
 0x99d   : > { %v8548_v9 = vpop.f32.mrb[32].mxu1 }
 0x99e   : > { %v2154_v43 = vpop.f32.mrb[33].mxu1 }
 0x99f   : > { %v8549_v4 = vpop.f32.mrb[34].mxu1 }
 0x9a0   : > { %v2186_v51 = vpack.c.bf16 %v8549_v4, %v8548_v9  ;;  %v2157_v34 = vpop.f32.mrb[35].mxu1 }
 0x9a1   : > { %v2185_v32 = vpack.c.bf16 %v2157_v34, %v2154_v43 }
 0x9a2   : > { %8575 = vmatmul.mubr.msk.bf16.vlgmr.msra.gmra.mrb[48].mxu0 %vm834_vm0, %v2186_v51 }
 0x9a3   : > { %v2190_v28 = vrot.slane %v2185_v32, 4  ;;  %8587 = vmatpush3.bf16.msra.mxu0 %v11084_v37  ;;  %8590 = vmatprep.mubr.msk.bf16.mxu0 %vm10272_vm3, %v10271_v36 }
 0x9a4   : > { %8588 = vmatprep.subr.bf16.mxu0 %v10271_v36 }
 0x9a5   : > { %v8552_v19 = vpop.f32.mrb[36].mxu1  ;;  %8559 = vmatmul.mubr.msk.bf16.vlgmr.msra.gmra.mrb[40].mxu1 %vm834_vm0, %v2190_v28 }
 0x9a6   : > { %v2170_v45 = vpop.f32.mrb[37].mxu1  ;;  %8563 = vmatpush3.bf16.msra.mxu1 %v11006_v12  ;;  %8566 = vmatprep.mubr.msk.bf16.mxu1 %vm10272_vm3, %v10271_v36  ;;  %v2600_v12 = vpop.permute.xlu0 %2599 }
 0x9a7   : > { %v8553_v41 = vpop.f32.mrb[38].mxu1  ;;  %8589 = vmatpush3.bf16.msra.mxu0 %v11096_v15  ;;  %8564 = vmatprep.subr.bf16.mxu1 %v10271_v36 }
 0x9a8   : > { %v2188_v37 = vpack.c.bf16 %v8553_v41, %v8552_v19  ;;  %v2173_v13 = vpop.f32.mrb[39].mxu1  ;;  %8602 = vmatprep.subr.bf16.mxu0 %v10271_v36 }
 0x9a9   : > { %v2187_v8 = vpack.c.bf16 %v2173_v13, %v2170_v45 }
 0x9aa   : > { %8565 = vmatpush3.bf16.msra.mxu1 %v11051_v26  ;;  %v2322_v26 = vrot.slane %v2186_v51, 4 }
 0x9ab   : > { %8591 = vmatmul.mubr.msk.bf16.vlgmr.msra.gmra.mrb[52].mxu0 %vm834_vm0, %v2187_v8  ;;  %8578 = vmatprep.subr.bf16.mxu1 %v10271_v36  ;;  %v2412_v15 = vrot.slane %v2187_v8, 4 }
 0x9ac   : > { %8603 = vmatpush3.bf16.msra.mxu0 %v11106_v52  ;;  %8606 = vmatprep.mubr.msk.bf16.mxu0 %vm10272_vm3, %v10271_v36  ;;  %v2604_v52 = vpop.permute.xlu0 %2603 }
 0x9ad   : > { %8567 = vmatmul.mubr.msk.bf16.vlgmr.msra.gmra.mrb[44].mxu1 %vm834_vm0, %v2185_v32  ;;  %8604 = vmatprep.subr.bf16.mxu0 %v10271_v36 }
 0x9ae   : > { %8579 = vmatpush3.bf16.msra.mxu1 %v11061_v11  ;;  %8582 = vmatprep.mubr.msk.bf16.mxu1 %vm10272_vm3, %v10271_v36  ;;  %v2616_v11 = vsel %vm834_vm0, %v2600_v12, 0 }
 0x9af   : > { %8580 = vmatprep.subr.bf16.mxu1 %v10271_v36 }
 0x9b0   : > { %8605 = vmatpush3.bf16.msra.mxu0 %v11118_v38  ;;  %v2622_v38 = vsel %vm834_vm0, %v2604_v52, 0 }
 0x9b1   : > { %9222 = vmatprep.subr.msk.bf16.mxu0 %vm834_vm0, %v2600_v12 }
 0x9b2   : > { %8581 = vmatpush3.bf16.msra.mxu1 %v11067_v17  ;;  %v2602_v17 = vpop.permute.xlu1 %2601 }
 0x9b3   : > { %8607 = vmatmul.mubr.msk.bf16.vlgmr.msra.gmra.mrb[56].mxu0 %vm834_vm0, %v2188_v37  ;;  %8594 = vmatprep.subr.bf16.mxu1 %v10271_v36 }
 0x9b4   : > { %8626 = vmatprep.mubr.msk.bf16.mxu0 %vm834_vm0, %v11242_v16 }
 0x9b5   : > { %8583 = vmatmul.mubr.msk.bf16.vlgmr.msra.gmra.mrb[48].mxu1 %vm834_vm0, %v2322_v26 }
 0x9b6   : > { %8595 = vmatpush3.bf16.msra.mxu1 %v11080_v44  ;;  %8598 = vmatprep.mubr.msk.bf16.mxu1 %vm10272_vm3, %v10271_v36  ;;  %v2619_v44 = vsel %vm834_vm0, %v2602_v17, 0  ;;  %v2606_v48 = vpop.permute.xlu1 %2605 }
 0x9b7   : > { %8596 = vmatprep.subr.bf16.mxu1 %v10271_v36 }
 0x9b9   : > { %8619 = vmatpush3.bf16.xpose.msra.mxu0 %v2616_v11 }
 0x9ba   : > { %9223 = vmatprep.subr.msk.bf16.mxu0 %vm834_vm0, %v2602_v17  ;;  %8597 = vmatpush3.bf16.msra.mxu1 %v11089_v49  ;;  %v2502_v49 = vrot.slane %v2188_v37, 4 }
 0x9bb   : > { %8610 = vmatprep.subr.bf16.mxu1 %v10271_v36 }
 0x9bd   : > { %8599 = vmatmul.mubr.msk.bf16.vlgmr.msra.gmra.mrb[52].mxu1 %vm834_vm0, %v2412_v15 }
 0x9be   : > { %8611 = vmatpush3.bf16.msra.mxu1 %v11102_v42  ;;  %8614 = vmatprep.mubr.msk.bf16.mxu1 %vm10272_vm3, %v10271_v36  ;;  %v2625_v42 = vsel %vm834_vm0, %v2606_v48, 0 }
 0x9bf   : > { %8612 = vmatprep.subr.bf16.mxu1 %v10271_v36 }
 0x9c1   : > { %8621 = vmatpush3.bf16.xpose.msra.mxu0 %v2619_v44 }
 0x9c2   : > { %9224 = vmatprep.subr.msk.bf16.mxu0 %vm834_vm0, %v2604_v52  ;;  %8613 = vmatpush3.bf16.msra.mxu1 %v11111_v54 }
 0x9c5   : > { %8615 = vmatmul.mubr.msk.bf16.vlgmr.msra.gmra.mrb[56].mxu1 %vm834_vm0, %v2502_v49 }
 0x9c9   : > { %8623 = vmatpush3.bf16.xpose.msra.mxu0 %v2622_v38 }
 0x9ca   : > { %9225 = vmatprep.subr.msk.bf16.mxu0 %vm834_vm0, %v2606_v48 }
 0x9d1   : > { %8625 = vmatpush3.bf16.xpose.msra.mxu0 %v2625_v42 }
 0x9d2   : > { %8666 = vmatprep.subr.bf16.mxu0 %v10271_v36 }
 0x9d8   : > { %8627 = vmatmul.mubr.msk.bf16.vlgmr.msra.gmra.mrb[60].mxu0 %vm834_vm0, %v11254_v62 }
 0x9d9   : > { %8630 = vmatprep.mubr.msk.bf16.mxu0 %vm834_vm0, %v11266_v47  ;;  %8667 = vmatpush3.bf16.msra.mxu0 %v11063_v5 }
 0x9da   : > { %8668 = vmatprep.subr.bf16.mxu0 %v10271_v36 }
 0x9dd   : > { %8669 = vmatpush3.bf16.msra.mxu0 %v11074_v30 }
 0x9de   : > { %8682 = vmatprep.subr.bf16.mxu0 %v10271_v36 }
 0x9e0   : > { %8631 = vmatmul.mubr.msk.bf16.gmra.mrb[64].mxu0 %vm834_vm0, %v11275_v39 }
 0x9e1   : > { %8670 = vmatprep.mubr.msk.bf16.mxu0 %vm10272_vm3, %v10271_v36 }
 0xa75   : > { %v2314_v54 = vpop.f32.mrb[48].mxu0 }
 0xa76   : > { %v8576_v1 = vpop.f32.mrb[49].mxu0 }
 0xa77   : > { %v2317_v18 = vpop.f32.mrb[50].mxu0 }
 0xa78   : > { %v2228_v53 = vpop.f32.mrb[40].mxu1  ;;  %v8577_v57 = vpop.f32.mrb[51].mxu0 }
 0xa79   : > { %v8560_v35 = vpop.f32.mrb[41].mxu1 }
 0xa7a   : > { %v2231_v50 = vpop.f32.mrb[42].mxu1 }
 0xa7b   : > { %v8561_v5 = vpop.f32.mrb[43].mxu1  ;;  %v11348_v50 = vld [vmem:[#allocation7] sm:$0xff] }
 0xa7e   : > { %v2404_v59 = vpop.f32.mrb[52].mxu0 }
 0xa7f   : > { %v8592_v31 = vpop.f32.mrb[53].mxu0 }
 0xa80   : > { %v2271_v6 = vpop.f32.mrb[44].mxu1  ;;  %v2407_v30 = vpop.f32.mrb[54].mxu0 }
 0xa81   : > { %v2272_v10 = vadd.f32 %v2271_v6, %v2228_v53  ;;  %v8568_v7 = vpop.f32.mrb[45].mxu1  ;;  %v8593_v22 = vpop.f32.mrb[55].mxu0  ;;  %v11352_v6 = vld [vmem:[#allocation7 + $0x8] sm:$0xff] }
 0xa82   : > { %v2274_v2 = vpop.f32.mrb[46].mxu1 }
 0xa83   : > { %v8569_v9 = vpop.f32.mrb[47].mxu1  ;;  %v2320_v43 = vadd.f32 %v2314_v54, %v2272_v10  ;;  %v11355_v10 = vld [vmem:[#allocation7 + $0x10] sm:$0xff] }
 0xa86   : > { %v2494_v4 = vpop.f32.mrb[56].mxu0 }
 0xa87   : > { %v8608_v51 = vpop.f32.mrb[57].mxu0 }
 0xa88   : > { %v2360_v34 = vpop.f32.mrb[48].mxu1  ;;  %v2497_v32 = vpop.f32.mrb[58].mxu0 }
 0xa89   : > { %v2366_v28 = vadd.f32 %v2360_v34, %v2320_v43  ;;  %v8584_v19 = vpop.f32.mrb[49].mxu1  ;;  %v8609_v45 = vpop.f32.mrb[59].mxu0  ;;  %v11359_v43 = vld [vmem:[#allocation7 + $0x18] sm:$0xff] }
 0xa8a   : > { %v2363_v41 = vpop.f32.mrb[50].mxu1 }
 0xa8b   : > { %v8585_v37 = vpop.f32.mrb[51].mxu1  ;;  %v2410_v13 = vadd.f32 %v2404_v59, %v2366_v28  ;;  %v11363_v41 = vld [vmem:[#allocation7 + $0x20] sm:$0xff] }
 0xa90   : > { %v2450_v8 = vpop.f32.mrb[52].mxu1 }
 0xa91   : > { %v2456_v12 = vadd.f32 %v2450_v8, %v2410_v13  ;;  %v8600_v26 = vpop.f32.mrb[53].mxu1 }
 0xa92   : > { %v2453_v11 = vpop.f32.mrb[54].mxu1  ;;  %v11368_v26 = vld [vmem:[#allocation7 + $0x30] sm:$0xff] }
 0xa93   : > { %v8601_v17 = vpop.f32.mrb[55].mxu1  ;;  %v2500_v15 = vadd.f32 %v2494_v4, %v2456_v12 }
 0xa94   : > { %v11371_v17 = vld [vmem:[#allocation7 + $0x28] sm:$0xff] }
 0xa98   : > { %v2540_v44 = vpop.f32.mrb[56].mxu1 }
 0xa99   : > { %v11346_v52 = vadd.f32 %v2540_v44, %v2500_v15  ;;  %v8616_v49 = vpop.f32.mrb[57].mxu1 }
 0xa9a   : > { %v2543_v38 = vpop.f32.mrb[58].mxu1 }
 0xa9b   : > { %v8617_v48 = vpop.f32.mrb[59].mxu1  ;;  %v11376_v38 = vld [vmem:[#allocation7 + $0x38] sm:$0xff] }
 0xaab   : > { %v8628_v42 = vpop.f32.mrb[60].mxu0 }
 0xaac   : > { %v2661_v54 = vpop.f32.mrb[61].mxu0  ;;  %v2694_v1 = vmul.f32 0.0625, %v8628_v42 }
 0xaad   : > { %v2692_v18 = vmul.f32 0.0625, %v2661_v54  ;;  %v8629_v53 = vpop.f32.mrb[62].mxu0 }
 0xaae   : > { %v2664_v57 = vpop.f32.mrb[63].mxu0  ;;  %v2695_v59 = vmul.f32 0.0625, %v8629_v53  ;;  %v2702_v7 = vadd.f32 %v11355_v10, %v2694_v1 }
 0xaaf   : > { %v2693_v35 = vmul.f32 0.0625, %v2664_v57  ;;  %v2700_v5 = vadd.f32 %v11348_v50, %v2692_v18 }
 0xab0   : > { %v2703_v4 = vadd.f32 %v11359_v43, %v2695_v59  ;;  %v2714_v28 = vsel %vm1066_vm2, %v2702_v7, -inf }
 0xab1   : > { %v2708_v31 = vsel %vm1066_vm2, %v2700_v5, -inf  ;;  %v2701_v30 = vadd.f32 %v11352_v6, %v2693_v35 }
 0xab2   : > { %2709 = vmax.xlane.f32.xlu0 %v2708_v31  ;;  %v2717_v13 = vsel %vm1066_vm2, %v2703_v4, -inf }
 0xab3   : > { %v8632_v22 = vpop.f32.mrb[64].mxu0  ;;  %v2711_v2 = vsel %vm1066_vm2, %v2701_v30, -inf }
 0xab4   : > { %2712 = vmax.xlane.f32.xlu1 %v2711_v2  ;;  %v2677_v9 = vpop.f32.mrb[65].mxu0  ;;  %v2698_v51 = vmul.f32 0.0625, %v8632_v22 }
 0xab5   : > { %v2696_v34 = vmul.f32 0.0625, %v2677_v9  ;;  %v8633_v32 = vpop.f32.mrb[66].mxu0 }
 0xab6   : > { %2715 = vmax.xlane.f32.xlu0 %v2714_v28  ;;  %v2680_v19 = vpop.f32.mrb[67].mxu0  ;;  %v2699_v8 = vmul.f32 0.0625, %v8633_v32  ;;  %v2706_v11 = vadd.f32 %v11368_v26, %v2698_v51 }
 0xab7   : > { %v2697_v45 = vmul.f32 0.0625, %v2680_v19  ;;  %v2704_v37 = vadd.f32 %v11363_v41, %v2696_v34 }
 0xab8   : > { %v2726_v44 = vsel %vm1066_vm2, %v2706_v11, -inf  ;;  %v2707_v48 = vadd.f32 %v11376_v38, %v2699_v8 }
 0xab9   : > { %v2720_v12 = vsel %vm1066_vm2, %v2704_v37, -inf  ;;  %v2705_v15 = vadd.f32 %v11371_v17, %v2697_v45 }
 0xaba   : > { %2718 = vmax.xlane.f32.xlu0 %v2717_v13  ;;  %2721 = vmax.xlane.f32.xlu1 %v2720_v12  ;;  %v2729_v42 = vsel %vm1066_vm2, %v2707_v48, -inf }
 0xabb   : > { %v2723_v49 = vsel %vm1066_vm2, %v2705_v15, -inf }
 0xabe   : > { %2727 = vmax.xlane.f32.xlu1 %v2726_v44  ;;  %2724 = vmax.xlane.f32.xlu0 %v2723_v49 }
 0xac2   : > { %2730 = vmax.xlane.f32.xlu0 %v2729_v42 }
 0xacf   : > { %2800 = vrot.lane.b32.xlu1 %v11242_v16, %s10268_s15 }
 0xb3f   : > { %v2710_v54 = vpop.xlane.xlu0 %2709 }
 0xb40   : > { %v2732_v1 = vsub.f32 %v2700_v5, %v2710_v54 }
 0xb41   : > { %v2713_v18 = vpop.xlane.xlu1 %2712 }
 0xb42   : > { %v2740_v35 = vmul.f32 1.442695, %v2732_v1  ;;  %v2733_v59 = vsub.f32 %v2701_v30, %v2713_v18 }
 0xb43   : > { %v2716_v53 = vpop.xlane.xlu0 %2715 }
 0xb44   : > { %v2734_v57 = vsub.f32 %v2702_v7, %v2716_v53  ;;  %v2742_v51 = vmul.f32 1.442695, %v2733_v59 }
 0xb46   : > { %v2744_v31 = vmul.f32 1.442695, %v2734_v57 }
 0xb47   : > { %v2719_v22 = vpop.xlane.xlu0 %2718  ;;  %v2722_v2 = vpop.xlane.xlu1 %2721 }
 0xb48   : > { %9542 = vpow2.f32 %v2744_v31  ;;  %v2735_v9 = vsub.f32 %v2703_v4, %v2719_v22  ;;  %v2736_v32 = vsub.f32 %v2704_v37, %v2722_v2 }
 0xb49   : > { %9544 = vpow2.f32 %v2740_v35 }
 0xb4a   : > { %v2746_v34 = vmul.f32 1.442695, %v2735_v9  ;;  %v2748_v5 = vmul.f32 1.442695, %v2736_v32 }
 0xb4b   : > { %v2728_v28 = vpop.xlane.xlu1 %2727  ;;  %v2725_v19 = vpop.xlane.xlu0 %2724 }
 0xb4c   : > { %9546 = vpow2.f32 %v2746_v34  ;;  %v2738_v16 = vsub.f32 %v2706_v11, %v2728_v28  ;;  %v2737_v13 = vsub.f32 %v2705_v15, %v2725_v19 }
 0xb4d   : > { %9548 = vpow2.f32 %v2742_v51 }
 0xb4e   : > { %v2752_v45 = vmul.f32 1.442695, %v2738_v16  ;;  %v2750_v4 = vmul.f32 1.442695, %v2737_v13 }
 0xb4f   : > { %v2801_v7 = vpop.permute.xlu1 %2800  ;;  %v2731_v8 = vpop.xlane.xlu0 %2730 }
 0xb50   : > { %9550 = vpow2.f32 %v2752_v45  ;;  %v2739_v30 = vsub.f32 %v2707_v48, %v2731_v8  ;;  %8634 = vmatprep.subr.bf16.mxu1 %v2801_v7 }
 0xb51   : > { %8635 = vmatpush3.bf16.msra.mxu1 %v2801_v7  ;;  %9552 = vpow2.f32 %v2748_v5 }
 0xb52   : > { %v11382_v12 = vpop.eup %9542  ;;  %v2754_v44 = vmul.f32 1.442695, %v2739_v30 }
 0xb53   : > { %v2762_v37 = vsel %vm1066_vm2, %v11382_v12, 0.0  ;;  %v9545_v49 = vpop.eup %9544 }
 0xb54   : > { %9554 = vpow2.f32 %v2754_v44  ;;  %2763 = vadd.xlane.f32.xlu1 %v2762_v37  ;;  %v2756_v15 = vsel %vm1066_vm2, %v9545_v49, 0.0 }
 0xb55   : > { %9556 = vpow2.f32 %v2750_v4 }
 0xb56   : > { %v11386_v11 = vpop.eup %9546 }
 0xb57   : > { %v2765_v48 = vsel %vm1066_vm2, %v11386_v11, 0.0  ;;  %v9549_v42 = vpop.eup %9548 }
 0xb58   : > { %2757 = vadd.xlane.f32.xlu1 %v2756_v15  ;;  %2766 = vadd.xlane.f32.xlu0 %v2765_v48  ;;  %v2759_v18 = vsel %vm1066_vm2, %v9549_v42, 0.0 }
 0xb5a   : > { %v11391_v54 = vpop.eup %9550 }
 0xb5b   : > { %v2774_v1 = vsel %vm1066_vm2, %v11391_v54, 0.0  ;;  %v11396_v53 = vpop.eup %9552 }
 0xb5c   : > { %2775 = vadd.xlane.f32.xlu1 %v2774_v1  ;;  %2760 = vadd.xlane.f32.xlu0 %v2759_v18  ;;  %v2768_v35 = vsel %vm1066_vm2, %v11396_v53, 0.0 }
 0xb5e   : > { %v11398_v57 = vpop.eup %9554 }
 0xb5f   : > { %v2777_v59 = vsel %vm1066_vm2, %v11398_v57, 0.0  ;;  %v9557_v31 = vpop.eup %9556 }
 0xb60   : > { %2769 = vadd.xlane.f32.xlu1 %v2768_v35  ;;  %2778 = vadd.xlane.f32.xlu0 %v2777_v59  ;;  %v2771_v22 = vsel %vm1066_vm2, %v9557_v31, 0.0 }
 0xb64   : > { %2772 = vadd.xlane.f32.xlu0 %v2771_v22 }
 0xb71   : > { %2804 = vrot.lane.b32.xlu1 %v11266_v47, %s10268_s15 }
 0xb75   : > { %2806 = vrot.lane.b32.xlu1 %v11275_v39, %s10268_s15 }
 0xb79   : > { %3253 = vrot.lane.b32.xlu1 %v10819_v3, %s10269_s29 }
 0xb7a   : > { %2802 = vrot.lane.b32.xlu0 %v11254_v62, %s10268_s15 }
 0xb7d   : > { %3258 = vrot.lane.b32.xlu1 %v2562_v40, %s10268_s15 }
 0xb7e   : > { %3251 = vrot.lane.b32.xlu0 %v10811_v63, %s10269_s29 }
 0xb81   : > { %3263 = vrot.lane.b32.xlu1 %v10883_v56, %s10269_s29 }
 0xb82   : > { %3256 = vrot.lane.b32.xlu0 %v2550_v58, %s10268_s15 }
 0xb85   : > { %3268 = vrot.lane.b32.xlu1 %v2568_v60, %s10268_s15 }
 0xb86   : > { %3261 = vrot.lane.b32.xlu0 %v10881_v55, %s10270_s3 }
 0xb89   : > { %3273 = vrot.lane.b32.xlu1 %v11040_v29, %s10270_s3 }
 0xb8a   : > { %3265 = vrot.lane.b32.xlu0 %v11034_v46, %s10269_s29 }
 0xb8e   : > { %3270 = vrot.lane.b32.xlu0 %v2580_v33, %s10268_s15 }
 0xbe1   : > { %v2764_v40 = vpop.xlane.xlu1 %2763 }
 0xbe5   : > { %v2758_v3 = vpop.xlane.xlu1 %2757  ;;  %v2767_v58 = vpop.xlane.xlu0 %2766 }
 0xbe6   : > { %9558 = vrcp.f32 %v2758_v3 }
 0xbe9   : > { %v2776_v62 = vpop.xlane.xlu1 %2775  ;;  %v2761_v47 = vpop.xlane.xlu0 %2760 }
 0xbea   : > { %9560 = vrcp.f32 %v2761_v47 }
 0xbeb   : > { %9562 = vrcp.f32 %v2767_v58  ;;  %v11470_v58 = vld [vmem:[#allocation16 + $0x18] sm:$0xff]  }
 0xbec   : > { %9564 = vrcp.f32 %v2764_v40 }
 0xbed   : > { %v2770_v60 = vpop.xlane.xlu1 %2769  ;;  %v2779_v39 = vpop.xlane.xlu0 %2778 }
 0xbee   : > { %9566 = vrcp.f32 %v2770_v60 }
 0xbf0   : > { %v9559_v46 = vpop.eup %9558 }
 0xbf1   : > { %v2805_v55 = vpop.permute.xlu1 %2804  ;;  %v2773_v2 = vpop.xlane.xlu0 %2772  ;;  %v2788_v33 = vmul.f32 %v9559_v46, %v9545_v49 }
 0xbf2   : > { %9568 = vrcp.f32 %v2773_v2 }
 0xbf3   : > { %9570 = vrcp.f32 %v2779_v39 }
 0xbf4   : > { %v9561_v9 = vpop.eup %9560  ;;  %9572 = vrcp.f32 %v2776_v62 }
 0xbf5   : > { %v2807_v51 = vpop.permute.xlu1 %2806  ;;  %v2803_v29 = vpop.permute.xlu0 %2802  ;;  %v2789_v34 = vmul.f32 %v9561_v9, %v9549_v42 }
 0xbf6   : > { %8636 = vmatprep.subr.bf16.mxu1 %v2803_v29  ;;  %v9563_v28 = vpop.eup %9562 }
 0xbf7   : > { %8637 = vmatpush3.bf16.msra.mxu1 %v2803_v29  ;;  %v2796_v32 = vpack.c.bf16 %v2789_v34, %v2788_v33  ;;  %v9565_v5 = vpop.eup %9564  ;;  %v2791_v30 = vmul.f32 %v9563_v28, %v11386_v11  ;;  %v11491_v34 = vld [vmem:[#allocation16] sm:$0xff]   ;;  %v11496_v28 = vld [vmem:[#allocation16 + $0x48] sm:$0xff]  }
 0xbf8   : > { %8638 = vmatprep.subr.bf16.mxu1 %v2805_v55  ;;  %v9567_v13 = vpop.eup %9566  ;;  %v2790_v49 = vmul.f32 %v9565_v5, %v11382_v12 }
 0xbf9   : > { %v3254_v19 = vpop.permute.xlu1 %3253  ;;  %v3252_v16 = vpop.permute.xlu0 %3251  ;;  %8642 = vmatprep.mubr.msk.bf16.mxu1 %vm1066_vm2, %v2796_v32  ;;  %v2792_v15 = vmul.f32 %v9567_v13, %v11396_v53  ;;  %v11457_v53 = vld [vmem:[#allocation16 + $0x10] sm:$0xff]   ;;  %v11506_v13 = vld [vmem:[#allocation16 + $0x60] sm:$0xff]  }
 0xbfa   : > { %v3255_v45 = vsel %vm834_vm0, %v3252_v16, %v3254_v19  ;;  %v2797_v48 = vpack.c.bf16 %v2791_v30, %v2790_v49  ;;  %v11531_v49 = vld [vmem:[#allocation16 + $0x50] sm:$0xff]  }
 0xbfb   : > { %8639 = vmatpush3.bf16.msra.mxu1 %v2805_v55  ;;  %v11440_v7 = vsel %vm1089_vm1, %v2549_v61, %v3255_v45  ;;  %v11501_v45 = vld [vmem:[#allocation16 + $0x8] sm:$0xff]  }
 0xbfc   : > { %v9569_v8 = vpop.eup %9568  ;;  %8640 = vmatprep.subr.bf16.mxu1 %v2807_v51  ;;  %3291 = vrot.lane.b32.xlu0 %v11440_v7, %s10270_s3 }
 0xbfd   : > { %v3259_v4 = vpop.permute.xlu1 %3258  ;;  %v3257_v44 = vpop.permute.xlu0 %3256  ;;  %v2793_v37 = vmul.f32 %v9569_v8, %v9557_v31  ;;  %v11513_v8 = vld [vmem:[#allocation16 + $0x30] sm:$0xff]  }
 0xbfe   : > { %v9571_v63 = vpop.eup %9570  ;;  %v3260_v61 = vsel %vm1066_vm2, %v3257_v44, %v3259_v4  ;;  %v11519_v4 = vld [vmem:[#allocation16 + $0x68] sm:$0xff]   ;;  %v11523_v44 = vld [vmem:[#allocation16 + $0x38] sm:$0xff]  }
 0xbff   : > { %8641 = vmatpush3.bf16.msra.mxu1 %v2807_v51  ;;  %v2798_v1 = vpack.c.bf16 %v2793_v37, %v2792_v15  ;;  %v9573_v35 = vpop.eup %9572  ;;  %v2795_v12 = vmul.f32 %v9571_v63, %v11398_v57  ;;  %v11484_v51 = vld [vmem:[#allocation16 + $0x40] sm:$0xff]   ;;  %v11539_v63 = vld [vmem:[#allocation16 + $0x58] sm:$0xff]  }
 0xc00   : > { %8650 = vmatprep.subr.bf16.mxu1 %v10271_v36  ;;  %v2794_v40 = vmul.f32 %v9573_v35, %v11391_v54  ;;  %v11552_v35 = vld [vmem:[#allocation16 + $0x78] sm:$0xff]  }
 0xc01   : > { %v3264_v42 = vpop.permute.xlu1 %3263  ;;  %v3262_v11 = vpop.permute.xlu0 %3261 }
 0xc02   : > { %v11450_v18 = vsel %vm1089_vm1, %v3260_v61, %v3262_v11  ;;  %8643 = vmatmul.mubr.msk.bf16.vlgmr.msra.gmra.mrb[60].mxu1 %vm1066_vm2, %v2797_v48  ;;  %v2799_v57 = vpack.c.bf16 %v2795_v12, %v2794_v40  ;;  %v9804_v40 = vld [vmem:[#allocation16 + $0x20] sm:$0xff]  }
 0xc03   : > { %8646 = vmatprep.mubr.msk.bf16.mxu1 %vm1066_vm2, %v2798_v1  ;;  %3293 = vrot.lane.b32.xlu1 %v11450_v18, %s10270_s3 }
 0xc04   : > { %8651 = vmatpush3.bf16.msra.mxu1 %v11457_v53 }
 0xc05   : > { %v3269_v59 = vpop.permute.xlu1 %3268  ;;  %v3266_v31 = vpop.permute.xlu0 %3265  ;;  %8652 = vmatprep.subr.bf16.mxu1 %v10271_v36 }
 0xc06   : > { %v3267_v22 = vsel %vm834_vm0, %v3264_v42, %v3266_v31  ;;  %v11544_v42 = vld [vmem:[#allocation16 + $0x70] sm:$0xff]  }
 0xc07   : > { %v11466_v3 = vsel %vm1089_vm1, %v2567_v14, %v3267_v22 }
 0xc08   : > { %3295 = vrot.lane.b32.xlu0 %v11466_v3, %s10270_s3  ;;  %8653 = vmatpush3.bf16.msra.mxu1 %v11470_v58 }
 0xc09   : > { %v3274_v62 = vpop.permute.xlu1 %3273  ;;  %v3271_v47 = vpop.permute.xlu0 %3270  ;;  %8658 = vmatprep.subr.bf16.mxu1 %v10271_v36 }
 0xc0a   : > { %v3272_v60 = vsel %vm1066_vm2, %v3269_v59, %v3271_v47  ;;  %8647 = vmatmul.mubr.msk.bf16.gmra.mrb[64].mxu1 %vm1066_vm2, %v2799_v57  ;;  %v9805_v57 = vld [vmem:[#allocation16 + $0x28] sm:$0xff]  }
 0xc0b   : > { %v11477_v56 = vsel %vm1089_vm1, %v3272_v60, %v3274_v62  ;;  %8654 = vmatprep.mubr.msk.bf16.mxu1 %vm10272_vm3, %v10271_v36 }
 0xc0c   : > { %3297 = vrot.lane.b32.xlu1 %v11477_v56, %s10270_s3 }
 0xc6e   : > { %v3292_v30 = vpop.permute.xlu0 %3291 }
 0xc6f   : > { %v3308_v15 = vsel %vm834_vm0, %v3292_v30, 0 }
 0xc75   : > { %v3294_v48 = vpop.permute.xlu1 %3293 }
 0xc76   : > { %v3311_v11 = vsel %vm834_vm0, %v3294_v48, 0 }
 0xc7a   : > { %v3296_v1 = vpop.permute.xlu0 %3295 }
 0xc7b   : > { %v3314_v59 = vsel %vm834_vm0, %v3296_v1, 0 }
 0xc7e   : > { %v3298_v31 = vpop.permute.xlu1 %3297 }
 0xc7f   : > { %v3317_v22 = vsel %vm834_vm0, %v3298_v31, 0 }
 0xcd5   : > { %v8644_v14 = vpop.f32.mrb[60].mxu1 }
 0xcd6   : > { %v2858_v54 = vpop.f32.mrb[61].mxu1 }
 0xcd7   : > { %v8645_v39 = vpop.f32.mrb[62].mxu1 }
 0xcd8   : > { %v2890_v55 = vpack.c.bf16 %v8645_v39, %v8644_v14  ;;  %v2861_v2 = vpop.f32.mrb[63].mxu1 }
 0xcd9   : > { %v2889_v46 = vpack.c.bf16 %v2861_v2, %v2858_v54 }
 0xcda   : > { %8671 = vmatmul.mubr.msk.bf16.vlgmr.msra.gmra.mrb[68].mxu0 %vm834_vm0, %v2890_v55  ;;  %v3026_v37 = vrot.slane %v2890_v55, 4 }
 0xcdb   : > { %v2894_v9 = vrot.slane %v2889_v46, 4  ;;  %8683 = vmatpush3.bf16.msra.mxu0 %v11484_v51  ;;  %8686 = vmatprep.mubr.msk.bf16.mxu0 %vm10272_vm3, %v10271_v36 }
 0xcdc   : > { %8684 = vmatprep.subr.bf16.mxu0 %v10271_v36 }
 0xcdd   : > { %v8648_v29 = vpop.f32.mrb[64].mxu1  ;;  %8655 = vmatmul.mubr.msk.bf16.vlgmr.msra.gmra.mrb[68].mxu1 %vm834_vm0, %v2894_v9 }
 0xcde   : > { %v2874_v33 = vpop.f32.mrb[65].mxu1  ;;  %8659 = vmatpush3.bf16.msra.mxu1 %v11491_v34  ;;  %8662 = vmatprep.mubr.msk.bf16.mxu1 %vm10272_vm3, %v10271_v36 }
 0xcdf   : > { %v8649_v32 = vpop.f32.mrb[66].mxu1  ;;  %8685 = vmatpush3.bf16.msra.mxu0 %v11496_v28  ;;  %8660 = vmatprep.subr.bf16.mxu1 %v10271_v36 }
 0xce0   : > { %v2892_v19 = vpack.c.bf16 %v8649_v32, %v8648_v29  ;;  %v2877_v16 = vpop.f32.mrb[67].mxu1  ;;  %8698 = vmatprep.subr.bf16.mxu0 %v10271_v36 }
 0xce1   : > { %v2891_v5 = vpack.c.bf16 %v2877_v16, %v2874_v33 }
 0xce2   : > { %8661 = vmatpush3.bf16.msra.mxu1 %v11501_v45  ;;  %v3206_v12 = vrot.slane %v2892_v19, 4 }
 0xce3   : > { %8687 = vmatmul.mubr.msk.bf16.vlgmr.msra.gmra.mrb[72].mxu0 %vm834_vm0, %v2891_v5  ;;  %8674 = vmatprep.subr.bf16.mxu1 %v10271_v36  ;;  %v3116_v61 = vrot.slane %v2891_v5, 4 }
 0xce4   : > { %8699 = vmatpush3.bf16.msra.mxu0 %v11506_v13  ;;  %8702 = vmatprep.mubr.msk.bf16.mxu0 %vm10272_vm3, %v10271_v36 }
 0xce5   : > { %8663 = vmatmul.mubr.msk.bf16.vlgmr.msra.gmra.mrb[72].mxu1 %vm834_vm0, %v2889_v46  ;;  %8700 = vmatprep.subr.bf16.mxu0 %v10271_v36 }
 0xce6   : > { %8675 = vmatpush3.bf16.msra.mxu1 %v11513_v8  ;;  %8678 = vmatprep.mubr.msk.bf16.mxu1 %vm10272_vm3, %v10271_v36 }
 0xce7   : > { %8676 = vmatprep.subr.bf16.mxu1 %v10271_v36 }
 0xce8   : > { %8701 = vmatpush3.bf16.msra.mxu0 %v11519_v4 }
 0xce9   : > { %9226 = vmatprep.subr.msk.bf16.mxu0 %vm834_vm0, %v3292_v30 }
 0xcea   : > { %8677 = vmatpush3.bf16.msra.mxu1 %v11523_v44 }
 0xceb   : > { %8703 = vmatmul.mubr.msk.bf16.vlgmr.msra.gmra.mrb[76].mxu0 %vm834_vm0, %v2892_v19  ;;  %8690 = vmatprep.subr.bf16.mxu1 %v10271_v36 }
 0xcec   : > { %8722 = vmatprep.mubr.msk.bf16.mxu0 %vm834_vm0, %v11440_v7 }
 0xced   : > { %8679 = vmatmul.mubr.msk.bf16.vlgmr.msra.gmra.mrb[76].mxu1 %vm834_vm0, %v3026_v37 }
 0xcee   : > { %8691 = vmatpush3.bf16.msra.mxu1 %v11531_v49  ;;  %8694 = vmatprep.mubr.msk.bf16.mxu1 %vm10272_vm3, %v10271_v36 }
 0xcef   : > { %8692 = vmatprep.subr.bf16.mxu1 %v10271_v36 }
 0xcf1   : > { %8715 = vmatpush3.bf16.xpose.msra.mxu0 %v3308_v15 }
 0xcf2   : > { %9227 = vmatprep.subr.msk.bf16.mxu0 %vm834_vm0, %v3294_v48  ;;  %8693 = vmatpush3.bf16.msra.mxu1 %v11539_v63 }
 0xcf3   : > { %8706 = vmatprep.subr.bf16.mxu1 %v10271_v36 }
 0xcf5   : > { %8695 = vmatmul.mubr.msk.bf16.vlgmr.msra.gmra.mrb[80].mxu1 %vm834_vm0, %v3116_v61 }
 0xcf6   : > { %8707 = vmatpush3.bf16.msra.mxu1 %v11544_v42  ;;  %8710 = vmatprep.mubr.msk.bf16.mxu1 %vm10272_vm3, %v10271_v36 }
 0xcf7   : > { %8708 = vmatprep.subr.bf16.mxu1 %v10271_v36 }
 0xcf9   : > { %8717 = vmatpush3.bf16.xpose.msra.mxu0 %v3311_v11 }
 0xcfa   : > { %9228 = vmatprep.subr.msk.bf16.mxu0 %vm834_vm0, %v3296_v1  ;;  %8709 = vmatpush3.bf16.msra.mxu1 %v11552_v35 }
 0xcfd   : > { %8711 = vmatmul.mubr.msk.bf16.vlgmr.msra.gmra.mrb[84].mxu1 %vm834_vm0, %v3206_v12 }
 0xd01   : > { %8719 = vmatpush3.bf16.xpose.msra.mxu0 %v3314_v59 }
 0xd02   : > { %9229 = vmatprep.subr.msk.bf16.mxu0 %vm834_vm0, %v3298_v31 }
 0xd09   : > { %8721 = vmatpush3.bf16.xpose.msra.mxu0 %v3317_v22 }
 0xd0a   : > { %8762 = vmatprep.subr.bf16.mxu0 %v10271_v36 }
 0xd10   : > { %8723 = vmatmul.mubr.msk.bf16.vlgmr.msra.gmra.mrb[80].mxu0 %vm834_vm0, %v11450_v18 }
 0xd11   : > { %8726 = vmatprep.mubr.msk.bf16.mxu0 %vm834_vm0, %v11466_v3  ;;  %8763 = vmatpush3.bf16.msra.mxu0 %v9804_v40 }
 0xd12   : > { %8764 = vmatprep.subr.bf16.mxu0 %v10271_v36 }
 0xd15   : > { %8765 = vmatpush3.bf16.msra.mxu0 %v9805_v57 }
 0xd16   : > { %8778 = vmatprep.subr.bf16.mxu0 %v10271_v36 }
 0xd18   : > { %8727 = vmatmul.mubr.msk.bf16.gmra.mrb[84].mxu0 %vm834_vm0, %v11477_v56 }
 0xd19   : > { %8766 = vmatprep.mubr.msk.bf16.mxu0 %vm10272_vm3, %v10271_v36 }
 0xdad   : > { %v3018_v62 = vpop.f32.mrb[68].mxu0 }
 0xdae   : > { %v8672_v47 = vpop.f32.mrb[69].mxu0 }
 0xdaf   : > { %v3021_v60 = vpop.f32.mrb[70].mxu0 }
 0xdb0   : > { %v2932_v14 = vpop.f32.mrb[68].mxu1  ;;  %v8673_v54 = vpop.f32.mrb[71].mxu0 }
 0xdb1   : > { %v8656_v39 = vpop.f32.mrb[69].mxu1 }
 0xdb2   : > { %v2935_v55 = vpop.f32.mrb[70].mxu1 }
 0xdb3   : > { %v8657_v2 = vpop.f32.mrb[71].mxu1 }
 0xdb6   : > { %v3108_v46 = vpop.f32.mrb[72].mxu0 }
 0xdb7   : > { %v8688_v9 = vpop.f32.mrb[73].mxu0 }
 0xdb8   : > { %v2975_v29 = vpop.f32.mrb[72].mxu1  ;;  %v3111_v33 = vpop.f32.mrb[74].mxu0 }
 0xdb9   : > { %v2976_v32 = vadd.f32 %v2975_v29, %v2932_v14  ;;  %v8664_v19 = vpop.f32.mrb[73].mxu1  ;;  %v8689_v16 = vpop.f32.mrb[75].mxu0 }
 0xdba   : > { %v2978_v5 = vpop.f32.mrb[74].mxu1 }
 0xdbb   : > { %v8665_v30 = vpop.f32.mrb[75].mxu1  ;;  %v3024_v37 = vadd.f32 %v3018_v62, %v2976_v32 }
 0xdbe   : > { %v3198_v15 = vpop.f32.mrb[76].mxu0 }
 0xdbf   : > { %v8704_v48 = vpop.f32.mrb[77].mxu0 }
 0xdc0   : > { %v3064_v61 = vpop.f32.mrb[76].mxu1  ;;  %v3201_v11 = vpop.f32.mrb[78].mxu0 }
 0xdc1   : > { %v3070_v1 = vadd.f32 %v3064_v61, %v3024_v37  ;;  %v8680_v12 = vpop.f32.mrb[77].mxu1  ;;  %v8705_v59 = vpop.f32.mrb[79].mxu0 }
 0xdc2   : > { %v3067_v31 = vpop.f32.mrb[78].mxu1 }
 0xdc3   : > { %v8681_v22 = vpop.f32.mrb[79].mxu1  ;;  %v3114_v40 = vadd.f32 %v3108_v46, %v3070_v1 }
 0xdc8   : > { %v3154_v57 = vpop.f32.mrb[80].mxu1 }
 0xdc9   : > { %v3160_v47 = vadd.f32 %v3154_v57, %v3114_v40  ;;  %v8696_v60 = vpop.f32.mrb[81].mxu1 }
 0xdca   : > { %v3157_v54 = vpop.f32.mrb[82].mxu1 }
 0xdcb   : > { %v8697_v14 = vpop.f32.mrb[83].mxu1  ;;  %v3204_v39 = vadd.f32 %v3198_v15, %v3160_v47 }
 0xdd0   : > { %v3244_v55 = vpop.f32.mrb[84].mxu1 }
 0xdd1   : > { %v11570_v2 = vadd.f32 %v3244_v55, %v3204_v39  ;;  %v8712_v62 = vpop.f32.mrb[85].mxu1 }
 0xdd2   : > { %v3247_v9 = vpop.f32.mrb[86].mxu1 }
 0xdd3   : > { %v8713_v29 = vpop.f32.mrb[87].mxu1 }
 0xde3   : > { %v8724_v33 = vpop.f32.mrb[80].mxu0 }
 0xde4   : > { %v3386_v32 = vmul.f32 0.0625, %v8724_v33  ;;  %v3353_v19 = vpop.f32.mrb[81].mxu0 }
 0xde5   : > { %v3384_v16 = vmul.f32 0.0625, %v3353_v19  ;;  %v8725_v5 = vpop.f32.mrb[82].mxu0 }
 0xde6   : > { %v3394_v30 = vadd.f32 %v11355_v10, %v3386_v32  ;;  %v3356_v46 = vpop.f32.mrb[83].mxu0  ;;  %v3387_v37 = vmul.f32 0.0625, %v8725_v5 }
 0xde7   : > { %v3385_v48 = vmul.f32 0.0625, %v3356_v46  ;;  %v3392_v61 = vadd.f32 %v11348_v50, %v3384_v16 }
 0xde8   : > { %v3406_v15 = vsel %vm1066_vm2, %v3394_v30, -inf  ;;  %v3395_v1 = vadd.f32 %v11359_v43, %v3387_v37 }
 0xde9   : > { %v3393_v11 = vadd.f32 %v11352_v6, %v3385_v48  ;;  %3407 = vmax.xlane.f32.xlu0 %v3406_v15  ;;  %v3400_v10 = vsel %vm1066_vm2, %v3392_v61, -inf }
 0xdea   : > { %v3409_v6 = vsel %vm1066_vm2, %v3395_v1, -inf }
 0xdeb   : > { %v8728_v12 = vpop.f32.mrb[84].mxu0  ;;  %v3403_v59 = vsel %vm1066_vm2, %v3393_v11, -inf }
 0xdec   : > { %v3390_v31 = vmul.f32 0.0625, %v8728_v12  ;;  %3404 = vmax.xlane.f32.xlu1 %v3403_v59  ;;  %v3369_v22 = vpop.f32.mrb[85].mxu0 }
 0xded   : > { %v3388_v40 = vmul.f32 0.0625, %v3369_v22  ;;  %3401 = vmax.xlane.f32.xlu0 %v3400_v10  ;;  %v8729_v57 = vpop.f32.mrb[86].mxu0 }
 0xdee   : > { %v3398_v50 = vadd.f32 %v11368_v26, %v3390_v31  ;;  %v3391_v47 = vmul.f32 0.0625, %v8729_v57  ;;  %v3372_v60 = vpop.f32.mrb[87].mxu0 }
 0xdef   : > { %v11582_v54 = vadd.f32 %v11363_v41, %v3388_v40  ;;  %v3389_v14 = vmul.f32 0.0625, %v3372_v60 }
 0xdf0   : > { %v11585_v43 = vadd.f32 %v11376_v38, %v3391_v47  ;;  %v3418_v39 = vsel %vm1066_vm2, %v3398_v50, -inf }
 0xdf1   : > { %3410 = vmax.xlane.f32.xlu0 %v3409_v6  ;;  %3419 = vmax.xlane.f32.xlu1 %v3418_v39  ;;  %v3397_v55 = vadd.f32 %v11371_v17, %v3389_v14  ;;  %v3412_v26 = vsel %vm1066_vm2, %v11582_v54, -inf }
 0xdf2   : > { %v3421_v62 = vsel %vm1066_vm2, %v11585_v43, -inf }
 0xdf3   : > { %v3415_v41 = vsel %vm1066_vm2, %v3397_v55, -inf }
 0xdf5   : > { %3413 = vmax.xlane.f32.xlu1 %v3412_v26  ;;  %3422 = vmax.xlane.f32.xlu0 %v3421_v62 }
 0xdf9   : > { %3416 = vmax.xlane.f32.xlu0 %v3415_v41 }
 0xe06   : > { %3492 = vrot.lane.b32.xlu1 %v11440_v7, %s10268_s15 }
 0xe0f   : > { %3494 = vrot.lane.b32.xlu0 %v11450_v18, %s10268_s15 }
 0xe76   : > { %v3408_v38 = vpop.xlane.xlu0 %3407 }
 0xe77   : > { %v3426_v9 = vsub.f32 %v3394_v30, %v3408_v38 }
 0xe79   : > { %v3436_v17 = vmul.f32 1.442695, %v3426_v9  ;;  %v3405_v29 = vpop.xlane.xlu1 %3404 }
 0xe7a   : > { %v3402_v33 = vpop.xlane.xlu0 %3401  ;;  %v3425_v19 = vsub.f32 %v3393_v11, %v3405_v29  ;;  %v11622_v29 = vld [vmem:[#allocation17] ss:$0 sm:$0xff] }
 0xe7b   : > { %9574 = vpow2.f32 %v3436_v17  ;;  %v3424_v32 = vsub.f32 %v3392_v61, %v3402_v33  ;;  %v3950_v33 = vadd.f32 %v11622_v29, %v11150_v27 }
 0xe7c   : > { %v3434_v48 = vmul.f32 1.442695, %v3425_v19 }
 0xe7d   : > { %v3432_v16 = vmul.f32 1.442695, %v3424_v32 }
 0xe7e   : > { %v3411_v5 = vpop.xlane.xlu0 %3410  ;;  %v3420_v46 = vpop.xlane.xlu1 %3419 }
 0xe7f   : > { %9576 = vpow2.f32 %v3432_v16  ;;  %v3427_v37 = vsub.f32 %v3395_v1, %v3411_v5  ;;  %v3430_v12 = vsub.f32 %v3398_v50, %v3420_v46  ;;  %v9807_v5 = vld [vmem:[%s10717_s16 + $0x8] sm:$0xff] }
 0xe81   : > { %v3438_v15 = vmul.f32 1.442695, %v3427_v37  ;;  %v3444_v30 = vmul.f32 1.442695, %v3430_v12 }
 0xe82   : > { %v3414_v7 = vpop.xlane.xlu1 %3413  ;;  %v3423_v59 = vpop.xlane.xlu0 %3422 }
 0xe83   : > { %9578 = vpow2.f32 %v3438_v15  ;;  %v3428_v62 = vsub.f32 %v11582_v54, %v3414_v7  ;;  %v3431_v38 = vsub.f32 %v11585_v43, %v3423_v59  ;;  %v3951_v54 = vadd.f32 %v11622_v29, %v11346_v52  ;;  %v9806_v43 = vld [vmem:[%s10717_s16] sm:$0xff] }
 0xe84   : > { %9580 = vpow2.f32 %v3434_v48  ;;  %v3954_v19 = vadd.f32 %v9806_v43, %v3950_v33  ;;  %v3952_v43 = vadd.f32 %v11622_v29, %v11570_v2 }
 0xe85   : > { %v11598_v18 = vpop.eup %9574  ;;  %9582 = vpow2.f32 %v3444_v30  ;;  %v3440_v41 = vmul.f32 1.442695, %v3428_v62  ;;  %v3446_v9 = vmul.f32 1.442695, %v3431_v38  ;;  %v3955_v46 = vadd.f32 %v9807_v5, %v3951_v54 }
 0xe86   : > { %v3493_v31 = vpop.permute.xlu1 %3492  ;;  %v3417_v22 = vpop.xlane.xlu0 %3416  ;;  %v3454_v61 = vsel %vm1066_vm2, %v11598_v18, 0.0  ;;  %v3958_v16 = vsel %vm834_vm0, %v3954_v19, 0.0 }
 0xe87   : > { %v3429_v11 = vsub.f32 %v3397_v55, %v3417_v22  ;;  %3455 = vadd.xlane.f32.xlu1 %v3454_v61  ;;  %8730 = vmatprep.subr.bf16.mxu1 %v3493_v31  ;;  %v3961_v27 = vsel %vm834_vm0, %v3955_v46, 0.0 }
 0xe88   : > { %8731 = vmatpush3.bf16.msra.mxu1 %v3493_v31 }
 0xe89   : > { %v11602_v1 = vpop.eup %9576  ;;  %v3442_v10 = vmul.f32 1.442695, %v3429_v11 }
 0xe8a   : > { %v3495_v40 = vpop.permute.xlu0 %3494  ;;  %v3448_v57 = vsel %vm1066_vm2, %v11602_v1, 0.0 }
 0xe8b   : > { %3449 = vadd.xlane.f32.xlu1 %v3448_v57  ;;  %8732 = vmatprep.subr.bf16.mxu1 %v3495_v40  ;;  %9584 = vpow2.f32 %v3442_v10 }
 0xe8c   : > { %8733 = vmatpush3.bf16.msra.mxu1 %v3495_v40  ;;  %9586 = vpow2.f32 %v3440_v41 }
 0xe8d   : > { %v9579_v50 = vpop.eup %9578  ;;  %9588 = vpow2.f32 %v3446_v9 }
 0xe8e   : > { %v3457_v47 = vsel %vm1066_vm2, %v9579_v50, 0.0  ;;  %v9581_v60 = vpop.eup %9580 }
 0xe8f   : > { %3458 = vadd.xlane.f32.xlu0 %v3457_v47  ;;  %v3451_v6 = vsel %vm1066_vm2, %v9581_v60, 0.0  ;;  %v11608_v14 = vpop.eup %9582 }
 0xe90   : > { %v3466_v39 = vsel %vm1066_vm2, %v11608_v14, 0.0 }
 0xe93   : > { %3452 = vadd.xlane.f32.xlu0 %v3451_v6 }
 0xe95   : > { %v11612_v55 = vpop.eup %9584 }
 0xe96   : > { %v3463_v26 = vsel %vm1066_vm2, %v11612_v55, 0.0  ;;  %v9587_v17 = vpop.eup %9586 }
 0xe97   : > { %3467 = vadd.xlane.f32.xlu0 %v3466_v39  ;;  %v11627_v32 = vpop.eup %9588 }
 0xe9b   : > { %3464 = vadd.xlane.f32.xlu0 %v3463_v26 }
 0xe9c   : > { %3496 = vrot.lane.b32.xlu1 %v11466_v3, %s10268_s15  ;;  %v3460_v3 = vsel %vm1066_vm2, %v9587_v17, 0.0 }
 0xeb1   : > { %3498 = vrot.lane.b32.xlu0 %v11477_v56, %s10268_s15  ;;  %v3469_v56 = vsel %vm1066_vm2, %v11627_v32, 0.0 }
 0xec0   : > { %3461 = vadd.xlane.f32.xlu1 %v3460_v3 }
 0xec4   : > { %3470 = vadd.xlane.f32.xlu1 %v3469_v56 }
 0xec8   : > { %3959 = vadd.xlane.f32.xlu1 %v3958_v16 }
 0xecc   : > { %3962 = vadd.xlane.f32.xlu1 %v3961_v27 }
 0xf14   : > { %v3456_v37 = vpop.xlane.xlu1 %3455 }
 0xf18   : > { %v3450_v48 = vpop.xlane.xlu1 %3449 }
 0xf1c   : > { %v3497_v15 = vpop.permute.xlu1 %3496  ;;  %v3459_v12 = vpop.xlane.xlu0 %3458 }
 0xf1d   : > { %8734 = vmatprep.subr.bf16.mxu1 %v3497_v15  ;;  %9590 = vrcp.f32 %v3459_v12 }
 0xf1e   : > { %8735 = vmatpush3.bf16.msra.mxu1 %v3497_v15  ;;  %9592 = vrcp.f32 %v3450_v48  ;;  %v9808_v48 = vld [vmem:[%s10717_s16 + $0x10] sm:$0xff] }
 0xf1f   : > { %9594 = vrcp.f32 %v3456_v37  ;;  %v3956_v15 = vadd.f32 %v9808_v48, %v3952_v43  ;;  %v9446_v43 = vld [vmem:[#allocation11 + $0x14] ss:$8 sps:$4 sm:$0xff]  }
 0xf20   : > { %v3453_v52 = vpop.xlane.xlu0 %3452 }
 0xf21   : > { %9596 = vrcp.f32 %v3453_v52  ;;  %v3964_v2 = vsel %vm834_vm0, %v3956_v15, 0.0 }
 0xf24   : > { %v3468_v7 = vpop.xlane.xlu0 %3467 }
 0xf27   : > { %v9591_v59 = vpop.eup %9590 }
 0xf28   : > { %v3465_v30 = vpop.xlane.xlu0 %3464  ;;  %v9593_v31 = vpop.eup %9592  ;;  %v3483_v11 = vmul.f32 %v9591_v59, %v9579_v50 }
 0xf29   : > { %v9595_v22 = vpop.eup %9594  ;;  %v3480_v40 = vmul.f32 %v9593_v31, %v11602_v1  ;;  %9598 = vrcp.f32 %v3465_v30 }
 0xf2a   : > { %v3482_v47 = vmul.f32 %v9595_v22, %v11598_v18 }
 0xf2b   : > { %v9597_v61 = vpop.eup %9596 }
 0xf2c   : > { %v3499_v10 = vpop.permute.xlu0 %3498  ;;  %v3481_v57 = vmul.f32 %v9597_v61, %v9581_v60  ;;  %v3489_v39 = vpack.c.bf16 %v3483_v11, %v3482_v47 }
 0xf2d   : > { %8736 = vmatprep.subr.bf16.mxu1 %v3499_v10 }
 0xf2e   : > { %8737 = vmatpush3.bf16.msra.mxu1 %v3499_v10  ;;  %v3488_v6 = vpack.c.bf16 %v3481_v57, %v3480_v40 }
 0xf2f   : > { %8746 = vmatprep.subr.bf16.mxu1 %v10271_v36 }
 0xf30   : > { %8738 = vmatprep.mubr.msk.bf16.mxu1 %vm1066_vm2, %v3488_v6 }
 0xf31   : > { %8739 = vmatmul.mubr.msk.bf16.vlgmr.msra.gmra.mrb[88].mxu1 %vm1066_vm2, %v3489_v39 }
 0xf32   : > { %8747 = vmatpush3.bf16.msra.mxu1 %v11457_v53 }
 0xf33   : > { %8748 = vmatprep.subr.bf16.mxu1 %v10271_v36  ;;  %v9599_v60 = vpop.eup %9598 }
 0xf34   : > { %v3485_v9 = vmul.f32 %v9599_v60, %v11612_v55 }
 0xf36   : > { %8749 = vmatpush3.bf16.msra.mxu1 %v11470_v58 }
 0xf37   : > { %8754 = vmatprep.subr.bf16.mxu1 %v10271_v36 }
 0xf4d   : > { %v3462_v18 = vpop.xlane.xlu1 %3461 }
 0xf4e   : > { %9600 = vrcp.f32 %v3462_v18 }
 0xf4f   : > { %9602 = vrcp.f32 %v3468_v7 }
 0xf51   : > { %v3471_v1 = vpop.xlane.xlu1 %3470 }
 0xf52   : > { %9604 = vrcp.f32 %v3471_v1 }
 0xf55   : > { %v3960_v50 = vpop.xlane.xlu1 %3959 }
 0xf56   : > { %v3971_v26 = vmul.f32 0.03125, %v3960_v50 }
 0xf58   : > { %v9601_v62 = vpop.eup %9600  ;;  %v11646_v41 = vsub.f32 %v3954_v19, %v3971_v26 }
 0xf59   : > { %v3963_v38 = vpop.xlane.xlu1 %3962  ;;  %v3484_v53 = vmul.f32 %v9601_v62, %v9587_v17  ;;  %v9603_v58 = vpop.eup %9602 }
 0xf5a   : > { %v3972_v33 = vmul.f32 0.03125, %v3963_v38  ;;  %v3979_v3 = vmul.f32 %v11646_v41, %v11646_v41  ;;  %v3486_v55 = vmul.f32 %v9603_v58, %v11608_v14 }
 0xf5b   : > { %v3490_v54 = vpack.c.bf16 %v3485_v9, %v3484_v53 }
 0xf5c   : > { %v9605_v56 = vpop.eup %9604  ;;  %v11653_v16 = vsub.f32 %v3955_v46, %v3972_v33  ;;  %v3983_v19 = vsel %vm834_vm0, %v3979_v3, 0.0  ;;  %v9440_v33 = vld [vmem:[#allocation11 + $0x4] ss:$8 sps:$4 sm:$0xff]  }
 0xf5d   : > { %3984 = vadd.xlane.f32.xlu1 %v3983_v19  ;;  %8742 = vmatprep.mubr.msk.bf16.mxu1 %vm1066_vm2, %v3490_v54  ;;  %v3487_v17 = vmul.f32 %v9605_v56, %v11627_v32  ;;  %v9443_v3 = vld [vmem:[%s12957_s12 + $0x4] ss:$16 sps:$4 sm:$0xff]   ;;  %v11716_v54 = vld [vmem:[%s12958_s18] ss:$0 sm:$0xff] }
 0xf5e   : > { %v3980_v5 = vmul.f32 %v11653_v16, %v11653_v16  ;;  %v9438_v56 = vld [vmem:[#allocation11] ss:$8 sps:$4 sm:$0xff]  }
 0xf5f   : > { %v3491_v27 = vpack.c.bf16 %v3487_v17, %v3486_v55  ;;  %v9441_v55 = vld [vmem:[%s12957_s12] ss:$16 sps:$4 sm:$0xff]   ;;  %v4003_v17 = vmul.f32 %v11716_v54, %v11646_v41  ;;  %v9452_v41 = vld [vmem:[%s12957_s12 + $0xc] ss:$16 sps:$4 sm:$0xff]  }
 0xf60   : > { %v3986_v37 = vsel %vm834_vm0, %v3980_v5, 0.0 }
 0xf61   : > { %3987 = vadd.xlane.f32.xlu1 %v3986_v37  ;;  %8743 = vmatmul.mubr.msk.bf16.gmra.mrb[92].mxu1 %vm1066_vm2, %v3491_v27  ;;  %v9444_v27 = vld [vmem:[#allocation11 + $0x10] ss:$8 sps:$4 sm:$0xff]   ;;  %v713_v37 = vld [vmem:[%s10725_s6 + $0x8] sm:$0xff] }
 0xf62   : > { %8750 = vmatprep.mubr.msk.bf16.mxu1 %vm10272_vm3, %v10271_v36 }
 0xf65   : > { %3965 = vadd.xlane.f32.xlu1 %v3964_v2  ;;  %v11745_v2 = vld [vmem:[%s12958_s18 + $0x1] ss:$0 sm:$0xff] }
 0xfea   : > { %v3985_v14 = vpop.xlane.xlu1 %3984 }
 0xfee   : > { %v3988_v46 = vpop.xlane.xlu1 %3987 }
 0xff2   : > { %v3966_v32 = vpop.xlane.xlu1 %3965 }
 0xff3   : > { %v3973_v12 = vmul.f32 0.03125, %v3966_v32  ;;  %v9450_v32 = vld [vmem:[%s12957_s12 + $0x8] ss:$16 sps:$4 sm:$0xff]  }
 0xff5   : > { %v11667_v52 = vsub.f32 %v3956_v15, %v3973_v12  ;;  %v9447_v15 = vld [vmem:[%s12957_s12 + $0x20] ss:$16 sps:$4 sm:$0xff]  }
 0xff7   : > { %v3981_v7 = vmul.f32 %v11667_v52, %v11667_v52 }
 0xff9   : > { %v3989_v59 = vsel %vm834_vm0, %v3981_v7, 0.0  ;;  %v9455_v7 = vld [vmem:[%s12957_s12 + $0x2c] ss:$16 sps:$4 sm:$0xff]  }
 0xffa   : > { %3990 = vadd.xlane.f32.xlu0 %v3989_v59 }
0x1004   : > { %v8740_v30 = vpop.f32.mrb[88].mxu1 }
0x1005   : > { %v3550_v31 = vpop.f32.mrb[89].mxu1 }
0x1006   : > { %v8741_v22 = vpop.f32.mrb[90].mxu1 }
0x1007   : > { %v3582_v61 = vpack.c.bf16 %v8741_v22, %v8740_v30  ;;  %v3553_v11 = vpop.f32.mrb[91].mxu1  ;;  %v714_v30 = vld [vmem:[%s10725_s6 + $0x10] sm:$0xff]  ;;  %v9453_v22 = vld [vmem:[%s12957_s12 + $0x28] ss:$16 sps:$4 sm:$0xff]  }
0x1008   : > { %v3581_v10 = vpack.c.bf16 %v3553_v11, %v3550_v31  ;;  %v715_v31 = vld [vmem:[%s10725_s6 + $0x18] sm:$0xff] }
0x1009   : > { %8767 = vmatmul.mubr.msk.bf16.vlgmr.msra.gmra.mrb[88].mxu0 %vm834_vm0, %v3582_v61 }
0x100a   : > { %v3586_v40 = vrot.slane %v3581_v10, 4  ;;  %8779 = vmatpush3.bf16.msra.mxu0 %v11484_v51  ;;  %8782 = vmatprep.mubr.msk.bf16.mxu0 %vm10272_vm3, %v10271_v36  ;;  %v3996_v51 = vmul.f32 0.032258064, %v3988_v46 }
0x100b   : > { %8780 = vmatprep.subr.bf16.mxu0 %v10271_v36 }
0x100c   : > { %8751 = vmatmul.mubr.msk.bf16.vlgmr.msra.gmra.mrb[96].mxu1 %vm834_vm0, %v3586_v40  ;;  %9606 = vrsqrt.f32 %v3996_v51  ;;  %vm4016_vm4 = vcmp.eq.f32.partialorder %v3996_v51, inf  ;;  %v4019_v6 = vand.u32 2147483648, %v3996_v51  ;;  %vm4018_vm6 = vcmp.eq.f32.partialorder %v3996_v51, 0.0 }
0x100d   : > { %8755 = vmatpush3.bf16.msra.mxu1 %v11491_v34  ;;  %8758 = vmatprep.mubr.msk.bf16.mxu1 %vm10272_vm3, %v10271_v36  ;;  %v3995_v34 = vmul.f32 0.032258064, %v3985_v14 }
0x100e   : > { %8756 = vmatprep.subr.bf16.mxu1 %v10271_v36  ;;  %8781 = vmatpush3.bf16.msra.mxu0 %v11496_v28  ;;  %v3718_v28 = vrot.slane %v3582_v61, 4  ;;  %v4056_v61 = vpack.c.bf16 %v715_v31, %v714_v30 }
0x100f   : > { %8794 = vmatprep.subr.bf16.mxu0 %v10271_v36  ;;  %9608 = vrsqrt.f32 %v3995_v34  ;;  %vm4009_vm5 = vcmp.eq.f32.partialorder %v3995_v34, inf  ;;  %vm4011_vm7 = vcmp.eq.f32.partialorder %v3995_v34, 0.0 }
0x1011   : > { %8757 = vmatpush3.bf16.msra.mxu1 %v11501_v45 }
0x1012   : > { %8770 = vmatprep.subr.bf16.mxu1 %v10271_v36 }
0x1014   : > { %8759 = vmatmul.mubr.msk.bf16.vlgmr.msra.gmra.mrb[100].mxu1 %vm834_vm0, %v3581_v10 }
0x1015   : > { %8771 = vmatpush3.bf16.msra.mxu1 %v11513_v8  ;;  %8774 = vmatprep.mubr.msk.bf16.mxu1 %vm10272_vm3, %v10271_v36 }
0x1016   : > { %8772 = vmatprep.subr.bf16.mxu1 %v10271_v36  ;;  %v9607_v45 = vpop.eup %9606 }
0x1019   : > { %8773 = vmatpush3.bf16.msra.mxu1 %v11523_v44  ;;  %v9609_v8 = vpop.eup %9608  ;;  %v4015_v44 = vmul.f32 %v9607_v45, %v3996_v51 }
0x101a   : > { %8786 = vmatprep.subr.bf16.mxu1 %v10271_v36  ;;  %v4008_v57 = vmul.f32 %v9609_v8, %v3995_v34 }
0x101b   : > { %v4017_v47 = vsel %vm4016_vm4, %v3996_v51, %v4015_v44 }
0x101c   : > { %8775 = vmatmul.mubr.msk.bf16.vlgmr.msra.gmra.mrb[104].mxu1 %vm834_vm0, %v3718_v28  ;;  %v4010_v39 = vsel %vm4009_vm5, %v3995_v34, %v4008_v57  ;;  %v4020_v18 = vsel %vm4018_vm6, %v4019_v6, %v4017_v47 }
0x101d   : > { %8787 = vmatpush3.bf16.msra.mxu1 %v11531_v49  ;;  %8790 = vmatprep.mubr.msk.bf16.mxu1 %vm10272_vm3, %v10271_v36  ;;  %v4012_v49 = vand.u32 2147483648, %v3995_v34  ;;  %v4036_v50 = vadd.f32 1e-05, %v4020_v18 }
0x101e   : > { %8788 = vmatprep.subr.bf16.mxu1 %v10271_v36 }
0x101f   : > { %v4013_v1 = vsel %vm4011_vm7, %v4012_v49, %v4010_v39  ;;  %9610 = vrcp.f32 %v4036_v50 }
0x1020   : > { %v4035_v60 = vadd.f32 1e-05, %v4013_v1 }
0x1021   : > { %8789 = vmatpush3.bf16.msra.mxu1 %v11539_v63 }
0x1022   : > { %8802 = vmatprep.subr.bf16.mxu1 %v10271_v36  ;;  %9612 = vrcp.f32 %v4035_v60 }
0x1034   : > { %v8744_v26 = vpop.f32.mrb[92].mxu1 }
0x1035   : > { %v3566_v63 = vpop.f32.mrb[93].mxu1 }
0x1036   : > { %v8745_v62 = vpop.f32.mrb[94].mxu1 }
0x1037   : > { %v3584_v38 = vpack.c.bf16 %v8745_v62, %v8744_v26  ;;  %v3569_v53 = vpop.f32.mrb[95].mxu1 }
0x1038   : > { %v3583_v9 = vpack.c.bf16 %v3569_v53, %v3566_v63 }
0x1039   : > { %v3898_v5 = vrot.slane %v3584_v38, 4 }
0x103a   : > { %v3808_v58 = vrot.slane %v3583_v9, 4  ;;  %8783 = vmatmul.mubr.msk.bf16.vlgmr.msra.gmra.mrb[92].mxu0 %vm834_vm0, %v3583_v9 }
0x103b   : > { %8795 = vmatpush3.bf16.msra.mxu0 %v11506_v13  ;;  %8798 = vmatprep.mubr.msk.bf16.mxu0 %vm10272_vm3, %v10271_v36  ;;  %v9611_v13 = vpop.eup %9610 }
0x103c   : > { %8791 = vmatmul.mubr.msk.bf16.vlgmr.msra.gmra.mrb[108].mxu1 %vm834_vm0, %v3808_v58  ;;  %8796 = vmatprep.subr.bf16.mxu0 %v10271_v36  ;;  %v9613_v19 = vpop.eup %9612 }
0x103d   : > { %8803 = vmatpush3.bf16.msra.mxu1 %v11544_v42  ;;  %8806 = vmatprep.mubr.msk.bf16.mxu1 %vm10272_vm3, %v10271_v36  ;;  %v4004_v42 = vmul.f32 %v11716_v54, %v11653_v16  ;;  %v4040_v48 = vmul.f32 %v9613_v19, %v4003_v17  ;;  %v4061_v17 = vld [vmem:[#allocation13] sm:$0x3] }
0x103e   : > { %8804 = vmatprep.subr.bf16.mxu1 %v10271_v36 }
0x103f   : > { %8797 = vmatpush3.bf16.msra.mxu0 %v11519_v4  ;;  %v9449_v4 = vld [vmem:[%s12957_s12 + $0x24] ss:$16 sps:$4 sm:$0xff]   ;;  %v4042_v16 = vmul.f32 %v9611_v13, %v4004_v42  ;;  %v11754_v12 = vadd.f32 %v11745_v2, %v4040_v48  ;;  %v4066_v48 = vrot.slane %v4061_v17, %v10770_v21 }
0x1040   : > { %4099 = vmatprep.subr.bf16.mxu0 %v9440_v33 }
0x1041   : > { %8805 = vmatpush3.bf16.msra.mxu1 %v11552_v35  ;;  %v712_v35 = vld [vmem:[%s10725_s6] sm:$0xff]  ;;  %v11748_v46 = vadd.f32 %v11745_v2, %v4042_v16  ;;  %s10273_s6 = smov [#allocation20]  }
0x1042   : > { %8799 = vmatmul.mubr.msk.bf16.vlgmr.msra.gmra.mrb[96].mxu0 %vm834_vm0, %v3584_v38  ;;  %4234 = vmatprep.subr.bf16.mxu1 %v9443_v3  ;;  %v4055_v14 = vpack.c.bf16 %v713_v37, %v712_v35 }
0x1043   : > { %4100 = vmatpush1.bf16.msra.mxu0 %v9438_v56  ;;  %4131 = vmatprep.mubr.bf16.mxu0 %v10267_v0  ;;  %v4156_v59 = vpack.c.bf16 %v11748_v46, %v11754_v12 }
0x1044   : > { %8807 = vmatmul.mubr.msk.bf16.vlgmr.msra.gmra.mrb[112].mxu1 %vm834_vm0, %v3898_v5  ;;  %4101 = vmatprep.subr.bf16.mxu0 %v9446_v43 }
0x1045   : > { %4235 = vmatpush1.bf16.msra.mxu1 %v9441_v55  ;;  %4266 = vmatprep.mubr.bf16.mxu1 %v10267_v0 }
0x1046   : > { %4236 = vmatprep.subr.bf16.mxu1 %v9449_v4 }
0x1047   : > { %4102 = vmatpush1.bf16.msra.mxu0 %v9444_v27 }
0x1048   : > { %4287 = vmatprep.subr.bf16.mxu0 %v9452_v41  ;;  %v4166_v41 = vld [vmem:[#allocation14] sm:$0xf] }
0x1049   : > { %4237 = vmatpush1.bf16.msra.mxu1 %v9447_v15  ;;  %v4070_v15 = vrot.slane %v4061_v17, %v10773_v23 }
0x104a   : > { %7979 = vmatmul.mubr.msk.bf16.vlgmr.msra.gmra.mrb[100].mxu0 %vm834_vm0, %v4055_v14  ;;  %v9809_v14 = vld [vmem:[%s10717_s16 + $0x18] sm:$0xff]  ;;  %s12960_s16 = sld [smem:[#allocation39_spill]] }
0x104b   : > { %4141 = vmatprep.mubr.bf16.mxu0 %v10267_v0  ;;  %4288 = vmatpush1.bf16.msra.mxu0 %v9450_v32 }
0x104c   : > { %7989 = vmatmul.mubr.msk.bf16.vlgmr.msra.gmra.mrb[116].mxu1 %vm834_vm0, %v4156_v59  ;;  %4289 = vmatprep.subr.bf16.mxu0 %v9455_v7 }
0x104d   : > { %4276 = vmatprep.mubr.bf16.mxu1 %v10267_v0 }
0x104f   : > { %4290 = vmatpush1.bf16.msra.mxu0 %v9453_v22 }
0x1052   : > { %7980 = vmatmul.mubr.msk.bf16.gmra.mrb[104].mxu0 %vm834_vm0, %v4056_v61 }
0x1053   : > { %4319 = vmatprep.mubr.bf16.mxu0 %v10267_v0 }
0x105a   : > { %7991 = vmatmul.mubr.msk.bf16.vlgmr.msra.gmra.mrb[108].mxu0 %vm834_vm0, %v4156_v59  ;;  %v11779_v59 = vrot.slane %v4166_v41, %v10770_v21 }
0x105b   : > { %4329 = vmatprep.mubr.bf16.mxu0 %v10267_v0 }
0x10dc   : > { %v3710_v11 = vpop.f32.mrb[88].mxu0 }
0x10dd   : > { %v8768_v10 = vpop.f32.mrb[89].mxu0 }
0x10de   : > { %v3713_v40 = vpop.f32.mrb[90].mxu0 }
0x10df   : > { %v3624_v51 = vpop.f32.mrb[96].mxu1  ;;  %v8769_v34 = vpop.f32.mrb[91].mxu0 }
0x10e0   : > { %v8752_v28 = vpop.f32.mrb[97].mxu1 }
0x10e1   : > { %v3627_v45 = vpop.f32.mrb[98].mxu1 }
0x10e2   : > { %v8753_v8 = vpop.f32.mrb[99].mxu1 }
0x10e7   : > { %v3667_v44 = vpop.f32.mrb[100].mxu1 }
0x10e8   : > { %v3668_v57 = vadd.f32 %v3667_v44, %v3624_v51  ;;  %v8760_v47 = vpop.f32.mrb[101].mxu1 }
0x10e9   : > { %v3670_v6 = vpop.f32.mrb[102].mxu1 }
0x10ea   : > { %v8761_v39 = vpop.f32.mrb[103].mxu1  ;;  %v3716_v49 = vadd.f32 %v3710_v11, %v3668_v57 }
0x10ef   : > { %v3756_v18 = vpop.f32.mrb[104].mxu1 }
0x10f0   : > { %v3762_v1 = vadd.f32 %v3756_v18, %v3716_v49  ;;  %v8776_v50 = vpop.f32.mrb[105].mxu1 }
0x10f1   : > { %v3759_v60 = vpop.f32.mrb[106].mxu1 }
0x10f2   : > { %v8777_v26 = vpop.f32.mrb[107].mxu1 }
0x110d   : > { %v3800_v0 = vpop.f32.mrb[92].mxu0 }
0x110e   : > { %v3806_v63 = vadd.f32 %v3800_v0, %v3762_v1  ;;  %v8784_v62 = vpop.f32.mrb[93].mxu0 }
0x110f   : > { %v3803_v38 = vpop.f32.mrb[94].mxu0  ;;  %v3846_v53 = vpop.f32.mrb[108].mxu1 }
0x1110   : > { %v3852_v9 = vadd.f32 %v3846_v53, %v3806_v63  ;;  %v8785_v58 = vpop.f32.mrb[95].mxu0  ;;  %v8792_v33 = vpop.f32.mrb[109].mxu1 }
0x1111   : > { %v3849_v3 = vpop.f32.mrb[110].mxu1  ;;  %v11807_v33 = vrot.slane %v4166_v41, %v758_v25 }
0x1112   : > { %v8793_v13 = vpop.f32.mrb[111].mxu1 }
0x1115   : > { %v3890_v56 = vpop.f32.mrb[96].mxu0 }
0x1116   : > { %v3896_v42 = vadd.f32 %v3890_v56, %v3852_v9  ;;  %v8800_v43 = vpop.f32.mrb[97].mxu0  ;;  %v11803_v9 = vrot.slane %v4166_v41, %v754_v24 }
0x1117   : > { %v3893_v19 = vpop.f32.mrb[98].mxu0  ;;  %v3936_v55 = vpop.f32.mrb[112].mxu1 }
0x1118   : > { %v3942_v5 = vadd.f32 %v3936_v55, %v3896_v42  ;;  %v8801_v4 = vpop.f32.mrb[99].mxu0  ;;  %v8808_v16 = vpop.f32.mrb[113].mxu1 }
0x1119   : > { %v3939_v27 = vpop.f32.mrb[114].mxu1 }
0x111a   : > { %v3953_v35 = vadd.f32 %v11622_v29, %v3942_v5  ;;  %v8809_v37 = vpop.f32.mrb[115].mxu1  ;;  %v11783_v29 = vrot.slane %v4166_v41, %v10773_v23 }
0x111c   : > { %v3957_v32 = vadd.f32 %v9809_v14, %v3953_v35 }
0x111d   : > { %v4133_v7 = vpop.f32.mrb[100].mxu0 }
0x111e   : > { %v3967_v30 = vsel %vm834_vm0, %v3957_v32, 0.0  ;;  %v4134_v31 = vadd.f32 %v4133_v7, %v4066_v48  ;;  %v4135_v22 = vpop.f32.mrb[101].mxu0 }
0x111f   : > { %v4268_v61 = vpop.f32.mrb[116].mxu1  ;;  %3968 = vadd.xlane.f32.xlu1 %v3967_v30  ;;  %v4136_v11 = vadd.f32 %v4135_v22, %v4070_v15  ;;  %v4137_v10 = vpop.f32.mrb[102].mxu0 }
0x1120   : > { %v4270_v40 = vpop.f32.mrb[117].mxu1  ;;  %v4138_v51 = vadd.f32 %v4137_v10, %v4066_v48  ;;  %v4139_v34 = vpop.f32.mrb[103].mxu0  ;;  %v4269_v8 = vadd.f32 %v4268_v61, %v11779_v59 }
0x1121   : > { %v4272_v28 = vpop.f32.mrb[118].mxu1  ;;  %v4140_v45 = vadd.f32 %v4139_v34, %v4070_v15  ;;  %v4271_v47 = vadd.f32 %v4270_v40, %v11783_v29  ;;  %v3991_v30 = vpop.xlane.xlu0 %3990 }
0x1122   : > { %v4273_v21 = vadd.f32 %v4272_v28, %v11779_v59  ;;  %v4274_v44 = vpop.f32.mrb[119].mxu1  ;;  %v11787_v57 = vpack.c.bf16 %v4138_v51, %v4134_v31  ;;  %v3997_v31 = vmul.f32 0.032258064, %v3991_v30 }
0x1123   : > { %v4275_v6 = vadd.f32 %v4274_v44, %v11783_v29  ;;  %v11791_v23 = vpack.c.bf16 %v4140_v45, %v4136_v11 }
0x1124   : > { %v11793_v39 = vpack.c.bf16 %v4273_v21, %v4269_v8  ;;  %9614 = vrsqrt.f32 %v3997_v31  ;;  %vm4023_vm8 = vcmp.eq.f32.partialorder %v3997_v31, inf  ;;  %v4026_v45 = vand.u32 2147483648, %v3997_v31 }
0x1125   : > { %v11795_v49 = vpack.c.bf16 %v4275_v6, %v4271_v47  ;;  %v4143_v18 = vpop.f32.mrb[104].mxu0  ;;  %v11856_v7 = vrot.slane %v11791_v23, 4  ;;  %vm4025_vm9 = vcmp.eq.f32.partialorder %v3997_v31, 0.0 }
0x1126   : > { %v4144_v1 = vadd.f32 %v4143_v18, %v4066_v48  ;;  %v4145_v50 = vpop.f32.mrb[105].mxu0  ;;  %v4417_v3 = vrot.slane %v11793_v39, 4 }
0x1127   : > { %v4146_v60 = vadd.f32 %v4145_v50, %v4070_v15  ;;  %v4147_v26 = vpop.f32.mrb[106].mxu0 }
0x1128   : > { %v4148_v0 = vadd.f32 %v4147_v26, %v4066_v48  ;;  %v4149_v63 = vpop.f32.mrb[107].mxu0 }
0x1129   : > { %v4150_v62 = vadd.f32 %v4149_v63, %v4070_v15  ;;  %v4421_v15 = vrot.slane %v11795_v49, 4 }
0x112a   : > { %v11797_v38 = vpack.c.bf16 %v4148_v0, %v4144_v1 }
0x112b   : > { %v11799_v53 = vpack.c.bf16 %v4150_v62, %v4146_v60 }
0x112d   : > { %v4321_v58 = vpop.f32.mrb[108].mxu0 }
0x112e   : > { %v4323_v13 = vpop.f32.mrb[109].mxu0  ;;  %v4322_v42 = vadd.f32 %v4321_v58, %v11803_v9  ;;  %v9615_v22 = vpop.eup %9614 }
0x112f   : > { %v4325_v56 = vpop.f32.mrb[110].mxu0  ;;  %v4324_v24 = vadd.f32 %v4323_v13, %v11807_v33  ;;  %v4022_v10 = vmul.f32 %v9615_v22, %v3997_v31 }
0x1130   : > { %v4326_v43 = vadd.f32 %v4325_v56, %v11803_v9  ;;  %4418 = vrot.lane.b32.xlu1 %v4417_v3, %s10268_s15  ;;  %v4327_v19 = vpop.f32.mrb[111].mxu0 }
0x1131   : > { %v4328_v55 = vadd.f32 %v4327_v19, %v11807_v33  ;;  %v4024_v34 = vsel %vm4023_vm8, %v3997_v31, %v4022_v10 }
0x1132   : > { %v11817_v20 = vpack.c.bf16 %v4326_v43, %v4322_v42  ;;  %v4027_v21 = vsel %vm4025_vm9, %v4026_v45, %v4024_v34  ;;  %v4005_v43 = vmul.f32 %v11716_v54, %v11667_v52 }
0x1133   : > { %v11819_v25 = vpack.c.bf16 %v4328_v55, %v4324_v24  ;;  %v4037_v47 = vadd.f32 1e-05, %v4027_v21 }
0x1134   : > { %v4425_v14 = vrot.slane %v11817_v20, 4 }
0x1135   : > { %v4429_v17 = vrot.slane %v11819_v25, 4 }
0x1137   : > { %4430 = vrot.lane.b32.xlu0 %v4429_v17, %s10268_s15 }
0x11a9   : > { %v4431_v6 = vpop.permute.xlu0 %4430 }
0x11aa   : > { %v11882_v60 = vsel %vm1089_vm1, %v11819_v25, %v4431_v6 }
0x11ab   : > { %v4458_v13 = vsel %vm834_vm0, %v11882_v60, 0 }
0x11ac   : > { %v3969_v5 = vpop.xlane.xlu1 %3968 }
0x11ad   : > { %v3974_v4 = vmul.f32 0.03125, %v3969_v5 }
0x11af   : > { %v11825_v16 = vsub.f32 %v3957_v32, %v3974_v4  ;;  %v11847_v32 = vrot.slane %v11787_v57, 4 }
0x11b0   : > { %v4419_v27 = vpop.permute.xlu1 %4418 }
0x11b1   : > { %v11829_v35 = vsel %vm1089_vm1, %v11793_v39, %v4419_v27  ;;  %v3982_v37 = vmul.f32 %v11825_v16, %v11825_v16  ;;  %v4006_v19 = vmul.f32 %v11716_v54, %v11825_v16 }
0x11b2   : > { %9230 = vmatprep.subr.msk.bf16.mxu1 %vm834_vm0, %v11829_v35  ;;  %v4452_v48 = vsel %vm834_vm0, %v11829_v35, 0 }
0x11b3   : > { %8811 = vmatpush3.bf16.xpose.msra.mxu1 %v4452_v48  ;;  %v3992_v41 = vsel %vm834_vm0, %v3982_v37, 0.0 }
0x11b4   : > { %3993 = vadd.xlane.f32.xlu1 %v3992_v41 }
0x11c5   : > { %4422 = vrot.lane.b32.xlu1 %v4421_v15, %s10268_s15 }
0x11c9   : > { %4426 = vrot.lane.b32.xlu1 %v4425_v14, %s10268_s15 }
0x11cd   : > { %4390 = vrot.lane.b32.xlu1 %v11847_v32, %s10270_s3 }
0x11d1   : > { %4392 = vrot.lane.b32.xlu1 %v11787_v57, %s10268_s15 }
0x11d5   : > { %4394 = vrot.lane.b32.xlu1 %v11847_v32, %s10269_s29 }
0x11d9   : > { %4398 = vrot.lane.b32.xlu1 %v11856_v7, %s10270_s3 }
0x11dd   : > { %4400 = vrot.lane.b32.xlu1 %v11791_v23, %s10268_s15 }
0x11e1   : > { %4402 = vrot.lane.b32.xlu1 %v11856_v7, %s10269_s29 }
0x1241   : > { %v3994_v61 = vpop.xlane.xlu1 %3993 }
0x1242   : > { %v3998_v11 = vmul.f32 0.032258064, %v3994_v61 }
0x1244   : > { %9616 = vrsqrt.f32 %v3998_v11  ;;  %vm4030_vm10 = vcmp.eq.f32.partialorder %v3998_v11, inf  ;;  %v4033_v26 = vand.u32 2147483648, %v3998_v11  ;;  %vm4032_vm11 = vcmp.eq.f32.partialorder %v3998_v11, 0.0 }
0x1245   : > { %v4423_v40 = vpop.permute.xlu1 %4422  ;;  %9618 = vrcp.f32 %v4037_v47 }
0x1246   : > { %v11866_v51 = vsel %vm1089_vm1, %v11795_v49, %v4423_v40 }
0x1247   : > { %9231 = vmatprep.subr.msk.bf16.mxu1 %vm834_vm0, %v11866_v51  ;;  %v4454_v28 = vsel %vm834_vm0, %v11866_v51, 0 }
0x1248   : > { %8813 = vmatpush3.bf16.xpose.msra.mxu1 %v4454_v28 }
0x1249   : > { %v4427_v8 = vpop.permute.xlu1 %4426 }
0x124a   : > { %v11874_v44 = vsel %vm1089_vm1, %v11817_v20, %v4427_v8 }
0x124b   : > { %9232 = vmatprep.subr.msk.bf16.mxu1 %vm834_vm0, %v11874_v44  ;;  %v4456_v50 = vsel %vm834_vm0, %v11874_v44, 0 }
0x124d   : > { %v4391_v58 = vpop.permute.xlu1 %4390 }
0x124e   : > { %v9617_v18 = vpop.eup %9616  ;;  %v4406_v41 = vsel %vm1089_vm1, %v11787_v57, %v4391_v58 }
0x124f   : > { %v4029_v1 = vmul.f32 %v9617_v18, %v3998_v11  ;;  %v9619_v42 = vpop.eup %9618 }
0x1250   : > { %8815 = vmatpush3.bf16.xpose.msra.mxu1 %v4456_v50  ;;  %v4044_v24 = vmul.f32 %v9619_v42, %v4005_v43 }
0x1251   : > { %v4031_v0 = vsel %vm4030_vm10, %v3998_v11, %v4029_v1  ;;  %9233 = vmatprep.subr.msk.bf16.mxu1 %vm834_vm0, %v11882_v60  ;;  %v4393_v56 = vpop.permute.xlu1 %4392 }
0x1252   : > { %v4034_v63 = vsel %vm4032_vm11, %v4033_v26, %v4031_v0  ;;  %v11894_v27 = vadd.f32 %v11745_v2, %v4044_v24 }
0x1253   : > { %v4038_v62 = vadd.f32 1e-05, %v4034_v63 }
0x1255   : > { %9620 = vrcp.f32 %v4038_v62  ;;  %v4395_v5 = vpop.permute.xlu1 %4394 }
0x1256   : > { %v4409_v16 = vsel %vm1089_vm1, %v4393_v56, %v4395_v5 }
0x1258   : > { %8817 = vmatpush3.bf16.xpose.msra.mxu1 %v4458_v13 }
0x1259   : > { %8850 = vmatprep.subr.bf16.mxu1 %v10271_v36  ;;  %v4399_v52 = vpop.permute.xlu1 %4398 }
0x125d   : > { %v4401_v54 = vpop.permute.xlu1 %4400 }
0x125f   : > { %v9621_v55 = vpop.eup %9620 }
0x1260   : > { %v4046_v4 = vmul.f32 %v9621_v55, %v4006_v19  ;;  %v11931_v19 = vld [vmem:[#allocation7] sm:$0xff] }
0x1261   : > { %v4403_v30 = vpop.permute.xlu1 %4402 }
0x1262   : > { %v11897_v37 = vadd.f32 %v11745_v2, %v4046_v4  ;;  %v4412_v2 = vsel %vm1089_vm1, %v11791_v23, %v4399_v52  ;;  %v4415_v31 = vsel %vm1089_vm1, %v4401_v54, %v4403_v30  ;;  %v11937_v4 = vld [vmem:[#allocation7 + $0x8] sm:$0xff] }
0x1264   : > { %v4157_v48 = vpack.c.bf16 %v11897_v37, %v11894_v27 }
0x1266   : > { %7990 = vmatmul.mubr.msk.bf16.gmra.mrb[120].mxu1 %vm834_vm0, %v4157_v48  ;;  %7992 = vmatmul.mubr.msk.bf16.gmra.mrb[112].mxu0 %vm834_vm0, %v4157_v48 }
0x1267   : > { %8818 = vmatprep.mubr.msk.bf16.mxu1 %vm834_vm0, %v4406_v41 }
0x126e   : > { %8819 = vmatmul.mubr.msk.bf16.vlgmr.msra.gmra.mrb[124].mxu1 %vm834_vm0, %v4409_v16 }
0x126f   : > { %8822 = vmatprep.mubr.msk.bf16.mxu1 %vm834_vm0, %v4412_v2  ;;  %v11942_v2 = vld [vmem:[#allocation7 + $0x18] sm:$0xff] }
0x1276   : > { %8823 = vmatmul.mubr.msk.bf16.gmra.mrb[128].mxu1 %vm834_vm0, %v4415_v31 }
0x1277   : > { %8854 = vmatprep.mubr.msk.bf16.mxu1 %vm10272_vm3, %v10271_v36 }
0x1339   : > { %v4278_v22 = vpop.f32.mrb[120].mxu1  ;;  %v4331_v61 = vpop.f32.mrb[112].mxu0 }
0x133a   : > { %v4280_v11 = vpop.f32.mrb[121].mxu1  ;;  %v4333_v10 = vpop.f32.mrb[113].mxu0  ;;  %v4279_v28 = vadd.f32 %v4278_v22, %v11779_v59  ;;  %v4332_v45 = vadd.f32 %v4331_v61, %v11803_v9 }
0x133b   : > { %v4282_v40 = vpop.f32.mrb[122].mxu1  ;;  %v4335_v34 = vpop.f32.mrb[114].mxu0  ;;  %v4281_v18 = vadd.f32 %v4280_v11, %v11783_v29  ;;  %v4334_v1 = vadd.f32 %v4333_v10, %v11807_v33 }
0x133c   : > { %v4283_v8 = vadd.f32 %v4282_v40, %v11779_v59  ;;  %v4336_v21 = vadd.f32 %v4335_v34, %v11803_v9  ;;  %v4284_v47 = vpop.f32.mrb[123].mxu1  ;;  %v4337_v6 = vpop.f32.mrb[115].mxu0  ;;  %v11946_v34 = vld [vmem:[#allocation7 + $0x38] sm:$0xff] }
0x133d   : > { %v4285_v50 = vadd.f32 %v4284_v47, %v11783_v29  ;;  %v4338_v26 = vadd.f32 %v4337_v6, %v11807_v33  ;;  %v11934_v33 = vld [vmem:[#allocation7 + $0x10] sm:$0xff]  ;;  %v11953_v6 = vld [vmem:[#allocation7 + $0x28] sm:$0xff] }
0x133e   : > { %v11923_v0 = vpack.c.bf16 %v4283_v8, %v4279_v28  ;;  %v11925_v63 = vpack.c.bf16 %v4336_v21, %v4332_v45  ;;  %v11949_v45 = vld [vmem:[#allocation7 + $0x30] sm:$0xff] }
0x133f   : > { %v11927_v62 = vpack.c.bf16 %v4285_v50, %v4281_v18  ;;  %v11929_v58 = vpack.c.bf16 %v4338_v26, %v4334_v1  ;;  %v11957_v50 = vld [vmem:[#allocation7 + $0x20] sm:$0xff] }
0x1341   : > { %v8820_v59 = vpop.f32.mrb[124].mxu1 }
0x1342   : > { %v4494_v9 = vpop.f32.mrb[125].mxu1  ;;  %v4527_v13 = vmul.f32 0.0625, %v8820_v59 }
0x1343   : > { %v4525_v56 = vmul.f32 0.0625, %v4494_v9  ;;  %v8821_v42 = vpop.f32.mrb[126].mxu1 }
0x1344   : > { %v4497_v43 = vpop.f32.mrb[127].mxu1  ;;  %v4535_v55 = vadd.f32 %v11934_v33, %v4527_v13  ;;  %v4528_v5 = vmul.f32 0.0625, %v8821_v42 }
0x1345   : > { %v4533_v29 = vadd.f32 %v11931_v19, %v4525_v56  ;;  %v4526_v24 = vmul.f32 0.0625, %v4497_v43 }
0x1346   : > { %v4536_v30 = vadd.f32 %v11942_v2, %v4528_v5  ;;  %v4547_v61 = vsel %vm1066_vm2, %v4535_v55, -inf }
0x1347   : > { %v4534_v48 = vadd.f32 %v11937_v4, %v4526_v24  ;;  %v4541_v41 = vsel %vm1066_vm2, %v4533_v29, -inf }
0x1348   : > { %4542 = vmax.xlane.f32.xlu0 %v4541_v41  ;;  %v4550_v47 = vsel %vm1066_vm2, %v4536_v30, -inf }
0x1349   : > { %v8824_v52 = vpop.f32.mrb[128].mxu1  ;;  %v4544_v54 = vsel %vm1066_vm2, %v4534_v48, -inf }
0x134a   : > { %4545 = vmax.xlane.f32.xlu1 %v4544_v54  ;;  %v4510_v16 = vpop.f32.mrb[129].mxu1  ;;  %v4531_v31 = vmul.f32 0.0625, %v8824_v52 }
0x134b   : > { %v8825_v22 = vpop.f32.mrb[130].mxu1  ;;  %v4529_v21 = vmul.f32 0.0625, %v4510_v16 }
0x134c   : > { %v4532_v11 = vmul.f32 0.0625, %v8825_v22  ;;  %4548 = vmax.xlane.f32.xlu0 %v4547_v61  ;;  %v4513_v10 = vpop.f32.mrb[131].mxu1  ;;  %v4539_v8 = vadd.f32 %v11949_v45, %v4531_v31 }
0x134d   : > { %v4530_v40 = vmul.f32 0.0625, %v4513_v10  ;;  %v4537_v26 = vadd.f32 %v11957_v50, %v4529_v21 }
0x134e   : > { %v4540_v28 = vadd.f32 %v11946_v34, %v4532_v11  ;;  %v4559_v59 = vsel %vm1066_vm2, %v4539_v8, -inf }
0x134f   : > { %v4538_v18 = vadd.f32 %v11953_v6, %v4530_v40  ;;  %v4553_v13 = vsel %vm1066_vm2, %v4537_v26, -inf }
0x1350   : > { %4551 = vmax.xlane.f32.xlu0 %v4550_v47  ;;  %v4562_v1 = vsel %vm1066_vm2, %v4540_v28, -inf }
0x1351   : > { %4563 = vmax.xlane.f32.xlu1 %v4562_v1  ;;  %v4556_v9 = vsel %vm1066_vm2, %v4538_v18, -inf }
0x1354   : > { %4560 = vmax.xlane.f32.xlu0 %v4559_v59 }
0x1355   : > { %4557 = vmax.xlane.f32.xlu1 %v4556_v9 }
0x1358   : > { %4554 = vmax.xlane.f32.xlu0 %v4553_v13 }
0x1366   : > { %4639 = vrot.lane.b32.xlu1 %v11866_v51, %s10270_s3 }
0x136e   : > { %4637 = vrot.lane.b32.xlu0 %v11829_v35, %s10270_s3 }
0x13d5   : > { %v4543_v56 = vpop.xlane.xlu0 %4542 }
0x13d6   : > { %v4565_v42 = vsub.f32 %v4533_v29, %v4543_v56 }
0x13d7   : > { %v4546_v43 = vpop.xlane.xlu1 %4545 }
0x13d8   : > { %v4573_v41 = vmul.f32 1.442695, %v4565_v42  ;;  %v4566_v52 = vsub.f32 %v4534_v48, %v4546_v43 }
0x13d9   : > { %v4549_v24 = vpop.xlane.xlu0 %4548 }
0x13da   : > { %v4567_v5 = vsub.f32 %v4535_v55, %v4549_v24  ;;  %v4575_v61 = vmul.f32 1.442695, %v4566_v52 }
0x13dc   : > { %v4577_v54 = vmul.f32 1.442695, %v4567_v5 }
0x13dd   : > { %v4552_v16 = vpop.xlane.xlu0 %4551 }
0x13de   : > { %9622 = vpow2.f32 %v4577_v54  ;;  %v4568_v31 = vsub.f32 %v4536_v30, %v4552_v16  ;;  %v4564_v22 = vpop.xlane.xlu1 %4563 }
0x13df   : > { %9624 = vpow2.f32 %v4573_v41  ;;  %v4572_v35 = vsub.f32 %v4540_v28, %v4564_v22 }
0x13e0   : > { %v4579_v11 = vmul.f32 1.442695, %v4568_v31 }
0x13e1   : > { %v4561_v10 = vpop.xlane.xlu0 %4560  ;;  %v4587_v48 = vmul.f32 1.442695, %v4572_v35 }
0x13e2   : > { %9626 = vpow2.f32 %v4579_v11  ;;  %v4571_v51 = vsub.f32 %v4539_v8, %v4561_v10  ;;  %v4558_v29 = vpop.xlane.xlu1 %4557 }
0x13e3   : > { %9628 = vpow2.f32 %v4575_v61  ;;  %v4570_v1 = vsub.f32 %v4538_v18, %v4558_v29 }
0x13e4   : > { %v4585_v40 = vmul.f32 1.442695, %v4571_v51 }
0x13e5   : > { %v4555_v21 = vpop.xlane.xlu0 %4554 }
0x13e6   : > { %9630 = vpow2.f32 %v4585_v40  ;;  %v4569_v55 = vsub.f32 %v4537_v26, %v4555_v21  ;;  %v4640_v28 = vpop.permute.xlu1 %4639  ;;  %v4583_v26 = vmul.f32 1.442695, %v4570_v1 }
0x13e8   : > { %v11967_v47 = vpop.eup %9622  ;;  %v4581_v59 = vmul.f32 1.442695, %v4569_v55 }
0x13e9   : > { %v4638_v30 = vpop.permute.xlu0 %4637  ;;  %v4595_v9 = vsel %vm1066_vm2, %v11967_v47, 0.0  ;;  %v11971_v13 = vpop.eup %9624 }
0x13ea   : > { %9632 = vpow2.f32 %v4581_v59  ;;  %4596 = vadd.xlane.f32.xlu0 %v4595_v9  ;;  %8826 = vmatprep.subr.bf16.mxu0 %v4638_v30  ;;  %v4589_v18 = vsel %vm1066_vm2, %v11971_v13, 0.0 }
0x13eb   : > { %8827 = vmatpush3.bf16.msra.mxu0 %v4638_v30  ;;  %9634 = vpow2.f32 %v4587_v48 }
0x13ec   : > { %v11973_v8 = vpop.eup %9626  ;;  %8828 = vmatprep.subr.bf16.mxu0 %v4640_v28  ;;  %9636 = vpow2.f32 %v4583_v26 }
0x13ed   : > { %v4598_v56 = vsel %vm1066_vm2, %v11973_v8, 0.0  ;;  %v9629_v42 = vpop.eup %9628 }
0x13ee   : > { %4590 = vadd.xlane.f32.xlu0 %v4589_v18  ;;  %4599 = vadd.xlane.f32.xlu1 %v4598_v56  ;;  %v4592_v5 = vsel %vm1066_vm2, %v9629_v42, 0.0  ;;  %v12028_v18 = vld [vmem:[#allocation16 + $0x90] sm:$0xff]  }
0x13ef   : > { %8829 = vmatpush3.bf16.msra.mxu0 %v4640_v28 }
0x13f0   : > { %v11979_v43 = vpop.eup %9630 }
0x13f1   : > { %v4607_v24 = vsel %vm1066_vm2, %v11979_v43, 0.0 }
0x13f2   : > { %4608 = vadd.xlane.f32.xlu0 %v4607_v24  ;;  %4593 = vadd.xlane.f32.xlu1 %v4592_v5 }
0x13f4   : > { %v11984_v41 = vpop.eup %9632 }
0x13f5   : > { %v4601_v52 = vsel %vm1066_vm2, %v11984_v41, 0.0  ;;  %v11988_v54 = vpop.eup %9634 }
0x13f6   : > { %4602 = vadd.xlane.f32.xlu1 %v4601_v52  ;;  %v4610_v16 = vsel %vm1066_vm2, %v11988_v54, 0.0  ;;  %v11992_v31 = vpop.eup %9636 }
0x13f7   : > { %v4604_v22 = vsel %vm1066_vm2, %v11992_v31, 0.0 }
0x13fa   : > { %4611 = vadd.xlane.f32.xlu1 %v4610_v16 }
0x13fe   : > { %4605 = vadd.xlane.f32.xlu1 %v4604_v22 }
0x1408   : > { %4641 = vrot.lane.b32.xlu0 %v11874_v44, %s10270_s3  ;;  %v12020_v44 = vld [vmem:[#allocation16 + $0x80] sm:$0xff]  }
0x1409   : > { %8851 = vmatpush3.bf16.msra.mxu1 %v12020_v44 }
0x140a   : > { %8852 = vmatprep.subr.bf16.mxu1 %v10271_v36 }
0x140c   : > { %5208 = vrot.lane.b32.xlu0 %v11793_v39, %s10268_s15 }
0x140f   : > { %4643 = vrot.lane.b32.xlu1 %v11882_v60, %s10270_s3 }
0x1410   : > { %5212 = vrot.lane.b32.xlu0 %v11817_v20, %s10268_s15 }
0x1413   : > { %5210 = vrot.lane.b32.xlu1 %v11795_v49, %s10268_s15 }
0x1414   : > { %5184 = vrot.lane.b32.xlu0 %v11787_v57, %s10270_s3 }
0x1417   : > { %5214 = vrot.lane.b32.xlu1 %v11819_v25, %s10268_s15 }
0x1418   : > { %5188 = vrot.lane.b32.xlu0 %v11787_v57, %s10269_s29 }
0x141b   : > { %5186 = vrot.lane.b32.xlu1 %v11847_v32, %s10268_s15 }
0x141c   : > { %5192 = vrot.lane.b32.xlu0 %v11856_v7, %s10268_s15 }
0x141f   : > { %5190 = vrot.lane.b32.xlu1 %v11791_v23, %s10270_s3 }
0x1423   : > { %5194 = vrot.lane.b32.xlu1 %v11791_v23, %s10269_s29 }
0x1477   : > { %v4597_v60 = vpop.xlane.xlu0 %4596 }
0x147b   : > { %v4591_v57 = vpop.xlane.xlu0 %4590  ;;  %v4600_v61 = vpop.xlane.xlu1 %4599 }
0x147c   : > { %9638 = vrcp.f32 %v4591_v57  ;;  %v12042_v57 = vld [vmem:[#allocation16 + $0x98] sm:$0xff]  }
0x147d   : > { %9640 = vrcp.f32 %v4600_v61 }
0x147f   : > { %v4609_v11 = vpop.xlane.xlu0 %4608  ;;  %v4594_v10 = vpop.xlane.xlu1 %4593 }
0x1480   : > { %9642 = vrcp.f32 %v4594_v10  ;;  %v12050_v10 = vld [vmem:[#allocation16 + $0xb0] sm:$0xff]  }
0x1481   : > { %9644 = vrcp.f32 %v4597_v60 }
0x1483   : > { %v4642_v51 = vpop.permute.xlu0 %4641  ;;  %v4603_v35 = vpop.xlane.xlu1 %4602 }
0x1484   : > { %8830 = vmatprep.subr.bf16.mxu0 %v4642_v51 }
0x1485   : > { %8831 = vmatpush3.bf16.msra.mxu0 %v4642_v51 }
0x1486   : > { %v9639_v40 = vpop.eup %9638 }
0x1487   : > { %v4612_v23 = vpop.xlane.xlu1 %4611  ;;  %v9641_v29 = vpop.eup %9640  ;;  %v4621_v48 = vmul.f32 %v9639_v40, %v11971_v13  ;;  %v12056_v40 = vld [vmem:[#allocation16 + $0xb8] sm:$0xff]  }
0x1488   : > { %9646 = vrcp.f32 %v4612_v23  ;;  %v4624_v30 = vmul.f32 %v9641_v29, %v11973_v8 }
0x1489   : > { %9648 = vrcp.f32 %v4603_v35  ;;  %v12052_v35 = vld [vmem:[#allocation16 + $0xa0] sm:$0xff]  }
0x148a   : > { %v9643_v21 = vpop.eup %9642  ;;  %9650 = vrcp.f32 %v4609_v11 }
0x148b   : > { %v4606_v55 = vpop.xlane.xlu1 %4605  ;;  %v4622_v1 = vmul.f32 %v9643_v21, %v9629_v42  ;;  %v9645_v59 = vpop.eup %9644 }
0x148c   : > { %9652 = vrcp.f32 %v4606_v55  ;;  %v4623_v26 = vmul.f32 %v9645_v59, %v11967_v47  ;;  %v12063_v55 = vld [vmem:[#allocation16 + $0xa8] sm:$0xff]  }
0x148d   : > { %v4629_v9 = vpack.c.bf16 %v4622_v1, %v4621_v48 }
0x148e   : > { %v4630_v56 = vpack.c.bf16 %v4624_v30, %v4623_v26  ;;  %v12069_v30 = vld [vmem:[#allocation16 + $0xd0] sm:$0xff]   ;;  %v12073_v26 = vld [vmem:[#allocation16 + $0xc0] sm:$0xff]  }
0x148f   : > { %v4644_v28 = vpop.permute.xlu1 %4643  ;;  %8834 = vmatprep.mubr.msk.bf16.mxu0 %vm1066_vm2, %v4629_v9 }
0x1490   : > { %8832 = vmatprep.subr.bf16.mxu0 %v4644_v28 }
0x1491   : > { %8833 = vmatpush3.bf16.msra.mxu0 %v4644_v28 }
0x1492   : > { %8842 = vmatprep.subr.bf16.mxu0 %v10271_v36  ;;  %v9647_v24 = vpop.eup %9646 }
0x1493   : > { %v9649_v5 = vpop.eup %9648  ;;  %v4628_v42 = vmul.f32 %v9647_v24, %v11988_v54  ;;  %v12044_v54 = vld [vmem:[#allocation16 + $0x88] sm:$0xff]   ;;  %v5209_v24 = vpop.permute.xlu0 %5208 }
0x1494   : > { %8835 = vmatmul.mubr.msk.bf16.vlgmr.msra.gmra.mrb[116].mxu0 %vm1066_vm2, %v4630_v56  ;;  %v9651_v13 = vpop.eup %9650  ;;  %v4625_v47 = vmul.f32 %v9649_v5, %v11984_v41  ;;  %8853 = vmatpush3.bf16.msra.mxu1 %v12044_v54  ;;  %v12078_v56 = vld [vmem:[#allocation16 + $0xd8] sm:$0xff]   ;;  %v12085_v5 = vld [vmem:[#allocation16 + $0xc8] sm:$0xff]  }
0x1495   : > { %8843 = vmatpush3.bf16.msra.mxu0 %v12028_v18  ;;  %v4627_v16 = vmul.f32 %v9651_v13, %v11979_v43  ;;  %8866 = vmatprep.subr.bf16.mxu1 %v10271_v36  ;;  %v12091_v13 = vld [vmem:[#allocation16 + $0xf0] sm:$0xff]  }
0x1496   : > { %v9653_v8 = vpop.eup %9652  ;;  %8844 = vmatprep.subr.bf16.mxu0 %v10271_v36 }
0x1497   : > { %v4626_v52 = vmul.f32 %v9653_v8, %v11992_v31  ;;  %v4632_v60 = vpack.c.bf16 %v4628_v42, %v4627_v16  ;;  %v12095_v42 = vld [vmem:[#allocation16 + $0xe0] sm:$0xff]   ;;  %v12107_v16 = vld [vmem:[#allocation16 + $0xe8] sm:$0xff]  }
0x1499   : > { %v4631_v22 = vpack.c.bf16 %v4626_v52, %v4625_v47  ;;  %8845 = vmatpush3.bf16.msra.mxu0 %v12042_v57  ;;  %v5213_v47 = vpop.permute.xlu0 %5212  ;;  %v12100_v52 = vld [vmem:[#allocation16 + $0xf8] sm:$0xff]  }
0x149a   : > { %8858 = vmatprep.subr.bf16.mxu0 %v10271_v36 }
0x149b   : > { %8838 = vmatprep.mubr.msk.bf16.mxu0 %vm1066_vm2, %v4631_v22 }
0x149c   : > { %8839 = vmatmul.mubr.msk.bf16.gmra.mrb[120].mxu0 %vm1066_vm2, %v4632_v60  ;;  %v12116_v60 = vsel %vm1089_vm1, %v4417_v3, %v5209_v24 }
0x149d   : > { %8846 = vmatprep.mubr.msk.bf16.mxu0 %vm10272_vm3, %v10271_v36  ;;  %v5236_v39 = vsel %vm834_vm0, %v12116_v60, 0 }
0x1567   : > { %v8836_v43 = vpop.f32.mrb[116].mxu0 }
0x1568   : > { %v4695_v41 = vpop.f32.mrb[117].mxu0 }
0x1569   : > { %v8837_v31 = vpop.f32.mrb[118].mxu0 }
0x156a   : > { %v4727_v61 = vpack.c.bf16 %v8837_v31, %v8836_v43  ;;  %v4698_v11 = vpop.f32.mrb[119].mxu0  ;;  %v5185_v43 = vpop.permute.xlu0 %5184 }
0x156b   : > { %v4726_v51 = vpack.c.bf16 %v4698_v11, %v4695_v41  ;;  %v5198_v41 = vsel %vm1089_vm1, %v11847_v32, %v5185_v43  ;;  %v5211_v31 = vpop.permute.xlu1 %5210 }
0x156c   : > { %v4899_v9 = vrot.slane %v4727_v61, 4  ;;  %v12131_v3 = vsel %vm1089_vm1, %v4421_v15, %v5211_v31 }
0x156d   : > { %v4731_v23 = vrot.slane %v4726_v51, 4  ;;  %8855 = vmatmul.mubr.msk.bf16.vlgmr.msra.gmra.mrb[132].mxu1 %vm834_vm0, %v4726_v51  ;;  %v5238_v32 = vsel %vm834_vm0, %v12131_v3, 0 }
0x156e   : > { %8867 = vmatpush3.bf16.msra.mxu1 %v12050_v10  ;;  %8870 = vmatprep.mubr.msk.bf16.mxu1 %vm10272_vm3, %v10271_v36 }
0x156f   : > { %v8840_v29 = vpop.f32.mrb[120].mxu0  ;;  %8847 = vmatmul.mubr.msk.bf16.vlgmr.msra.gmra.mrb[124].mxu0 %vm834_vm0, %v4731_v23  ;;  %8868 = vmatprep.subr.bf16.mxu1 %v10271_v36  ;;  %v5215_v49 = vpop.permute.xlu1 %5214 }
0x1570   : > { %8859 = vmatpush3.bf16.msra.mxu0 %v12052_v35  ;;  %v4711_v21 = vpop.f32.mrb[121].mxu0  ;;  %8862 = vmatprep.mubr.msk.bf16.mxu0 %vm10272_vm3, %v10271_v36  ;;  %v12149_v11 = vsel %vm1089_vm1, %v4429_v17, %v5215_v49  ;;  %v5189_v23 = vpop.permute.xlu0 %5188 }
0x1571   : > { %v8841_v48 = vpop.f32.mrb[122].mxu0  ;;  %8860 = vmatprep.subr.bf16.mxu0 %v10271_v36 }
0x1572   : > { %v4729_v1 = vpack.c.bf16 %v8841_v48, %v8840_v29  ;;  %v4714_v59 = vpop.f32.mrb[123].mxu0  ;;  %8869 = vmatpush3.bf16.msra.mxu1 %v12056_v40 }
0x1573   : > { %v4728_v28 = vpack.c.bf16 %v4714_v59, %v4711_v21  ;;  %8882 = vmatprep.subr.bf16.mxu1 %v10271_v36  ;;  %v5187_v20 = vpop.permute.xlu1 %5186 }
0x1574   : > { %8861 = vmatpush3.bf16.msra.mxu0 %v12063_v55  ;;  %v5127_v22 = vrot.slane %v4729_v1, 4  ;;  %v5201_v29 = vsel %vm1089_vm1, %v5187_v20, %v5189_v23  ;;  %v5193_v21 = vpop.permute.xlu0 %5192 }
0x1575   : > { %8871 = vmatmul.mubr.msk.bf16.vlgmr.msra.gmra.mrb[136].mxu1 %vm834_vm0, %v4899_v9  ;;  %8874 = vmatprep.subr.bf16.mxu0 %v10271_v36  ;;  %v5013_v8 = vrot.slane %v4728_v28, 4 }
0x1576   : > { %8883 = vmatpush3.bf16.msra.mxu1 %v12069_v30  ;;  %8886 = vmatprep.mubr.msk.bf16.mxu1 %vm10272_vm3, %v10271_v36 }
0x1577   : > { %8863 = vmatmul.mubr.msk.bf16.vlgmr.msra.gmra.mrb[128].mxu0 %vm834_vm0, %v4727_v61  ;;  %8884 = vmatprep.subr.bf16.mxu1 %v10271_v36  ;;  %v12140_v61 = vsel %vm1089_vm1, %v4425_v14, %v5213_v47  ;;  %v5242_v14 = vsel %vm834_vm0, %v12149_v11, 0  ;;  %v5191_v51 = vpop.permute.xlu1 %5190 }
0x1578   : > { %8875 = vmatpush3.bf16.msra.mxu0 %v12073_v26  ;;  %8878 = vmatprep.mubr.msk.bf16.mxu0 %vm10272_vm3, %v10271_v36  ;;  %v5240_v15 = vsel %vm834_vm0, %v12140_v61, 0  ;;  %v5204_v25 = vsel %vm1089_vm1, %v11856_v7, %v5191_v51 }
0x1579   : > { %8876 = vmatprep.subr.bf16.mxu0 %v10271_v36 }
0x157a   : > { %8885 = vmatpush3.bf16.msra.mxu1 %v12078_v56 }
0x157b   : > { %8898 = vmatprep.subr.bf16.mxu1 %v10271_v36  ;;  %v5195_v17 = vpop.permute.xlu1 %5194 }
0x157c   : > { %8877 = vmatpush3.bf16.msra.mxu0 %v12085_v5  ;;  %v5207_v48 = vsel %vm1089_vm1, %v5193_v21, %v5195_v17 }
0x157d   : > { %8887 = vmatmul.mubr.msk.bf16.vlgmr.msra.gmra.mrb[140].mxu1 %vm834_vm0, %v5013_v8  ;;  %8890 = vmatprep.subr.bf16.mxu0 %v10271_v36 }
0x157e   : > { %8899 = vmatpush3.bf16.msra.mxu1 %v12091_v13  ;;  %8902 = vmatprep.mubr.msk.bf16.mxu1 %vm10272_vm3, %v10271_v36 }
0x157f   : > { %8879 = vmatmul.mubr.msk.bf16.vlgmr.msra.gmra.mrb[132].mxu0 %vm834_vm0, %v4728_v28  ;;  %8900 = vmatprep.subr.bf16.mxu1 %v10271_v36 }
0x1580   : > { %8891 = vmatpush3.bf16.msra.mxu0 %v12095_v42  ;;  %8894 = vmatprep.mubr.msk.bf16.mxu0 %vm10272_vm3, %v10271_v36 }
0x1581   : > { %8892 = vmatprep.subr.bf16.mxu0 %v10271_v36 }
0x1582   : > { %8901 = vmatpush3.bf16.msra.mxu1 %v12100_v52 }
0x1584   : > { %8893 = vmatpush3.bf16.msra.mxu0 %v12107_v16 }
0x1585   : > { %9234 = vmatprep.subr.msk.bf16.mxu0 %vm834_vm0, %v12116_v60  ;;  %8903 = vmatmul.mubr.msk.bf16.vlgmr.msra.gmra.mrb[144].mxu1 %vm834_vm0, %v5127_v22 }
0x1587   : > { %8895 = vmatmul.mubr.msk.bf16.vlgmr.msra.gmra.mrb[136].mxu0 %vm834_vm0, %v4729_v1 }
0x1588   : > { %8914 = vmatprep.mubr.msk.bf16.mxu0 %vm834_vm0, %v5198_v41 }
0x158d   : > { %8907 = vmatpush3.bf16.xpose.msra.mxu0 %v5236_v39 }
0x158e   : > { %9235 = vmatprep.subr.msk.bf16.mxu0 %vm834_vm0, %v12131_v3 }
0x1595   : > { %8909 = vmatpush3.bf16.xpose.msra.mxu0 %v5238_v32 }
0x1596   : > { %9236 = vmatprep.subr.msk.bf16.mxu0 %vm834_vm0, %v12140_v61 }
0x159d   : > { %8911 = vmatpush3.bf16.xpose.msra.mxu0 %v5240_v15 }
0x159e   : > { %9237 = vmatprep.subr.msk.bf16.mxu0 %vm834_vm0, %v12149_v11 }
0x15a5   : > { %8913 = vmatpush3.bf16.xpose.msra.mxu0 %v5242_v14 }
0x15a6   : > { %8954 = vmatprep.subr.bf16.mxu0 %v10271_v36 }
0x15ac   : > { %8915 = vmatmul.mubr.msk.bf16.vlgmr.msra.gmra.mrb[140].mxu0 %vm834_vm0, %v5201_v29 }
0x15ad   : > { %8918 = vmatprep.mubr.msk.bf16.mxu0 %vm834_vm0, %v5204_v25  ;;  %8955 = vmatpush3.bf16.msra.mxu0 %v12052_v35 }
0x15ae   : > { %8956 = vmatprep.subr.bf16.mxu0 %v10271_v36 }
0x15b1   : > { %8957 = vmatpush3.bf16.msra.mxu0 %v12063_v55 }
0x15b2   : > { %8970 = vmatprep.subr.bf16.mxu0 %v10271_v36 }
0x15b4   : > { %8919 = vmatmul.mubr.msk.bf16.gmra.mrb[144].mxu0 %vm834_vm0, %v5207_v48 }
0x15b5   : > { %8958 = vmatprep.mubr.msk.bf16.mxu0 %vm10272_vm3, %v10271_v36 }
0x1640   : > { %v4836_v7 = vpop.f32.mrb[132].mxu1 }
0x1641   : > { %v8856_v1 = vpop.f32.mrb[133].mxu1 }
0x1642   : > { %v4781_v59 = vpop.f32.mrb[124].mxu0  ;;  %v4839_v9 = vpop.f32.mrb[134].mxu1 }
0x1643   : > { %v4837_v28 = vadd.f32 %v4836_v7, %v4781_v59  ;;  %v8848_v24 = vpop.f32.mrb[125].mxu0  ;;  %v8857_v8 = vpop.f32.mrb[135].mxu1 }
0x1644   : > { %v4784_v47 = vpop.f32.mrb[126].mxu0 }
0x1645   : > { %v8849_v22 = vpop.f32.mrb[127].mxu0 }
0x1648   : > { %v4949_v43 = vpop.f32.mrb[136].mxu1 }
0x1649   : > { %v8872_v41 = vpop.f32.mrb[137].mxu1 }
0x164a   : > { %v4891_v31 = vpop.f32.mrb[128].mxu0  ;;  %v4952_v39 = vpop.f32.mrb[138].mxu1 }
0x164b   : > { %v4897_v32 = vadd.f32 %v4891_v31, %v4837_v28  ;;  %v8864_v49 = vpop.f32.mrb[129].mxu0  ;;  %v8873_v15 = vpop.f32.mrb[139].mxu1 }
0x164c   : > { %v4894_v20 = vpop.f32.mrb[130].mxu0 }
0x164d   : > { %v8865_v14 = vpop.f32.mrb[131].mxu0  ;;  %v4955_v51 = vadd.f32 %v4949_v43, %v4897_v32 }
0x1650   : > { %v5063_v23 = vpop.f32.mrb[140].mxu1 }
0x1651   : > { %v8888_v29 = vpop.f32.mrb[141].mxu1 }
0x1652   : > { %v5005_v25 = vpop.f32.mrb[132].mxu0  ;;  %v5066_v17 = vpop.f32.mrb[142].mxu1 }
0x1653   : > { %v5011_v21 = vadd.f32 %v5005_v25, %v4955_v51  ;;  %v8880_v48 = vpop.f32.mrb[133].mxu0  ;;  %v8889_v7 = vpop.f32.mrb[143].mxu1 }
0x1654   : > { %v5008_v1 = vpop.f32.mrb[134].mxu0 }
0x1655   : > { %v8881_v59 = vpop.f32.mrb[135].mxu0  ;;  %v5069_v9 = vadd.f32 %v5063_v23, %v5011_v21 }
0x1658   : > { %v5177_v24 = vpop.f32.mrb[144].mxu1 }
0x1659   : > { %v8904_v8 = vpop.f32.mrb[145].mxu1 }
0x165a   : > { %v5119_v47 = vpop.f32.mrb[136].mxu0  ;;  %v5180_v22 = vpop.f32.mrb[146].mxu1 }
0x165b   : > { %v5125_v28 = vadd.f32 %v5119_v47, %v5069_v9  ;;  %v8896_v41 = vpop.f32.mrb[137].mxu0  ;;  %v8905_v31 = vpop.f32.mrb[147].mxu1 }
0x165c   : > { %v5122_v39 = vpop.f32.mrb[138].mxu0 }
0x165d   : > { %v12169_v49 = vadd.f32 %v5177_v24, %v5125_v28  ;;  %v8897_v43 = vpop.f32.mrb[139].mxu0 }
0x167f   : > { %v8916_v32 = vpop.f32.mrb[140].mxu0 }
0x1680   : > { %v5278_v15 = vpop.f32.mrb[141].mxu0  ;;  %v5311_v20 = vmul.f32 0.0625, %v8916_v32 }
0x1681   : > { %v5309_v14 = vmul.f32 0.0625, %v5278_v15  ;;  %v8917_v51 = vpop.f32.mrb[142].mxu0 }
0x1682   : > { %v5281_v29 = vpop.f32.mrb[143].mxu0  ;;  %v5319_v17 = vadd.f32 %v11934_v33, %v5311_v20  ;;  %v5312_v21 = vmul.f32 0.0625, %v8917_v51 }
0x1683   : > { %v5317_v25 = vadd.f32 %v11931_v19, %v5309_v14  ;;  %v5310_v23 = vmul.f32 0.0625, %v5281_v29 }
0x1684   : > { %v5320_v24 = vadd.f32 %v11942_v2, %v5312_v21  ;;  %v5331_v19 = vsel %vm1066_vm2, %v5319_v17, -inf }
0x1685   : > { %v5318_v48 = vadd.f32 %v11937_v4, %v5310_v23  ;;  %v5325_v7 = vsel %vm1066_vm2, %v5317_v25, -inf }
0x1686   : > { %5326 = vmax.xlane.f32.xlu0 %v5325_v7  ;;  %v5334_v39 = vsel %vm1066_vm2, %v5320_v24, -inf }
0x1687   : > { %v8920_v1 = vpop.f32.mrb[144].mxu0  ;;  %v5328_v59 = vsel %vm1066_vm2, %v5318_v48, -inf }
0x1688   : > { %5329 = vmax.xlane.f32.xlu1 %v5328_v59  ;;  %v5294_v9 = vpop.f32.mrb[145].mxu0  ;;  %v5315_v41 = vmul.f32 0.0625, %v8920_v1 }
0x1689   : > { %v5313_v8 = vmul.f32 0.0625, %v5294_v9  ;;  %v8921_v47 = vpop.f32.mrb[146].mxu0 }
0x168a   : > { %5332 = vmax.xlane.f32.xlu0 %v5331_v19  ;;  %v5297_v22 = vpop.f32.mrb[147].mxu0  ;;  %v5316_v33 = vmul.f32 0.0625, %v8921_v47  ;;  %v5323_v32 = vadd.f32 %v11949_v45, %v5315_v41 }
0x168b   : > { %v5314_v28 = vmul.f32 0.0625, %v5297_v22  ;;  %v5321_v4 = vadd.f32 %v11957_v50, %v5313_v8 }
0x168c   : > { %v12184_v43 = vadd.f32 %v11946_v34, %v5316_v33 }
0x168d   : > { %v12180_v31 = vadd.f32 %v11953_v6, %v5314_v28  ;;  %v5337_v15 = vsel %vm1066_vm2, %v5321_v4, -inf  ;;  %v5343_v6 = vsel %vm1066_vm2, %v5323_v32, -inf }
0x168e   : > { %5335 = vmax.xlane.f32.xlu0 %v5334_v39  ;;  %v5346_v50 = vsel %vm1066_vm2, %v12184_v43, -inf }
0x168f   : > { %v5340_v2 = vsel %vm1066_vm2, %v12180_v31, -inf }
0x1690   : > { %5341 = vmax.xlane.f32.xlu1 %v5340_v2 }
0x1692   : > { %5338 = vmax.xlane.f32.xlu0 %v5337_v15 }
0x1694   : > { %5347 = vmax.xlane.f32.xlu1 %v5346_v50 }
0x1696   : > { %5344 = vmax.xlane.f32.xlu0 %v5343_v6 }
0x1713   : > { %v5327_v20 = vpop.xlane.xlu0 %5326 }
0x1714   : > { %v5349_v14 = vsub.f32 %v5317_v25, %v5327_v20 }
0x1715   : > { %v5330_v34 = vpop.xlane.xlu1 %5329 }
0x1716   : > { %v5357_v23 = vmul.f32 1.442695, %v5349_v14  ;;  %v5350_v21 = vsub.f32 %v5318_v48, %v5330_v34  ;;  %v5901_v14 = vrot.slane %v11923_v0, 4 }
0x1717   : > { %v5333_v51 = vpop.xlane.xlu0 %5332 }
0x1718   : > { %v5351_v29 = vsub.f32 %v5319_v17, %v5333_v51  ;;  %v5359_v59 = vmul.f32 1.442695, %v5350_v21 }
0x171a   : > { %v5361_v7 = vmul.f32 1.442695, %v5351_v29  ;;  %v5909_v29 = vrot.slane %v11925_v63, 4 }
0x171b   : > { %v5336_v1 = vpop.xlane.xlu0 %5335 }
0x171c   : > { %9654 = vpow2.f32 %v5361_v7  ;;  %v5352_v45 = vsub.f32 %v5320_v24, %v5336_v1  ;;  %v5905_v1 = vrot.slane %v11927_v62, 4 }
0x171d   : > { %9656 = vpow2.f32 %v5357_v23  ;;  %v5342_v20 = vpop.xlane.xlu1 %5341 }
0x171e   : > { %v5363_v9 = vmul.f32 1.442695, %v5352_v45  ;;  %v5913_v45 = vrot.slane %v11929_v58, 4 }
0x171f   : > { %v5339_v8 = vpop.xlane.xlu0 %5338 }
0x1720   : > { %9658 = vpow2.f32 %v5363_v9  ;;  %v5353_v47 = vsub.f32 %v5321_v4, %v5339_v8 }
0x1721   : > { %9660 = vpow2.f32 %v5359_v59  ;;  %v5348_v34 = vpop.xlane.xlu1 %5347  ;;  %v12254_v59 = vrot.slane %v11799_v53, 4 }
0x1722   : > { %v5365_v25 = vmul.f32 1.442695, %v5353_v47  ;;  %v5356_v51 = vsub.f32 %v12184_v43, %v5348_v34 }
0x1723   : > { %v5345_v19 = vpop.xlane.xlu0 %5344 }
0x1724   : > { %v5355_v22 = vsub.f32 %v5323_v32, %v5345_v19 }
0x1726   : > { %v12193_v33 = vpop.eup %9654  ;;  %v5369_v28 = vmul.f32 1.442695, %v5355_v22 }
0x1727   : > { %v5379_v17 = vsel %vm1066_vm2, %v12193_v33, 0.0  ;;  %v12197_v48 = vpop.eup %9656 }
0x1728   : > { %9662 = vpow2.f32 %v5369_v28  ;;  %5380 = vadd.xlane.f32.xlu0 %v5379_v17  ;;  %v5373_v41 = vsel %vm1066_vm2, %v12197_v48, 0.0 }
0x1729   : > { %9664 = vpow2.f32 %v5365_v25 }
0x172a   : > { %v12199_v24 = vpop.eup %9658 }
0x172b   : > { %v5382_v4 = vsel %vm1066_vm2, %v12199_v24, 0.0  ;;  %v9661_v39 = vpop.eup %9660 }
0x172c   : > { %5374 = vadd.xlane.f32.xlu0 %v5373_v41  ;;  %5383 = vadd.xlane.f32.xlu1 %v5382_v4  ;;  %v5376_v2 = vsel %vm1066_vm2, %v9661_v39, 0.0 }
0x1730   : > { %5377 = vadd.xlane.f32.xlu1 %v5376_v2 }
0x1732   : > { %v12206_v32 = vpop.eup %9662 }
0x1733   : > { %v5391_v15 = vsel %vm1066_vm2, %v12206_v32, 0.0  ;;  %v12210_v50 = vpop.eup %9664 }
0x1734   : > { %5392 = vadd.xlane.f32.xlu0 %v5391_v15  ;;  %v5385_v6 = vsel %vm1066_vm2, %v12210_v50, 0.0 }
0x1738   : > { %5386 = vadd.xlane.f32.xlu0 %v5385_v6 }
0x1741   : > { %5423 = vrot.lane.b32.xlu1 %v12131_v3, %s10270_s3  ;;  %v5354_v3 = vsub.f32 %v12180_v31, %v5342_v20 }
0x1743   : > { %v5367_v23 = vmul.f32 1.442695, %v5354_v3 }
0x1745   : > { %5425 = vrot.lane.b32.xlu1 %v12140_v61, %s10270_s3  ;;  %v5371_v61 = vmul.f32 1.442695, %v5356_v51 }
0x1747   : > { %9666 = vpow2.f32 %v5371_v61 }
0x1748   : > { %9668 = vpow2.f32 %v5367_v23 }
0x174e   : > { %5421 = vrot.lane.b32.xlu0 %v12116_v60, %s10270_s3  ;;  %v12231_v60 = vrot.slane %v11797_v38, 4 }
0x1751   : > { %v9667_v43 = vpop.eup %9666 }
0x1752   : > { %5902 = vrot.lane.b32.xlu0 %v5901_v14, %s10268_s15  ;;  %v5394_v21 = vsel %vm1066_vm2, %v9667_v43, 0.0  ;;  %v9669_v31 = vpop.eup %9668 }
0x1753   : > { %v5388_v7 = vsel %vm1066_vm2, %v9669_v31, 0.0 }
0x1756   : > { %5910 = vrot.lane.b32.xlu0 %v5909_v29, %s10268_s15 }
0x175a   : > { %5874 = vrot.lane.b32.xlu0 %v12231_v60, %s10270_s3 }
0x175e   : > { %5878 = vrot.lane.b32.xlu0 %v12231_v60, %s10269_s29 }
0x1762   : > { %5884 = vrot.lane.b32.xlu0 %v11799_v53, %s10268_s15 }
0x1769   : > { %5395 = vadd.xlane.f32.xlu1 %v5394_v21 }
0x176d   : > { %5389 = vadd.xlane.f32.xlu1 %v5388_v7 }
0x177e   : > { %5427 = vrot.lane.b32.xlu1 %v12149_v11, %s10270_s3 }
0x1782   : > { %5906 = vrot.lane.b32.xlu1 %v5905_v1, %s10268_s15 }
0x1786   : > { %5914 = vrot.lane.b32.xlu1 %v5913_v45, %s10268_s15 }
0x178a   : > { %5876 = vrot.lane.b32.xlu1 %v11797_v38, %s10268_s15 }
0x178e   : > { %5882 = vrot.lane.b32.xlu1 %v12254_v59, %s10270_s3 }
0x1792   : > { %5886 = vrot.lane.b32.xlu1 %v12254_v59, %s10269_s29 }
0x17b5   : > { %v5381_v11 = vpop.xlane.xlu0 %5380 }
0x17b9   : > { %v5375_v9 = vpop.xlane.xlu0 %5374  ;;  %v5384_v8 = vpop.xlane.xlu1 %5383 }
0x17ba   : > { %9670 = vrcp.f32 %v5375_v9 }
0x17bd   : > { %v5378_v47 = vpop.xlane.xlu1 %5377 }
0x17be   : > { %9672 = vrcp.f32 %v5378_v47 }
0x17bf   : > { %9674 = vrcp.f32 %v5384_v8 }
0x17c0   : > { %9676 = vrcp.f32 %v5381_v11 }
0x17c1   : > { %v5393_v19 = vpop.xlane.xlu0 %5392  ;;  %v5424_v17 = vpop.permute.xlu1 %5423 }
0x17c4   : > { %v9671_v25 = vpop.eup %9670 }
0x17c5   : > { %v5387_v22 = vpop.xlane.xlu0 %5386  ;;  %v5405_v4 = vmul.f32 %v9671_v25, %v12197_v48  ;;  %v5426_v6 = vpop.permute.xlu1 %5425 }
0x17c8   : > { %v9673_v28 = vpop.eup %9672 }
0x17c9   : > { %v5422_v41 = vpop.permute.xlu0 %5421  ;;  %v5406_v2 = vmul.f32 %v9673_v28, %v9661_v39  ;;  %v9675_v34 = vpop.eup %9674 }
0x17ca   : > { %8922 = vmatprep.subr.bf16.mxu1 %v5422_v41  ;;  %v9677_v48 = vpop.eup %9676  ;;  %v5408_v39 = vmul.f32 %v9675_v34, %v12199_v24 }
0x17cb   : > { %8923 = vmatpush3.bf16.msra.mxu1 %v5422_v41  ;;  %v5413_v15 = vpack.c.bf16 %v5406_v2, %v5405_v4  ;;  %v5407_v61 = vmul.f32 %v9677_v48, %v12193_v33 }
0x17cc   : > { %8924 = vmatprep.subr.bf16.mxu1 %v5424_v17 }
0x17cd   : > { %8930 = vmatprep.mubr.msk.bf16.mxu1 %vm1066_vm2, %v5413_v15  ;;  %v5414_v23 = vpack.c.bf16 %v5408_v39, %v5407_v61 }
0x17cf   : > { %8925 = vmatpush3.bf16.msra.mxu1 %v5424_v17 }
0x17d0   : > { %8926 = vmatprep.subr.bf16.mxu1 %v5426_v6 }
0x17d3   : > { %8927 = vmatpush3.bf16.msra.mxu1 %v5426_v6 }
0x17f6   : > { %v5396_v20 = vpop.xlane.xlu1 %5395 }
0x17f7   : > { %9678 = vrcp.f32 %v5396_v20 }
0x17f8   : > { %9680 = vrcp.f32 %v5387_v22 }
0x17f9   : > { %9682 = vrcp.f32 %v5393_v19 }
0x17fa   : > { %v5390_v51 = vpop.xlane.xlu1 %5389 }
0x17fb   : > { %9684 = vrcp.f32 %v5390_v51 }
0x17fe   : > { %v5428_v3 = vpop.permute.xlu1 %5427 }
0x17ff   : > { %8928 = vmatprep.subr.bf16.mxu1 %v5428_v3 }
0x1800   : > { %8929 = vmatpush3.bf16.msra.mxu1 %v5428_v3 }
0x1801   : > { %8938 = vmatprep.subr.bf16.mxu1 %v10271_v36  ;;  %v9679_v21 = vpop.eup %9678 }
0x1802   : > { %v9681_v7 = vpop.eup %9680  ;;  %v5412_v8 = vmul.f32 %v9679_v21, %v9667_v43 }
0x1803   : > { %8931 = vmatmul.mubr.msk.bf16.vlgmr.msra.gmra.mrb[148].mxu1 %vm1066_vm2, %v5414_v23  ;;  %v9683_v11 = vpop.eup %9682  ;;  %v5409_v24 = vmul.f32 %v9681_v7, %v12210_v50 }
0x1804   : > { %8939 = vmatpush3.bf16.msra.mxu1 %v12028_v18  ;;  %v5411_v33 = vmul.f32 %v9683_v11, %v12206_v32 }
0x1805   : > { %v9685_v9 = vpop.eup %9684  ;;  %8940 = vmatprep.subr.bf16.mxu1 %v10271_v36 }
0x1806   : > { %v5410_v47 = vmul.f32 %v9685_v9, %v9669_v31  ;;  %v5416_v22 = vpack.c.bf16 %v5412_v8, %v5411_v33 }
0x1808   : > { %v5415_v19 = vpack.c.bf16 %v5410_v47, %v5409_v24  ;;  %8941 = vmatpush3.bf16.msra.mxu1 %v12042_v57  ;;  %v5903_v57 = vpop.permute.xlu0 %5902 }
0x1809   : > { %8946 = vmatprep.subr.bf16.mxu1 %v10271_v36 }
0x180a   : > { %8934 = vmatprep.mubr.msk.bf16.mxu1 %vm1066_vm2, %v5415_v19 }
0x180b   : > { %8935 = vmatmul.mubr.msk.bf16.gmra.mrb[152].mxu1 %vm1066_vm2, %v5416_v22 }
0x180c   : > { %8942 = vmatprep.mubr.msk.bf16.mxu1 %vm10272_vm3, %v10271_v36  ;;  %v5911_v6 = vpop.permute.xlu0 %5910 }
0x180d   : > { %v12337_v34 = vsel %vm1089_vm1, %v11925_v63, %v5911_v6 }
0x180e   : > { %v5940_v51 = vsel %vm834_vm0, %v12337_v34, 0 }
0x18d6   : > { %v8932_v18 = vpop.f32.mrb[148].mxu1 }
0x18d7   : > { %v5479_v43 = vpop.f32.mrb[149].mxu1 }
0x18d8   : > { %v8933_v25 = vpop.f32.mrb[150].mxu1 }
0x18d9   : > { %v5511_v50 = vpack.c.bf16 %v8933_v25, %v8932_v18  ;;  %v5482_v31 = vpop.f32.mrb[151].mxu1 }
0x18da   : > { %v5510_v28 = vpack.c.bf16 %v5482_v31, %v5479_v43 }
0x18db   : > { %8959 = vmatmul.mubr.msk.bf16.vlgmr.msra.gmra.mrb[148].mxu0 %vm834_vm0, %v5511_v50 }
0x18dc   : > { %v5515_v32 = vrot.slane %v5510_v28, 4  ;;  %8971 = vmatpush3.bf16.msra.mxu0 %v12073_v26  ;;  %8974 = vmatprep.mubr.msk.bf16.mxu0 %vm10272_vm3, %v10271_v36 }
0x18dd   : > { %8972 = vmatprep.subr.bf16.mxu0 %v10271_v36 }
0x18de   : > { %v8936_v17 = vpop.f32.mrb[152].mxu1  ;;  %8943 = vmatmul.mubr.msk.bf16.vlgmr.msra.gmra.mrb[156].mxu1 %vm834_vm0, %v5515_v32 }
0x18df   : > { %v5495_v41 = vpop.f32.mrb[153].mxu1  ;;  %8947 = vmatpush3.bf16.msra.mxu1 %v12020_v44  ;;  %8950 = vmatprep.mubr.msk.bf16.mxu1 %vm10272_vm3, %v10271_v36  ;;  %v12302_v44 = vsel %vm1089_vm1, %v11923_v0, %v5903_v57 }
0x18e0   : > { %v8937_v4 = vpop.f32.mrb[154].mxu1  ;;  %8973 = vmatpush3.bf16.msra.mxu0 %v12085_v5  ;;  %8948 = vmatprep.subr.bf16.mxu1 %v10271_v36  ;;  %v5647_v5 = vrot.slane %v5511_v50, 4 }
0x18e1   : > { %v5513_v26 = vpack.c.bf16 %v8937_v4, %v8936_v17  ;;  %v5498_v2 = vpop.f32.mrb[155].mxu1  ;;  %8986 = vmatprep.subr.bf16.mxu0 %v10271_v36 }
0x18e2   : > { %v5512_v15 = vpack.c.bf16 %v5498_v2, %v5495_v41 }
0x18e3   : > { %8949 = vmatpush3.bf16.msra.mxu1 %v12044_v54  ;;  %v5875_v54 = vpop.permute.xlu0 %5874 }
0x18e4   : > { %8975 = vmatmul.mubr.msk.bf16.vlgmr.msra.gmra.mrb[152].mxu0 %vm834_vm0, %v5512_v15  ;;  %8962 = vmatprep.subr.bf16.mxu1 %v10271_v36  ;;  %v5737_v20 = vrot.slane %v5512_v15, 4 }
0x18e5   : > { %8987 = vmatpush3.bf16.msra.mxu0 %v12095_v42  ;;  %8990 = vmatprep.mubr.msk.bf16.mxu0 %vm10272_vm3, %v10271_v36  ;;  %v5907_v42 = vpop.permute.xlu1 %5906 }
0x18e6   : > { %8951 = vmatmul.mubr.msk.bf16.vlgmr.msra.gmra.mrb[160].mxu1 %vm834_vm0, %v5510_v28  ;;  %8988 = vmatprep.subr.bf16.mxu0 %v10271_v36 }
0x18e7   : > { %8963 = vmatpush3.bf16.msra.mxu1 %v12050_v10  ;;  %8966 = vmatprep.mubr.msk.bf16.mxu1 %vm10272_vm3, %v10271_v36  ;;  %v5890_v10 = vsel %vm1089_vm1, %v11797_v38, %v5875_v54  ;;  %v5879_v61 = vpop.permute.xlu0 %5878 }
0x18e8   : > { %8964 = vmatprep.subr.bf16.mxu1 %v10271_v36 }
0x18e9   : > { %8989 = vmatpush3.bf16.msra.mxu0 %v12107_v16  ;;  %v12322_v16 = vsel %vm1089_vm1, %v11927_v62, %v5907_v42 }
0x18ea   : > { %9238 = vmatprep.subr.msk.bf16.mxu0 %vm834_vm0, %v12302_v44 }
0x18eb   : > { %8965 = vmatpush3.bf16.msra.mxu1 %v12056_v40  ;;  %v5936_v40 = vsel %vm834_vm0, %v12302_v44, 0  ;;  %v5885_v11 = vpop.permute.xlu0 %5884 }
0x18ec   : > { %8991 = vmatmul.mubr.msk.bf16.vlgmr.msra.gmra.mrb[156].mxu0 %vm834_vm0, %v5513_v26  ;;  %8978 = vmatprep.subr.bf16.mxu1 %v10271_v36 }
0x18ed   : > { %9010 = vmatprep.mubr.msk.bf16.mxu0 %vm834_vm0, %v5890_v10 }
0x18ee   : > { %8967 = vmatmul.mubr.msk.bf16.vlgmr.msra.gmra.mrb[164].mxu1 %vm834_vm0, %v5647_v5 }
0x18ef   : > { %8979 = vmatpush3.bf16.msra.mxu1 %v12069_v30  ;;  %8982 = vmatprep.mubr.msk.bf16.mxu1 %vm10272_vm3, %v10271_v36  ;;  %v5938_v30 = vsel %vm834_vm0, %v12322_v16, 0 }
0x18f0   : > { %8980 = vmatprep.subr.bf16.mxu1 %v10271_v36 }
0x18f2   : > { %9003 = vmatpush3.bf16.xpose.msra.mxu0 %v5936_v40 }
0x18f3   : > { %9239 = vmatprep.subr.msk.bf16.mxu0 %vm834_vm0, %v12322_v16  ;;  %8981 = vmatpush3.bf16.msra.mxu1 %v12078_v56  ;;  %v5827_v56 = vrot.slane %v5513_v26, 4 }
0x18f4   : > { %8994 = vmatprep.subr.bf16.mxu1 %v10271_v36 }
0x18f6   : > { %8983 = vmatmul.mubr.msk.bf16.vlgmr.msra.gmra.mrb[168].mxu1 %vm834_vm0, %v5737_v20 }
0x18f7   : > { %8995 = vmatpush3.bf16.msra.mxu1 %v12091_v13  ;;  %8998 = vmatprep.mubr.msk.bf16.mxu1 %vm10272_vm3, %v10271_v36  ;;  %v5915_v13 = vpop.permute.xlu1 %5914 }
0x18f8   : > { %8996 = vmatprep.subr.bf16.mxu1 %v10271_v36  ;;  %v12347_v48 = vsel %vm1089_vm1, %v11929_v58, %v5915_v13 }
0x18f9   : > { %v5942_v3 = vsel %vm834_vm0, %v12347_v48, 0 }
0x18fa   : > { %9005 = vmatpush3.bf16.xpose.msra.mxu0 %v5938_v30 }
0x18fb   : > { %9240 = vmatprep.subr.msk.bf16.mxu0 %vm834_vm0, %v12337_v34  ;;  %8997 = vmatpush3.bf16.msra.mxu1 %v12100_v52  ;;  %v5877_v39 = vpop.permute.xlu1 %5876 }
0x18fc   : > { %v5893_v23 = vsel %vm1089_vm1, %v5877_v39, %v5879_v61 }
0x18fe   : > { %8999 = vmatmul.mubr.msk.bf16.vlgmr.msra.gmra.mrb[172].mxu1 %vm834_vm0, %v5827_v56 }
0x18ff   : > { %v5883_v52 = vpop.permute.xlu1 %5882 }
0x1900   : > { %v5896_v21 = vsel %vm1089_vm1, %v11799_v53, %v5883_v52 }
0x1902   : > { %9007 = vmatpush3.bf16.xpose.msra.mxu0 %v5940_v51 }
0x1903   : > { %9241 = vmatprep.subr.msk.bf16.mxu0 %vm834_vm0, %v12347_v48  ;;  %v5887_v7 = vpop.permute.xlu1 %5886 }
0x1904   : > { %v5899_v9 = vsel %vm1089_vm1, %v5885_v11, %v5887_v7 }
0x190a   : > { %9009 = vmatpush3.bf16.xpose.msra.mxu0 %v5942_v3 }
0x190b   : > { %9050 = vmatprep.subr.bf16.mxu0 %v10271_v36 }
0x1911   : > { %9011 = vmatmul.mubr.msk.bf16.vlgmr.msra.gmra.mrb[160].mxu0 %vm834_vm0, %v5893_v23 }
0x1912   : > { %9014 = vmatprep.mubr.msk.bf16.mxu0 %vm834_vm0, %v5896_v21  ;;  %9051 = vmatpush3.bf16.msra.mxu0 %v12052_v35 }
0x1913   : > { %9052 = vmatprep.subr.bf16.mxu0 %v10271_v36 }
0x1916   : > { %9053 = vmatpush3.bf16.msra.mxu0 %v12063_v55 }
0x1917   : > { %9066 = vmatprep.subr.bf16.mxu0 %v10271_v36 }
0x1919   : > { %9015 = vmatmul.mubr.msk.bf16.gmra.mrb[164].mxu0 %vm834_vm0, %v5899_v9 }
0x191a   : > { %9054 = vmatprep.mubr.msk.bf16.mxu0 %vm10272_vm3, %v10271_v36 }
0x19ae   : > { %v5639_v8 = vpop.f32.mrb[148].mxu0 }
0x19af   : > { %v8960_v24 = vpop.f32.mrb[149].mxu0 }
0x19b0   : > { %v5642_v47 = vpop.f32.mrb[150].mxu0 }
0x19b1   : > { %v5553_v33 = vpop.f32.mrb[156].mxu1  ;;  %v8961_v35 = vpop.f32.mrb[151].mxu0 }
0x19b2   : > { %v8944_v19 = vpop.f32.mrb[157].mxu1 }
0x19b3   : > { %v5556_v22 = vpop.f32.mrb[158].mxu1 }
0x19b4   : > { %v8945_v18 = vpop.f32.mrb[159].mxu1  ;;  %v12372_v22 = vld [vmem:[#allocation7 + $0x10] sm:$0xff] }
0x19b7   : > { %v5729_v43 = vpop.f32.mrb[152].mxu0 }
0x19b8   : > { %v8976_v55 = vpop.f32.mrb[153].mxu0 }
0x19b9   : > { %v5596_v25 = vpop.f32.mrb[160].mxu1  ;;  %v5732_v50 = vpop.f32.mrb[154].mxu0  ;;  %v12375_v55 = vld [vmem:[#allocation7 + $0x8] sm:$0xff] }
0x19ba   : > { %v5597_v31 = vadd.f32 %v5596_v25, %v5553_v33  ;;  %v8952_v28 = vpop.f32.mrb[161].mxu1  ;;  %v8977_v32 = vpop.f32.mrb[155].mxu0  ;;  %v12369_v33 = vld [vmem:[#allocation7] sm:$0xff] }
0x19bb   : > { %v5599_v57 = vpop.f32.mrb[162].mxu1 }
0x19bc   : > { %v8953_v17 = vpop.f32.mrb[163].mxu1  ;;  %v5645_v41 = vadd.f32 %v5639_v8, %v5597_v31  ;;  %v12380_v57 = vld [vmem:[#allocation7 + $0x18] sm:$0xff] }
0x19bf   : > { %v5819_v4 = vpop.f32.mrb[156].mxu0 }
0x19c0   : > { %v8992_v26 = vpop.f32.mrb[157].mxu0 }
0x19c1   : > { %v5685_v2 = vpop.f32.mrb[164].mxu1  ;;  %v5822_v15 = vpop.f32.mrb[158].mxu0 }
0x19c2   : > { %v5691_v6 = vadd.f32 %v5685_v2, %v5645_v41  ;;  %v8968_v54 = vpop.f32.mrb[165].mxu1  ;;  %v8993_v10 = vpop.f32.mrb[159].mxu0 }
0x19c3   : > { %v5688_v5 = vpop.f32.mrb[166].mxu1  ;;  %v12384_v10 = vld [vmem:[#allocation7 + $0x20] sm:$0xff] }
0x19c4   : > { %v8969_v42 = vpop.f32.mrb[167].mxu1  ;;  %v5735_v40 = vadd.f32 %v5729_v43, %v5691_v6 }
0x19c5   : > { %v12387_v42 = vld [vmem:[#allocation7 + $0x28] sm:$0xff] }
0x19c9   : > { %v5775_v20 = vpop.f32.mrb[168].mxu1 }
0x19ca   : > { %v5781_v30 = vadd.f32 %v5775_v20, %v5735_v40  ;;  %v8984_v56 = vpop.f32.mrb[169].mxu1 }
0x19cb   : > { %v5778_v13 = vpop.f32.mrb[170].mxu1 }
0x19cc   : > { %v8985_v51 = vpop.f32.mrb[171].mxu1  ;;  %v5825_v39 = vadd.f32 %v5819_v4, %v5781_v30  ;;  %v12393_v30 = vld [vmem:[#allocation7 + $0x38] sm:$0xff] }
0x19cd   : > { %v12398_v51 = vld [vmem:[#allocation7 + $0x30] sm:$0xff] }
0x19d1   : > { %v5865_v3 = vpop.f32.mrb[172].mxu1 }
0x19d2   : > { %v12367_v52 = vadd.f32 %v5865_v3, %v5825_v39  ;;  %v9000_v61 = vpop.f32.mrb[173].mxu1 }
0x19d3   : > { %v5868_v23 = vpop.f32.mrb[174].mxu1 }
0x19d4   : > { %v9001_v21 = vpop.f32.mrb[175].mxu1 }
0x19e4   : > { %v9012_v7 = vpop.f32.mrb[160].mxu0 }
0x19e5   : > { %v5978_v11 = vpop.f32.mrb[161].mxu0  ;;  %v6011_v9 = vmul.f32 0.0625, %v9012_v7 }
0x19e6   : > { %v6009_v8 = vmul.f32 0.0625, %v5978_v11  ;;  %v9013_v24 = vpop.f32.mrb[162].mxu0 }
0x19e7   : > { %v5981_v47 = vpop.f32.mrb[163].mxu0  ;;  %v6019_v18 = vadd.f32 %v12372_v22, %v6011_v9  ;;  %v6012_v43 = vmul.f32 0.0625, %v9013_v24 }
0x19e8   : > { %v6017_v35 = vadd.f32 %v12369_v33, %v6009_v8  ;;  %v6010_v19 = vmul.f32 0.0625, %v5981_v47 }
0x19e9   : > { %v6020_v17 = vadd.f32 %v12380_v57, %v6012_v43  ;;  %v6031_v26 = vsel %vm1066_vm2, %v6019_v18, -inf }
0x19ea   : > { %v6018_v25 = vadd.f32 %v12375_v55, %v6010_v19  ;;  %v6025_v50 = vsel %vm1066_vm2, %v6017_v35, -inf }
0x19eb   : > { %6026 = vmax.xlane.f32.xlu0 %v6025_v50  ;;  %v6034_v20 = vsel %vm1066_vm2, %v6020_v17, -inf }
0x19ec   : > { %v9016_v31 = vpop.f32.mrb[164].mxu0  ;;  %v6028_v28 = vsel %vm1066_vm2, %v6018_v25, -inf }
0x19ed   : > { %6029 = vmax.xlane.f32.xlu1 %v6028_v28  ;;  %v5994_v32 = vpop.f32.mrb[165].mxu0  ;;  %v6015_v54 = vmul.f32 0.0625, %v9016_v31 }
0x19ee   : > { %v6013_v41 = vmul.f32 0.0625, %v5994_v32  ;;  %v9017_v4 = vpop.f32.mrb[166].mxu0 }
0x19ef   : > { %6032 = vmax.xlane.f32.xlu0 %v6031_v26  ;;  %v5997_v2 = vpop.f32.mrb[167].mxu0  ;;  %v6016_v15 = vmul.f32 0.0625, %v9017_v4  ;;  %v6023_v39 = vadd.f32 %v12398_v51, %v6015_v54 }
0x19f0   : > { %v6014_v6 = vmul.f32 0.0625, %v5997_v2  ;;  %v6021_v5 = vadd.f32 %v12384_v10, %v6013_v41 }
0x19f1   : > { %v6024_v56 = vadd.f32 %v12393_v30, %v6016_v15  ;;  %v6043_v23 = vsel %vm1066_vm2, %v6023_v39, -inf }
0x19f2   : > { %v12390_v40 = vadd.f32 %v12387_v42, %v6014_v6  ;;  %v6037_v3 = vsel %vm1066_vm2, %v6021_v5, -inf }
0x19f3   : > { %6035 = vmax.xlane.f32.xlu0 %v6034_v20  ;;  %v6046_v61 = vsel %vm1066_vm2, %v6024_v56, -inf }
0x19f4   : > { %v6040_v13 = vsel %vm1066_vm2, %v12390_v40, -inf }
0x19f5   : > { %6041 = vmax.xlane.f32.xlu1 %v6040_v13 }
0x19f7   : > { %6038 = vmax.xlane.f32.xlu0 %v6037_v3 }
0x19f9   : > { %6047 = vmax.xlane.f32.xlu1 %v6046_v61 }
0x19fb   : > { %6044 = vmax.xlane.f32.xlu0 %v6043_v23 }
0x1a78   : > { %v6027_v21 = vpop.xlane.xlu0 %6026 }
0x1a79   : > { %v6049_v7 = vsub.f32 %v6017_v35, %v6027_v21 }
0x1a7a   : > { %v6030_v11 = vpop.xlane.xlu1 %6029 }
0x1a7b   : > { %v6057_v24 = vmul.f32 1.442695, %v6049_v7  ;;  %v6050_v47 = vsub.f32 %v6018_v25, %v6030_v11 }
0x1a7c   : > { %v6033_v9 = vpop.xlane.xlu0 %6032 }
0x1a7d   : > { %v6051_v8 = vsub.f32 %v6019_v18, %v6033_v9  ;;  %v6059_v31 = vmul.f32 1.442695, %v6050_v47 }
0x1a7f   : > { %v6061_v19 = vmul.f32 1.442695, %v6051_v8 }
0x1a80   : > { %v6036_v43 = vpop.xlane.xlu0 %6035 }
0x1a81   : > { %9686 = vpow2.f32 %v6061_v19  ;;  %v6052_v50 = vsub.f32 %v6020_v17, %v6036_v43 }
0x1a82   : > { %9688 = vpow2.f32 %v6057_v24  ;;  %v6042_v23 = vpop.xlane.xlu1 %6041 }
0x1a83   : > { %v6063_v28 = vmul.f32 1.442695, %v6052_v50  ;;  %v6054_v11 = vsub.f32 %v12390_v40, %v6042_v23  ;;  %v12458_v23 = vld [vmem:[#allocation16 + $0x90] sm:$0xff]  }
0x1a84   : > { %v6039_v32 = vpop.xlane.xlu0 %6038 }
0x1a85   : > { %9690 = vpow2.f32 %v6063_v28  ;;  %v6053_v41 = vsub.f32 %v6021_v5, %v6039_v32 }
0x1a86   : > { %9692 = vpow2.f32 %v6059_v31  ;;  %v6048_v21 = vpop.xlane.xlu1 %6047 }
0x1a87   : > { %v6065_v35 = vmul.f32 1.442695, %v6053_v41  ;;  %v6056_v7 = vsub.f32 %v6024_v56, %v6048_v21 }
0x1a88   : > { %v6045_v4 = vpop.xlane.xlu0 %6044 }
0x1a89   : > { %v6055_v26 = vsub.f32 %v6023_v39, %v6045_v4  ;;  %v6071_v9 = vmul.f32 1.442695, %v6056_v7 }
0x1a8b   : > { %v12404_v2 = vpop.eup %9686  ;;  %v6069_v15 = vmul.f32 1.442695, %v6055_v26 }
0x1a8c   : > { %v6079_v18 = vsel %vm1066_vm2, %v12404_v2, 0.0  ;;  %v9689_v25 = vpop.eup %9688 }
0x1a8d   : > { %9694 = vpow2.f32 %v6069_v15  ;;  %6080 = vadd.xlane.f32.xlu0 %v6079_v18  ;;  %v6073_v6 = vsel %vm1066_vm2, %v9689_v25, 0.0 }
0x1a8e   : > { %9696 = vpow2.f32 %v6065_v35 }
0x1a8f   : > { %v12408_v17 = vpop.eup %9690  ;;  %9698 = vpow2.f32 %v6071_v9 }
0x1a90   : > { %v6082_v54 = vsel %vm1066_vm2, %v12408_v17, 0.0  ;;  %v9693_v5 = vpop.eup %9692 }
0x1a91   : > { %6074 = vadd.xlane.f32.xlu0 %v6073_v6  ;;  %6083 = vadd.xlane.f32.xlu1 %v6082_v54  ;;  %v6076_v20 = vsel %vm1066_vm2, %v9693_v5, 0.0 }
0x1a95   : > { %6077 = vadd.xlane.f32.xlu1 %v6076_v20 }
0x1a97   : > { %v12414_v13 = vpop.eup %9694 }
0x1a98   : > { %v6091_v39 = vsel %vm1066_vm2, %v12414_v13, 0.0  ;;  %v12418_v3 = vpop.eup %9696 }
0x1a99   : > { %6092 = vadd.xlane.f32.xlu0 %v6091_v39  ;;  %v6085_v61 = vsel %vm1066_vm2, %v12418_v3, 0.0 }
0x1a9d   : > { %6086 = vadd.xlane.f32.xlu0 %v6085_v61 }
0x1aa6   : > { %6123 = vrot.lane.b32.xlu1 %v12322_v16, %s10270_s3  ;;  %v6067_v16 = vmul.f32 1.442695, %v6054_v11 }
0x1aa8   : > { %9700 = vpow2.f32 %v6067_v16  ;;  %v12464_v16 = vld [vmem:[#allocation16 + $0x98] sm:$0xff]  }
0x1aaa   : > { %6125 = vrot.lane.b32.xlu1 %v12337_v34, %s10270_s3 }
0x1ab3   : > { %6121 = vrot.lane.b32.xlu0 %v12302_v44, %s10270_s3  ;;  %v9699_v44 = vpop.eup %9698 }
0x1ab4   : > { %v6094_v34 = vsel %vm1066_vm2, %v9699_v44, 0.0  ;;  %v9701_v56 = vpop.eup %9700 }
0x1ab5   : > { %v6088_v40 = vsel %vm1066_vm2, %v9701_v56, 0.0 }
0x1ab7   : > { %6596 = vrot.lane.b32.xlu0 %v11923_v0, %s10268_s15 }
0x1abb   : > { %6600 = vrot.lane.b32.xlu0 %v11925_v63, %s10268_s15 }
0x1abf   : > { %6572 = vrot.lane.b32.xlu0 %v11797_v38, %s10270_s3 }
0x1ac3   : > { %6576 = vrot.lane.b32.xlu0 %v11797_v38, %s10269_s29 }
0x1ac7   : > { %6580 = vrot.lane.b32.xlu0 %v12254_v59, %s10268_s15 }
0x1ace   : > { %6095 = vadd.xlane.f32.xlu1 %v6094_v34 }
0x1ad2   : > { %6089 = vadd.xlane.f32.xlu1 %v6088_v40 }
0x1ae3   : > { %6127 = vrot.lane.b32.xlu1 %v12347_v48, %s10270_s3 }
0x1ae7   : > { %6598 = vrot.lane.b32.xlu1 %v11927_v62, %s10268_s15 }
0x1aeb   : > { %6602 = vrot.lane.b32.xlu1 %v11929_v58, %s10268_s15 }
0x1aef   : > { %6574 = vrot.lane.b32.xlu1 %v12231_v60, %s10268_s15  ;;  %s10160_s15 = sshll.u32 %s10273_s6, 4  ;;  %s10161_s15 = int_to_ptr.vmem [resolvable:$false] %s10160_s15 }
0x1af0   : > { %p10163_p4 = scmp.lt.s32.totalorder %s12836_s28, %s10161_s15 }
0x1af3   : > { %6578 = vrot.lane.b32.xlu1 %v11799_v53, %s10270_s3 }
0x1af7   : > { %6582 = vrot.lane.b32.xlu1 %v11799_v53, %s10269_s29  ;;  %s12961_s29 = sld [smem:[#allocation41_spill]] }
0x1b1a   : > { %v6081_v38 = vpop.xlane.xlu0 %6080 }
0x1b1e   : > { %v6075_v8 = vpop.xlane.xlu0 %6074  ;;  %v6084_v24 = vpop.xlane.xlu1 %6083 }
0x1b1f   : > { %9702 = vrcp.f32 %v6075_v8 }
0x1b22   : > { %v6078_v48 = vpop.xlane.xlu1 %6077 }
0x1b23   : > { %9704 = vrcp.f32 %v6078_v48 }
0x1b24   : > { %9706 = vrcp.f32 %v6084_v24  ;;  %v12473_v24 = vld [vmem:[#allocation16 + $0xc0] sm:$0xff]  }
0x1b25   : > { %9708 = vrcp.f32 %v6081_v38 }
0x1b26   : > { %v6093_v47 = vpop.xlane.xlu0 %6092  ;;  %v6124_v31 = vpop.permute.xlu1 %6123 }
0x1b29   : > { %v9703_v43 = vpop.eup %9702 }
0x1b2a   : > { %v6087_v19 = vpop.xlane.xlu0 %6086  ;;  %v6105_v32 = vmul.f32 %v9703_v43, %v9689_v25  ;;  %v6126_v53 = vpop.permute.xlu1 %6125  ;;  %v12480_v43 = vld [vmem:[#allocation16 + $0x80] sm:$0xff]  }
0x1b2d   : > { %v9705_v50 = vpop.eup %9704 }
0x1b2e   : > { %v6122_v28 = vpop.permute.xlu0 %6121  ;;  %v6106_v41 = vmul.f32 %v9705_v50, %v9693_v5  ;;  %v9707_v35 = vpop.eup %9706 }
0x1b2f   : > { %9018 = vmatprep.subr.bf16.mxu1 %v6122_v28  ;;  %v9709_v18 = vpop.eup %9708  ;;  %v6108_v25 = vmul.f32 %v9707_v35, %v12408_v17  ;;  %v12502_v35 = vld [vmem:[#allocation16 + $0xb0] sm:$0xff]  }
0x1b30   : > { %9019 = vmatpush3.bf16.msra.mxu1 %v6122_v28  ;;  %v6113_v4 = vpack.c.bf16 %v6106_v41, %v6105_v32  ;;  %v6107_v54 = vmul.f32 %v9709_v18, %v12404_v2 }
0x1b31   : > { %9020 = vmatprep.subr.bf16.mxu1 %v6124_v31 }
0x1b32   : > { %9026 = vmatprep.mubr.msk.bf16.mxu1 %vm1066_vm2, %v6113_v4  ;;  %v6114_v5 = vpack.c.bf16 %v6108_v25, %v6107_v54  ;;  %v6597_v48 = vpop.permute.xlu0 %6596  ;;  %v12513_v25 = vld [vmem:[#allocation16 + $0xe8] sm:$0xff]  }
0x1b34   : > { %9021 = vmatpush3.bf16.msra.mxu1 %v6124_v31  ;;  %v12485_v31 = vld [vmem:[#allocation16 + $0xc8] sm:$0xff]  }
0x1b35   : > { %9022 = vmatprep.subr.bf16.mxu1 %v6126_v53 }
0x1b36   : > { %v6601_v4 = vpop.permute.xlu0 %6600 }
0x1b38   : > { %9023 = vmatpush3.bf16.msra.mxu1 %v6126_v53  ;;  %v12490_v53 = vld [vmem:[#allocation16 + $0x88] sm:$0xff]  }
0x1b3a   : > { %v6573_v18 = vpop.permute.xlu0 %6572 }
0x1b3b   : > { %v6586_v54 = vsel %vm1089_vm1, %v12231_v60, %v6573_v18 }
0x1b5b   : > { %v6096_v26 = vpop.xlane.xlu1 %6095 }
0x1b5c   : > { %9710 = vrcp.f32 %v6096_v26  ;;  %v12495_v26 = vld [vmem:[#allocation16 + $0xe0] sm:$0xff]  }
0x1b5d   : > { %9712 = vrcp.f32 %v6087_v19 }
0x1b5e   : > { %9714 = vrcp.f32 %v6093_v47 }
0x1b5f   : > { %v6090_v15 = vpop.xlane.xlu1 %6089 }
0x1b60   : > { %9716 = vrcp.f32 %v6090_v15  ;;  %v12511_v15 = vsel %vm1089_vm1, %v5901_v14, %v6597_v48  ;;  %v12527_v14 = vld [vmem:[#allocation16 + $0xd0] sm:$0xff]  }
0x1b61   : > { %v6624_v60 = vsel %vm834_vm0, %v12511_v15, 0 }
0x1b63   : > { %v6128_v6 = vpop.permute.xlu1 %6127 }
0x1b64   : > { %9024 = vmatprep.subr.bf16.mxu1 %v6128_v6 }
0x1b65   : > { %9025 = vmatpush3.bf16.msra.mxu1 %v6128_v6  ;;  %v12518_v6 = vld [vmem:[#allocation16 + $0xb8] sm:$0xff]  }
0x1b66   : > { %9034 = vmatprep.subr.bf16.mxu1 %v10271_v36  ;;  %v9711_v20 = vpop.eup %9710 }
0x1b67   : > { %v9713_v39 = vpop.eup %9712  ;;  %v6112_v7 = vmul.f32 %v9711_v20, %v9699_v44  ;;  %v6599_v0 = vpop.permute.xlu1 %6598 }
0x1b68   : > { %9027 = vmatmul.mubr.msk.bf16.vlgmr.msra.gmra.mrb[176].mxu1 %vm1066_vm2, %v6114_v5  ;;  %v9715_v61 = vpop.eup %9714  ;;  %v6109_v2 = vmul.f32 %v9713_v39, %v12418_v3  ;;  %v12538_v20 = vsel %vm1089_vm1, %v5905_v1, %v6599_v0  ;;  %v12542_v39 = vld [vmem:[#allocation16 + $0xd8] sm:$0xff]   ;;  %v12558_v1 = vsel %vm1089_vm1, %v5909_v29, %v6601_v4 }
0x1b69   : > { %9035 = vmatpush3.bf16.msra.mxu1 %v12458_v23  ;;  %v6111_v11 = vmul.f32 %v9715_v61, %v12414_v13  ;;  %v6626_v62 = vsel %vm834_vm0, %v12538_v20, 0 }
0x1b6a   : > { %v9717_v21 = vpop.eup %9716  ;;  %9036 = vmatprep.subr.bf16.mxu1 %v10271_v36 }
0x1b6b   : > { %v6110_v17 = vmul.f32 %v9717_v21, %v9701_v56  ;;  %v6116_v34 = vpack.c.bf16 %v6112_v7, %v6111_v11  ;;  %v12547_v21 = vld [vmem:[#allocation16 + $0xf0] sm:$0xff]   ;;  %v12562_v7 = vld [vmem:[#allocation16 + $0xf8] sm:$0xff]   ;;  %v6628_v11 = vsel %vm834_vm0, %v12558_v1, 0 }
0x1b6d   : > { %v6115_v9 = vpack.c.bf16 %v6110_v17, %v6109_v2  ;;  %9037 = vmatpush3.bf16.msra.mxu1 %v12464_v16  ;;  %v6603_v17 = vpop.permute.xlu1 %6602 }
0x1b6e   : > { %9042 = vmatprep.subr.bf16.mxu1 %v10271_v36  ;;  %v12571_v63 = vsel %vm1089_vm1, %v5913_v45, %v6603_v17  ;;  %v9840_v45 = vld [vmem:[#allocation16 + $0xa0] sm:$0xff]  }
0x1b6f   : > { %9030 = vmatprep.mubr.msk.bf16.mxu1 %vm1066_vm2, %v6115_v9  ;;  %v6630_v9 = vsel %vm834_vm0, %v12571_v63, 0 }
0x1b70   : > { %9031 = vmatmul.mubr.msk.bf16.gmra.mrb[180].mxu1 %vm1066_vm2, %v6116_v34 }
0x1b71   : > { %9038 = vmatprep.mubr.msk.bf16.mxu1 %vm10272_vm3, %v10271_v36  ;;  %v6575_v29 = vpop.permute.xlu1 %6574 }
0x1b75   : > { %v6579_v34 = vpop.permute.xlu1 %6578 }
0x1b76   : > { %v6592_v58 = vsel %vm1089_vm1, %v12254_v59, %v6579_v34 }
0x1c3b   : > { %v9028_v44 = vpop.f32.mrb[176].mxu1 }
0x1c3c   : > { %v6179_v3 = vpop.f32.mrb[177].mxu1 }
0x1c3d   : > { %v9029_v56 = vpop.f32.mrb[178].mxu1 }
0x1c3e   : > { %v6211_v40 = vpack.c.bf16 %v9029_v56, %v9028_v44  ;;  %v6182_v13 = vpop.f32.mrb[179].mxu1  ;;  %v6577_v44 = vpop.permute.xlu0 %6576 }
0x1c3f   : > { %v6210_v38 = vpack.c.bf16 %v6182_v13, %v6179_v3  ;;  %v6589_v3 = vsel %vm1089_vm1, %v6575_v29, %v6577_v44  ;;  %v6583_v56 = vpop.permute.xlu1 %6582 }
0x1c40   : > { %9055 = vmatmul.mubr.msk.bf16.vlgmr.msra.gmra.mrb[168].mxu0 %vm834_vm0, %v6211_v40  ;;  %v6347_v5 = vrot.slane %v6211_v40, 4  ;;  %v9841_v40 = vld [vmem:[#allocation16 + $0xa8] sm:$0xff]  }
0x1c41   : > { %v6215_v8 = vrot.slane %v6210_v38, 4  ;;  %9067 = vmatpush3.bf16.msra.mxu0 %v12473_v24  ;;  %9070 = vmatprep.mubr.msk.bf16.mxu0 %vm10272_vm3, %v10271_v36 }
0x1c42   : > { %9068 = vmatprep.subr.bf16.mxu0 %v10271_v36  ;;  %v6581_v13 = vpop.permute.xlu0 %6580 }
0x1c43   : > { %v9032_v47 = vpop.f32.mrb[180].mxu1  ;;  %9039 = vmatmul.mubr.msk.bf16.vlgmr.msra.gmra.mrb[184].mxu1 %vm834_vm0, %v6215_v8 }
0x1c44   : > { %v6195_v19 = vpop.f32.mrb[181].mxu1  ;;  %9043 = vmatpush3.bf16.msra.mxu1 %v12480_v43  ;;  %9046 = vmatprep.mubr.msk.bf16.mxu1 %vm10272_vm3, %v10271_v36 }
0x1c45   : > { %v9033_v50 = vpop.f32.mrb[182].mxu1  ;;  %9069 = vmatpush3.bf16.msra.mxu0 %v12485_v31  ;;  %9044 = vmatprep.subr.bf16.mxu1 %v10271_v36 }
0x1c46   : > { %v6213_v28 = vpack.c.bf16 %v9033_v50, %v9032_v47  ;;  %v6198_v32 = vpop.f32.mrb[183].mxu1  ;;  %9082 = vmatprep.subr.bf16.mxu0 %v10271_v36 }
0x1c47   : > { %v6212_v41 = vpack.c.bf16 %v6198_v32, %v6195_v19 }
0x1c48   : > { %9045 = vmatpush3.bf16.msra.mxu1 %v12490_v53  ;;  %v6527_v2 = vrot.slane %v6213_v28, 4 }
0x1c49   : > { %9071 = vmatmul.mubr.msk.bf16.vlgmr.msra.gmra.mrb[172].mxu0 %vm834_vm0, %v6212_v41  ;;  %9058 = vmatprep.subr.bf16.mxu1 %v10271_v36  ;;  %v6437_v61 = vrot.slane %v6212_v41, 4 }
0x1c4a   : > { %9083 = vmatpush3.bf16.msra.mxu0 %v12495_v26  ;;  %9086 = vmatprep.mubr.msk.bf16.mxu0 %vm10272_vm3, %v10271_v36 }
0x1c4b   : > { %9047 = vmatmul.mubr.msk.bf16.vlgmr.msra.gmra.mrb[188].mxu1 %vm834_vm0, %v6210_v38  ;;  %9084 = vmatprep.subr.bf16.mxu0 %v10271_v36  ;;  %v6595_v38 = vsel %vm1089_vm1, %v6581_v13, %v6583_v56 }
0x1c4c   : > { %9059 = vmatpush3.bf16.msra.mxu1 %v12502_v35  ;;  %9062 = vmatprep.mubr.msk.bf16.mxu1 %vm10272_vm3, %v10271_v36 }
0x1c4d   : > { %9060 = vmatprep.subr.bf16.mxu1 %v10271_v36 }
0x1c4e   : > { %9085 = vmatpush3.bf16.msra.mxu0 %v12513_v25 }
0x1c4f   : > { %9242 = vmatprep.subr.msk.bf16.mxu0 %vm834_vm0, %v12511_v15 }
0x1c50   : > { %9061 = vmatpush3.bf16.msra.mxu1 %v12518_v6 }
0x1c51   : > { %9087 = vmatmul.mubr.msk.bf16.vlgmr.msra.gmra.mrb[176].mxu0 %vm834_vm0, %v6213_v28  ;;  %9074 = vmatprep.subr.bf16.mxu1 %v10271_v36 }
0x1c52   : > { %9106 = vmatprep.mubr.msk.bf16.mxu0 %vm834_vm0, %v6586_v54 }
0x1c53   : > { %9063 = vmatmul.mubr.msk.bf16.vlgmr.msra.gmra.mrb[192].mxu1 %vm834_vm0, %v6347_v5 }
0x1c54   : > { %9075 = vmatpush3.bf16.msra.mxu1 %v12527_v14  ;;  %9078 = vmatprep.mubr.msk.bf16.mxu1 %vm10272_vm3, %v10271_v36 }
0x1c55   : > { %9076 = vmatprep.subr.bf16.mxu1 %v10271_v36 }
0x1c57   : > { %9099 = vmatpush3.bf16.xpose.msra.mxu0 %v6624_v60 }
0x1c58   : > { %9243 = vmatprep.subr.msk.bf16.mxu0 %vm834_vm0, %v12538_v20  ;;  %9077 = vmatpush3.bf16.msra.mxu1 %v12542_v39 }
0x1c59   : > { %9090 = vmatprep.subr.bf16.mxu1 %v10271_v36 }
0x1c5b   : > { %9079 = vmatmul.mubr.msk.bf16.vlgmr.msra.gmra.mrb[196].mxu1 %vm834_vm0, %v6437_v61 }
0x1c5c   : > { %9091 = vmatpush3.bf16.msra.mxu1 %v12547_v21  ;;  %9094 = vmatprep.mubr.msk.bf16.mxu1 %vm10272_vm3, %v10271_v36 }
0x1c5d   : > { %9092 = vmatprep.subr.bf16.mxu1 %v10271_v36 }
0x1c5f   : > { %9101 = vmatpush3.bf16.xpose.msra.mxu0 %v6626_v62 }
0x1c60   : > { %9244 = vmatprep.subr.msk.bf16.mxu0 %vm834_vm0, %v12558_v1  ;;  %9093 = vmatpush3.bf16.msra.mxu1 %v12562_v7 }
0x1c63   : > { %9095 = vmatmul.mubr.msk.bf16.vlgmr.msra.gmra.mrb[200].mxu1 %vm834_vm0, %v6527_v2 }
0x1c67   : > { %9103 = vmatpush3.bf16.xpose.msra.mxu0 %v6628_v11 }
0x1c68   : > { %9245 = vmatprep.subr.msk.bf16.mxu0 %vm834_vm0, %v12571_v63 }
0x1c6f   : > { %9105 = vmatpush3.bf16.xpose.msra.mxu0 %v6630_v9 }
0x1c70   : > { %9146 = vmatprep.subr.bf16.mxu0 %v10271_v36 }
0x1c76   : > { %9107 = vmatmul.mubr.msk.bf16.vlgmr.msra.gmra.mrb[180].mxu0 %vm834_vm0, %v6589_v3 }
0x1c77   : > { %9110 = vmatprep.mubr.msk.bf16.mxu0 %vm834_vm0, %v6592_v58  ;;  %9147 = vmatpush3.bf16.msra.mxu0 %v9840_v45 }
0x1c78   : > { %9148 = vmatprep.subr.bf16.mxu0 %v10271_v36 }
0x1c7b   : > { %9149 = vmatpush3.bf16.msra.mxu0 %v9841_v40 }
0x1c7c   : > { %9162 = vmatprep.subr.bf16.mxu0 %v10271_v36 }
0x1c7e   : > { %9111 = vmatmul.mubr.msk.bf16.gmra.mrb[184].mxu0 %vm834_vm0, %v6595_v38 }
0x1c7f   : > { %9150 = vmatprep.mubr.msk.bf16.mxu0 %vm10272_vm3, %v10271_v36 }
0x1d13   : > { %v6339_v59 = vpop.f32.mrb[168].mxu0 }
0x1d14   : > { %v9056_v8 = vpop.f32.mrb[169].mxu0 }
0x1d15   : > { %v6342_v48 = vpop.f32.mrb[170].mxu0 }
0x1d16   : > { %v6253_v47 = vpop.f32.mrb[184].mxu1  ;;  %v9057_v19 = vpop.f32.mrb[171].mxu0 }
0x1d17   : > { %v9040_v50 = vpop.f32.mrb[185].mxu1 }
0x1d18   : > { %v6256_v28 = vpop.f32.mrb[186].mxu1 }
0x1d19   : > { %v9041_v32 = vpop.f32.mrb[187].mxu1 }
0x1d1c   : > { %v6429_v41 = vpop.f32.mrb[172].mxu0 }
0x1d1d   : > { %v9072_v4 = vpop.f32.mrb[173].mxu0 }
0x1d1e   : > { %v6296_v18 = vpop.f32.mrb[188].mxu1  ;;  %v6432_v54 = vpop.f32.mrb[174].mxu0 }
0x1d1f   : > { %v6297_v5 = vadd.f32 %v6296_v18, %v6253_v47  ;;  %v9048_v0 = vpop.f32.mrb[189].mxu1  ;;  %v9073_v60 = vpop.f32.mrb[175].mxu0 }
0x1d20   : > { %v6299_v61 = vpop.f32.mrb[190].mxu1 }
0x1d21   : > { %v9049_v62 = vpop.f32.mrb[191].mxu1  ;;  %v6345_v2 = vadd.f32 %v6339_v59, %v6297_v5 }
0x1d24   : > { %v6519_v17 = vpop.f32.mrb[176].mxu0 }
0x1d25   : > { %v9088_v11 = vpop.f32.mrb[177].mxu0 }
0x1d26   : > { %v6385_v29 = vpop.f32.mrb[192].mxu1  ;;  %v6522_v9 = vpop.f32.mrb[178].mxu0 }
0x1d27   : > { %v6391_v34 = vadd.f32 %v6385_v29, %v6345_v2  ;;  %v9064_v44 = vpop.f32.mrb[193].mxu1  ;;  %v9089_v3 = vpop.f32.mrb[179].mxu0 }
0x1d28   : > { %v6388_v58 = vpop.f32.mrb[194].mxu1 }
0x1d29   : > { %v9065_v45 = vpop.f32.mrb[195].mxu1  ;;  %v6435_v56 = vadd.f32 %v6429_v41, %v6391_v34 }
0x1d2e   : > { %v6475_v40 = vpop.f32.mrb[196].mxu1 }
0x1d2f   : > { %v6481_v13 = vadd.f32 %v6475_v40, %v6435_v56  ;;  %v9080_v38 = vpop.f32.mrb[197].mxu1 }
0x1d30   : > { %v6478_v8 = vpop.f32.mrb[198].mxu1 }
0x1d31   : > { %v9081_v48 = vpop.f32.mrb[199].mxu1  ;;  %v6525_v47 = vadd.f32 %v6519_v17, %v6481_v13 }
0x1d36   : > { %v6565_v19 = vpop.f32.mrb[200].mxu1 }
0x1d37   : > { %v12589_v50 = vadd.f32 %v6565_v19, %v6525_v47  ;;  %v9096_v59 = vpop.f32.mrb[201].mxu1 }
0x1d38   : > { %v6568_v28 = vpop.f32.mrb[202].mxu1 }
0x1d39   : > { %v9097_v32 = vpop.f32.mrb[203].mxu1 }
0x1d49   : > { %v9108_v4 = vpop.f32.mrb[180].mxu0 }
0x1d4a   : > { %v6666_v18 = vpop.f32.mrb[181].mxu0  ;;  %v6699_v54 = vmul.f32 0.0625, %v9108_v4 }
0x1d4b   : > { %v6697_v5 = vmul.f32 0.0625, %v6666_v18  ;;  %v9109_v0 = vpop.f32.mrb[182].mxu0 }
0x1d4c   : > { %v6669_v60 = vpop.f32.mrb[183].mxu0  ;;  %v6707_v62 = vadd.f32 %v12372_v22, %v6699_v54  ;;  %v6700_v2 = vmul.f32 0.0625, %v9109_v0 }
0x1d4d   : > { %v6705_v41 = vadd.f32 %v12369_v33, %v6697_v5  ;;  %v6698_v61 = vmul.f32 0.0625, %v6669_v60 }
0x1d4e   : > { %v6708_v44 = vadd.f32 %v12380_v57, %v6700_v2  ;;  %v6719_v33 = vsel %vm1066_vm2, %v6707_v62, -inf }
0x1d4f   : > { %v6706_v17 = vadd.f32 %v12375_v55, %v6698_v61  ;;  %v6713_v11 = vsel %vm1066_vm2, %v6705_v41, -inf }
0x1d50   : > { %6714 = vmax.xlane.f32.xlu0 %v6713_v11  ;;  %v6722_v38 = vsel %vm1066_vm2, %v6708_v44, -inf }
0x1d51   : > { %v9112_v29 = vpop.f32.mrb[184].mxu0  ;;  %v6716_v9 = vsel %vm1066_vm2, %v6706_v17, -inf }
0x1d52   : > { %6717 = vmax.xlane.f32.xlu1 %v6716_v9  ;;  %v6682_v34 = vpop.f32.mrb[185].mxu0  ;;  %v6703_v40 = vmul.f32 0.0625, %v9112_v29 }
0x1d53   : > { %v6701_v3 = vmul.f32 0.0625, %v6682_v34  ;;  %v9113_v58 = vpop.f32.mrb[186].mxu0 }
0x1d54   : > { %v6704_v45 = vmul.f32 0.0625, %v9113_v58  ;;  %6720 = vmax.xlane.f32.xlu0 %v6719_v33  ;;  %v6685_v22 = vpop.f32.mrb[187].mxu0  ;;  %v6711_v48 = vadd.f32 %v12398_v51, %v6703_v40 }
0x1d55   : > { %v6702_v56 = vmul.f32 0.0625, %v6685_v22  ;;  %v6709_v13 = vadd.f32 %v12384_v10, %v6701_v3 }
0x1d56   : > { %v12599_v55 = vadd.f32 %v12393_v30, %v6704_v45  ;;  %v6731_v19 = vsel %vm1066_vm2, %v6711_v48, -inf }
0x1d57   : > { %v6710_v8 = vadd.f32 %v12387_v42, %v6702_v56  ;;  %v6725_v47 = vsel %vm1066_vm2, %v6709_v13, -inf }
0x1d58   : > { %6723 = vmax.xlane.f32.xlu0 %v6722_v38  ;;  %v6734_v57 = vsel %vm1066_vm2, %v12599_v55, -inf }
0x1d59   : > { %6735 = vmax.xlane.f32.xlu1 %v6734_v57  ;;  %v6728_v30 = vsel %vm1066_vm2, %v6710_v8, -inf }
0x1d5c   : > { %6726 = vmax.xlane.f32.xlu0 %v6725_v47 }
0x1d5d   : > { %6729 = vmax.xlane.f32.xlu1 %v6728_v30 }
0x1d60   : > { %6732 = vmax.xlane.f32.xlu0 %v6731_v19 }
0x1d6e   : > { %6811 = vrot.lane.b32.xlu1 %v12538_v20, %s10270_s3 }
0x1d72   : > { %6813 = vrot.lane.b32.xlu1 %v12558_v1, %s10270_s3 }
0x1ddd   : > { %v6715_v10 = vpop.xlane.xlu0 %6714 }
0x1dde   : > { %v6737_v42 = vsub.f32 %v6705_v41, %v6715_v10 }
0x1ddf   : > { %v6718_v59 = vpop.xlane.xlu1 %6717 }
0x1de0   : > { %v6745_v32 = vmul.f32 1.442695, %v6737_v42  ;;  %v6738_v4 = vsub.f32 %v6706_v17, %v6718_v59 }
0x1de1   : > { %v6721_v28 = vpop.xlane.xlu0 %6720 }
0x1de2   : > { %v6739_v51 = vsub.f32 %v6707_v62, %v6721_v28  ;;  %v6747_v0 = vmul.f32 1.442695, %v6738_v4 }
0x1de4   : > { %v6749_v18 = vmul.f32 1.442695, %v6739_v51 }
0x1de5   : > { %v6724_v54 = vpop.xlane.xlu0 %6723 }
0x1de6   : > { %9718 = vpow2.f32 %v6749_v18  ;;  %v6740_v5 = vsub.f32 %v6708_v44, %v6724_v54  ;;  %v6736_v58 = vpop.xlane.xlu1 %6735 }
0x1de7   : > { %9720 = vpow2.f32 %v6745_v32 }
0x1de8   : > { %v6751_v60 = vmul.f32 1.442695, %v6740_v5 }
0x1de9   : > { %v6727_v61 = vpop.xlane.xlu0 %6726 }
0x1dea   : > { %9722 = vpow2.f32 %v6751_v60  ;;  %v6741_v20 = vsub.f32 %v6709_v13, %v6727_v61  ;;  %v6730_v22 = vpop.xlane.xlu1 %6729  ;;  %v6744_v13 = vsub.f32 %v12599_v55, %v6736_v58 }
0x1deb   : > { %9724 = vpow2.f32 %v6747_v0  ;;  %v6742_v56 = vsub.f32 %v6710_v8, %v6730_v22 }
0x1dec   : > { %v6753_v2 = vmul.f32 1.442695, %v6741_v20  ;;  %v6759_v57 = vmul.f32 1.442695, %v6744_v13 }
0x1ded   : > { %v6733_v33 = vpop.xlane.xlu0 %6732  ;;  %v6755_v38 = vmul.f32 1.442695, %v6742_v56 }
0x1dee   : > { %9726 = vpow2.f32 %v6753_v2  ;;  %v6743_v45 = vsub.f32 %v6711_v48, %v6733_v33  ;;  %v6812_v32 = vpop.permute.xlu1 %6811 }
0x1df0   : > { %v12614_v1 = vpop.eup %9718  ;;  %v6757_v40 = vmul.f32 1.442695, %v6743_v45 }
0x1df1   : > { %v6767_v41 = vsel %vm1066_vm2, %v12614_v1, 0.0  ;;  %v12618_v62 = vpop.eup %9720 }
0x1df2   : > { %6768 = vadd.xlane.f32.xlu0 %v6767_v41  ;;  %v6761_v11 = vsel %vm1066_vm2, %v12618_v62, 0.0  ;;  %9728 = vpow2.f32 %v6757_v40  ;;  %v6814_v4 = vpop.permute.xlu1 %6813 }
0x1df3   : > { %9730 = vpow2.f32 %v6755_v38 }
0x1df4   : > { %v12620_v17 = vpop.eup %9722  ;;  %9732 = vpow2.f32 %v6759_v57 }
0x1df5   : > { %v6770_v29 = vsel %vm1066_vm2, %v12620_v17, 0.0  ;;  %v12626_v9 = vpop.eup %9724 }
0x1df6   : > { %6762 = vadd.xlane.f32.xlu0 %v6761_v11  ;;  %6771 = vadd.xlane.f32.xlu1 %v6770_v29  ;;  %v6764_v34 = vsel %vm1066_vm2, %v12626_v9, 0.0 }
0x1df8   : > { %v12630_v44 = vpop.eup %9726 }
0x1df9   : > { %v6773_v3 = vsel %vm1066_vm2, %v12630_v44, 0.0 }
0x1dfa   : > { %6765 = vadd.xlane.f32.xlu1 %v6764_v34 }
0x1dfc   : > { %v12639_v47 = vpop.eup %9728 }
0x1dfd   : > { %v12643_v30 = vpop.eup %9730 }
0x1dfe   : > { %6774 = vadd.xlane.f32.xlu1 %v6773_v3  ;;  %v6776_v55 = vsel %vm1066_vm2, %v12643_v30, 0.0  ;;  %v12651_v48 = vpop.eup %9732 }
0x1dff   : > { %v6782_v10 = vsel %vm1066_vm2, %v12651_v48, 0.0 }
0x1e0c   : > { %6809 = vrot.lane.b32.xlu0 %v12511_v15, %s10270_s3  ;;  %v6779_v15 = vsel %vm1066_vm2, %v12639_v47, 0.0 }
0x1e0f   : > { %6815 = vrot.lane.b32.xlu1 %v12571_v63, %s10270_s3  ;;  %v12645_v63 = vld [vmem:[#allocation17 + $0x1] ss:$0 sm:$0xff] }
0x1e10   : > { %v7268_v8 = vadd.f32 %v12645_v63, %v12169_v49  ;;  %v7269_v19 = vadd.f32 %v12645_v63, %v12367_v52  ;;  %v7270_v59 = vadd.f32 %v12645_v63, %v12589_v50 }
0x1e12   : > { %v7272_v42 = vadd.f32 %v7268_v8, %v11754_v12  ;;  %v12662_v28 = vadd.f32 %v7269_v19, %v11748_v46  ;;  %v12667_v52 = vadd.f32 %v7270_v59, %v11894_v27 }
0x1e14   : > { %v7276_v49 = vsel %vm834_vm0, %v7272_v42, 0.0  ;;  %v7279_v51 = vsel %vm834_vm0, %v12662_v28, 0.0  ;;  %v7282_v12 = vsel %vm834_vm0, %v12667_v52, 0.0 }
0x1e2b   : > { %6780 = vadd.xlane.f32.xlu0 %v6779_v15 }
0x1e2f   : > { %6777 = vadd.xlane.f32.xlu0 %v6776_v55 }
0x1e33   : > { %6783 = vadd.xlane.f32.xlu0 %v6782_v10 }
0x1e37   : > { %7277 = vadd.xlane.f32.xlu0 %v7276_v49 }
0x1e3b   : > { %7280 = vadd.xlane.f32.xlu0 %v7279_v51 }
0x1e3f   : > { %7283 = vadd.xlane.f32.xlu0 %v7282_v12 }
0x1e7f   : > { %v6769_v50 = vpop.xlane.xlu0 %6768 }
0x1e83   : > { %v6763_v18 = vpop.xlane.xlu0 %6762  ;;  %v6772_v54 = vpop.xlane.xlu1 %6771 }
0x1e84   : > { %9734 = vrcp.f32 %v6772_v54 }
0x1e85   : > { %9736 = vrcp.f32 %v6763_v18 }
0x1e86   : > { %9738 = vrcp.f32 %v6769_v50 }
0x1e87   : > { %v6810_v46 = vpop.permute.xlu0 %6809  ;;  %v6766_v5 = vpop.xlane.xlu1 %6765 }
0x1e88   : > { %9740 = vrcp.f32 %v6766_v5  ;;  %9114 = vmatprep.subr.bf16.mxu1 %v6810_v46 }
0x1e89   : > { %9115 = vmatpush3.bf16.msra.mxu1 %v6810_v46 }
0x1e8a   : > { %9116 = vmatprep.subr.bf16.mxu1 %v6812_v32 }
0x1e8b   : > { %v6775_v27 = vpop.xlane.xlu1 %6774 }
0x1e8c   : > { %9742 = vrcp.f32 %v6775_v27 }
0x1e8d   : > { %9117 = vmatpush3.bf16.msra.mxu1 %v6812_v32 }
0x1e8e   : > { %9118 = vmatprep.subr.bf16.mxu1 %v6814_v4  ;;  %v9735_v0 = vpop.eup %9734 }
0x1e8f   : > { %v9737_v60 = vpop.eup %9736  ;;  %v6816_v20 = vpop.permute.xlu1 %6815  ;;  %v6796_v41 = vmul.f32 %v9735_v0, %v12620_v17 }
0x1e90   : > { %v9739_v61 = vpop.eup %9738  ;;  %v6793_v11 = vmul.f32 %v9737_v60, %v12618_v62 }
0x1e91   : > { %9119 = vmatpush3.bf16.msra.mxu1 %v6814_v4  ;;  %v6795_v34 = vmul.f32 %v9739_v61, %v12614_v1 }
0x1e92   : > { %v9741_v2 = vpop.eup %9740  ;;  %9120 = vmatprep.subr.bf16.mxu1 %v6816_v20 }
0x1e93   : > { %v6794_v29 = vmul.f32 %v9741_v2, %v12626_v9  ;;  %v6802_v58 = vpack.c.bf16 %v6796_v41, %v6795_v34 }
0x1e95   : > { %9121 = vmatpush3.bf16.msra.mxu1 %v6816_v20  ;;  %v6801_v3 = vpack.c.bf16 %v6794_v29, %v6793_v11 }
0x1e96   : > { %9130 = vmatprep.subr.bf16.mxu1 %v10271_v36  ;;  %v9743_v33 = vpop.eup %9742 }
0x1e97   : > { %9122 = vmatprep.mubr.msk.bf16.mxu1 %vm1066_vm2, %v6801_v3 }
0x1e98   : > { %9123 = vmatmul.mubr.msk.bf16.vlgmr.msra.gmra.mrb[204].mxu1 %vm1066_vm2, %v6802_v58 }
0x1e99   : > { %9131 = vmatpush3.bf16.msra.mxu1 %v12458_v23  ;;  %v6797_v23 = vmul.f32 %v9743_v33, %v12630_v44 }
0x1e9a   : > { %9132 = vmatprep.subr.bf16.mxu1 %v10271_v36 }
0x1e9d   : > { %9133 = vmatpush3.bf16.msra.mxu1 %v12464_v16 }
0x1e9e   : > { %9138 = vmatprep.subr.bf16.mxu1 %v10271_v36 }
0x1eb8   : > { %v6781_v62 = vpop.xlane.xlu0 %6780 }
0x1ebc   : > { %v6778_v1 = vpop.xlane.xlu0 %6777 }
0x1ebd   : > { %9744 = vrcp.f32 %v6778_v1 }
0x1ebe   : > { %9746 = vrcp.f32 %v6781_v62 }
0x1ec0   : > { %v6784_v17 = vpop.xlane.xlu0 %6783 }
0x1ec1   : > { %9748 = vrcp.f32 %v6784_v17 }
0x1ec4   : > { %v7278_v9 = vpop.xlane.xlu0 %7277 }
0x1ec5   : > { %v7288_v45 = vmul.f32 0.03125, %v7278_v9 }
0x1ec7   : > { %v9745_v22 = vpop.eup %9744  ;;  %v12682_v56 = vsub.f32 %v7272_v42, %v7288_v45 }
0x1ec8   : > { %v6798_v40 = vmul.f32 %v9745_v22, %v12643_v30  ;;  %v9747_v16 = vpop.eup %9746  ;;  %v7281_v41 = vpop.xlane.xlu0 %7280 }
0x1ec9   : > { %v7296_v13 = vmul.f32 %v12682_v56, %v12682_v56  ;;  %v6799_v8 = vmul.f32 %v9747_v16, %v12639_v47  ;;  %v7289_v45 = vmul.f32 0.03125, %v7281_v41 }
0x1eca   : > { %v6803_v38 = vpack.c.bf16 %v6798_v40, %v6797_v23 }
0x1ecb   : > { %v9749_v57 = vpop.eup %9748  ;;  %v7300_v15 = vsel %vm834_vm0, %v7296_v13, 0.0 }
0x1ecc   : > { %7301 = vadd.xlane.f32.xlu1 %v7300_v15  ;;  %9126 = vmatprep.mubr.msk.bf16.mxu1 %vm1066_vm2, %v6803_v38  ;;  %v6800_v55 = vmul.f32 %v9749_v57, %v12651_v48  ;;  %v7284_v22 = vpop.xlane.xlu0 %7283 }
0x1ece   : > { %v6804_v19 = vpack.c.bf16 %v6800_v55, %v6799_v8  ;;  %v7293_v55 = vsub.f32 %v12662_v28, %v7289_v45 }
0x1ed0   : > { %9127 = vmatmul.mubr.msk.bf16.gmra.mrb[208].mxu1 %vm1066_vm2, %v6804_v19  ;;  %v7290_v19 = vmul.f32 0.03125, %v7284_v22 }
0x1ed1   : > { %9134 = vmatprep.mubr.msk.bf16.mxu1 %vm10272_vm3, %v10271_v36 }
0x1f6b   : > { %v9124_v44 = vpop.f32.mrb[204].mxu1 }
0x1f6c   : > { %v6867_v30 = vpop.f32.mrb[205].mxu1 }
0x1f6d   : > { %v9125_v10 = vpop.f32.mrb[206].mxu1 }
0x1f6e   : > { %v6899_v42 = vpack.c.bf16 %v9125_v10, %v9124_v44  ;;  %v6870_v59 = vpop.f32.mrb[207].mxu1 }
0x1f6f   : > { %v6898_v49 = vpack.c.bf16 %v6870_v59, %v6867_v30 }
0x1f70   : > { %9151 = vmatmul.mubr.msk.bf16.vlgmr.msra.gmra.mrb[188].mxu0 %vm834_vm0, %v6899_v42 }
0x1f71   : > { %v6903_v51 = vrot.slane %v6898_v49, 4  ;;  %9163 = vmatpush3.bf16.msra.mxu0 %v12473_v24  ;;  %9166 = vmatprep.mubr.msk.bf16.mxu0 %vm10272_vm3, %v10271_v36  ;;  %v7035_v24 = vrot.slane %v6899_v42, 4  ;;  %v12741_v42 = vsub.f32 %v12667_v52, %v7290_v19 }
0x1f72   : > { %9164 = vmatprep.subr.bf16.mxu0 %v10271_v36 }
0x1f73   : > { %9135 = vmatmul.mubr.msk.bf16.vlgmr.msra.gmra.mrb[212].mxu1 %vm834_vm0, %v6903_v51 }
0x1f74   : > { %9139 = vmatpush3.bf16.msra.mxu1 %v12480_v43  ;;  %9142 = vmatprep.mubr.msk.bf16.mxu1 %vm10272_vm3, %v10271_v36 }
0x1f75   : > { %9140 = vmatprep.subr.bf16.mxu1 %v10271_v36  ;;  %9165 = vmatpush3.bf16.msra.mxu0 %v12485_v31 }
0x1f76   : > { %9178 = vmatprep.subr.bf16.mxu0 %v10271_v36 }
0x1f78   : > { %9141 = vmatpush3.bf16.msra.mxu1 %v12490_v53 }
0x1f79   : > { %9154 = vmatprep.subr.bf16.mxu1 %v10271_v36 }
0x1f7b   : > { %9143 = vmatmul.mubr.msk.bf16.vlgmr.msra.gmra.mrb[216].mxu1 %vm834_vm0, %v6898_v49  ;;  %v7297_v49 = vmul.f32 %v7293_v55, %v7293_v55 }
0x1f7c   : > { %9155 = vmatpush3.bf16.msra.mxu1 %v12502_v35  ;;  %9158 = vmatprep.mubr.msk.bf16.mxu1 %vm10272_vm3, %v10271_v36 }
0x1f7d   : > { %9156 = vmatprep.subr.bf16.mxu1 %v10271_v36  ;;  %v7303_v51 = vsel %vm834_vm0, %v7297_v49, 0.0 }
0x1f80   : > { %9157 = vmatpush3.bf16.msra.mxu1 %v12518_v6 }
0x1f81   : > { %9170 = vmatprep.subr.bf16.mxu1 %v10271_v36 }
0x1f83   : > { %9159 = vmatmul.mubr.msk.bf16.vlgmr.msra.gmra.mrb[220].mxu1 %vm834_vm0, %v7035_v24  ;;  %v7298_v24 = vmul.f32 %v12741_v42, %v12741_v42 }
0x1f84   : > { %9171 = vmatpush3.bf16.msra.mxu1 %v12527_v14  ;;  %9174 = vmatprep.mubr.msk.bf16.mxu1 %vm10272_vm3, %v10271_v36 }
0x1f85   : > { %9172 = vmatprep.subr.bf16.mxu1 %v10271_v36  ;;  %v7306_v28 = vsel %vm834_vm0, %v7298_v24, 0.0  ;;  %v9476_v24 = vld [vmem:[%s12959_s4 + $0x10] sm:$0xff]  }
0x1f88   : > { %9173 = vmatpush3.bf16.msra.mxu1 %v12542_v39 }
0x1f89   : > { %9186 = vmatprep.subr.bf16.mxu1 %v10271_v36 }
0x1fa3   : > { %v9128_v43 = vpop.f32.mrb[208].mxu1 }
0x1fa4   : > { %v6883_v31 = vpop.f32.mrb[209].mxu1 }
0x1fa5   : > { %v9129_v53 = vpop.f32.mrb[210].mxu1 }
0x1fa6   : > { %v6901_v35 = vpack.c.bf16 %v9129_v53, %v9128_v43  ;;  %v6886_v6 = vpop.f32.mrb[211].mxu1 }
0x1fa7   : > { %v6900_v47 = vpack.c.bf16 %v6886_v6, %v6883_v31 }
0x1fa8   : > { %v7215_v14 = vrot.slane %v6901_v35, 4 }
0x1fa9   : > { %v7125_v48 = vrot.slane %v6900_v47, 4  ;;  %9167 = vmatmul.mubr.msk.bf16.vlgmr.msra.gmra.mrb[192].mxu0 %vm834_vm0, %v6900_v47 }
0x1faa   : > { %9179 = vmatpush3.bf16.msra.mxu0 %v12495_v26  ;;  %9182 = vmatprep.mubr.msk.bf16.mxu0 %vm10272_vm3, %v10271_v36 }
0x1fab   : > { %9175 = vmatmul.mubr.msk.bf16.vlgmr.msra.gmra.mrb[224].mxu1 %vm834_vm0, %v7125_v48  ;;  %9180 = vmatprep.subr.bf16.mxu0 %v10271_v36 }
0x1fac   : > { %9187 = vmatpush3.bf16.msra.mxu1 %v12547_v21  ;;  %9190 = vmatprep.mubr.msk.bf16.mxu1 %vm10272_vm3, %v10271_v36 }
0x1fad   : > { %9188 = vmatprep.subr.bf16.mxu1 %v10271_v36 }
0x1fae   : > { %9181 = vmatpush3.bf16.msra.mxu0 %v12513_v25 }
0x1fb0   : > { %9189 = vmatpush3.bf16.msra.mxu1 %v12562_v7 }
0x1fb1   : > { %9183 = vmatmul.mubr.msk.bf16.vlgmr.msra.gmra.mrb[196].mxu0 %vm834_vm0, %v6901_v35 }
0x1fb3   : > { %9191 = vmatmul.mubr.msk.bf16.vlgmr.msra.gmra.mrb[228].mxu1 %vm834_vm0, %v7215_v14 }
0x2043   : > { %v7027_v26 = vpop.f32.mrb[188].mxu0 }
0x2044   : > { %v9152_v39 = vpop.f32.mrb[189].mxu0 }
0x2045   : > { %v7030_v12 = vpop.f32.mrb[190].mxu0 }
0x2046   : > { %v6941_v32 = vpop.f32.mrb[212].mxu1  ;;  %v9153_v4 = vpop.f32.mrb[191].mxu0 }
0x2047   : > { %v9136_v21 = vpop.f32.mrb[213].mxu1 }
0x2048   : > { %v6944_v50 = vpop.f32.mrb[214].mxu1 }
0x2049   : > { %v9137_v18 = vpop.f32.mrb[215].mxu1 }
0x204e   : > { %v6984_v54 = vpop.f32.mrb[216].mxu1 }
0x204f   : > { %v6985_v46 = vadd.f32 %v6984_v54, %v6941_v32  ;;  %v9144_v36 = vpop.f32.mrb[217].mxu1 }
0x2050   : > { %v6987_v5 = vpop.f32.mrb[218].mxu1 }
0x2051   : > { %v9145_v25 = vpop.f32.mrb[219].mxu1  ;;  %v7033_v27 = vadd.f32 %v7027_v26, %v6985_v46  ;;  %v9842_v5 = vld [vmem:[%s12958_s18] ss:$0 sm:$0xff] }
0x2052   : > { %v7316_v25 = vmul.f32 %v9842_v5, %v12682_v56  ;;  %v9474_v56 = vld [vmem:[%s12959_s4] sm:$0xff]  }
0x2053   : > { %9202 = vmatprep.subr.bf16.mxu1 %v9474_v56 }
0x2054   : > { %9203 = vmatpush3.bf16.msra.mxu1 %v9474_v56 }
0x2056   : > { %v7073_v7 = vpop.f32.mrb[220].mxu1 }
0x2057   : > { %v7079_v0 = vadd.f32 %v7073_v7, %v7033_v27  ;;  %v9160_v60 = vpop.f32.mrb[221].mxu1  ;;  %v7317_v27 = vmul.f32 %v9842_v5, %v7293_v55  ;;  %v7318_v55 = vmul.f32 %v9842_v5, %v12741_v42  ;;  %v9477_v42 = vld [vmem:[%s12959_s4 + $0x18] sm:$0xff]  }
0x2058   : > { %v7076_v61 = vpop.f32.mrb[222].mxu1 }
0x2059   : > { %v9161_v20 = vpop.f32.mrb[223].mxu1  ;;  %v9843_v61 = vld [vmem:[%s12958_s18 + $0x1] ss:$0 sm:$0xff] }
0x207c   : > { %v7117_v2 = vpop.f32.mrb[192].mxu0 }
0x207d   : > { %v7123_v11 = vadd.f32 %v7117_v2, %v7079_v0  ;;  %v9168_v29 = vpop.f32.mrb[193].mxu0 }
0x207e   : > { %v7120_v34 = vpop.f32.mrb[194].mxu0  ;;  %v7163_v3 = vpop.f32.mrb[224].mxu1  ;;  %v9473_v29 = vld [vmem:[#allocation19 + $0x8] sm:$0xff]  }
0x207f   : > { %v7169_v58 = vadd.f32 %v7163_v3, %v7123_v11  ;;  %v9169_v62 = vpop.f32.mrb[195].mxu0  ;;  %v9176_v1 = vpop.f32.mrb[225].mxu1  ;;  %v9472_v11 = vld [vmem:[#allocation19] sm:$0xff]  }
0x2080   : > { %v7166_v17 = vpop.f32.mrb[226].mxu1  ;;  %9194 = vmatprep.subr.bf16.mxu0 %v9472_v11  ;;  %v9475_v34 = vld [vmem:[%s12959_s4 + $0x8] sm:$0xff]  }
0x2081   : > { %v9177_v9 = vpop.f32.mrb[227].mxu1  ;;  %9195 = vmatpush3.bf16.msra.mxu0 %v9472_v11  ;;  %9204 = vmatprep.subr.bf16.mxu1 %v9475_v34 }
0x2082   : > { %9196 = vmatprep.subr.bf16.mxu0 %v9473_v29  ;;  %9205 = vmatpush3.bf16.msra.mxu1 %v9475_v34 }
0x2083   : > { %9206 = vmatprep.subr.bf16.mxu1 %v9476_v24 }
0x2084   : > { %v7207_v33 = vpop.f32.mrb[196].mxu0 }
0x2085   : > { %v7213_v23 = vadd.f32 %v7207_v33, %v7169_v58  ;;  %v9184_v40 = vpop.f32.mrb[197].mxu0  ;;  %9197 = vmatpush3.bf16.msra.mxu0 %v9473_v29 }
0x2086   : > { %v7210_v16 = vpop.f32.mrb[198].mxu0  ;;  %v7253_v13 = vpop.f32.mrb[228].mxu1  ;;  %9207 = vmatpush3.bf16.msra.mxu1 %v9476_v24 }
0x2087   : > { %v7259_v38 = vadd.f32 %v7253_v13, %v7213_v23  ;;  %v9185_v57 = vpop.f32.mrb[199].mxu0  ;;  %v9192_v15 = vpop.f32.mrb[229].mxu1  ;;  %9208 = vmatprep.subr.bf16.mxu1 %v9477_v42 }
0x2088   : > { %v7256_v8 = vpop.f32.mrb[230].mxu1 }
0x2089   : > { %v7271_v44 = vadd.f32 %v12645_v63, %v7259_v38  ;;  %v9193_v30 = vpop.f32.mrb[231].mxu1  ;;  %v7302_v63 = vpop.xlane.xlu1 %7301 }
0x208a   : > { %v7312_v43 = vmul.f32 0.032258064, %v7302_v63  ;;  %9209 = vmatpush3.bf16.msra.mxu1 %v9477_v42 }
0x208b   : > { %v7275_v10 = vadd.f32 %v7271_v44, %v11897_v37 }
0x208c   : > { %9750 = vrsqrt.f32 %v7312_v43  ;;  %vm7322_vm12 = vcmp.eq.f32.partialorder %v7312_v43, inf  ;;  %v7325_v39 = vand.u32 2147483648, %v7312_v43  ;;  %vm7324_vm13 = vcmp.eq.f32.partialorder %v7312_v43, 0.0 }
0x208d   : > { %v7285_v59 = vsel %vm834_vm0, %v7275_v10, 0.0 }
0x208e   : > { %7286 = vadd.xlane.f32.xlu0 %v7285_v59 }
0x2092   : > { %7304 = vadd.xlane.f32.xlu0 %v7303_v51 }
0x2096   : > { %7307 = vadd.xlane.f32.xlu0 %v7306_v28  ;;  %v9751_v52 = vpop.eup %9750  ;;  %v8074_v28 = vld [vmem:[%s12960_s16] ss:$0 sm:$0xff]  ;;  %s7649_s16 = scalar_lea.sflag [#allocation4], %s10710_s9 }
0x2097   : > { %v7321_v48 = vmul.f32 %v9751_v52, %v7312_v43 }
0x2099   : > { %v7323_v26 = vsel %vm7322_vm12, %v7312_v43, %v7321_v48 }
0x209a   : > { %v7326_v12 = vsel %vm7324_vm13, %v7325_v39, %v7323_v26 }
0x209b   : > { %v7348_v32 = vadd.f32 1e-05, %v7326_v12 }
0x211b   : > { %v7287_v37 = vpop.xlane.xlu0 %7286 }
0x211c   : > { %v7291_v31 = vmul.f32 0.03125, %v7287_v37 }
0x211e   : > { %v12748_v53 = vsub.f32 %v7275_v10, %v7291_v31 }
0x211f   : > { %v7305_v35 = vpop.xlane.xlu0 %7304 }
0x2120   : > { %v7313_v6 = vmul.f32 0.032258064, %v7305_v35  ;;  %v7299_v47 = vmul.f32 %v12748_v53, %v12748_v53  ;;  %v7319_v19 = vmul.f32 %v9842_v5, %v12748_v53 }
0x2122   : > { %9752 = vrsqrt.f32 %v7313_v6  ;;  %v7309_v14 = vsel %vm834_vm0, %v7299_v47, 0.0  ;;  %vm7329_vm14 = vcmp.eq.f32.partialorder %v7313_v6, inf  ;;  %v7332_v50 = vand.u32 2147483648, %v7313_v6 }
0x2123   : > { %7310 = vadd.xlane.f32.xlu0 %v7309_v14  ;;  %9754 = vrcp.f32 %v7348_v32  ;;  %vm7331_vm15 = vcmp.eq.f32.partialorder %v7313_v6, 0.0  ;;  %v7308_v3 = vpop.xlane.xlu0 %7307  ;;  %v8079_v32 = vld [vmem:[%s12961_s29] ss:$0 sm:$0xff]  ;;  %s10162_s29 = scalar_lea.vmem %s10161_s15, 1024 }
0x2124   : > { %v7314_v58 = vmul.f32 0.032258064, %v7308_v3  ;;  %p10164_p3 = scmp.lt.s32.totalorder %s10162_s29, %s10156_s27 }
0x2126   : > { %vm7336_vm1 = vcmp.eq.f32.partialorder %v7314_v58, inf  ;;  %v7339_v45 = vand.u32 2147483648, %v7314_v58  ;;  %vm7338_vm3 = vcmp.eq.f32.partialorder %v7314_v58, 0.0  ;;  %p10165_p10 = por %p10164_p3, %p10163_p4 }
0x2128   : > { %p10166_p1 = pnand %p10165_p10, %p10159_p8 }
0x212c   : > { %v9753_v4 = vpop.eup %9752 }
0x212d   : > { %v7328_v21 = vmul.f32 %v9753_v4, %v7313_v6  ;;  %v9755_v36 = vpop.eup %9754 }
0x212e   : > { %v7353_v7 = vmul.f32 %v9755_v36, %v7316_v25 }
0x212f   : > { %v7330_v18 = vsel %vm7329_vm14, %v7313_v6, %v7328_v21 }
0x2130   : > { %v7333_v54 = vsel %vm7331_vm15, %v7332_v50, %v7330_v18  ;;  %v12760_v20 = vadd.f32 %v9843_v61, %v7353_v7 }
0x2131   : > { %v7349_v46 = vadd.f32 1e-05, %v7333_v54 }
0x2133   : > { %9756 = vrcp.f32 %v7349_v46 }
0x2134   : > { %9758 = vrsqrt.f32 %v7314_v58 }
0x213d   : > { %v9757_v0 = vpop.eup %9756 }
0x213e   : > { %v7355_v60 = vmul.f32 %v9757_v0, %v7317_v27  ;;  %v9759_v62 = vpop.eup %9758 }
0x213f   : > { %v7335_v9 = vmul.f32 %v9759_v62, %v7314_v58 }
0x2140   : > { %v12762_v2 = vadd.f32 %v9843_v61, %v7355_v60 }
0x2141   : > { %v7337_v33 = vsel %vm7336_vm1, %v7314_v58, %v7335_v9 }
0x2142   : > { %v7364_v41 = vpack.c.bf16 %v12762_v2, %v12760_v20  ;;  %v7340_v22 = vsel %vm7338_vm3, %v7339_v45, %v7337_v33 }
0x2143   : > { %v7350_v23 = vadd.f32 1e-05, %v7340_v22 }
0x2144   : > { %9198 = vmatprep.mubr.msk.bf16.mxu0 %vm834_vm0, %v7364_v41 }
0x21b0   : > { %v7311_v1 = vpop.xlane.xlu0 %7310 }
0x21b1   : > { %v7315_v17 = vmul.f32 0.032258064, %v7311_v1 }
0x21b3   : > { %9760 = vrsqrt.f32 %v7315_v17  ;;  %vm7343_vm4 = vcmp.eq.f32.partialorder %v7315_v17, inf  ;;  %v7346_v13 = vand.u32 2147483648, %v7315_v17  ;;  %vm7345_vm5 = vcmp.eq.f32.partialorder %v7315_v17, 0.0 }
0x21b4   : > { %9762 = vrcp.f32 %v7350_v23 }
0x21bd   : > { %v9761_v40 = vpop.eup %9760 }
0x21be   : > { %v7342_v16 = vmul.f32 %v9761_v40, %v7315_v17  ;;  %v9763_v8 = vpop.eup %9762 }
0x21bf   : > { %v7357_v44 = vmul.f32 %v9763_v8, %v7318_v55 }
0x21c0   : > { %v7344_v38 = vsel %vm7343_vm4, %v7315_v17, %v7342_v16 }
0x21c1   : > { %v7347_v57 = vsel %vm7345_vm5, %v7346_v13, %v7344_v38  ;;  %v7362_v59 = vadd.f32 %v9843_v61, %v7357_v44 }
0x21c2   : > { %v7351_v15 = vadd.f32 1e-05, %v7347_v57 }
0x21c4   : > { %9764 = vrcp.f32 %v7351_v15 }
0x21ce   : > { %v9765_v30 = vpop.eup %9764 }
0x21cf   : > { %v7359_v10 = vmul.f32 %v9765_v30, %v7319_v19 }
0x21d1   : > { %v7363_v49 = vadd.f32 %v9843_v61, %v7359_v10 }
0x21d3   : > { %v7365_v51 = vpack.c.bf16 %v7363_v49, %v7362_v59 }
0x21d5   : > { %9199 = vmatmul.mubr.msk.bf16.vlgmr.msra.gmra.mrb[200].mxu0 %vm834_vm0, %v7365_v51 }
0x22a8   : > { %v9200_v63 = vpop.f32.mrb[200].mxu0 }
0x22a9   : > { %v7438_v43 = vadd.f32 %v9200_v63, %v8074_v28  ;;  %v7429_v37 = vpop.f32.mrb[201].mxu0 }
0x22aa   : > { %v7430_v31 = vadd.f32 %v8074_v28, %v7429_v37  ;;  %v9201_v52 = vpop.f32.mrb[202].mxu0 }
0x22ab   : > { %v7441_v53 = vadd.f32 %v9201_v52, %v8074_v28  ;;  %v7432_v35 = vpop.f32.mrb[203].mxu0  ;;  %v7446_v47 = vmax.f32 %v7438_v43, 0.0 }
0x22ac   : > { %v7433_v6 = vadd.f32 %v8074_v28, %v7432_v35  ;;  %v7444_v14 = vmax.f32 %v7430_v31, 0.0 }
0x22ad   : > { %v7447_v48 = vmax.f32 %v7441_v53, 0.0 }
0x22ae   : > { %v7445_v26 = vmax.f32 %v7433_v6, 0.0 }
0x22af   : > { %v7449_v39 = vpack.c.bf16 %v7447_v48, %v7446_v47 }
0x22b0   : > { %v7448_v12 = vpack.c.bf16 %v7445_v26, %v7444_v14 }
0x22b2   : > { %9210 = vmatprep.mubr.msk.bf16.mxu1 %vm1066_vm2, %v7448_v12  ;;  %v8086_v12 = vld [vmem:[%s12958_s18 + $0x2] ss:$0 sm:$0xff] }
0x22b3   : > { %9211 = vmatmul.mubr.msk.bf16.vlgmr.msra.gmra.mrb[232].mxu1 %vm1066_vm2, %v7449_v39 }
0x2386   : > { %v9212_v4 = vpop.f32.mrb[232].mxu1 }
0x2387   : > { %v7538_v21 = vadd.f32 %v9212_v4, %v8079_v32  ;;  %v7529_v50 = vpop.f32.mrb[233].mxu1 }
0x2388   : > { %v7530_v18 = vadd.f32 %v8079_v32, %v7529_v50  ;;  %v9213_v54 = vpop.f32.mrb[234].mxu1 }
0x2389   : > { %v7546_v46 = vadd.f32 %v7538_v21, %v7362_v59  ;;  %v7532_v36 = vpop.f32.mrb[235].mxu1  ;;  %v7541_v7 = vadd.f32 %v9213_v54, %v8079_v32 }
0x238a   : > { %v7544_v5 = vadd.f32 %v7530_v18, %v12760_v20  ;;  %v7533_v25 = vadd.f32 %v8079_v32, %v7532_v36 }
0x238b   : > { %v7554_v27 = vsel %vm834_vm0, %v7546_v46, 0.0  ;;  %v7547_v61 = vadd.f32 %v7541_v7, %v7363_v49 }
0x238c   : > { %7555 = vadd.xlane.f32.xlu0 %v7554_v27  ;;  %v7545_v0 = vadd.f32 %v7533_v25, %v12762_v2  ;;  %v7548_v60 = vsel %vm834_vm0, %v7544_v5, 0.0 }
0x238d   : > { %v7557_v11 = vsel %vm834_vm0, %v7547_v61, 0.0 }
0x238e   : > { %v7551_v41 = vsel %vm834_vm0, %v7545_v0, 0.0 }
0x2390   : > { %7549 = vadd.xlane.f32.xlu0 %v7548_v60 }
0x2394   : > { %7552 = vadd.xlane.f32.xlu0 %v7551_v41 }
0x2398   : > { %7558 = vadd.xlane.f32.xlu0 %v7557_v11 }
0x2419   : > { %v7556_v29 = vpop.xlane.xlu0 %7555 }
0x241a   : > { %v7562_v56 = vmul.f32 0.03125, %v7556_v29 }
0x241c   : > { %v12796_v20 = vsub.f32 %v7546_v46, %v7562_v56 }
0x241d   : > { %v7550_v34 = vpop.xlane.xlu0 %7549 }
0x241e   : > { %v7560_v3 = vmul.f32 0.03125, %v7550_v34  ;;  %v7570_v58 = vmul.f32 %v12796_v20, %v12796_v20  ;;  %v7594_v18 = vmul.f32 %v8086_v12, %v12796_v20 }
0x2420   : > { %v12800_v2 = vsub.f32 %v7544_v5, %v7560_v3  ;;  %v7578_v62 = vsel %vm834_vm0, %v7570_v58, 0.0  ;;  %v8087_v5 = vld [vmem:[%s12958_s18 + $0x3] ss:$0 sm:$0xff] }
0x2421   : > { %7579 = vadd.xlane.f32.xlu1 %v7578_v62  ;;  %v7553_v1 = vpop.xlane.xlu0 %7552 }
0x2422   : > { %v7561_v17 = vmul.f32 0.03125, %v7553_v1  ;;  %v7568_v9 = vmul.f32 %v12800_v2, %v12800_v2  ;;  %v7592_v27 = vmul.f32 %v8086_v12, %v12800_v2 }
0x2424   : > { %v12805_v33 = vsub.f32 %v7545_v0, %v7561_v17  ;;  %v7572_v45 = vsel %vm834_vm0, %v7568_v9, 0.0 }
0x2425   : > { %7573 = vadd.xlane.f32.xlu0 %v7572_v45  ;;  %v7559_v22 = vpop.xlane.xlu0 %7558 }
0x2426   : > { %v7563_v23 = vmul.f32 0.03125, %v7559_v22  ;;  %v7569_v40 = vmul.f32 %v12805_v33, %v12805_v33 }
0x2428   : > { %v12810_v16 = vsub.f32 %v7547_v61, %v7563_v23  ;;  %v7575_v13 = vsel %vm834_vm0, %v7569_v40, 0.0  ;;  %v7593_v61 = vmul.f32 %v8086_v12, %v12805_v33 }
0x2429   : > { %7576 = vadd.xlane.f32.xlu0 %v7575_v13 }
0x242a   : > { %v7571_v38 = vmul.f32 %v12810_v16, %v12810_v16  ;;  %v7595_v56 = vmul.f32 %v8086_v12, %v12810_v16 }
0x242c   : > { %v7581_v57 = vsel %vm834_vm0, %v7571_v38, 0.0 }
0x242d   : > { %7582 = vadd.xlane.f32.xlu0 %v7581_v57 }
0x24ae   : > { %v7580_v15 = vpop.xlane.xlu1 %7579 }
0x24af   : > { %v7586_v8 = vmul.f32 0.032258064, %v7580_v15 }
0x24b1   : > { %9766 = vrsqrt.f32 %v7586_v8  ;;  %vm7612_vm2 = vcmp.eq.f32.partialorder %v7586_v8, inf  ;;  %v7615_v24 = vand.u32 2147483648, %v7586_v8  ;;  %vm7614_vm6 = vcmp.eq.f32.partialorder %v7586_v8, 0.0 }
0x24b2   : > { %v7574_v55 = vpop.xlane.xlu0 %7573 }
0x24b3   : > { %v7584_v19 = vmul.f32 0.032258064, %v7574_v55 }
0x24b5   : > { %9768 = vrsqrt.f32 %v7584_v19  ;;  %vm7598_vm7 = vcmp.eq.f32.partialorder %v7584_v19, inf  ;;  %v7601_v31 = vand.u32 2147483648, %v7584_v19  ;;  %vm7600_vm8 = vcmp.eq.f32.partialorder %v7584_v19, 0.0 }
0x24b6   : > { %v7577_v44 = vpop.xlane.xlu0 %7576 }
0x24b7   : > { %v7585_v30 = vmul.f32 0.032258064, %v7577_v44 }
0x24b9   : > { %9770 = vrsqrt.f32 %v7585_v30  ;;  %vm7605_vm9 = vcmp.eq.f32.partialorder %v7585_v30, inf  ;;  %v7608_v48 = vand.u32 2147483648, %v7585_v30  ;;  %vm7607_vm10 = vcmp.eq.f32.partialorder %v7585_v30, 0.0 }
0x24ba   : > { %v7583_v10 = vpop.xlane.xlu0 %7582 }
0x24bb   : > { %v9767_v59 = vpop.eup %9766  ;;  %v7587_v49 = vmul.f32 0.032258064, %v7583_v10 }
0x24bc   : > { %v7611_v51 = vmul.f32 %v9767_v59, %v7586_v8 }
0x24bd   : > { %9772 = vrsqrt.f32 %v7587_v49  ;;  %vm7619_vm11 = vcmp.eq.f32.partialorder %v7587_v49, inf  ;;  %v7622_v21 = vand.u32 2147483648, %v7587_v49  ;;  %vm7621_vm12 = vcmp.eq.f32.partialorder %v7587_v49, 0.0 }
0x24be   : > { %v7613_v42 = vsel %vm7612_vm2, %v7586_v8, %v7611_v51 }
0x24bf   : > { %v9769_v28 = vpop.eup %9768  ;;  %v7616_v63 = vsel %vm7614_vm6, %v7615_v24, %v7613_v42 }
0x24c0   : > { %v7626_v43 = vadd.f32 1e-05, %v7616_v63  ;;  %v7597_v37 = vmul.f32 %v9769_v28, %v7584_v19 }
0x24c2   : > { %9774 = vrcp.f32 %v7626_v43  ;;  %v7599_v52 = vsel %vm7598_vm7, %v7584_v19, %v7597_v37 }
0x24c3   : > { %v9771_v53 = vpop.eup %9770  ;;  %v7602_v35 = vsel %vm7600_vm8, %v7601_v31, %v7599_v52 }
0x24c4   : > { %v7624_v6 = vadd.f32 1e-05, %v7602_v35  ;;  %v7604_v47 = vmul.f32 %v9771_v53, %v7585_v30 }
0x24c6   : > { %9776 = vrcp.f32 %v7624_v6  ;;  %v7606_v14 = vsel %vm7605_vm9, %v7585_v30, %v7604_v47 }
0x24c7   : > { %v9773_v26 = vpop.eup %9772  ;;  %v7609_v39 = vsel %vm7607_vm10, %v7608_v48, %v7606_v14 }
0x24c8   : > { %v7625_v32 = vadd.f32 1e-05, %v7609_v39  ;;  %v7618_v4 = vmul.f32 %v9773_v26, %v7587_v49 }
0x24ca   : > { %9778 = vrcp.f32 %v7625_v32  ;;  %v7620_v50 = vsel %vm7619_vm11, %v7587_v49, %v7618_v4 }
0x24cb   : > { %v7623_v54 = vsel %vm7621_vm12, %v7622_v21, %v7620_v50 }
0x24cc   : > { %v9775_v46 = vpop.eup %9774  ;;  %v7627_v36 = vadd.f32 1e-05, %v7623_v54 }
0x24cd   : > { %v7633_v25 = vmul.f32 %v9775_v46, %v7594_v18 }
0x24ce   : > { %9780 = vrcp.f32 %v7627_v36 }
0x24cf   : > { %v7642_v7 = vadd.f32 %v8087_v5, %v7633_v25 }
0x24d0   : > { %v9777_v0 = vpop.eup %9776 }
0x24d1   : > { %v7629_v60 = vmul.f32 %v9777_v0, %v7592_v27  ;;  %7646 = vst.msk [vmem:[%s703_s13 + $0x10] sm:$0xff] %vm834_vm0, %v7642_v7 }
0x24d3   : > { %v7640_v41 = vadd.f32 %v8087_v5, %v7629_v60 }
0x24d4   : > { %v9779_v11 = vpop.eup %9778 }
0x24d5   : > { %v7631_v29 = vmul.f32 %v9779_v11, %v7593_v61  ;;  %7644 = vst.msk [vmem:[%s703_s13] sm:$0xff] %vm834_vm0, %v7640_v41 }
0x24d7   : > { %v7641_v20 = vadd.f32 %v8087_v5, %v7631_v29 }
0x24d8   : > { %v9781_v34 = vpop.eup %9780 }
0x24d9   : > { %v7635_v3 = vmul.f32 %v9781_v34, %v7595_v56  ;;  %7645 = vst.msk [vmem:[%s703_s13 + $0x8] sm:$0xff] %vm834_vm0, %v7641_v20 }
0x24db   : > { %v7643_v58 = vadd.f32 %v8087_v5, %v7635_v3 }
0x24dd   : > { %7647 = vst.msk [vmem:[%s703_s13 + $0x18] sm:$0xff] %vm834_vm0, %v7643_v58 }
0x24de   : > { %10169 = shalt.err (!%p10166_p1)
}
0x24df   : > { %s10170_s3 = scalar_lea.hbm %s12834_s14, 512  ;;  %s10174_s20 = scalar_lea.hbm %s12962_s30, 1024 }
0x24e0   : > { %p10171_p11 = scmp.ne.s32.totalorder %s12834_s14, %s10170_s3  ;;  %p10175_p13 = scmp.lt.u32.totalorder %s12834_s14, %s12962_s30 }
0x24e1   : > { %p10176_p6 = scmp.lt.u32.totalorder %s10174_s20, %s10170_s3  ;;  %p10178_p0 = scmp.lt.u32.totalorder %s10170_s3, %s12834_s14 }
0x24e2   : > { %p10172_p12 = pnand %p10171_p11, %p12963_p5 }
0x24e3   : > { %p10177_p9 = por %p10176_p6, %p10175_p13 }
0x24e4   : > { %p10173_p2 = pneg %p10172_p12 }
0x24e5   : > { %p10179_p7 = por %p10178_p0, %p10177_p9 }
0x24e7   : > { %p10180_p8 = pnand %p10179_p7, %p10173_p2 }
0x24e9   : > { %10183 = shalt.err (!%p10180_p8)
}
0x24ea   : > { %s10274_s25 = smov 128   ;;  %s10275_s17 = smov 8  }
0x24eb   : > { %9286 = dma.vmem_to_hbm [thread:$0]  (%p12963_p5), %s12836_s28, 512, %s12834_s14, %s7649_s16, %s10274_s25, %s10274_s25, %s10275_s17  }
0x24ec PF: > { %s7677_s27 = sand.u32 1, %s10234_s21   ;;  %p12964_p4 = scmp.ne.s32.totalorder %s12941_s26, 0 }
0x24ed   : > { %p12965_p3 = scmp.ge.s32.totalorder %s10246_s24, 2  ;;  %s7678_s6 = scalar_lea.sflag [#allocation4], %s7677_s27 }
0x24ef   : > { %p9324_p10 = pnand %p12965_p3, %p12964_p4 }
0x24f1   : > { %10229 = dma.done.wait (!%p9324_p10), %s7678_s6, 512  }
0x24f2   : > { %10231 = vsyncadd (!%p9324_p10), %s7678_s6, 4294966784  ;;  %p36_p1 = scmp.ge.s32.totalorder %s10593_s0, 4   ;;  %s12966_s21 = smov %s10238_s22 }
0x24f3   : > { %s12967_s22 = smov %s10242_s23  ;;  %s12968_s23 = smov %s10605_s19 }
0x24f4   : > { %s12969_s24 = smov %s10593_s0  ;;  %38 = sbr.rel (!%p36_p1) target bundleno = 26 (0x1a), region = 194 }
0x24fb   :  { %7683 = vsyncpa [#allocation3], 1 }
0x24fc   :  { %7685 = vsyncpa [#allocation3 + $0x1], 1 }
0x24fd   :  { %7686 = vsyncpa [#allocation6], 1 }
0x24fe   :  { %7688 = vsyncpa [#allocation6 + $0x1], 1 }
0x24ff   :  { %7689 = vsyncpa [#allocation9], 1 }
0x2500   :  { %7690 = vsyncpa [#allocation12], 1 }
0x2501   :  { %7691 = vsyncpa [#allocation15], 1 }
0x2502   :  { %7692 = vsyncpa [#allocation18], 1 }
0x2503   :  { %7693 = vsyncpa [#allocation4], 1 }
0x2504   :  { %7695 = vsyncpa [#allocation4 + $0x1], 1 }

</bundles_post_ra>
